<compile_context>
chip_gen: v7x
topology: tpu7x:2x2x1
jax: 0.10.0
libtpu: 0.0.40
codegen_flags: <defaults>
</compile_context>

<pallas_src>
import jax
import jax.numpy as jnp
from jax import lax
from jax.experimental import pallas as pl
from jax.experimental.pallas import tpu as pltpu

B = 2                      # batch size (kernel wall time is ~flat in B)
IN_FLAT = 64 * 64          # 4096  (= self._in_size_flatten)
MID = 1024                 # self._mid_size
LATENT = 2                 # self._latent_size
BN_EPS = 1e-5


def vae_encoder_kernel(scalars_ref, x_ref, w1q_ref, w1s_ref, b1_ref, wmu_ref,
                       mu_ref):
    """One grid step: full x, an N-slice of w1 (+scale, +b1) and the matching
    K-slice of wmu -> one partial (B, LATENT) contribution to mu."""
    x = x_ref[...]                              # (B, IN_FLAT) f32
    cw = scalars_ref[0]                         # conv_enc weight (1x1, 1->1 ch)
    cb = scalars_ref[1]                         # conv_enc bias
    gamma = scalars_ref[2]                      # BN weight
    beta = scalars_ref[3]                       # BN bias

    # Training-mode BatchNorm2d: biased batch statistics over B*H*W.
    # Two-pass mean/var (one-pass E[x^2]-E[x]^2 is cancellation-prone), clamped.
    n_inv = 1.0 / float(x_ref.shape[0] * x_ref.shape[1])
    mean_x = jnp.sum(x) * n_inv
    var_x = jnp.maximum(jnp.sum((x - mean_x) ** 2) * n_inv, 0.0)

    # Fold conv_enc (scalar affine) + batch_norm into one scalar FMA:
    #   bn(cw*x + cb) = cw*(x - mean_x)*inv + beta,
    #   inv = gamma / sqrt(cw^2 * var_x + eps).
    inv = gamma * lax.rsqrt(cw * cw * var_x + BN_EPS)
    scale = cw * inv
    shift = beta - cw * mean_x * inv

    # relu -> linear_enc slice.  w1 is int8; the per-column scale is applied
    # to the f32 accumulator instead of the 4M-element weight block.
    h0 = jnp.maximum(x * scale + shift, 0.0).astype(jnp.bfloat16)
    w1 = w1q_ref[...].astype(jnp.bfloat16)       # int8 -> bf16 (exact values)
    acc = jnp.dot(h0, w1, preferred_element_type=jnp.float32)
    h1 = jnp.maximum(acc * w1s_ref[...] + b1_ref[...], 0.0).astype(jnp.bfloat16)

    # linear_enc_mu K-slice (bias bmu is added once, in the wrapper).
    mu_ref[...] = jnp.dot(h1, wmu_ref[...], preferred_element_type=jnp.float32)


def _default_num_splits():
    """Split the N dimension across TensorCores only on 2-TC chips (v7x)."""
    try:
        kind = jax.devices()[0].device_kind.lower()
    except Exception:
        return 1
    return 2 if "v7" in kind else 1


def vae_encoder_forward(x_nchw, params, n_splits=None):
    """x_nchw: (B, 1, 64, 64) f32. Returns mu: (B, LATENT) f32."""
    b = x_nchw.shape[0]
    x_flat = x_nchw.reshape(b, IN_FLAT).astype(jnp.float32)

    if n_splits is None:
        n_splits = _default_num_splits()
    mid_split = MID // n_splits

    smem = pl.BlockSpec(memory_space=pltpu.MemorySpace.SMEM)
    # Actual footprint is a few MiB (int8 w1 + bf16 cast temp); keep the scoped
    # limit modest so neighbouring fusions aren't starved (v7x: 64 MiB/TC).
    vmem_limit = (40 if n_splits == 1 else 20) * 1024 * 1024

    partial = pl.pallas_call(
        vae_encoder_kernel,
        out_shape=jax.ShapeDtypeStruct((n_splits, b, LATENT), jnp.float32),
        grid=(n_splits,),
        in_specs=[
            smem,                                                   # scalars (4,)
            pl.BlockSpec((b, IN_FLAT), lambda i: (0, 0)),           # x
            pl.BlockSpec((IN_FLAT, mid_split), lambda i: (0, i)),   # w1 int8
            pl.BlockSpec((1, mid_split), lambda i: (0, i)),         # w1 scale
            pl.BlockSpec((1, mid_split), lambda i: (0, i)),         # b1
            pl.BlockSpec((mid_split, LATENT), lambda i: (i, 0)),    # wmu bf16
        ],
        out_specs=pl.BlockSpec((None, b, LATENT), lambda i: (i, 0, 0)),
        compiler_params=pltpu.CompilerParams(
            dimension_semantics=("parallel",),
            vmem_limit_bytes=vmem_limit,
        ),
    )(
        params["scalars"], x_flat,
        params["w1_q"], params["w1_scale"], params["b1"],
        params["wmu"],
    )
    # TODO(synk): for repeated calls with fixed weights, keep w1 VMEM-resident
    # across calls (cross-pallas_call future pattern) instead of re-streaming.
    return jnp.sum(partial, axis=0) + params["bmu"]


def init_params(key):
    """Deterministic synthetic parameters matching the PyTorch module shapes.

    w1 (linear_enc, the dominant 4096x1024 weight) is stored as int8 with a
    per-output-column f32 scale; wmu stays bf16 (tiny); biases and the
    conv/BN scalars stay f32.
    """
    ks = jax.random.split(key, 6)

    def u(k, shape, fan_in):
        bound = 1.0 / jnp.sqrt(float(fan_in))
        return jax.random.uniform(k, shape, jnp.float32, -bound, bound)

    conv_w = u(ks[0], (1,), 1)                 # Conv2d(1,1,1): weight -> scalar
    conv_b = u(ks[1], (1,), 1)
    bn_gamma = jnp.ones((1,), jnp.float32)     # BatchNorm2d default init
    bn_beta = jnp.zeros((1,), jnp.float32)
    scalars = jnp.concatenate([conv_w, conv_b, bn_gamma, bn_beta])  # one SMEM DMA

    # Linear(4096, 1024): PyTorch weight is (out, in); kernel uses (in, out).
    w1_f32 = u(ks[2], (IN_FLAT, MID), IN_FLAT)
    w1_scale = jnp.maximum(jnp.max(jnp.abs(w1_f32), axis=0, keepdims=True),
                           1e-12) / 127.0                       # (1, MID) f32
    w1_q = jnp.clip(jnp.round(w1_f32 / w1_scale), -127.0, 127.0).astype(jnp.int8)
    b1 = u(ks[3], (1, MID), IN_FLAT)

    # Linear(1024, 2): no 128-lane zero pad in HBM; bmu is added in the wrapper.
    wmu = u(ks[4], (MID, LATENT), MID).astype(jnp.bfloat16)
    bmu = u(ks[5], (1, LATENT), MID)

    return dict(scalars=scalars, w1_q=w1_q,
                w1_scale=w1_scale.astype(jnp.float32),
                b1=b1, wmu=wmu, bmu=bmu)


def vae_encoder_reference(x_nchw, params):
    """Pure-JAX f32 reference of VAEncoder.forward (training-mode BN), using
    the dequantized (int8 * scale) w1 as the effective linear_enc weight."""
    b = x_nchw.shape[0]
    x = x_nchw.reshape(b, IN_FLAT).astype(jnp.float32)
    cw, cb, gamma, beta = (params["scalars"][i] for i in range(4))
    y = x * cw + cb
    mean = jnp.mean(y)
    var = jnp.mean((y - mean) ** 2)
    y = (y - mean) * (gamma / jnp.sqrt(var + BN_EPS)) + beta
    h = jnp.maximum(y, 0.0)
    w1 = params["w1_q"].astype(jnp.float32) * params["w1_scale"]
    h = jnp.maximum(h @ w1 + params["b1"], 0.0)
    return h @ params["wmu"].astype(jnp.float32) + params["bmu"]


if __name__ == "__main__":
    key = jax.random.PRNGKey(0)
    k_x, k_p = jax.random.split(key)
    x = jax.random.normal(k_x, (B, 1, 64, 64), jnp.float32)
    params = init_params(k_p)

    mu_ref = vae_encoder_reference(x, params)

    # Default path (N-split auto-gated on chip generation).
    mu = vae_encoder_forward(x, params)
    jax.block_until_ready(mu)
    assert mu.shape == (B, LATENT)
    assert bool(jnp.allclose(mu, mu_ref, rtol=5e-2, atol=5e-2)), (mu, mu_ref)

    # Also exercise the explicit 2-way split path (the one used on 2-TC chips)
    # so it is validated regardless of which chip this script runs on.
    mu2 = vae_encoder_forward(x, params, n_splits=2)
    jax.block_until_ready(mu2)
    assert bool(jnp.allclose(mu2, mu_ref, rtol=5e-2, atol=5e-2)), (mu2, mu_ref)

    print("KERNEL_OK")
</pallas_src>

<mosaic_0001>
module attributes {stable_mosaic.version = 11 : i64} {
  func.func @vae_encoder_kernel(%arg0: i32, %arg1: memref<4xf32, #tpu.memory_space<smem>>, %arg2: memref<2x4096xf32, #tpu.memory_space<vmem>>, %arg3: memref<4096x1024xi8, #tpu.memory_space<vmem>>, %arg4: memref<1x1024xf32, #tpu.memory_space<vmem>>, %arg5: memref<1x1024xf32, #tpu.memory_space<vmem>>, %arg6: memref<1024x2xbf16, #tpu.memory_space<vmem>>, %arg7: memref<1x2x2xf32, #tpu.memory_space<vmem>>) attributes {dimension_semantics = [#tpu.dimension_semantics<parallel>], iteration_bounds = array<i64: 1>, scalar_prefetch = 0 : i64, scratch_operands = 0 : i64, tpu.core_type = #tpu.core_type<tc>, window_params = [{transform_indices = @transform_0, window_bounds = array<i64: 4>}, {pipeline_mode = #tpu.pipeline_mode<synchronous>, transform_indices = @transform_1, window_bounds = array<i64: 2, 4096>}, {transform_indices = @transform_2, window_bounds = array<i64: 4096, 1024>}, {transform_indices = @transform_3, window_bounds = array<i64: 1, 1024>}, {transform_indices = @transform_4, window_bounds = array<i64: 1, 1024>}, {transform_indices = @transform_5, window_bounds = array<i64: 1024, 2>}, {transform_indices = @transform_6, window_bounds = array<i64: 1, 2, 2>}]} {
    %c0 = arith.constant 0 : index
    %c0_0 = arith.constant 0 : index
    %0 = vector.load %arg2[%c0, %c0_0] : memref<2x4096xf32, #tpu.memory_space<vmem>>, vector<2x4096xf32>
    %c0_1 = arith.constant 0 : index
    %1 = memref.load %arg1[%c0_1] : memref<4xf32, #tpu.memory_space<smem>>
    %c2 = arith.constant 2 : index
    %2 = memref.load %arg1[%c2] : memref<4xf32, #tpu.memory_space<smem>>
    %c3 = arith.constant 3 : index
    %3 = memref.load %arg1[%c3] : memref<4xf32, #tpu.memory_space<smem>>
    %4 = vector.shape_cast %0 : vector<2x4096xf32> to vector<1x2x4096xf32>
    %cst = arith.constant dense<0.000000e+00> : vector<1xf32>
    %5 = vector.multi_reduction <add>, %4, %cst [1, 2] : vector<1x2x4096xf32> to vector<1xf32>
    %6 = vector.shape_cast %5 : vector<1xf32> to vector<1x1x1xf32>
    %7 = vector.extract %6[0, 0, 0] : f32 from vector<1x1x1xf32>
    %cst_2 = arith.constant 1.22070313E-4 : f32
    %8 = arith.mulf %7, %cst_2 : f32
    %9 = vector.broadcast %8 : f32 to vector<2x4096xf32>
    %10 = arith.subf %0, %9 : vector<2x4096xf32>
    %11 = arith.mulf %10, %10 : vector<2x4096xf32>
    %12 = vector.shape_cast %11 : vector<2x4096xf32> to vector<1x2x4096xf32>
    %cst_3 = arith.constant dense<0.000000e+00> : vector<1xf32>
    %13 = vector.multi_reduction <add>, %12, %cst_3 [1, 2] : vector<1x2x4096xf32> to vector<1xf32>
    %14 = vector.shape_cast %13 : vector<1xf32> to vector<1x1x1xf32>
    %15 = vector.extract %14[0, 0, 0] : f32 from vector<1x1x1xf32>
    %cst_4 = arith.constant 1.22070313E-4 : f32
    %16 = arith.mulf %15, %cst_4 : f32
    %cst_5 = arith.constant 0.000000e+00 : f32
    %17 = arith.maximumf %16, %cst_5 : f32
    %18 = arith.mulf %1, %1 : f32
    %19 = arith.mulf %18, %17 : f32
    %cst_6 = arith.constant 9.99999974E-6 : f32
    %20 = arith.addf %19, %cst_6 : f32
    %21 = math.rsqrt %20 : f32
    %22 = arith.mulf %2, %21 : f32
    %23 = arith.mulf %1, %22 : f32
    %24 = arith.mulf %1, %8 : f32
    %25 = arith.mulf %24, %22 : f32
    %26 = arith.subf %3, %25 : f32
    %27 = vector.broadcast %23 : f32 to vector<2x4096xf32>
    %28 = arith.mulf %0, %27 : vector<2x4096xf32>
    %29 = vector.broadcast %26 : f32 to vector<2x4096xf32>
    %30 = arith.addf %28, %29 : vector<2x4096xf32>
    %cst_7 = arith.constant 0.000000e+00 : f32
    %31 = vector.broadcast %cst_7 : f32 to vector<2x4096xf32>
    %32 = arith.maximumf %30, %31 : vector<2x4096xf32>
    %33 = arith.truncf %32 : vector<2x4096xf32> to vector<2x4096xbf16>
    %c0_8 = arith.constant 0 : index
    %c0_9 = arith.constant 0 : index
    %34 = vector.load %arg3[%c0_8, %c0_9] : memref<4096x1024xi8, #tpu.memory_space<vmem>>, vector<4096x1024xi8>
    %35 = arith.sitofp %34 : vector<4096x1024xi8> to vector<4096x1024xbf16>
    %cst_10 = arith.constant dense<0.000000e+00> : vector<2x1024xf32>
    %36 = tpu.matmul %33, %35, %cst_10 {dimension_numbers = #tpu.dot_dimension_numbers<[1], [0], [0], [1], [0, 0, 1, 1], [], []>} : vector<2x4096xbf16>, vector<4096x1024xbf16>, vector<2x1024xf32> -> vector<2x1024xf32>
    %c0_11 = arith.constant 0 : index
    %c0_12 = arith.constant 0 : index
    %37 = vector.load %arg4[%c0_11, %c0_12] : memref<1x1024xf32, #tpu.memory_space<vmem>>, vector<1x1024xf32>
    %38 = vector.broadcast %37 : vector<1x1024xf32> to vector<2x1024xf32>
    %39 = arith.mulf %36, %38 : vector<2x1024xf32>
    %c0_13 = arith.constant 0 : index
    %c0_14 = arith.constant 0 : index
    %40 = vector.load %arg5[%c0_13, %c0_14] : memref<1x1024xf32, #tpu.memory_space<vmem>>, vector<1x1024xf32>
    %41 = vector.broadcast %40 : vector<1x1024xf32> to vector<2x1024xf32>
    %42 = arith.addf %39, %41 : vector<2x1024xf32>
    %cst_15 = arith.constant 0.000000e+00 : f32
    %43 = vector.broadcast %cst_15 : f32 to vector<2x1024xf32>
    %44 = arith.maximumf %42, %43 : vector<2x1024xf32>
    %45 = arith.truncf %44 : vector<2x1024xf32> to vector<2x1024xbf16>
    %c0_16 = arith.constant 0 : index
    %c0_17 = arith.constant 0 : index
    %46 = vector.load %arg6[%c0_16, %c0_17] : memref<1024x2xbf16, #tpu.memory_space<vmem>>, vector<1024x2xbf16>
    %cst_18 = arith.constant dense<0.000000e+00> : vector<2x2xf32>
    %47 = tpu.matmul %45, %46, %cst_18 {dimension_numbers = #tpu.dot_dimension_numbers<[1], [0], [0], [1], [0, 0, 1, 1], [], []>} : vector<2x1024xbf16>, vector<1024x2xbf16>, vector<2x2xf32> -> vector<2x2xf32>
    %c0_19 = arith.constant 0 : index
    %c0_20 = arith.constant 0 : index
    %c0_21 = arith.constant 0 : index
    %48 = vector.load %arg7[%c0_19, %c0_20, %c0_21] : memref<1x2x2xf32, #tpu.memory_space<vmem>>, vector<1x2x2xf32>
    %49 = vector.shape_cast %48 : vector<1x2x2xf32> to vector<2x2xf32>
    %50 = vector.shape_cast %47 : vector<2x2xf32> to vector<1x2x2xf32>
    tpu.vector_store %arg7[%c0_19, %c0_20, %c0_21], %50 {strides = array<i32>} : memref<1x2x2xf32, #tpu.memory_space<vmem>>, vector<1x2x2xf32>,
    return
  }
  func.func @transform_0(%arg0: i32) -> i32 {
    %c0_i32 = arith.constant 0 : i32
    %c0_i32_0 = arith.constant 0 : i32
    return %c0_i32 : i32
  }
  func.func @transform_1(%arg0: i32) -> (i32, i32) {
    %c0_i32 = arith.constant 0 : i32
    %c0_i32_0 = arith.constant 0 : i32
    %c0_i32_1 = arith.constant 0 : i32
    return %c0_i32, %c0_i32_0 : i32, i32
  }
  func.func @transform_2(%arg0: i32) -> (i32, i32) {
    %c0_i32 = arith.constant 0 : i32
    %c0_i32_0 = arith.constant 0 : i32
    return %c0_i32, %arg0 : i32, i32
  }
  func.func @transform_3(%arg0: i32) -> (i32, i32) {
    %c0_i32 = arith.constant 0 : i32
    %c0_i32_0 = arith.constant 0 : i32
    return %c0_i32, %arg0 : i32, i32
  }
  func.func @transform_4(%arg0: i32) -> (i32, i32) {
    %c0_i32 = arith.constant 0 : i32
    %c0_i32_0 = arith.constant 0 : i32
    return %c0_i32, %arg0 : i32, i32
  }
  func.func @transform_5(%arg0: i32) -> (i32, i32) {
    %c0_i32 = arith.constant 0 : i32
    %c0_i32_0 = arith.constant 0 : i32
    return %arg0, %c0_i32 : i32, i32
  }
  func.func @transform_6(%arg0: i32) -> (i32, i32, i32) {
    %c0_i32 = arith.constant 0 : i32
    %c0_i32_0 = arith.constant 0 : i32
    %c0_i32_1 = arith.constant 0 : i32
    return %arg0, %c0_i32, %c0_i32_0 : i32, i32, i32
  }
}

</mosaic_0001>

<bundles_post_ra>
// kernel: tpu_custom_call.1
= control target key start
LH: loop header
LB: loop body
LE: loop exit
PB: predicated region body
PF: predicated region fallthrough
CT: control target
= control target key end

     0   :  { %11 = vsyncpa [#allocation5], 0  ;;  %s8881_s0 = inlined_call_operand.hbm [shape: f32[4], index: 0, kind: input, shape index: {}]   ;;  %s8882_s1 = inlined_call_operand.hbm [shape: f32[2,4096], index: 1, kind: input, shape index: {}]   ;;  %s8883_s2 = inlined_call_operand.hbm [shape: s8[4096,1024], index: 2, kind: input, shape index: {}]   ;;  %s8884_s3 = inlined_call_operand.hbm [shape: f32[1,1024], index: 3, kind: input, shape index: {}]   ;;  %s8885_s4 = inlined_call_operand.hbm [shape: f32[1,1024], index: 4, kind: input, shape index: {}]   ;;  %s8886_s5 = inlined_call_operand.vmem [shape: bf16[1024,2], index: 5, kind: input, shape index: {}]   ;;  %s8887_s6 = inlined_call_operand.hbm [shape: f32[1,2,2], index: 6, kind: output, shape index: {}]  }
   0x1   :  { %12 = vsyncpa [#allocation3], 0 }
   0x2   :  { %13 = vsyncpa [#allocation8], 0 }
   0x3   :  { %14 = vsyncpa [#allocation11], 0 }
   0x4   :  { %15 = vsyncpa [#allocation4], 0  ;;  %s7981_s21 = smov [#allocation7]   ;;  %s7851_s25 = scalar_lea.hbm %s8883_s2, 131072 }
   0x5   :  { %s39_s22 = sshll.u32 %s7981_s21, 4  ;;  %p7852_p0 = scmp.ne.s32.totalorder %s8883_s2, %s7851_s25  ;;  %s40_s22 = int_to_ptr.vmem [resolvable:$true] %s39_s22 }
   0x6   :  { %p7855_p1 = scmp.lt.u32.totalorder %s7851_s25, %s8883_s2 }
   0x8   :  { %p7857_p2 = pnand %p7855_p1, %p7852_p0 }
   0xa   :  { %7860 = shalt.err (!%p7857_p2)
}
   0xb   :  { %s7861_s30 = scalar_lea.vmem %s40_s22, 131072  ;;  %p7866_p4 = scmp.lt.s32.totalorder %s40_s22, %s40_s22 }
   0xc   :  { %p7862_p3 = scmp.ne.s32.totalorder %s40_s22, %s7861_s30  ;;  %p7867_p5 = scmp.lt.s32.totalorder %s7861_s30, %s7861_s30 }
   0xe   :  { %p7868_p6 = por %p7867_p5, %p7866_p4 }
  0x10   :  { %p7869_p7 = pnand %p7868_p6, %p7862_p3 }
  0x12   :  { %7872 = shalt.err (!%p7869_p7)
}
  0x13   :  { %s7982_s7 = smov 1024   ;;  %s7983_s8 = smov 64  }
  0x14   :  { %45 = dma.hbm_to_vmem [thread:$0]  %s8883_s2, 131072, %s40_s22, [#allocation8], %s7982_s7, %s7982_s7, %s7983_s8  }
  0x15   :  { %s7873_s13 = scalar_lea.hbm %s8881_s0, 16 }
  0x16   :  { %p7874_p8 = scmp.ne.s32.totalorder %s8881_s0, %s7873_s13  ;;  %p7877_p9 = scmp.lt.u32.totalorder %s7873_s13, %s8881_s0 }
  0x18   :  { %p7879_p10 = pnand %p7877_p9, %p7874_p8 }
  0x1a   :  { %7882 = shalt.err (!%p7879_p10)
}
  0x1b   :  { %s7984_s18 = smov [#allocation2]   ;;  %s7985_s2 = smov [#allocation6]  }
  0x1c   :  { %23 = dma.hbm_to_smem %s8881_s0, 16, %s7984_s18, [#allocation5]  }
  0x1d   :  { %s30_s21 = sshll.u32 %s7985_s2, 4  ;;  %s7986_s22 = smov [#allocation9]   ;;  %s31_s21 = int_to_ptr.vmem [resolvable:$true] %s30_s21 }
  0x1e   :  { %s52_s23 = sshll.u32 %s7986_s22, 4  ;;  %s7883_s26 = scalar_lea.hbm %s8882_s1, 1024  ;;  %s53_s23 = int_to_ptr.vmem [resolvable:$true] %s52_s23 }
  0x1f   :  { %p7884_p11 = scmp.ne.s32.totalorder %s8882_s1, %s7883_s26  ;;  %p7887_p12 = scmp.lt.u32.totalorder %s7883_s26, %s8882_s1 }
  0x21   :  { %p7889_p13 = pnand %p7887_p12, %p7884_p11 }
  0x23   :  { %7892 = shalt.err (!%p7889_p13)
}
  0x24   :  { %s7893_s0 = scalar_lea.vmem %s31_s21, 1024  ;;  %p7898_p1 = scmp.lt.s32.totalorder %s31_s21, %s31_s21 }
  0x25   :  { %p7894_p0 = scmp.ne.s32.totalorder %s31_s21, %s7893_s0  ;;  %p7899_p2 = scmp.lt.s32.totalorder %s7893_s0, %s7893_s0 }
  0x27   :  { %p7900_p3 = por %p7899_p2, %p7898_p1 }
  0x29   :  { %p7901_p4 = pnand %p7900_p3, %p7894_p0 }
  0x2b   :  { %7904 = shalt.err (!%p7901_p4)
}
  0x2c   :  { %33 = dma.hbm_to_vmem [thread:$0]  %s8882_s1, 1024, %s31_s21, [#allocation3]  }
  0x2d   :  { %s7905_s11 = scalar_lea.hbm %s8884_s3, 128 }
  0x2e   :  { %p7906_p5 = scmp.ne.s32.totalorder %s8884_s3, %s7905_s11  ;;  %p7909_p6 = scmp.lt.u32.totalorder %s7905_s11, %s8884_s3 }
  0x30   :  { %p7911_p7 = pnand %p7909_p6, %p7906_p5 }
  0x32   :  { %7914 = shalt.err (!%p7911_p7)
}
  0x33   :  { %s7915_s16 = scalar_lea.vmem %s53_s23, 128  ;;  %p7920_p9 = scmp.lt.s32.totalorder %s53_s23, %s53_s23 }
  0x34   :  { %p7916_p8 = scmp.ne.s32.totalorder %s53_s23, %s7915_s16  ;;  %p7921_p10 = scmp.lt.s32.totalorder %s7915_s16, %s7915_s16 }
  0x36   :  { %p7922_p11 = por %p7921_p10, %p7920_p9 }
  0x38   :  { %p7923_p12 = pnand %p7922_p11, %p7916_p8 }
  0x3a   :  { %7926 = shalt.err (!%p7923_p12)
}
  0x3b   :  { %55 = dma.hbm_to_vmem [thread:$0]  %s8884_s3, 128, %s53_s23, [#allocation8]  }
  0x3c   :  { %s7987_s18 = smov [#allocation10]   ;;  %s7927_s21 = scalar_lea.hbm %s8885_s4, 128 }
  0x3d   :  { %s62_s19 = sshll.u32 %s7987_s18, 4  ;;  %p7928_p13 = scmp.ne.s32.totalorder %s8885_s4, %s7927_s21  ;;  %s63_s19 = int_to_ptr.vmem [resolvable:$true] %s62_s19 }
  0x3e   :  { %p7931_p0 = scmp.lt.u32.totalorder %s7927_s21, %s8885_s4 }
  0x40   :  { %p7933_p1 = pnand %p7931_p0, %p7928_p13 }
  0x42   :  { %7936 = shalt.err (!%p7933_p1)
}
  0x43   :  { %s7937_s27 = scalar_lea.vmem %s63_s19, 128  ;;  %p7942_p3 = scmp.lt.s32.totalorder %s63_s19, %s63_s19 }
  0x44   :  { %p7938_p2 = scmp.ne.s32.totalorder %s63_s19, %s7937_s27  ;;  %p7943_p4 = scmp.lt.s32.totalorder %s7937_s27, %s7937_s27 }
  0x46   :  { %p7944_p5 = por %p7943_p4, %p7942_p3 }
  0x48   :  { %p7945_p6 = pnand %p7944_p5, %p7938_p2 }
  0x4a   :  { %7948 = shalt.err (!%p7945_p6)
}
  0x4b   :  { %65 = dma.hbm_to_vmem [thread:$0]  %s8885_s4, 128, %s63_s19, [#allocation11]  }
  0x4c   :  { %7971 = dma.done.wait [#allocation5], 16  }
  0x4d   :  { %7972 = vsyncadd [#allocation5], 4294967280 }
  0x4e   :  { %7973 = dma.done.wait [#allocation3], 1024  }
  0x4f   :  { %7974 = vsyncadd [#allocation3], 4294966272 }
  0x50   :  { %7975 = dma.done.wait [#allocation8], 131200  }
  0x51   :  { %7976 = vsyncadd [#allocation8], 4294836096 }
  0x52   :  { %7977 = dma.done.wait [#allocation11], 128  }
  0x53   :  { %7978 = vsyncadd [#allocation11], 4294967168 }
  0x54   :  { %83 = sfence }
  0x55   :  { %v108_v0 = vlaneseq  ;;  %v7988_v1 = vmov 1983009808   ;;  %v8086_v3 = vld [vmem:[#allocation6] sm:$0xff]  ;;  %vm272_vm0 = vcmask 1041408   ;;  %v8090_v6 = vld [vmem:[#allocation6 + $0x8] sm:$0xff]  ;;  %v8097_v9 = vld [vmem:[#allocation6 + $0x10] sm:$0xff] }
  0x56   :  { %v106_v2 = vunpack.c.l.s4 %v7988_v1  ;;  %v104_v7 = vcombine.high %v8086_v3, %v8086_v3  ;;  %v8099_v10 = vld [vmem:[#allocation6 + $0x18] sm:$0xff]  ;;  %v8103_v12 = vld [vmem:[#allocation6 + $0x20] sm:$0xff]  ;;  %v121_v13 = vcombine.high %v8090_v6, %v8090_v6  ;;  %v138_v15 = vcombine.high %v8097_v9, %v8097_v9  ;;  %s93_s29 = sld [smem:[#allocation2]]  ;;  %s7989_s8 = smov 0.0  }
  0x57   :  { %v8088_v4 = vshrl.u32 %v108_v0, 7  ;;  %v155_v17 = vcombine.high %v8099_v10, %v8099_v10  ;;  %v172_v19 = vcombine.high %v8103_v12, %v8103_v12  ;;  %s7362_s12 = sld [smem:[#allocation2 + $0x2]]  ;;  %s7363_s13 = sld [smem:[#allocation2 + $0x3]]  ;;  %vm7342_vm1 = vcmask 9216  }
  0x58   :  { %v107_v5 = vunpack.c.0.s8 %v106_v2 }
  0x5a   :  { %v8095_v8 = vsub.s32 %v107_v5, %v8088_v4 }
  0x5c   :  { %v111_v11 = vrot.slane %v8086_v3, %v8095_v8  ;;  %v118_v14 = vrot.slane %v104_v7, %v8095_v8  ;;  %v128_v16 = vrot.slane %v8090_v6, %v8095_v8  ;;  %v135_v20 = vrot.slane %v121_v13, %v8095_v8  ;;  %v8146_v7 = vld [vmem:[#allocation6 + $0x28] sm:$0xff]  ;;  %s613_s0 = smul.f32 %s93_s29, %s93_s29 }
  0x5d   :  { %v145_v22 = vrot.slane %v8097_v9, %v8095_v8  ;;  %v152_v23 = vrot.slane %v138_v15, %v8095_v8  ;;  %v162_v25 = vrot.slane %v8099_v10, %v8095_v8  ;;  %v169_v26 = vrot.slane %v155_v17, %v8095_v8 }
  0x5e   :  { %v119_v18 = vcombine.high %v111_v11, %v111_v11  ;;  %v120_v21 = vcombine.high %v118_v14, %v118_v14  ;;  %v136_v24 = vcombine.high %v128_v16, %v128_v16  ;;  %v179_v27 = vrot.slane %v8103_v12, %v8095_v8 }
  0x5f   :  { %v186_v28 = vrot.slane %v172_v19, %v8095_v8  ;;  %v273_v29 = vsel %vm272_vm0, %v111_v11, 0.0  ;;  %v276_v31 = vsel %vm272_vm0, %v118_v14, 0.0  ;;  %v137_v32 = vcombine.high %v135_v20, %v135_v20 }
  0x60   :  { %v274_v30 = vsel %vm272_vm0, %v119_v18, 0.0  ;;  %v153_v34 = vcombine.high %v145_v22, %v145_v22  ;;  %v154_v35 = vcombine.high %v152_v23, %v152_v23  ;;  %v278_v36 = vsel %vm272_vm0, %v120_v21, 0.0  ;;  %v8152_v18 = vld [vmem:[#allocation6 + $0x30] sm:$0xff] }
  0x61   :  { %v275_v33 = vadd.f32 %v274_v30, %v273_v29  ;;  %v170_v37 = vcombine.high %v162_v25, %v162_v25  ;;  %v171_v38 = vcombine.high %v169_v26, %v169_v26  ;;  %v187_v40 = vcombine.high %v179_v27, %v179_v27 }
  0x62   :  { %v188_v41 = vcombine.high %v186_v28, %v186_v28  ;;  %v280_v42 = vsel %vm272_vm0, %v128_v16, 0.0  ;;  %v282_v43 = vsel %vm272_vm0, %v136_v24, 0.0  ;;  %v284_v45 = vsel %vm272_vm0, %v135_v20, 0.0 }
  0x63   :  { %v277_v39 = vadd.f32 %v276_v31, %v275_v33  ;;  %v286_v46 = vsel %vm272_vm0, %v137_v32, 0.0  ;;  %v288_v47 = vsel %vm272_vm0, %v145_v22, 0.0  ;;  %v290_v48 = vsel %vm272_vm0, %v153_v34, 0.0 }
  0x64   :  { %v292_v49 = vsel %vm272_vm0, %v152_v23, 0.0  ;;  %v294_v50 = vsel %vm272_vm0, %v154_v35, 0.0  ;;  %v296_v51 = vsel %vm272_vm0, %v162_v25, 0.0  ;;  %v298_v53 = vsel %vm272_vm0, %v170_v37, 0.0  ;;  %v8164_v35 = vld [vmem:[#allocation6 + $0x38] sm:$0xff] }
  0x65   :  { %v279_v44 = vadd.f32 %v278_v36, %v277_v39  ;;  %v300_v54 = vsel %vm272_vm0, %v169_v26, 0.0  ;;  %v302_v55 = vsel %vm272_vm0, %v171_v38, 0.0  ;;  %v304_v56 = vsel %vm272_vm0, %v179_v27, 0.0 }
  0x66   :  { %v306_v57 = vsel %vm272_vm0, %v187_v40, 0.0  ;;  %v308_v58 = vsel %vm272_vm0, %v186_v28, 0.0  ;;  %v310_v59 = vsel %vm272_vm0, %v188_v41, 0.0  ;;  %v189_v15 = vcombine.high %v8146_v7, %v8146_v7 }
  0x67   :  { %v281_v52 = vadd.f32 %v280_v42, %v279_v44  ;;  %v196_v16 = vrot.slane %v8146_v7, %v8095_v8  ;;  %v206_v26 = vcombine.high %v8152_v18, %v8152_v18  ;;  %v213_v27 = vrot.slane %v8152_v18, %v8095_v8 }
  0x68   :  { %v203_v20 = vrot.slane %v189_v15, %v8095_v8  ;;  %v223_v40 = vcombine.high %v8164_v35, %v8164_v35  ;;  %v230_v41 = vrot.slane %v8164_v35, %v8095_v8 }
  0x69   :  { %v283_v60 = vadd.f32 %v282_v43, %v281_v52  ;;  %v204_v21 = vcombine.high %v196_v16, %v196_v16  ;;  %v312_v23 = vsel %vm272_vm0, %v196_v16, 0.0  ;;  %v220_v32 = vrot.slane %v206_v26, %v8095_v8 }
  0x6a   :  { %v205_v25 = vcombine.high %v203_v20, %v203_v20  ;;  %v316_v30 = vsel %vm272_vm0, %v203_v20, 0.0  ;;  %v221_v33 = vcombine.high %v213_v27, %v213_v27  ;;  %v320_v37 = vsel %vm272_vm0, %v213_v27, 0.0 }
  0x6b   :  { %v285_v61 = vadd.f32 %v284_v45, %v283_v60  ;;  %v314_v28 = vsel %vm272_vm0, %v204_v21, 0.0  ;;  %v222_v39 = vcombine.high %v220_v32, %v220_v32  ;;  %v324_v44 = vsel %vm272_vm0, %v220_v32, 0.0 }
  0x6c   :  { %v318_v34 = vsel %vm272_vm0, %v205_v25, 0.0  ;;  %v322_v42 = vsel %vm272_vm0, %v221_v33, 0.0 }
  0x6d   :  { %v287_v62 = vadd.f32 %v286_v46, %v285_v61  ;;  %v237_v46 = vrot.slane %v223_v40, %v8095_v8 }
  0x6f   :  { %v289_v63 = vadd.f32 %v288_v47, %v287_v62  ;;  %v238_v47 = vcombine.high %v230_v41, %v230_v41  ;;  %v239_v52 = vcombine.high %v237_v46, %v237_v46 }
  0x71   :  { %v291_v0 = vadd.f32 %v290_v48, %v289_v63  ;;  %v326_v48 = vsel %vm272_vm0, %v222_v39, 0.0 }
  0x73   :  { %v293_v1 = vadd.f32 %v292_v49, %v291_v0 }
  0x75   :  { %v295_v2 = vadd.f32 %v294_v50, %v293_v1  ;;  %v328_v50 = vsel %vm272_vm0, %v230_v41, 0.0 }
  0x77   :  { %v297_v5 = vadd.f32 %v296_v51, %v295_v2 }
  0x79   :  { %v299_v11 = vadd.f32 %v298_v53, %v297_v5  ;;  %v330_v53 = vsel %vm272_vm0, %v238_v47, 0.0 }
  0x7b   :  { %v301_v13 = vadd.f32 %v300_v54, %v299_v11 }
  0x7d   :  { %v303_v14 = vadd.f32 %v302_v55, %v301_v13  ;;  %v332_v55 = vsel %vm272_vm0, %v237_v46, 0.0 }
  0x7f   :  { %v305_v17 = vadd.f32 %v304_v56, %v303_v14 }
  0x81   :  { %v307_v19 = vadd.f32 %v306_v57, %v305_v17  ;;  %v334_v57 = vsel %vm272_vm0, %v239_v52, 0.0 }
  0x83   :  { %v309_v22 = vadd.f32 %v308_v58, %v307_v19 }
  0x85   :  { %v311_v24 = vadd.f32 %v310_v59, %v309_v22 }
  0x87   :  { %v313_v29 = vadd.f32 %v312_v23, %v311_v24 }
  0x89   :  { %v315_v31 = vadd.f32 %v314_v28, %v313_v29 }
  0x8b   :  { %v317_v36 = vadd.f32 %v316_v30, %v315_v31 }
  0x8d   :  { %v319_v38 = vadd.f32 %v318_v34, %v317_v36 }
  0x8f   :  { %v321_v43 = vadd.f32 %v320_v37, %v319_v38 }
  0x91   :  { %v323_v45 = vadd.f32 %v322_v42, %v321_v43 }
  0x93   :  { %v325_v49 = vadd.f32 %v324_v44, %v323_v45 }
  0x95   :  { %v327_v51 = vadd.f32 %v326_v48, %v325_v49 }
  0x97   :  { %v329_v54 = vadd.f32 %v328_v50, %v327_v51 }
  0x99   :  { %v331_v56 = vadd.f32 %v330_v53, %v329_v54 }
  0x9b   :  { %v333_v58 = vadd.f32 %v332_v55, %v331_v56 }
  0x9d   :  { %v335_v59 = vadd.f32 %v334_v57, %v333_v58 }
  0x9f   :  { %336 = vadd.xlane.f32.xlu0 %v335_v59 }
 0x12c   :  { %v337_v60 = vpop.xlane.xlu0 %336 }
 0x12d   :  { %v338_v61 = vrot.slane %v337_v60, 4 }
 0x12f   :  { %v339_v62 = vadd.f32 %v338_v61, %v337_v60 }
 0x131   :  { %v340_v63 = vrot.slane %v339_v62, 2 }
 0x133   :  { %v341_v0 = vadd.f32 %v340_v63, %v339_v62 }
 0x135   :  { %v342_v1 = vrot.slane %v341_v0, 1 }
 0x137   :  { %v343_v2 = vadd.f32 %v342_v1, %v341_v0 }
 0x139   :  { %7756 = vpush %v343_v2 }
 0x16a   :  { %s8179_s4 = spop %7756 }
 0x16b   :  { %s345_s28 = smul.f32 0.00012207031, %s8179_s4 }
 0x16d   :  { %v8184_v5 = vstv %s345_s28  ;;  %s621_s16 = smul.f32 %s345_s28, %s93_s29 }
 0x16e   :  { %v347_v11 = vsub.f32 %v8086_v3, %v8184_v5  ;;  %v348_v13 = vsub.f32 %v8090_v6, %v8184_v5  ;;  %v349_v21 = vsub.f32 %v8097_v9, %v8184_v5  ;;  %v350_v33 = vsub.f32 %v8099_v10, %v8184_v5 }
 0x16f   :  { %v351_v48 = vsub.f32 %v8103_v12, %v8184_v5  ;;  %v352_v62 = vsub.f32 %v8146_v7, %v8184_v5 }
 0x170   :  { %v355_v14 = vmul.f32 %v347_v11, %v347_v11  ;;  %v356_v17 = vmul.f32 %v348_v13, %v348_v13  ;;  %v357_v28 = vmul.f32 %v349_v21, %v349_v21  ;;  %v358_v43 = vmul.f32 %v350_v33, %v350_v33 }
 0x171   :  { %v359_v57 = vmul.f32 %v351_v48, %v351_v48 }
 0x172   :  { %v371_v15 = vcombine.high %v355_v14, %v355_v14  ;;  %v378_v16 = vrot.slane %v355_v14, %v8095_v8  ;;  %v388_v22 = vcombine.high %v356_v17, %v356_v17  ;;  %v395_v24 = vrot.slane %v356_v17, %v8095_v8 }
 0x173   :  { %v405_v37 = vcombine.high %v357_v28, %v357_v28  ;;  %v412_v38 = vrot.slane %v357_v28, %v8095_v8  ;;  %v422_v51 = vcombine.high %v358_v43, %v358_v43  ;;  %v429_v52 = vrot.slane %v358_v43, %v8095_v8 }
 0x174   :  { %v385_v19 = vrot.slane %v371_v15, %v8095_v8  ;;  %v386_v20 = vcombine.high %v378_v16, %v378_v16  ;;  %v539_v3 = vsel %vm272_vm0, %v378_v16, 0.0  ;;  %v402_v29 = vrot.slane %v388_v22, %v8095_v8 }
 0x175   :  { %v403_v30 = vcombine.high %v395_v24, %v395_v24  ;;  %v546_v9 = vsel %vm272_vm0, %v395_v24, 0.0  ;;  %v419_v44 = vrot.slane %v405_v37, %v8095_v8  ;;  %v420_v45 = vcombine.high %v412_v38, %v412_v38 }
 0x176   :  { %v387_v23 = vcombine.high %v385_v19, %v385_v19  ;;  %v540_v25 = vsel %vm272_vm0, %v386_v20, 0.0  ;;  %v542_v26 = vsel %vm272_vm0, %v385_v19, 0.0  ;;  %v404_v36 = vcombine.high %v402_v29, %v402_v29 }
 0x177   :  { %v541_v6 = vadd.f32 %v540_v25, %v539_v3  ;;  %v548_v39 = vsel %vm272_vm0, %v403_v30, 0.0  ;;  %v550_v41 = vsel %vm272_vm0, %v402_v29, 0.0  ;;  %v554_v10 = vsel %vm272_vm0, %v412_v38, 0.0 }
 0x178   :  { %v544_v31 = vsel %vm272_vm0, %v387_v23, 0.0  ;;  %v552_v46 = vsel %vm272_vm0, %v404_v36, 0.0  ;;  %v421_v50 = vcombine.high %v419_v44, %v419_v44  ;;  %v556_v53 = vsel %vm272_vm0, %v420_v45, 0.0 }
 0x179   :  { %v543_v27 = vadd.f32 %v542_v26, %v541_v6  ;;  %v558_v55 = vsel %vm272_vm0, %v419_v44, 0.0  ;;  %v436_v58 = vrot.slane %v422_v51, %v8095_v8  ;;  %v437_v59 = vcombine.high %v429_v52, %v429_v52 }
 0x17a   :  { %v560_v60 = vsel %vm272_vm0, %v421_v50, 0.0  ;;  %v562_v12 = vsel %vm272_vm0, %v429_v52, 0.0  ;;  %v439_v1 = vcombine.high %v359_v57, %v359_v57  ;;  %v446_v2 = vrot.slane %v359_v57, %v8095_v8 }
 0x17b   :  { %v545_v32 = vadd.f32 %v544_v31, %v543_v27  ;;  %v438_v0 = vcombine.high %v436_v58, %v436_v58  ;;  %v564_v11 = vsel %vm272_vm0, %v437_v59, 0.0  ;;  %v566_v14 = vsel %vm272_vm0, %v436_v58, 0.0 }
 0x17c   :  { %v360_v16 = vmul.f32 %v352_v62, %v352_v62  ;;  %v453_v17 = vrot.slane %v439_v1, %v8095_v8  ;;  %v454_v19 = vcombine.high %v446_v2, %v446_v2  ;;  %v570_v22 = vsel %vm272_vm0, %v446_v2, 0.0 }
 0x17d   :  { %v547_v34 = vadd.f32 %v546_v9, %v545_v32  ;;  %v568_v20 = vsel %vm272_vm0, %v438_v0, 0.0  ;;  %v353_v23 = vsub.f32 %v8152_v18, %v8184_v5  ;;  %v354_v36 = vsub.f32 %v8164_v35, %v8184_v5 }
 0x17e   :  { %v455_v3 = vcombine.high %v453_v17, %v453_v17  ;;  %v456_v25 = vcombine.high %v360_v16, %v360_v16  ;;  %v463_v6 = vrot.slane %v360_v16, %v8095_v8  ;;  %v572_v26 = vsel %vm272_vm0, %v454_v19, 0.0  ;;  %v858_v16 = vld [vmem:[#allocation7] sm:$0xff] }
 0x17f   :  { %v549_v40 = vadd.f32 %v548_v39, %v547_v34  ;;  %v574_v28 = vsel %vm272_vm0, %v453_v17, 0.0  ;;  %v361_v31 = vmul.f32 %v353_v23, %v353_v23  ;;  %v362_v45 = vmul.f32 %v354_v36, %v354_v36  ;;  %v877_v36 = vld [vmem:[#allocation7 + $0x98] sm:$0xff] }
 0x180   :  { %v471_v30 = vcombine.high %v463_v6, %v463_v6  ;;  %v470_v32 = vrot.slane %v456_v25, %v8095_v8  ;;  %v576_v9 = vsel %vm272_vm0, %v455_v3, 0.0  ;;  %v578_v34 = vsel %vm272_vm0, %v463_v6, 0.0  ;;  %v867_v3 = vld [vmem:[#allocation7 + $0x48] sm:$0xff]  ;;  %v869_v25 = vld [vmem:[#allocation7 + $0x58] sm:$0xff] }
 0x181   :  { %v551_v42 = vadd.f32 %v550_v41, %v549_v40  ;;  %v473_v39 = vcombine.high %v361_v31, %v361_v31  ;;  %v480_v40 = vrot.slane %v361_v31, %v8095_v8  ;;  %v490_v51 = vcombine.high %v362_v45, %v362_v45 }
 0x182   :  { %v472_v38 = vcombine.high %v470_v32, %v470_v32  ;;  %v580_v41 = vsel %vm272_vm0, %v471_v30, 0.0  ;;  %v582_v43 = vsel %vm272_vm0, %v470_v32, 0.0  ;;  %v497_v52 = vrot.slane %v362_v45, %v8095_v8  ;;  %v868_v30 = vld [vmem:[#allocation7 + $0x50] sm:$0xff] }
 0x183   :  { %v553_v47 = vadd.f32 %v552_v46, %v551_v42  ;;  %v487_v46 = vrot.slane %v473_v39, %v8095_v8  ;;  %v586_v5 = vsel %vm272_vm0, %v480_v40, 0.0  ;;  %v504_v57 = vrot.slane %v490_v51, %v8095_v8  ;;  %v882_v51 = vld [vmem:[#allocation7 + $0xc0] sm:$0xff] }
 0x184   :  { %v505_v58 = vcombine.high %v497_v52, %v497_v52  ;;  %v1882_v23 = vunpack.c.l.s8.bf16 %v858_v16  ;;  %v1890_v6 = vunpack.c.h.s8.bf16 %v858_v16  ;;  %v1900_v32 = vunpack.c.l.s8.bf16 %v868_v30 }
 0x185   :  { %v555_v49 = vadd.f32 %v554_v10, %v553_v47  ;;  %v488_v47 = vcombine.high %v480_v40, %v480_v40  ;;  %v584_v10 = vsel %vm272_vm0, %v472_v38, 0.0  ;;  %v489_v50 = vcombine.high %v487_v46, %v487_v46 }
 0x186   :  { %v506_v62 = vcombine.high %v504_v57, %v504_v57  ;;  %v598_v1 = vsel %vm272_vm0, %v504_v57, 0.0  ;;  %v1908_v38 = vunpack.c.h.s8.bf16 %v868_v30  ;;  %v1917_v40 = vunpack.c.l.s8.bf16 %v877_v36  ;;  %v891_v57 = vld [vmem:[#allocation7 + $0x108] sm:$0xff] }
 0x187   :  { %v557_v54 = vadd.f32 %v556_v53, %v555_v49  ;;  %v588_v53 = vsel %vm272_vm0, %v488_v47, 0.0  ;;  %v592_v59 = vsel %vm272_vm0, %v489_v50, 0.0  ;;  %v883_v47 = vld [vmem:[#allocation7 + $0xc8] sm:$0xff] }
 0x189   :  { %v559_v56 = vadd.f32 %v558_v55, %v557_v54  ;;  %v590_v55 = vsel %vm272_vm0, %v487_v46, 0.0  ;;  %v1925_v46 = vunpack.c.h.s8.bf16 %v877_v36 }
 0x18b   :  { %v561_v61 = vadd.f32 %v560_v60, %v559_v56 }
 0x18d   :  { %v563_v63 = vadd.f32 %v562_v12, %v561_v61  ;;  %v594_v61 = vsel %vm272_vm0, %v497_v52, 0.0  ;;  %v884_v52 = vld [vmem:[#allocation7 + $0xd0] sm:$0xff] }
 0x18f   :  { %v565_v13 = vadd.f32 %v564_v11, %v563_v63  ;;  %v596_v63 = vsel %vm272_vm0, %v505_v58, 0.0  ;;  %v600_v11 = vsel %vm272_vm0, %v506_v62, 0.0  ;;  %v893_v58 = vld [vmem:[#allocation7 + $0x118] sm:$0xff]  ;;  %v890_v62 = vld [vmem:[#allocation7 + $0x100] sm:$0xff] }
 0x191   :  { %v567_v15 = vadd.f32 %v566_v14, %v565_v13  ;;  %v859_v14 = vld [vmem:[#allocation7 + $0x8] sm:$0xff] }
 0x192   :  { %v1883_v17 = vunpack.c.l.s8.bf16 %v859_v14  ;;  %v1891_v19 = vunpack.c.h.s8.bf16 %v859_v14  ;;  %v901_v14 = vld [vmem:[#allocation7 + $0x158] sm:$0xff] }
 0x193   :  { %v569_v21 = vadd.f32 %v568_v20, %v567_v15  ;;  %v861_v15 = vld [vmem:[#allocation7 + $0x18] sm:$0xff] }
 0x194   :  { %v1885_v20 = vunpack.c.l.s8.bf16 %v861_v15  ;;  %3930 = vmatprep.subr.bf16.mxu0 %v1883_v17 }
 0x195   :  { %v571_v24 = vadd.f32 %v570_v22, %v569_v21  ;;  %v1893_v21 = vunpack.c.h.s8.bf16 %v861_v15  ;;  %v860_v22 = vld [vmem:[#allocation7 + $0x10] sm:$0xff]  ;;  %3931 = vmatpush1.bf16.msra.mxu0 %v1882_v23  ;;  %v1954_v15 = vunpack.c.h.s8.bf16 %v890_v62 }
 0x196   :  { %4586 = vmatprep.subr.bf16.mxu1 %v1885_v20  ;;  %3932 = vmatprep.subr.bf16.mxu0 %v1891_v19  ;;  %v1965_v19 = vunpack.c.l.s8.bf16 %v901_v14  ;;  %v898_v20 = vld [vmem:[#allocation7 + $0x140] sm:$0xff] }
 0x197   :  { %v573_v27 = vadd.f32 %v572_v26, %v571_v24  ;;  %v1884_v24 = vunpack.c.l.s8.bf16 %v860_v22  ;;  %v1892_v26 = vunpack.c.h.s8.bf16 %v860_v22  ;;  %v1962_v22 = vunpack.c.l.s8.bf16 %v898_v20 }
 0x199   :  { %v575_v29 = vadd.f32 %v574_v28, %v573_v27  ;;  %4587 = vmatpush1.bf16.msra.mxu1 %v1884_v24  ;;  %v1899_v27 = vunpack.c.l.s8.bf16 %v867_v3  ;;  %v1901_v28 = vunpack.c.l.s8.bf16 %v869_v25  ;;  %3933 = vmatpush1.bf16.msra.mxu0 %v1890_v6 }
 0x19a   :  { %4588 = vmatprep.subr.bf16.mxu1 %v1893_v21  ;;  %v900_v21 = vld [vmem:[#allocation7 + $0x150] sm:$0xff] }
 0x19b   :  { %v577_v33 = vadd.f32 %v576_v9, %v575_v29  ;;  %v866_v29 = vld [vmem:[#allocation7 + $0x40] sm:$0xff]  ;;  %3934 = vmatprep.subr.bf16.mxu0 %v1899_v27  ;;  %v1907_v9 = vunpack.c.h.s8.bf16 %v867_v3  ;;  %v1964_v23 = vunpack.c.l.s8.bf16 %v900_v21  ;;  %v1973_v3 = vunpack.c.h.s8.bf16 %v901_v14 }
 0x19c   :  { %v1898_v31 = vunpack.c.l.s8.bf16 %v866_v29  ;;  %v1972_v6 = vunpack.c.h.s8.bf16 %v900_v21 }
 0x19d   :  { %v579_v37 = vadd.f32 %v578_v34, %v577_v33  ;;  %4589 = vmatpush1.bf16.msra.mxu1 %v1892_v26  ;;  %v1909_v33 = vunpack.c.h.s8.bf16 %v869_v25  ;;  %v875_v34 = vld [vmem:[#allocation7 + $0x88] sm:$0xff]  ;;  %v1970_v25 = vunpack.c.h.s8.bf16 %v898_v20 }
 0x19e   :  { %4590 = vmatprep.subr.bf16.mxu1 %v1901_v28  ;;  %3935 = vmatpush1.bf16.msra.mxu0 %v1898_v31  ;;  %v1915_v39 = vunpack.c.l.s8.bf16 %v875_v34  ;;  %v1923_v45 = vunpack.c.h.s8.bf16 %v875_v34  ;;  %v906_v34 = vld [vmem:[#allocation7 + $0x180] sm:$0xff] }
 0x19f   :  { %v581_v42 = vadd.f32 %v580_v41, %v579_v37  ;;  %v1906_v37 = vunpack.c.h.s8.bf16 %v866_v29  ;;  %3936 = vmatprep.subr.bf16.mxu0 %v1907_v9  ;;  %v874_v41 = vld [vmem:[#allocation7 + $0x80] sm:$0xff]  ;;  %v907_v9 = vld [vmem:[#allocation7 + $0x188] sm:$0xff] }
 0x1a0   :  { %v1979_v36 = vunpack.c.l.s8.bf16 %v907_v9 }
 0x1a1   :  { %v583_v44 = vadd.f32 %v582_v43, %v581_v42  ;;  %4591 = vmatpush1.bf16.msra.mxu1 %v1900_v32  ;;  %v876_v42 = vld [vmem:[#allocation7 + $0x90] sm:$0xff]  ;;  %v1914_v43 = vunpack.c.l.s8.bf16 %v874_v41 }
 0x1a2   :  { %4592 = vmatprep.subr.bf16.mxu1 %v1909_v33  ;;  %3937 = vmatpush1.bf16.msra.mxu0 %v1906_v37  ;;  %v909_v33 = vld [vmem:[#allocation7 + $0x198] sm:$0xff] }
 0x1a3   :  { %v585_v48 = vadd.f32 %v584_v10, %v583_v44  ;;  %v1916_v44 = vunpack.c.l.s8.bf16 %v876_v42  ;;  %3938 = vmatprep.subr.bf16.mxu0 %v1915_v39  ;;  %v885_v10 = vld [vmem:[#allocation7 + $0xd8] sm:$0xff]  ;;  %v1981_v37 = vunpack.c.l.s8.bf16 %v909_v33  ;;  %v908_v39 = vld [vmem:[#allocation7 + $0x190] sm:$0xff] }
 0x1a4   :  { %v1933_v50 = vunpack.c.l.s8.bf16 %v885_v10 }
 0x1a5   :  { %v587_v49 = vadd.f32 %v586_v5, %v585_v48  ;;  %4593 = vmatpush1.bf16.msra.mxu1 %v1908_v38  ;;  %v1922_v48 = vunpack.c.h.s8.bf16 %v874_v41  ;;  %v1924_v5 = vunpack.c.h.s8.bf16 %v876_v42  ;;  %v1978_v38 = vunpack.c.l.s8.bf16 %v906_v34 }
 0x1a6   :  { %4594 = vmatprep.subr.bf16.mxu1 %v1917_v40  ;;  %3939 = vmatpush1.bf16.msra.mxu0 %v1914_v43  ;;  %v1987_v40 = vunpack.c.h.s8.bf16 %v907_v9  ;;  %v1980_v41 = vunpack.c.l.s8.bf16 %v908_v39  ;;  %v1989_v42 = vunpack.c.h.s8.bf16 %v909_v33  ;;  %v915_v43 = vld [vmem:[#allocation7 + $0x1c8] sm:$0xff] }
 0x1a7   :  { %v589_v54 = vadd.f32 %v588_v53, %v587_v49  ;;  %3940 = vmatprep.subr.bf16.mxu0 %v1923_v45  ;;  %v1931_v49 = vunpack.c.l.s8.bf16 %v883_v47  ;;  %v1930_v53 = vunpack.c.l.s8.bf16 %v882_v51  ;;  %v1986_v45 = vunpack.c.h.s8.bf16 %v906_v34 }
 0x1a9   :  { %v591_v56 = vadd.f32 %v590_v55, %v589_v54  ;;  %4595 = vmatpush1.bf16.msra.mxu1 %v1916_v44  ;;  %v1932_v54 = vunpack.c.l.s8.bf16 %v884_v52  ;;  %v1939_v55 = vunpack.c.h.s8.bf16 %v883_v47  ;;  %v917_v44 = vld [vmem:[#allocation7 + $0x1d8] sm:$0xff]  ;;  %v1995_v47 = vunpack.c.l.s8.bf16 %v915_v43 }
 0x1aa   :  { %4596 = vmatprep.subr.bf16.mxu1 %v1925_v46  ;;  %3941 = vmatpush1.bf16.msra.mxu0 %v1922_v48  ;;  %v1988_v46 = vunpack.c.h.s8.bf16 %v908_v39  ;;  %v914_v48 = vld [vmem:[#allocation7 + $0x1c0] sm:$0xff]  ;;  %v933_v39 = vld [vmem:[#allocation7 + $0x258] sm:$0xff] }
 0x1ab   :  { %v593_v60 = vadd.f32 %v592_v59, %v591_v56  ;;  %3942 = vmatprep.subr.bf16.mxu0 %v1931_v49  ;;  %v1941_v56 = vunpack.c.h.s8.bf16 %v885_v10  ;;  %v1938_v59 = vunpack.c.h.s8.bf16 %v882_v51  ;;  %v1997_v10 = vunpack.c.l.s8.bf16 %v917_v44 }
 0x1ac   :  { %v1994_v49 = vunpack.c.l.s8.bf16 %v914_v48  ;;  %v2003_v51 = vunpack.c.h.s8.bf16 %v915_v43  ;;  %v2029_v43 = vunpack.c.l.s8.bf16 %v933_v39 }
 0x1ad   :  { %v595_v12 = vadd.f32 %v594_v61, %v593_v60  ;;  %4597 = vmatpush1.bf16.msra.mxu1 %v1924_v5  ;;  %v1940_v60 = vunpack.c.h.s8.bf16 %v884_v52  ;;  %v1947_v61 = vunpack.c.l.s8.bf16 %v891_v57  ;;  %v916_v5 = vld [vmem:[#allocation7 + $0x1d0] sm:$0xff]  ;;  %v2005_v52 = vunpack.c.h.s8.bf16 %v917_v44  ;;  %v930_v44 = vld [vmem:[#allocation7 + $0x240] sm:$0xff] }
 0x1ae   :  { %4598 = vmatprep.subr.bf16.mxu1 %v1933_v50  ;;  %3943 = vmatpush1.bf16.msra.mxu0 %v1930_v53  ;;  %v1996_v50 = vunpack.c.l.s8.bf16 %v916_v5  ;;  %v8250_v53 = vld [vmem:[#allocation7 + $0x208] sm:$0xff] }
 0x1af   :  { %v597_v0 = vadd.f32 %v596_v63, %v595_v12  ;;  %3944 = vmatprep.subr.bf16.mxu0 %v1939_v55  ;;  %v1949_v12 = vunpack.c.l.s8.bf16 %v893_v58  ;;  %v892_v63 = vld [vmem:[#allocation7 + $0x110] sm:$0xff]  ;;  %v2002_v55 = vunpack.c.h.s8.bf16 %v914_v48  ;;  %v2037_v48 = vunpack.c.h.s8.bf16 %v933_v39 }
 0x1b0   :  { %v1956_v16 = vunpack.c.h.s8.bf16 %v892_v63 }
 0x1b1   :  { %v599_v2 = vadd.f32 %v598_v1, %v597_v0  ;;  %4599 = vmatpush1.bf16.msra.mxu1 %v1932_v54  ;;  %v1946_v0 = vunpack.c.l.s8.bf16 %v890_v62  ;;  %v1948_v1 = vunpack.c.l.s8.bf16 %v892_v63  ;;  %v8252_v54 = vld [vmem:[#allocation7 + $0x218] sm:$0xff]  ;;  %v7847_v63 = vld [vmem:[#allocation6 + $0x8] sm:$0xff] }
 0x1b2   :  { %4600 = vmatprep.subr.bf16.mxu1 %v1941_v56  ;;  %3945 = vmatpush1.bf16.msra.mxu0 %v1938_v59  ;;  %v2004_v56 = vunpack.c.h.s8.bf16 %v916_v5  ;;  %v939_v5 = vld [vmem:[#allocation7 + $0x288] sm:$0xff] }
 0x1b3   :  { %v601_v13 = vadd.f32 %v600_v11, %v599_v2  ;;  %3946 = vmatprep.subr.bf16.mxu0 %v1947_v61  ;;  %v1955_v2 = vunpack.c.h.s8.bf16 %v891_v57  ;;  %v1957_v11 = vunpack.c.h.s8.bf16 %v893_v58  ;;  %v2011_v57 = vunpack.c.l.s8.bf16 %v8250_v53 }
 0x1b4   :  { %v2013_v58 = vunpack.c.l.s8.bf16 %v8252_v54 }
 0x1b5   :  { %602 = vadd.xlane.f32.xlu0 %v601_v13  ;;  %4601 = vmatpush1.bf16.msra.mxu1 %v1940_v60  ;;  %v899_v13 = vld [vmem:[#allocation7 + $0x148] sm:$0xff] }
 0x1b6   :  { %4602 = vmatprep.subr.bf16.mxu1 %v1949_v12  ;;  %3947 = vmatpush1.bf16.msra.mxu0 %v1946_v0  ;;  %v1963_v17 = vunpack.c.l.s8.bf16 %v899_v13  ;;  %v1971_v24 = vunpack.c.h.s8.bf16 %v899_v13  ;;  %v7846_v12 = vld [vmem:[#allocation6] sm:$0xff] }
 0x1b7   :  { %3948 = vmatprep.subr.bf16.mxu0 %v1955_v2 }
 0x1b9   :  { %4603 = vmatpush1.bf16.msra.mxu1 %v1948_v1  ;;  %v7848_v1 = vld [vmem:[#allocation6 + $0x10] sm:$0xff] }
 0x1ba   :  { %4604 = vmatprep.subr.bf16.mxu1 %v1957_v11  ;;  %3949 = vmatpush1.bf16.msra.mxu0 %v1954_v15  ;;  %v7849_v11 = vld [vmem:[#allocation6 + $0x18] sm:$0xff]  ;;  %v7850_v15 = vld [vmem:[#allocation6 + $0x20] sm:$0xff] }
 0x1bb   :  { %3950 = vmatprep.subr.bf16.mxu0 %v1963_v17 }
 0x1bd   :  { %4605 = vmatpush1.bf16.msra.mxu1 %v1956_v16 }
 0x1be   :  { %4606 = vmatprep.subr.bf16.mxu1 %v1965_v19  ;;  %3951 = vmatpush1.bf16.msra.mxu0 %v1962_v22 }
 0x1bf   :  { %3952 = vmatprep.subr.bf16.mxu0 %v1971_v24 }
 0x1c1   :  { %4607 = vmatpush1.bf16.msra.mxu1 %v1964_v23 }
 0x1c2   :  { %4608 = vmatprep.subr.bf16.mxu1 %v1973_v3  ;;  %3953 = vmatpush1.bf16.msra.mxu0 %v1970_v25 }
 0x1c3   :  { %3954 = vmatprep.subr.bf16.mxu0 %v1979_v36  ;;  %v2019_v36 = vunpack.c.h.s8.bf16 %v8250_v53 }
 0x1c5   :  { %4609 = vmatpush1.bf16.msra.mxu1 %v1972_v6 }
 0x1c6   :  { %4610 = vmatprep.subr.bf16.mxu1 %v1981_v37  ;;  %3955 = vmatpush1.bf16.msra.mxu0 %v1978_v38  ;;  %v2021_v37 = vunpack.c.h.s8.bf16 %v8252_v54  ;;  %v931_v38 = vld [vmem:[#allocation7 + $0x248] sm:$0xff]  ;;  %v938_v54 = vld [vmem:[#allocation7 + $0x280] sm:$0xff] }
 0x1c7   :  { %3956 = vmatprep.subr.bf16.mxu0 %v1987_v40 }
 0x1c9   :  { %4611 = vmatpush1.bf16.msra.mxu1 %v1980_v41 }
 0x1ca   :  { %4612 = vmatprep.subr.bf16.mxu1 %v1989_v42  ;;  %3957 = vmatpush1.bf16.msra.mxu0 %v1986_v45  ;;  %v2027_v42 = vunpack.c.l.s8.bf16 %v931_v38  ;;  %v932_v45 = vld [vmem:[#allocation7 + $0x250] sm:$0xff] }
 0x1cb   :  { %3958 = vmatprep.subr.bf16.mxu0 %v1995_v47  ;;  %v2028_v47 = vunpack.c.l.s8.bf16 %v932_v45 }
 0x1cd   :  { %4613 = vmatpush1.bf16.msra.mxu1 %v1988_v46  ;;  %v2026_v46 = vunpack.c.l.s8.bf16 %v930_v44 }
 0x1ce   :  { %4614 = vmatprep.subr.bf16.mxu1 %v1997_v10  ;;  %3959 = vmatpush1.bf16.msra.mxu0 %v1994_v49  ;;  %v2035_v10 = vunpack.c.h.s8.bf16 %v931_v38  ;;  %v941_v49 = vld [vmem:[#allocation7 + $0x298] sm:$0xff] }
 0x1cf   :  { %3960 = vmatprep.subr.bf16.mxu0 %v2003_v51  ;;  %v2036_v51 = vunpack.c.h.s8.bf16 %v932_v45  ;;  %v2045_v53 = vunpack.c.l.s8.bf16 %v941_v49 }
 0x1d1   :  { %4615 = vmatpush1.bf16.msra.mxu1 %v1996_v50  ;;  %v2034_v50 = vunpack.c.h.s8.bf16 %v930_v44 }
 0x1d2   :  { %4616 = vmatprep.subr.bf16.mxu1 %v2005_v52  ;;  %3961 = vmatpush1.bf16.msra.mxu0 %v2002_v55  ;;  %v2043_v52 = vunpack.c.l.s8.bf16 %v939_v5  ;;  %v940_v55 = vld [vmem:[#allocation7 + $0x290] sm:$0xff] }
 0x1d3   :  { %3971 = vmatprep.subr.bf16.mxu0 %v2011_v57  ;;  %v2042_v57 = vunpack.c.l.s8.bf16 %v938_v54 }
 0x1d5   :  { %4617 = vmatpush1.bf16.msra.mxu1 %v2004_v56 }
 0x1d6   :  { %4627 = vmatprep.subr.bf16.mxu1 %v2013_v58  ;;  %v2044_v58 = vunpack.c.l.s8.bf16 %v940_v55 }
 0x242   :  { %v603_v26 = vpop.xlane.xlu0 %602 }
 0x243   :  { %v604_v27 = vrot.slane %v603_v26, 4 }
 0x245   :  { %v605_v28 = vadd.f32 %v604_v27, %v603_v26  ;;  %v922_v26 = vld [vmem:[#allocation7 + $0x200] sm:$0xff]  ;;  %v924_v27 = vld [vmem:[#allocation7 + $0x210] sm:$0xff] }
 0x246   :  { %v2018_v40 = vunpack.c.h.s8.bf16 %v922_v26  ;;  %v2020_v41 = vunpack.c.h.s8.bf16 %v924_v27 }
 0x247   :  { %v606_v29 = vrot.slane %v605_v28, 2 }
 0x249   :  { %v607_v30 = vadd.f32 %v606_v29, %v605_v28 }
 0x24b   :  { %v608_v31 = vrot.slane %v607_v30, 1 }
 0x24d   :  { %v609_v32 = vadd.f32 %v608_v31, %v607_v30  ;;  %v2010_v31 = vunpack.c.l.s8.bf16 %v922_v26  ;;  %v954_v26 = vld [vmem:[#allocation7 + $0x300] sm:$0xff] }
 0x24e   :  { %v2082_v38 = vunpack.c.h.s8.bf16 %v954_v26 }
 0x24f   :  { %7758 = vpush %v609_v32  ;;  %v2012_v32 = vunpack.c.l.s8.bf16 %v924_v27  ;;  %v956_v27 = vld [vmem:[#allocation7 + $0x310] sm:$0xff] }
 0x250   :  { %v2084_v39 = vunpack.c.h.s8.bf16 %v956_v27 }
 0x280   :  { %s7759_s30 = spop %7758 }
 0x281   :  { %s611_s7 = smul.f32 0.00012207031, %s7759_s30 }
 0x283   :  { %s612_s9 = smax.f32 %s7989_s8, %s611_s7 }
 0x284   :  { %s614_s10 = smul.f32 %s613_s0, %s612_s9 }
 0x286   :  { %s615_s11 = sadd.f32 1e-05, %s614_s10 }
 0x288   :  { %v616_v59 = vstv %s615_s11 }
 0x289   :  { %7844 = vrsqrt.f32 %v616_v59  ;;  %v2051_v59 = vunpack.c.h.s8.bf16 %v939_v5 }
 0x293   :  { %v7845_v60 = vpop.eup %7844 }
 0x294   :  { %7760 = vpush %v7845_v60  ;;  %v2053_v60 = vunpack.c.h.s8.bf16 %v941_v49 }
 0x2c5   :  { %s7761_s14 = spop %7760 }
 0x2c6   :  { %s619_s15 = smul.f32 %s7761_s14, %s7362_s12 }
 0x2c8   :  { %s620_s1 = smul.f32 %s619_s15, %s93_s29 }
 0x2c9   :  { %s622_s17 = smul.f32 %s621_s16, %s619_s15 }
 0x2ca   :  { %v8258_v61 = vstv %s620_s1 }
 0x2cb   :  { %s623_s18 = ssub.f32 %s7363_s13, %s622_s17  ;;  %v625_v62 = vmul.f32 %v7846_v12, %v8258_v61  ;;  %v626_v0 = vmul.f32 %v7847_v63, %v8258_v61  ;;  %v627_v2 = vmul.f32 %v7848_v1, %v8258_v61  ;;  %v628_v13 = vmul.f32 %v7849_v11, %v8258_v61  ;;  %v949_v63 = vld [vmem:[#allocation7 + $0x2d8] sm:$0xff]  ;;  %v948_v11 = vld [vmem:[#allocation7 + $0x2d0] sm:$0xff] }
 0x2cc   :  { %v629_v16 = vmul.f32 %v7850_v15, %v8258_v61  ;;  %v630_v17 = vmul.f32 %v8258_v61, %v8146_v7  ;;  %v631_v19 = vmul.f32 %v8258_v61, %v8152_v18  ;;  %v632_v56 = vmul.f32 %v8258_v61, %v8164_v35 }
 0x2cd   :  { %v8264_v14 = vstv %s623_s18  ;;  %v2052_v1 = vunpack.c.h.s8.bf16 %v940_v55  ;;  %v2061_v61 = vunpack.c.l.s8.bf16 %v949_v63  ;;  %v2060_v15 = vunpack.c.l.s8.bf16 %v948_v11 }
 0x2ce   :  { %v634_v20 = vadd.f32 %v8264_v14, %v625_v62  ;;  %v8273_v21 = vadd.f32 %v8264_v14, %v626_v0  ;;  %v8276_v22 = vadd.f32 %v8264_v14, %v627_v2  ;;  %v8279_v23 = vadd.f32 %v8264_v14, %v628_v13  ;;  %v947_v62 = vld [vmem:[#allocation7 + $0x2c8] sm:$0xff]  ;;  %v946_v2 = vld [vmem:[#allocation7 + $0x2c0] sm:$0xff] }
 0x2cf   :  { %v8282_v24 = vadd.f32 %v8264_v14, %v629_v16  ;;  %v8285_v3 = vadd.f32 %v8264_v14, %v630_v17  ;;  %v8288_v7 = vadd.f32 %v8264_v14, %v631_v19  ;;  %v8313_v12 = vadd.f32 %v8264_v14, %v632_v56  ;;  %v955_v17 = vld [vmem:[#allocation7 + $0x308] sm:$0xff]  ;;  %v957_v19 = vld [vmem:[#allocation7 + $0x318] sm:$0xff] }
 0x2d0   :  { %v642_v18 = vmax.f32 %v634_v20, 0.0  ;;  %v2050_v0 = vunpack.c.h.s8.bf16 %v938_v54  ;;  %v2059_v35 = vunpack.c.l.s8.bf16 %v947_v62  ;;  %v2058_v13 = vunpack.c.l.s8.bf16 %v946_v2 }
 0x2d1   :  { %v2067_v14 = vunpack.c.h.s8.bf16 %v947_v62  ;;  %v2069_v16 = vunpack.c.h.s8.bf16 %v949_v63  ;;  %v2066_v20 = vunpack.c.h.s8.bf16 %v946_v2 }
 0x2d2   :  { %v665_v25 = vrot.slane %v642_v18, %v8095_v8  ;;  %v658_v6 = vcombine.high %v642_v18, %v642_v18  ;;  %v2068_v18 = vunpack.c.h.s8.bf16 %v948_v11 }
 0x2d4   :  { %v673_v28 = vcombine.high %v665_v25, %v665_v25  ;;  %v8292_v29 = vrot.slane %v658_v6, %v8095_v8  ;;  %v8298_v33 = vpack.c.bf16 %v665_v25, %v665_v25  ;;  %v2075_v25 = vunpack.c.l.s8.bf16 %v955_v17 }
 0x2d5   :  { %v2077_v6 = vunpack.c.l.s8.bf16 %v957_v19 }
 0x2d6   :  { %v8294_v30 = vpack.c.bf16 %v673_v28, %v673_v28  ;;  %v674_v9 = vcombine.high %v8292_v29, %v8292_v29  ;;  %v2074_v28 = vunpack.c.l.s8.bf16 %v954_v26  ;;  %v988_v26 = vld [vmem:[#allocation7 + $0x410] sm:$0xff] }
 0x2d8   :  { %3962 = vmatprep.mubr.bf16.mxu0 %v8294_v30  ;;  %4618 = vmatprep.mubr.bf16.mxu1 %v8294_v30  ;;  %v8302_v34 = vpack.c.bf16 %v674_v9, %v674_v9  ;;  %v2085_v9 = vunpack.c.h.s8.bf16 %v957_v19 }
 0x2d9   :  { %3963 = vmatmul.mubr.bf16.vlgmr.msra.gmra.mrb[0].mxu0 %v8298_v33  ;;  %4619 = vmatmul.mubr.bf16.vlgmr.msra.gmra.mrb[0].mxu1 %v8298_v33 }
 0x2da   :  { %3972 = vmatpush1.bf16.msra.mxu0 %v2010_v31  ;;  %4628 = vmatpush1.bf16.msra.mxu1 %v2012_v32  ;;  %v2076_v31 = vunpack.c.l.s8.bf16 %v956_v27  ;;  %v2083_v32 = vunpack.c.h.s8.bf16 %v955_v17 }
 0x2db   :  { %4003 = vmatprep.mubr.bf16.mxu0 %v8302_v34  ;;  %4659 = vmatprep.mubr.bf16.mxu1 %v8302_v34 }
 0x2dc   :  { %3973 = vmatprep.subr.bf16.mxu0 %v2019_v36  ;;  %4629 = vmatprep.subr.bf16.mxu1 %v2021_v37  ;;  %v963_v36 = vld [vmem:[#allocation7 + $0x348] sm:$0xff]  ;;  %v965_v37 = vld [vmem:[#allocation7 + $0x358] sm:$0xff] }
 0x2de   :  { %3974 = vmatpush1.bf16.msra.mxu0 %v2018_v40  ;;  %4630 = vmatpush1.bf16.msra.mxu1 %v2020_v41  ;;  %v2091_v40 = vunpack.c.l.s8.bf16 %v963_v36  ;;  %v2093_v41 = vunpack.c.l.s8.bf16 %v965_v37 }
 0x2df   :  { %3975 = vmatprep.subr.bf16.mxu0 %v2027_v42  ;;  %4631 = vmatprep.subr.bf16.mxu1 %v2029_v43  ;;  %v962_v42 = vld [vmem:[#allocation7 + $0x340] sm:$0xff]  ;;  %v964_v43 = vld [vmem:[#allocation7 + $0x350] sm:$0xff] }
 0x2e0   :  { %v2090_v44 = vunpack.c.l.s8.bf16 %v962_v42  ;;  %v2092_v45 = vunpack.c.l.s8.bf16 %v964_v43  ;;  %v2098_v5 = vunpack.c.h.s8.bf16 %v962_v42  ;;  %v2100_v49 = vunpack.c.h.s8.bf16 %v964_v43  ;;  %v996_v43 = vld [vmem:[#allocation7 + $0x450] sm:$0xff] }
 0x2e2   :  { %3976 = vmatpush1.bf16.msra.mxu0 %v2026_v46  ;;  %4632 = vmatpush1.bf16.msra.mxu1 %v2028_v47  ;;  %v2099_v46 = vunpack.c.h.s8.bf16 %v963_v36  ;;  %v2101_v47 = vunpack.c.h.s8.bf16 %v965_v37  ;;  %v995_v37 = vld [vmem:[#allocation7 + $0x448] sm:$0xff] }
 0x2e3   :  { %3977 = vmatprep.subr.bf16.mxu0 %v2035_v10  ;;  %4633 = vmatprep.subr.bf16.mxu1 %v2037_v48  ;;  %v971_v10 = vld [vmem:[#allocation7 + $0x388] sm:$0xff]  ;;  %v973_v48 = vld [vmem:[#allocation7 + $0x398] sm:$0xff] }
 0x2e4   :  { %v2115_v56 = vunpack.c.h.s8.bf16 %v971_v10 }
 0x2e6   :  { %3978 = vmatpush1.bf16.msra.mxu0 %v2034_v50  ;;  %4634 = vmatpush1.bf16.msra.mxu1 %v2036_v51  ;;  %v2107_v50 = vunpack.c.l.s8.bf16 %v971_v10  ;;  %v2109_v51 = vunpack.c.l.s8.bf16 %v973_v48  ;;  %v1003_v10 = vld [vmem:[#allocation7 + $0x488] sm:$0xff] }
 0x2e7   :  { %3979 = vmatprep.subr.bf16.mxu0 %v2043_v52  ;;  %4635 = vmatprep.subr.bf16.mxu1 %v2045_v53  ;;  %v970_v52 = vld [vmem:[#allocation7 + $0x380] sm:$0xff]  ;;  %v972_v53 = vld [vmem:[#allocation7 + $0x390] sm:$0xff] }
 0x2e8   :  { %v2106_v54 = vunpack.c.l.s8.bf16 %v970_v52  ;;  %v2108_v55 = vunpack.c.l.s8.bf16 %v972_v53  ;;  %v2116_v62 = vunpack.c.h.s8.bf16 %v972_v53  ;;  %v1004_v53 = vld [vmem:[#allocation7 + $0x490] sm:$0xff] }
 0x2ea   :  { %3980 = vmatpush1.bf16.msra.mxu0 %v2042_v57  ;;  %4636 = vmatpush1.bf16.msra.mxu1 %v2044_v58  ;;  %v2117_v57 = vunpack.c.h.s8.bf16 %v973_v48  ;;  %v979_v58 = vld [vmem:[#allocation7 + $0x3c8] sm:$0xff]  ;;  %v1005_v48 = vld [vmem:[#allocation7 + $0x498] sm:$0xff] }
 0x2eb   :  { %3981 = vmatprep.subr.bf16.mxu0 %v2051_v59  ;;  %4637 = vmatprep.subr.bf16.mxu1 %v2053_v60  ;;  %v981_v59 = vld [vmem:[#allocation7 + $0x3d8] sm:$0xff]  ;;  %v2114_v60 = vunpack.c.h.s8.bf16 %v970_v52  ;;  %v2123_v63 = vunpack.c.l.s8.bf16 %v979_v58  ;;  %v2173_v52 = vunpack.c.l.s8.bf16 %v1005_v48 }
 0x2ee   :  { %3982 = vmatpush1.bf16.msra.mxu0 %v2050_v0  ;;  %4638 = vmatpush1.bf16.msra.mxu1 %v2052_v1  ;;  %v2125_v0 = vunpack.c.l.s8.bf16 %v981_v59  ;;  %v978_v1 = vld [vmem:[#allocation7 + $0x3c0] sm:$0xff] }
 0x2ef   :  { %3983 = vmatprep.subr.bf16.mxu0 %v2059_v35  ;;  %4639 = vmatprep.subr.bf16.mxu1 %v2061_v61  ;;  %v980_v35 = vld [vmem:[#allocation7 + $0x3d0] sm:$0xff]  ;;  %v8316_v61 = vmax.f32 %v8273_v21, 0.0  ;;  %v2122_v2 = vunpack.c.l.s8.bf16 %v978_v1  ;;  %v2130_v19 = vunpack.c.h.s8.bf16 %v978_v1 }
 0x2f0   :  { %v2124_v11 = vunpack.c.l.s8.bf16 %v980_v35 }
 0x2f1   :  { %v8320_v17 = vrot.slane %v8316_v61, %v8095_v8 }
 0x2f2   :  { %3984 = vmatpush1.bf16.msra.mxu0 %v2058_v13  ;;  %4640 = vmatpush1.bf16.msra.mxu1 %v2060_v15  ;;  %v2131_v13 = vunpack.c.h.s8.bf16 %v979_v58  ;;  %v2133_v15 = vunpack.c.h.s8.bf16 %v981_v59  ;;  %v1011_v58 = vld [vmem:[#allocation7 + $0x4c8] sm:$0xff]  ;;  %v1013_v59 = vld [vmem:[#allocation7 + $0x4d8] sm:$0xff] }
 0x2f3   :  { %3985 = vmatprep.subr.bf16.mxu0 %v2067_v14  ;;  %4641 = vmatprep.subr.bf16.mxu1 %v2069_v16  ;;  %v987_v14 = vld [vmem:[#allocation7 + $0x408] sm:$0xff]  ;;  %v989_v16 = vld [vmem:[#allocation7 + $0x418] sm:$0xff]  ;;  %v2189_v1 = vunpack.c.l.s8.bf16 %v1013_v59 }
 0x2f4   :  { %v2139_v21 = vunpack.c.l.s8.bf16 %v987_v14  ;;  %v2149_v36 = vunpack.c.h.s8.bf16 %v989_v16 }
 0x2f6   :  { %3986 = vmatpush1.bf16.msra.mxu0 %v2066_v20  ;;  %4642 = vmatpush1.bf16.msra.mxu1 %v2068_v18  ;;  %v2132_v20 = vunpack.c.h.s8.bf16 %v980_v35  ;;  %v2141_v18 = vunpack.c.l.s8.bf16 %v989_v16  ;;  %v1012_v35 = vld [vmem:[#allocation7 + $0x4d0] sm:$0xff]  ;;  %v1021_v16 = vld [vmem:[#allocation7 + $0x518] sm:$0xff] }
 0x2f7   :  { %3987 = vmatprep.subr.bf16.mxu0 %v2075_v25  ;;  %4643 = vmatprep.subr.bf16.mxu1 %v2077_v6  ;;  %v986_v25 = vld [vmem:[#allocation7 + $0x400] sm:$0xff]  ;;  %v690_v6 = vcombine.high %v8320_v17, %v8320_v17 }
 0x2f8   :  { %v2138_v27 = vunpack.c.l.s8.bf16 %v986_v25 }
 0x2fa   :  { %3988 = vmatpush1.bf16.msra.mxu0 %v2074_v28  ;;  %4644 = vmatpush1.bf16.msra.mxu1 %v2076_v31  ;;  %v8326_v28 = vpack.c.bf16 %v8292_v29, %v8292_v29  ;;  %v2140_v31 = vunpack.c.l.s8.bf16 %v988_v26  ;;  %v2148_v29 = vunpack.c.h.s8.bf16 %v988_v26 }
 0x2fb   :  { %3989 = vmatprep.subr.bf16.mxu0 %v2083_v32  ;;  %4645 = vmatprep.subr.bf16.mxu1 %v2085_v9  ;;  %v8328_v32 = vpack.c.bf16 %v690_v6, %v690_v6  ;;  %v2147_v9 = vunpack.c.h.s8.bf16 %v987_v14  ;;  %v1019_v14 = vld [vmem:[#allocation7 + $0x508] sm:$0xff]  ;;  %v1020_v6 = vld [vmem:[#allocation7 + $0x510] sm:$0xff] }
 0x2fe   :  { %3990 = vmatpush1.bf16.msra.mxu0 %v2082_v38  ;;  %4646 = vmatpush1.bf16.msra.mxu1 %v2084_v39  ;;  %v997_v38 = vld [vmem:[#allocation7 + $0x458] sm:$0xff]  ;;  %v2146_v39 = vunpack.c.h.s8.bf16 %v986_v25  ;;  %v2205_v25 = vunpack.c.l.s8.bf16 %v1021_v16 }
 0x2ff   :  { %3991 = vmatprep.subr.bf16.mxu0 %v2091_v40  ;;  %4647 = vmatprep.subr.bf16.mxu1 %v2093_v41  ;;  %v2155_v40 = vunpack.c.l.s8.bf16 %v995_v37  ;;  %v994_v41 = vld [vmem:[#allocation7 + $0x440] sm:$0xff]  ;;  %v2157_v42 = vunpack.c.l.s8.bf16 %v997_v38 }
 0x302   :  { %3992 = vmatpush1.bf16.msra.mxu0 %v2090_v44  ;;  %4648 = vmatpush1.bf16.msra.mxu1 %v2092_v45  ;;  %v2154_v44 = vunpack.c.l.s8.bf16 %v994_v41  ;;  %v2156_v45 = vunpack.c.l.s8.bf16 %v996_v43 }
 0x303   :  { %3993 = vmatprep.subr.bf16.mxu0 %v2099_v46  ;;  %4649 = vmatprep.subr.bf16.mxu1 %v2101_v47  ;;  %v2163_v46 = vunpack.c.h.s8.bf16 %v995_v37  ;;  %v2165_v47 = vunpack.c.h.s8.bf16 %v997_v38  ;;  %v1029_v37 = vld [vmem:[#allocation7 + $0x558] sm:$0xff] }
 0x306   :  { %3994 = vmatpush1.bf16.msra.mxu0 %v2098_v5  ;;  %4650 = vmatpush1.bf16.msra.mxu1 %v2100_v49  ;;  %v2162_v5 = vunpack.c.h.s8.bf16 %v994_v41  ;;  %v2164_v49 = vunpack.c.h.s8.bf16 %v996_v43  ;;  %v2221_v41 = vunpack.c.l.s8.bf16 %v1029_v37 }
 0x307   :  { %3995 = vmatprep.subr.bf16.mxu0 %v2107_v50  ;;  %4651 = vmatprep.subr.bf16.mxu1 %v2109_v51  ;;  %v2171_v50 = vunpack.c.l.s8.bf16 %v1003_v10  ;;  %v1002_v51 = vld [vmem:[#allocation7 + $0x480] sm:$0xff] }
 0x30a   :  { %3996 = vmatpush1.bf16.msra.mxu0 %v2106_v54  ;;  %4652 = vmatpush1.bf16.msra.mxu1 %v2108_v55  ;;  %v2170_v54 = vunpack.c.l.s8.bf16 %v1002_v51  ;;  %v2172_v55 = vunpack.c.l.s8.bf16 %v1004_v53 }
 0x30b   :  { %3997 = vmatprep.subr.bf16.mxu0 %v2115_v56  ;;  %4653 = vmatprep.subr.bf16.mxu1 %v2117_v57  ;;  %v2179_v56 = vunpack.c.h.s8.bf16 %v1003_v10  ;;  %v2181_v57 = vunpack.c.h.s8.bf16 %v1005_v48  ;;  %v1037_v10 = vld [vmem:[#allocation7 + $0x598] sm:$0xff] }
 0x30e   :  { %3998 = vmatpush1.bf16.msra.mxu0 %v2114_v60  ;;  %4654 = vmatpush1.bf16.msra.mxu1 %v2116_v62  ;;  %v2178_v60 = vunpack.c.h.s8.bf16 %v1002_v51  ;;  %v2180_v62 = vunpack.c.h.s8.bf16 %v1004_v53  ;;  %v2237_v51 = vunpack.c.l.s8.bf16 %v1037_v10 }
 0x30f   :  { %3999 = vmatprep.subr.bf16.mxu0 %v2123_v63  ;;  %4655 = vmatprep.subr.bf16.mxu1 %v2125_v0  ;;  %v2187_v63 = vunpack.c.l.s8.bf16 %v1011_v58  ;;  %v1010_v0 = vld [vmem:[#allocation7 + $0x4c0] sm:$0xff] }
 0x312   :  { %4000 = vmatpush1.bf16.msra.mxu0 %v2122_v2  ;;  %4656 = vmatpush1.bf16.msra.mxu1 %v2124_v11  ;;  %v2186_v2 = vunpack.c.l.s8.bf16 %v1010_v0  ;;  %v2188_v11 = vunpack.c.l.s8.bf16 %v1012_v35 }
 0x313   :  { %4001 = vmatprep.subr.bf16.mxu0 %v2131_v13  ;;  %4657 = vmatprep.subr.bf16.mxu1 %v2133_v15  ;;  %v2195_v13 = vunpack.c.h.s8.bf16 %v1011_v58  ;;  %v2197_v15 = vunpack.c.h.s8.bf16 %v1013_v59  ;;  %v1045_v58 = vld [vmem:[#allocation7 + $0x5d8] sm:$0xff] }
 0x316   :  { %4002 = vmatpush1.bf16.msra.mxu0 %v2130_v19  ;;  %4658 = vmatpush1.bf16.msra.mxu1 %v2132_v20  ;;  %v2194_v19 = vunpack.c.h.s8.bf16 %v1010_v0  ;;  %v2196_v20 = vunpack.c.h.s8.bf16 %v1012_v35  ;;  %v2253_v0 = vunpack.c.l.s8.bf16 %v1045_v58  ;;  %v675_v35 = vcombine.high %v8316_v61, %v8316_v61  ;;  %v1050_v61 = vld [vmem:[#allocation7 + $0x600] sm:$0xff] }
 0x317   :  { %4012 = vmatprep.subr.bf16.mxu0 %v2139_v21  ;;  %4668 = vmatprep.subr.bf16.mxu1 %v2141_v18  ;;  %v2203_v21 = vunpack.c.l.s8.bf16 %v1019_v14  ;;  %v1018_v18 = vld [vmem:[#allocation7 + $0x500] sm:$0xff] }
 0x318   :  { %v2202_v26 = vunpack.c.l.s8.bf16 %v1018_v18  ;;  %v2210_v38 = vunpack.c.h.s8.bf16 %v1018_v18 }
 0x319   :  { %4004 = vmatmul.mubr.bf16.vlgmr.msra.gmra.mrb[0].mxu0 %v8326_v28  ;;  %4660 = vmatmul.mubr.bf16.vlgmr.msra.gmra.mrb[0].mxu1 %v8326_v28 }
 0x31a   :  { %4013 = vmatpush1.bf16.msra.mxu0 %v2138_v27  ;;  %4044 = vmatprep.mubr.bf16.mxu0 %v8328_v32  ;;  %v2204_v27 = vunpack.c.l.s8.bf16 %v1020_v6 }
 0x31b   :  { %4669 = vmatpush1.bf16.msra.mxu1 %v2140_v31  ;;  %4700 = vmatprep.mubr.bf16.mxu1 %v8328_v32  ;;  %v2211_v31 = vunpack.c.h.s8.bf16 %v1019_v14  ;;  %v1051_v14 = vld [vmem:[#allocation7 + $0x608] sm:$0xff] }
 0x31c   :  { %4014 = vmatprep.subr.bf16.mxu0 %v2147_v9  ;;  %4670 = vmatprep.subr.bf16.mxu1 %v2149_v36  ;;  %v2213_v9 = vunpack.c.h.s8.bf16 %v1021_v16  ;;  %v1027_v36 = vld [vmem:[#allocation7 + $0x548] sm:$0xff]  ;;  %v1053_v16 = vld [vmem:[#allocation7 + $0x618] sm:$0xff]  ;;  %v2267_v18 = vunpack.c.l.s8.bf16 %v1051_v14 }
 0x31e   :  { %4015 = vmatpush1.bf16.msra.mxu0 %v2146_v39  ;;  %v2212_v39 = vunpack.c.h.s8.bf16 %v1020_v6  ;;  %v1052_v6 = vld [vmem:[#allocation7 + $0x610] sm:$0xff] }
 0x31f   :  { %4671 = vmatpush1.bf16.msra.mxu1 %v2148_v29  ;;  %4016 = vmatprep.subr.bf16.mxu0 %v2155_v40  ;;  %v2219_v29 = vunpack.c.l.s8.bf16 %v1027_v36  ;;  %v1026_v40 = vld [vmem:[#allocation7 + $0x540] sm:$0xff] }
 0x320   :  { %4672 = vmatprep.subr.bf16.mxu1 %v2157_v42  ;;  %v1028_v42 = vld [vmem:[#allocation7 + $0x550] sm:$0xff]  ;;  %v2218_v43 = vunpack.c.l.s8.bf16 %v1026_v40  ;;  %v2226_v48 = vunpack.c.h.s8.bf16 %v1026_v40  ;;  %v2274_v40 = vunpack.c.h.s8.bf16 %v1050_v61 }
 0x322   :  { %4017 = vmatpush1.bf16.msra.mxu0 %v2154_v44  ;;  %v2220_v44 = vunpack.c.l.s8.bf16 %v1028_v42 }
 0x323   :  { %4673 = vmatpush1.bf16.msra.mxu1 %v2156_v45  ;;  %4018 = vmatprep.subr.bf16.mxu0 %v2163_v46  ;;  %v2227_v45 = vunpack.c.h.s8.bf16 %v1027_v36  ;;  %v2229_v46 = vunpack.c.h.s8.bf16 %v1029_v37  ;;  %v2275_v36 = vunpack.c.h.s8.bf16 %v1051_v14  ;;  %v1059_v37 = vld [vmem:[#allocation7 + $0x648] sm:$0xff] }
 0x324   :  { %4674 = vmatprep.subr.bf16.mxu1 %v2165_v47  ;;  %v1035_v47 = vld [vmem:[#allocation7 + $0x588] sm:$0xff] }
 0x326   :  { %4019 = vmatpush1.bf16.msra.mxu0 %v2162_v5  ;;  %v2228_v5 = vunpack.c.h.s8.bf16 %v1028_v42  ;;  %v1058_v42 = vld [vmem:[#allocation7 + $0x640] sm:$0xff] }
 0x327   :  { %4675 = vmatpush1.bf16.msra.mxu1 %v2164_v49  ;;  %4020 = vmatprep.subr.bf16.mxu0 %v2171_v50  ;;  %v2235_v49 = vunpack.c.l.s8.bf16 %v1035_v47  ;;  %v1034_v50 = vld [vmem:[#allocation7 + $0x580] sm:$0xff] }
 0x328   :  { %4676 = vmatprep.subr.bf16.mxu1 %v2173_v52  ;;  %v1036_v52 = vld [vmem:[#allocation7 + $0x590] sm:$0xff]  ;;  %v2234_v53 = vunpack.c.l.s8.bf16 %v1034_v50  ;;  %v2242_v59 = vunpack.c.h.s8.bf16 %v1034_v50 }
 0x32a   :  { %4021 = vmatpush1.bf16.msra.mxu0 %v2170_v54  ;;  %v2236_v54 = vunpack.c.l.s8.bf16 %v1036_v52 }
 0x32b   :  { %4677 = vmatpush1.bf16.msra.mxu1 %v2172_v55  ;;  %4022 = vmatprep.subr.bf16.mxu0 %v2179_v56  ;;  %v2243_v55 = vunpack.c.h.s8.bf16 %v1035_v47  ;;  %v2245_v56 = vunpack.c.h.s8.bf16 %v1037_v10  ;;  %v2291_v47 = vunpack.c.h.s8.bf16 %v1059_v37 }
 0x32c   :  { %4678 = vmatprep.subr.bf16.mxu1 %v2181_v57  ;;  %v1043_v57 = vld [vmem:[#allocation7 + $0x5c8] sm:$0xff] }
 0x32e   :  { %4023 = vmatpush1.bf16.msra.mxu0 %v2178_v60  ;;  %v2244_v60 = vunpack.c.h.s8.bf16 %v1036_v52  ;;  %v1066_v52 = vld [vmem:[#allocation7 + $0x680] sm:$0xff] }
 0x32f   :  { %4679 = vmatpush1.bf16.msra.mxu1 %v2180_v62  ;;  %4024 = vmatprep.subr.bf16.mxu0 %v2187_v63  ;;  %v2251_v62 = vunpack.c.l.s8.bf16 %v1043_v57  ;;  %v1042_v63 = vld [vmem:[#allocation7 + $0x5c0] sm:$0xff] }
 0x330   :  { %4680 = vmatprep.subr.bf16.mxu1 %v2189_v1  ;;  %v1044_v1 = vld [vmem:[#allocation7 + $0x5d0] sm:$0xff] }
 0x332   :  { %4025 = vmatpush1.bf16.msra.mxu0 %v2186_v2  ;;  %v2250_v2 = vunpack.c.l.s8.bf16 %v1042_v63 }
 0x333   :  { %4681 = vmatpush1.bf16.msra.mxu1 %v2188_v11  ;;  %4026 = vmatprep.subr.bf16.mxu0 %v2195_v13  ;;  %v2252_v11 = vunpack.c.l.s8.bf16 %v1044_v1  ;;  %v2259_v13 = vunpack.c.h.s8.bf16 %v1043_v57 }
 0x334   :  { %4682 = vmatprep.subr.bf16.mxu1 %v2197_v15  ;;  %v2261_v15 = vunpack.c.h.s8.bf16 %v1045_v58 }
 0x336   :  { %4027 = vmatpush1.bf16.msra.mxu0 %v2194_v19  ;;  %v8337_v19 = vrot.slane %v675_v35, %v8095_v8 }
 0x337   :  { %4683 = vmatpush1.bf16.msra.mxu1 %v2196_v20  ;;  %4028 = vmatprep.subr.bf16.mxu0 %v2203_v21  ;;  %v2258_v20 = vunpack.c.h.s8.bf16 %v1042_v63  ;;  %v2260_v21 = vunpack.c.h.s8.bf16 %v1044_v1  ;;  %v1074_v1 = vld [vmem:[#allocation7 + $0x6c0] sm:$0xff] }
 0x338   :  { %4684 = vmatprep.subr.bf16.mxu1 %v2205_v25  ;;  %v2269_v25 = vunpack.c.l.s8.bf16 %v1053_v16 }
 0x33a   :  { %4029 = vmatpush1.bf16.msra.mxu0 %v2202_v26  ;;  %v691_v26 = vcombine.high %v8337_v19, %v8337_v19 }
 0x33b   :  { %4685 = vmatpush1.bf16.msra.mxu1 %v2204_v27  ;;  %4030 = vmatprep.subr.bf16.mxu0 %v2211_v31  ;;  %v2266_v27 = vunpack.c.l.s8.bf16 %v1050_v61  ;;  %v8343_v31 = vpack.c.bf16 %v8320_v17, %v8320_v17  ;;  %v2276_v17 = vunpack.c.h.s8.bf16 %v1052_v6 }
 0x33c   :  { %4686 = vmatprep.subr.bf16.mxu1 %v2213_v9  ;;  %v2268_v9 = vunpack.c.l.s8.bf16 %v1052_v6 }
 0x33e   :  { %4031 = vmatpush1.bf16.msra.mxu0 %v2210_v38  ;;  %v8346_v38 = vpack.c.bf16 %v691_v26, %v691_v26  ;;  %v1084_v26 = vld [vmem:[#allocation7 + $0x710] sm:$0xff] }
 0x33f   :  { %4687 = vmatpush1.bf16.msra.mxu1 %v2212_v39  ;;  %4032 = vmatprep.subr.bf16.mxu0 %v2219_v29  ;;  %v2277_v39 = vunpack.c.h.s8.bf16 %v1053_v16  ;;  %v1061_v29 = vld [vmem:[#allocation7 + $0x658] sm:$0xff]  ;;  %v1083_v16 = vld [vmem:[#allocation7 + $0x708] sm:$0xff] }
 0x340   :  { %4688 = vmatprep.subr.bf16.mxu1 %v2221_v41  ;;  %v2283_v41 = vunpack.c.l.s8.bf16 %v1059_v37  ;;  %v2293_v10 = vunpack.c.h.s8.bf16 %v1061_v29  ;;  %v2331_v61 = vunpack.c.l.s8.bf16 %v1083_v16 }
 0x342   :  { %4033 = vmatpush1.bf16.msra.mxu0 %v2218_v43  ;;  %v2285_v43 = vunpack.c.l.s8.bf16 %v1061_v29  ;;  %v1093_v29 = vld [vmem:[#allocation7 + $0x758] sm:$0xff] }
 0x343   :  { %4689 = vmatpush1.bf16.msra.mxu1 %v2220_v44  ;;  %4034 = vmatprep.subr.bf16.mxu0 %v2227_v45  ;;  %v1060_v44 = vld [vmem:[#allocation7 + $0x650] sm:$0xff]  ;;  %v2282_v45 = vunpack.c.l.s8.bf16 %v1058_v42 }
 0x344   :  { %4690 = vmatprep.subr.bf16.mxu1 %v2229_v46  ;;  %v2284_v46 = vunpack.c.l.s8.bf16 %v1060_v44  ;;  %v2292_v50 = vunpack.c.h.s8.bf16 %v1060_v44  ;;  %v1092_v44 = vld [vmem:[#allocation7 + $0x750] sm:$0xff] }
 0x346   :  { %4035 = vmatpush1.bf16.msra.mxu0 %v2226_v48  ;;  %v1067_v48 = vld [vmem:[#allocation7 + $0x688] sm:$0xff] }
 0x347   :  { %4691 = vmatpush1.bf16.msra.mxu1 %v2228_v5  ;;  %4036 = vmatprep.subr.bf16.mxu0 %v2235_v49  ;;  %v1069_v5 = vld [vmem:[#allocation7 + $0x698] sm:$0xff]  ;;  %v2290_v49 = vunpack.c.h.s8.bf16 %v1058_v42  ;;  %v2307_v57 = vunpack.c.h.s8.bf16 %v1067_v48  ;;  %v1090_v42 = vld [vmem:[#allocation7 + $0x740] sm:$0xff] }
 0x348   :  { %4692 = vmatprep.subr.bf16.mxu1 %v2237_v51  ;;  %v2299_v51 = vunpack.c.l.s8.bf16 %v1067_v48  ;;  %v2309_v58 = vunpack.c.h.s8.bf16 %v1069_v5  ;;  %v1099_v48 = vld [vmem:[#allocation7 + $0x788] sm:$0xff] }
 0x34a   :  { %4037 = vmatpush1.bf16.msra.mxu0 %v2234_v53  ;;  %v2301_v53 = vunpack.c.l.s8.bf16 %v1069_v5  ;;  %v1101_v5 = vld [vmem:[#allocation7 + $0x798] sm:$0xff] }
 0x34b   :  { %4693 = vmatpush1.bf16.msra.mxu1 %v2236_v54  ;;  %4038 = vmatprep.subr.bf16.mxu0 %v2243_v55  ;;  %v1068_v54 = vld [vmem:[#allocation7 + $0x690] sm:$0xff]  ;;  %v2298_v55 = vunpack.c.l.s8.bf16 %v1066_v52 }
 0x34c   :  { %4694 = vmatprep.subr.bf16.mxu1 %v2245_v56  ;;  %v2300_v56 = vunpack.c.l.s8.bf16 %v1068_v54  ;;  %v2308_v63 = vunpack.c.h.s8.bf16 %v1068_v54  ;;  %v1100_v54 = vld [vmem:[#allocation7 + $0x790] sm:$0xff] }
 0x34e   :  { %4039 = vmatpush1.bf16.msra.mxu0 %v2242_v59  ;;  %v1075_v59 = vld [vmem:[#allocation7 + $0x6c8] sm:$0xff] }
 0x34f   :  { %4695 = vmatpush1.bf16.msra.mxu1 %v2244_v60  ;;  %4040 = vmatprep.subr.bf16.mxu0 %v2251_v62  ;;  %v1077_v60 = vld [vmem:[#allocation7 + $0x6d8] sm:$0xff]  ;;  %v2306_v62 = vunpack.c.h.s8.bf16 %v1066_v52  ;;  %v1098_v52 = vld [vmem:[#allocation7 + $0x780] sm:$0xff] }
 0x350   :  { %4696 = vmatprep.subr.bf16.mxu1 %v2253_v0  ;;  %v2315_v0 = vunpack.c.l.s8.bf16 %v1075_v59  ;;  %v2317_v35 = vunpack.c.l.s8.bf16 %v1077_v60  ;;  %v2325_v14 = vunpack.c.h.s8.bf16 %v1077_v60  ;;  %v1109_v60 = vld [vmem:[#allocation7 + $0x7d8] sm:$0xff] }
 0x352   :  { %4041 = vmatpush1.bf16.msra.mxu0 %v2250_v2  ;;  %v1076_v2 = vld [vmem:[#allocation7 + $0x6d0] sm:$0xff] }
 0x353   :  { %4697 = vmatpush1.bf16.msra.mxu1 %v2252_v11  ;;  %4042 = vmatprep.subr.bf16.mxu0 %v2259_v13  ;;  %v2314_v11 = vunpack.c.l.s8.bf16 %v1074_v1  ;;  %v2316_v13 = vunpack.c.l.s8.bf16 %v1076_v2 }
 0x354   :  { %4698 = vmatprep.subr.bf16.mxu1 %v2261_v15  ;;  %v2323_v15 = vunpack.c.h.s8.bf16 %v1075_v59  ;;  %v1107_v59 = vld [vmem:[#allocation7 + $0x7c8] sm:$0xff] }
 0x356   :  { %4043 = vmatpush1.bf16.msra.mxu0 %v2258_v20  ;;  %v1085_v20 = vld [vmem:[#allocation7 + $0x718] sm:$0xff] }
 0x357   :  { %4699 = vmatpush1.bf16.msra.mxu1 %v2260_v21  ;;  %4053 = vmatprep.subr.bf16.mxu0 %v2267_v18  ;;  %v2322_v21 = vunpack.c.h.s8.bf16 %v1074_v1  ;;  %v2324_v18 = vunpack.c.h.s8.bf16 %v1076_v2  ;;  %v2333_v6 = vunpack.c.l.s8.bf16 %v1085_v20  ;;  %v2341_v37 = vunpack.c.h.s8.bf16 %v1085_v20  ;;  %v1106_v1 = vld [vmem:[#allocation7 + $0x7c0] sm:$0xff]  ;;  %v1108_v2 = vld [vmem:[#allocation7 + $0x7d0] sm:$0xff]  ;;  %v1115_v20 = vld [vmem:[#allocation7 + $0x808] sm:$0xff] }
 0x358   :  { %4709 = vmatprep.subr.bf16.mxu1 %v2269_v25  ;;  %v1082_v25 = vld [vmem:[#allocation7 + $0x700] sm:$0xff] }
 0x359   :  { %4045 = vmatmul.mubr.bf16.vlgmr.msra.gmra.mrb[0].mxu0 %v8343_v31 }
 0x35a   :  { %4701 = vmatmul.mubr.bf16.vlgmr.msra.gmra.mrb[0].mxu1 %v8343_v31  ;;  %4054 = vmatpush1.bf16.msra.mxu0 %v2266_v27  ;;  %v2330_v27 = vunpack.c.l.s8.bf16 %v1082_v25 }
 0x35b   :  { %4085 = vmatprep.mubr.bf16.mxu0 %v8346_v38  ;;  %4710 = vmatpush1.bf16.msra.mxu1 %v2268_v9  ;;  %v2332_v9 = vunpack.c.l.s8.bf16 %v1084_v26 }
 0x35c   :  { %4741 = vmatprep.mubr.bf16.mxu1 %v8346_v38  ;;  %4055 = vmatprep.subr.bf16.mxu0 %v2275_v36  ;;  %v2339_v36 = vunpack.c.h.s8.bf16 %v1083_v16  ;;  %v2389_v16 = vunpack.c.h.s8.bf16 %v1109_v60 }
 0x35d   :  { %4711 = vmatprep.subr.bf16.mxu1 %v2277_v39  ;;  %v1091_v39 = vld [vmem:[#allocation7 + $0x748] sm:$0xff] }
 0x35e   :  { %4056 = vmatpush1.bf16.msra.mxu0 %v2274_v40  ;;  %v2338_v40 = vunpack.c.h.s8.bf16 %v1082_v25  ;;  %v2395_v25 = vunpack.c.l.s8.bf16 %v1115_v20 }
 0x35f   :  { %4712 = vmatpush1.bf16.msra.mxu1 %v2276_v17  ;;  %4057 = vmatprep.subr.bf16.mxu0 %v2283_v41  ;;  %v2340_v17 = vunpack.c.h.s8.bf16 %v1084_v26  ;;  %v2347_v41 = vunpack.c.l.s8.bf16 %v1091_v39 }
 0x360   :  { %4713 = vmatprep.subr.bf16.mxu1 %v2285_v43  ;;  %v2349_v43 = vunpack.c.l.s8.bf16 %v1093_v29 }
 0x362   :  { %4058 = vmatpush1.bf16.msra.mxu0 %v2282_v45  ;;  %v2346_v45 = vunpack.c.l.s8.bf16 %v1090_v42 }
 0x363   :  { %4714 = vmatpush1.bf16.msra.mxu1 %v2284_v46  ;;  %4059 = vmatprep.subr.bf16.mxu0 %v2291_v47  ;;  %v2348_v46 = vunpack.c.l.s8.bf16 %v1092_v44  ;;  %v2355_v47 = vunpack.c.h.s8.bf16 %v1091_v39 }
 0x364   :  { %4715 = vmatprep.subr.bf16.mxu1 %v2293_v10  ;;  %v2357_v10 = vunpack.c.h.s8.bf16 %v1093_v29  ;;  %v2403_v29 = vunpack.c.h.s8.bf16 %v1115_v20 }
 0x366   :  { %4060 = vmatpush1.bf16.msra.mxu0 %v2290_v49  ;;  %v2354_v49 = vunpack.c.h.s8.bf16 %v1090_v42  ;;  %v1125_v42 = vld [vmem:[#allocation7 + $0x858] sm:$0xff] }
 0x367   :  { %4716 = vmatpush1.bf16.msra.mxu1 %v2292_v50  ;;  %4061 = vmatprep.subr.bf16.mxu0 %v2299_v51  ;;  %v2356_v50 = vunpack.c.h.s8.bf16 %v1092_v44  ;;  %v2363_v51 = vunpack.c.l.s8.bf16 %v1099_v48 }
 0x368   :  { %4717 = vmatprep.subr.bf16.mxu1 %v2301_v53  ;;  %v2365_v53 = vunpack.c.l.s8.bf16 %v1101_v5 }
 0x36a   :  { %4062 = vmatpush1.bf16.msra.mxu0 %v2298_v55  ;;  %v2362_v55 = vunpack.c.l.s8.bf16 %v1098_v52 }
 0x36b   :  { %4718 = vmatpush1.bf16.msra.mxu1 %v2300_v56  ;;  %4063 = vmatprep.subr.bf16.mxu0 %v2307_v57  ;;  %v2364_v56 = vunpack.c.l.s8.bf16 %v1100_v54  ;;  %v2371_v57 = vunpack.c.h.s8.bf16 %v1099_v48 }
 0x36c   :  { %4719 = vmatprep.subr.bf16.mxu1 %v2309_v58  ;;  %v2373_v58 = vunpack.c.h.s8.bf16 %v1101_v5 }
 0x36e   :  { %4064 = vmatpush1.bf16.msra.mxu0 %v2306_v62  ;;  %v2370_v62 = vunpack.c.h.s8.bf16 %v1098_v52 }
 0x36f   :  { %4720 = vmatpush1.bf16.msra.mxu1 %v2308_v63  ;;  %4065 = vmatprep.subr.bf16.mxu0 %v2315_v0  ;;  %v2372_v63 = vunpack.c.h.s8.bf16 %v1100_v54  ;;  %v2379_v0 = vunpack.c.l.s8.bf16 %v1107_v59 }
 0x370   :  { %4721 = vmatprep.subr.bf16.mxu1 %v2317_v35  ;;  %v2381_v35 = vunpack.c.l.s8.bf16 %v1109_v60 }
 0x372   :  { %4066 = vmatpush1.bf16.msra.mxu0 %v2314_v11  ;;  %v8352_v11 = vmax.f32 %v8276_v22, 0.0  ;;  %v2388_v22 = vunpack.c.h.s8.bf16 %v1108_v2 }
 0x373   :  { %4722 = vmatpush1.bf16.msra.mxu1 %v2316_v13  ;;  %4067 = vmatprep.subr.bf16.mxu0 %v2323_v15  ;;  %v2378_v13 = vunpack.c.l.s8.bf16 %v1106_v1  ;;  %v2380_v15 = vunpack.c.l.s8.bf16 %v1108_v2 }
 0x374   :  { %4723 = vmatprep.subr.bf16.mxu1 %v2325_v14  ;;  %v2387_v14 = vunpack.c.h.s8.bf16 %v1107_v59 }
 0x376   :  { %4068 = vmatpush1.bf16.msra.mxu0 %v2322_v21  ;;  %v1117_v21 = vld [vmem:[#allocation7 + $0x818] sm:$0xff] }
 0x377   :  { %4724 = vmatpush1.bf16.msra.mxu1 %v2324_v18  ;;  %4069 = vmatprep.subr.bf16.mxu0 %v2331_v61  ;;  %v8356_v18 = vrot.slane %v8352_v11, %v8095_v8  ;;  %v2386_v61 = vunpack.c.h.s8.bf16 %v1106_v1  ;;  %v2397_v26 = vunpack.c.l.s8.bf16 %v1117_v21 }
 0x378   :  { %4725 = vmatprep.subr.bf16.mxu1 %v2333_v6  ;;  %v1114_v6 = vld [vmem:[#allocation7 + $0x800] sm:$0xff] }
 0x37a   :  { %4070 = vmatpush1.bf16.msra.mxu0 %v2330_v27  ;;  %v1116_v27 = vld [vmem:[#allocation7 + $0x810] sm:$0xff] }
 0x37b   :  { %4726 = vmatpush1.bf16.msra.mxu1 %v2332_v9  ;;  %4071 = vmatprep.subr.bf16.mxu0 %v2339_v36  ;;  %v707_v9 = vcombine.high %v8356_v18, %v8356_v18  ;;  %v2394_v36 = vunpack.c.l.s8.bf16 %v1114_v6  ;;  %v2396_v39 = vunpack.c.l.s8.bf16 %v1116_v27 }
 0x37c   :  { %4727 = vmatprep.subr.bf16.mxu1 %v2341_v37  ;;  %v8362_v37 = vpack.c.bf16 %v8337_v19, %v8337_v19  ;;  %v2404_v19 = vunpack.c.h.s8.bf16 %v1116_v27 }
 0x37e   :  { %4072 = vmatpush1.bf16.msra.mxu0 %v2338_v40  ;;  %v1123_v40 = vld [vmem:[#allocation7 + $0x848] sm:$0xff] }
 0x37f   :  { %4728 = vmatpush1.bf16.msra.mxu1 %v2340_v17  ;;  %4073 = vmatprep.subr.bf16.mxu0 %v2347_v41  ;;  %v8365_v17 = vpack.c.bf16 %v707_v9, %v707_v9  ;;  %v2405_v41 = vunpack.c.h.s8.bf16 %v1117_v21  ;;  %v2411_v44 = vunpack.c.l.s8.bf16 %v1123_v40  ;;  %v2419_v5 = vunpack.c.h.s8.bf16 %v1123_v40  ;;  %v1146_v9 = vld [vmem:[#allocation7 + $0x900] sm:$0xff] }
 0x380   :  { %4729 = vmatprep.subr.bf16.mxu1 %v2349_v43  ;;  %v2402_v43 = vunpack.c.h.s8.bf16 %v1114_v6 }
 0x382   :  { %4074 = vmatpush1.bf16.msra.mxu0 %v2346_v45  ;;  %v1122_v45 = vld [vmem:[#allocation7 + $0x840] sm:$0xff] }
 0x383   :  { %4730 = vmatpush1.bf16.msra.mxu1 %v2348_v46  ;;  %4075 = vmatprep.subr.bf16.mxu0 %v2355_v47  ;;  %v2413_v46 = vunpack.c.l.s8.bf16 %v1125_v42  ;;  %v1124_v47 = vld [vmem:[#allocation7 + $0x850] sm:$0xff]  ;;  %v2418_v52 = vunpack.c.h.s8.bf16 %v1122_v45 }
 0x384   :  { %4731 = vmatprep.subr.bf16.mxu1 %v2357_v10  ;;  %v2410_v10 = vunpack.c.l.s8.bf16 %v1122_v45  ;;  %v2412_v48 = vunpack.c.l.s8.bf16 %v1124_v47 }
 0x386   :  { %4076 = vmatpush1.bf16.msra.mxu0 %v2354_v49  ;;  %v2421_v49 = vunpack.c.h.s8.bf16 %v1125_v42 }
 0x387   :  { %4732 = vmatpush1.bf16.msra.mxu1 %v2356_v50  ;;  %4077 = vmatprep.subr.bf16.mxu0 %v2363_v51  ;;  %v1131_v50 = vld [vmem:[#allocation7 + $0x888] sm:$0xff]  ;;  %v1133_v51 = vld [vmem:[#allocation7 + $0x898] sm:$0xff] }
 0x388   :  { %4733 = vmatprep.subr.bf16.mxu1 %v2365_v53  ;;  %v2420_v53 = vunpack.c.h.s8.bf16 %v1124_v47  ;;  %v2427_v54 = vunpack.c.l.s8.bf16 %v1131_v50  ;;  %v2435_v60 = vunpack.c.h.s8.bf16 %v1131_v50  ;;  %v1154_v47 = vld [vmem:[#allocation7 + $0x940] sm:$0xff] }
 0x38a   :  { %4078 = vmatpush1.bf16.msra.mxu0 %v2362_v55  ;;  %v1130_v55 = vld [vmem:[#allocation7 + $0x880] sm:$0xff] }
 0x38b   :  { %4734 = vmatpush1.bf16.msra.mxu1 %v2364_v56  ;;  %4079 = vmatprep.subr.bf16.mxu0 %v2371_v57  ;;  %v2429_v56 = vunpack.c.l.s8.bf16 %v1133_v51  ;;  %v1132_v57 = vld [vmem:[#allocation7 + $0x890] sm:$0xff]  ;;  %v2434_v1 = vunpack.c.h.s8.bf16 %v1130_v55 }
 0x38c   :  { %4735 = vmatprep.subr.bf16.mxu1 %v2373_v58  ;;  %v2426_v58 = vunpack.c.l.s8.bf16 %v1130_v55  ;;  %v2428_v59 = vunpack.c.l.s8.bf16 %v1132_v57 }
 0x38e   :  { %4080 = vmatpush1.bf16.msra.mxu0 %v2370_v62  ;;  %v2437_v62 = vunpack.c.h.s8.bf16 %v1133_v51 }
 0x38f   :  { %4736 = vmatpush1.bf16.msra.mxu1 %v2372_v63  ;;  %4081 = vmatprep.subr.bf16.mxu0 %v2379_v0  ;;  %v1139_v63 = vld [vmem:[#allocation7 + $0x8c8] sm:$0xff]  ;;  %v1141_v0 = vld [vmem:[#allocation7 + $0x8d8] sm:$0xff] }
 0x390   :  { %4737 = vmatprep.subr.bf16.mxu1 %v2381_v35  ;;  %v2436_v35 = vunpack.c.h.s8.bf16 %v1132_v57  ;;  %v2443_v2 = vunpack.c.l.s8.bf16 %v1139_v63  ;;  %v2451_v21 = vunpack.c.h.s8.bf16 %v1139_v63  ;;  %v1162_v57 = vld [vmem:[#allocation7 + $0x980] sm:$0xff] }
 0x392   :  { %4082 = vmatpush1.bf16.msra.mxu0 %v2378_v13  ;;  %v1138_v13 = vld [vmem:[#allocation7 + $0x8c0] sm:$0xff] }
 0x393   :  { %4738 = vmatpush1.bf16.msra.mxu1 %v2380_v15  ;;  %4083 = vmatprep.subr.bf16.mxu0 %v2387_v14  ;;  %v2445_v15 = vunpack.c.l.s8.bf16 %v1141_v0  ;;  %v1140_v14 = vld [vmem:[#allocation7 + $0x8d0] sm:$0xff]  ;;  %v2450_v6 = vunpack.c.h.s8.bf16 %v1138_v13 }
 0x394   :  { %4739 = vmatprep.subr.bf16.mxu1 %v2389_v16  ;;  %v2442_v16 = vunpack.c.l.s8.bf16 %v1138_v13  ;;  %v2444_v20 = vunpack.c.l.s8.bf16 %v1140_v14 }
 0x396   :  { %4084 = vmatpush1.bf16.msra.mxu0 %v2386_v61  ;;  %v2453_v61 = vunpack.c.h.s8.bf16 %v1141_v0 }
 0x397   :  { %4740 = vmatpush1.bf16.msra.mxu1 %v2388_v22  ;;  %4094 = vmatprep.subr.bf16.mxu0 %v2395_v25  ;;  %v1147_v22 = vld [vmem:[#allocation7 + $0x908] sm:$0xff]  ;;  %v1149_v25 = vld [vmem:[#allocation7 + $0x918] sm:$0xff] }
 0x398   :  { %4750 = vmatprep.subr.bf16.mxu1 %v2397_v26  ;;  %v2452_v26 = vunpack.c.h.s8.bf16 %v1140_v14  ;;  %v2459_v27 = vunpack.c.l.s8.bf16 %v1147_v22  ;;  %v2469_v42 = vunpack.c.h.s8.bf16 %v1149_v25  ;;  %v1170_v14 = vld [vmem:[#allocation7 + $0x9c0] sm:$0xff] }
 0x399   :  { %4086 = vmatmul.mubr.bf16.vlgmr.msra.gmra.mrb[0].mxu0 %v8362_v37 }
 0x39a   :  { %4742 = vmatmul.mubr.bf16.vlgmr.msra.gmra.mrb[0].mxu1 %v8362_v37  ;;  %4095 = vmatpush1.bf16.msra.mxu0 %v2394_v36  ;;  %v2461_v36 = vunpack.c.l.s8.bf16 %v1149_v25 }
 0x39b   :  { %4126 = vmatprep.mubr.bf16.mxu0 %v8365_v17  ;;  %4751 = vmatpush1.bf16.msra.mxu1 %v2396_v39  ;;  %v1148_v39 = vld [vmem:[#allocation7 + $0x910] sm:$0xff] }
 0x39c   :  { %4782 = vmatprep.mubr.bf16.mxu1 %v8365_v17  ;;  %4096 = vmatprep.subr.bf16.mxu0 %v2403_v29  ;;  %v2458_v29 = vunpack.c.l.s8.bf16 %v1146_v9  ;;  %v2460_v40 = vunpack.c.l.s8.bf16 %v1148_v39  ;;  %v2468_v45 = vunpack.c.h.s8.bf16 %v1148_v39 }
 0x39d   :  { %4752 = vmatprep.subr.bf16.mxu1 %v2405_v41  ;;  %v2467_v41 = vunpack.c.h.s8.bf16 %v1147_v22 }
 0x39e   :  { %4097 = vmatpush1.bf16.msra.mxu0 %v2402_v43  ;;  %v1155_v43 = vld [vmem:[#allocation7 + $0x948] sm:$0xff] }
 0x39f   :  { %4753 = vmatpush1.bf16.msra.mxu1 %v2404_v19  ;;  %4098 = vmatprep.subr.bf16.mxu0 %v2411_v44  ;;  %v1157_v19 = vld [vmem:[#allocation7 + $0x958] sm:$0xff]  ;;  %v2466_v44 = vunpack.c.h.s8.bf16 %v1146_v9  ;;  %v2483_v50 = vunpack.c.h.s8.bf16 %v1155_v43 }
 0x3a0   :  { %4754 = vmatprep.subr.bf16.mxu1 %v2413_v46  ;;  %v2475_v46 = vunpack.c.l.s8.bf16 %v1155_v43  ;;  %v2485_v51 = vunpack.c.h.s8.bf16 %v1157_v19 }
 0x3a2   :  { %4099 = vmatpush1.bf16.msra.mxu0 %v2410_v10  ;;  %v2477_v10 = vunpack.c.l.s8.bf16 %v1157_v19  ;;  %v8379_v19 = vpack.c.bf16 %v8356_v18, %v8356_v18 }
 0x3a3   :  { %4755 = vmatpush1.bf16.msra.mxu1 %v2412_v48  ;;  %4100 = vmatprep.subr.bf16.mxu0 %v2419_v5  ;;  %v1156_v48 = vld [vmem:[#allocation7 + $0x950] sm:$0xff]  ;;  %v2474_v5 = vunpack.c.l.s8.bf16 %v1154_v47 }
 0x3a4   :  { %4756 = vmatprep.subr.bf16.mxu1 %v2421_v49  ;;  %v2476_v49 = vunpack.c.l.s8.bf16 %v1156_v48  ;;  %v2484_v55 = vunpack.c.h.s8.bf16 %v1156_v48  ;;  %v1189_v48 = vld [vmem:[#allocation7 + $0xa58] sm:$0xff] }
 0x3a6   :  { %4101 = vmatpush1.bf16.msra.mxu0 %v2418_v52  ;;  %v1163_v52 = vld [vmem:[#allocation7 + $0x988] sm:$0xff] }
 0x3a7   :  { %4757 = vmatpush1.bf16.msra.mxu1 %v2420_v53  ;;  %4102 = vmatprep.subr.bf16.mxu0 %v2427_v54  ;;  %v1165_v53 = vld [vmem:[#allocation7 + $0x998] sm:$0xff]  ;;  %v2482_v54 = vunpack.c.h.s8.bf16 %v1154_v47  ;;  %v2499_v63 = vunpack.c.h.s8.bf16 %v1163_v52 }
 0x3a8   :  { %4758 = vmatprep.subr.bf16.mxu1 %v2429_v56  ;;  %v2491_v56 = vunpack.c.l.s8.bf16 %v1163_v52  ;;  %v2501_v0 = vunpack.c.h.s8.bf16 %v1165_v53  ;;  %v1188_v52 = vld [vmem:[#allocation7 + $0xa50] sm:$0xff] }
 0x3aa   :  { %4103 = vmatpush1.bf16.msra.mxu0 %v2426_v58  ;;  %v2493_v58 = vunpack.c.l.s8.bf16 %v1165_v53 }
 0x3ab   :  { %4759 = vmatpush1.bf16.msra.mxu1 %v2428_v59  ;;  %4104 = vmatprep.subr.bf16.mxu0 %v2435_v60  ;;  %v1164_v59 = vld [vmem:[#allocation7 + $0x990] sm:$0xff]  ;;  %v2490_v60 = vunpack.c.l.s8.bf16 %v1162_v57 }
 0x3ac   :  { %4760 = vmatprep.subr.bf16.mxu1 %v2437_v62  ;;  %v2492_v62 = vunpack.c.l.s8.bf16 %v1164_v59  ;;  %v2500_v13 = vunpack.c.h.s8.bf16 %v1164_v59 }
 0x3ae   :  { %4105 = vmatpush1.bf16.msra.mxu0 %v2434_v1  ;;  %v1171_v1 = vld [vmem:[#allocation7 + $0x9c8] sm:$0xff] }
 0x3af   :  { %4761 = vmatpush1.bf16.msra.mxu1 %v2436_v35  ;;  %4106 = vmatprep.subr.bf16.mxu0 %v2443_v2  ;;  %v1173_v35 = vld [vmem:[#allocation7 + $0x9d8] sm:$0xff]  ;;  %v2498_v2 = vunpack.c.h.s8.bf16 %v1162_v57  ;;  %v2515_v25 = vunpack.c.h.s8.bf16 %v1171_v1  ;;  %v1195_v57 = vld [vmem:[#allocation7 + $0xa88] sm:$0xff] }
 0x3b0   :  { %4762 = vmatprep.subr.bf16.mxu1 %v2445_v15  ;;  %v2507_v15 = vunpack.c.l.s8.bf16 %v1171_v1  ;;  %v1196_v1 = vld [vmem:[#allocation7 + $0xa90] sm:$0xff] }
 0x3b2   :  { %4107 = vmatpush1.bf16.msra.mxu0 %v2442_v16  ;;  %v2509_v16 = vunpack.c.l.s8.bf16 %v1173_v35 }
 0x3b3   :  { %4763 = vmatpush1.bf16.msra.mxu1 %v2444_v20  ;;  %4108 = vmatprep.subr.bf16.mxu0 %v2451_v21  ;;  %v1172_v20 = vld [vmem:[#allocation7 + $0x9d0] sm:$0xff]  ;;  %v692_v21 = vcombine.high %v8352_v11, %v8352_v11  ;;  %v1178_v11 = vld [vmem:[#allocation7 + $0xa00] sm:$0xff] }
 0x3b4   :  { %4764 = vmatprep.subr.bf16.mxu1 %v2453_v61  ;;  %v2506_v61 = vunpack.c.l.s8.bf16 %v1170_v14  ;;  %v2508_v22 = vunpack.c.l.s8.bf16 %v1172_v20  ;;  %v2516_v39 = vunpack.c.h.s8.bf16 %v1172_v20  ;;  %v2522_v43 = vunpack.c.l.s8.bf16 %v1178_v11 }
 0x3b5   :  { %v8373_v9 = vrot.slane %v692_v21, %v8095_v8  ;;  %v2564_v21 = vunpack.c.h.s8.bf16 %v1196_v1 }
 0x3b6   :  { %4109 = vmatpush1.bf16.msra.mxu0 %v2450_v6  ;;  %v2517_v6 = vunpack.c.h.s8.bf16 %v1173_v35 }
 0x3b7   :  { %4765 = vmatpush1.bf16.msra.mxu1 %v2452_v26  ;;  %4110 = vmatprep.subr.bf16.mxu0 %v2459_v27  ;;  %v1179_v26 = vld [vmem:[#allocation7 + $0xa08] sm:$0xff]  ;;  %v1181_v27 = vld [vmem:[#allocation7 + $0xa18] sm:$0xff] }
 0x3b8   :  { %4766 = vmatprep.subr.bf16.mxu1 %v2461_v36  ;;  %v2514_v36 = vunpack.c.h.s8.bf16 %v1170_v14  ;;  %v1203_v14 = vld [vmem:[#allocation7 + $0xac8] sm:$0xff] }
 0x3ba   :  { %4111 = vmatpush1.bf16.msra.mxu0 %v2458_v29  ;;  %v2523_v29 = vunpack.c.l.s8.bf16 %v1179_v26 }
 0x3bb   :  { %4767 = vmatpush1.bf16.msra.mxu1 %v2460_v40  ;;  %4112 = vmatprep.subr.bf16.mxu0 %v2467_v41  ;;  %v2525_v40 = vunpack.c.l.s8.bf16 %v1181_v27  ;;  %v1180_v41 = vld [vmem:[#allocation7 + $0xa10] sm:$0xff] }
 0x3bc   :  { %4768 = vmatprep.subr.bf16.mxu1 %v2469_v42  ;;  %v708_v42 = vcombine.high %v8373_v9, %v8373_v9  ;;  %v2532_v18 = vunpack.c.h.s8.bf16 %v1180_v41 }
 0x3be   :  { %4113 = vmatpush1.bf16.msra.mxu0 %v2466_v44  ;;  %v2524_v44 = vunpack.c.l.s8.bf16 %v1180_v41  ;;  %v8382_v47 = vpack.c.bf16 %v708_v42, %v708_v42 }
 0x3bf   :  { %4769 = vmatpush1.bf16.msra.mxu1 %v2468_v45  ;;  %4114 = vmatprep.subr.bf16.mxu0 %v2475_v46  ;;  %v2531_v45 = vunpack.c.h.s8.bf16 %v1179_v26  ;;  %v1187_v46 = vld [vmem:[#allocation7 + $0xa48] sm:$0xff] }
 0x3c0   :  { %4770 = vmatprep.subr.bf16.mxu1 %v2477_v10  ;;  %v2533_v10 = vunpack.c.h.s8.bf16 %v1181_v27 }
 0x3c2   :  { %4115 = vmatpush1.bf16.msra.mxu0 %v2474_v5  ;;  %v2530_v5 = vunpack.c.h.s8.bf16 %v1178_v11  ;;  %v1213_v11 = vld [vmem:[#allocation7 + $0xb18] sm:$0xff] }
 0x3c3   :  { %4771 = vmatpush1.bf16.msra.mxu1 %v2476_v49  ;;  %4116 = vmatprep.subr.bf16.mxu0 %v2483_v50  ;;  %v2539_v49 = vunpack.c.l.s8.bf16 %v1187_v46  ;;  %v1186_v50 = vld [vmem:[#allocation7 + $0xa40] sm:$0xff] }
 0x3c4   :  { %4772 = vmatprep.subr.bf16.mxu1 %v2485_v51  ;;  %v2541_v51 = vunpack.c.l.s8.bf16 %v1189_v48  ;;  %v2538_v53 = vunpack.c.l.s8.bf16 %v1186_v50  ;;  %v2546_v59 = vunpack.c.h.s8.bf16 %v1186_v50 }
 0x3c6   :  { %4117 = vmatpush1.bf16.msra.mxu0 %v2482_v54  ;;  %v2540_v54 = vunpack.c.l.s8.bf16 %v1188_v52 }
 0x3c7   :  { %4773 = vmatpush1.bf16.msra.mxu1 %v2484_v55  ;;  %4118 = vmatprep.subr.bf16.mxu0 %v2491_v56  ;;  %v2547_v55 = vunpack.c.h.s8.bf16 %v1187_v46  ;;  %v2549_v56 = vunpack.c.h.s8.bf16 %v1189_v48 }
 0x3c8   :  { %4774 = vmatprep.subr.bf16.mxu1 %v2493_v58  ;;  %v1197_v58 = vld [vmem:[#allocation7 + $0xa98] sm:$0xff] }
 0x3ca   :  { %4119 = vmatpush1.bf16.msra.mxu0 %v2490_v60  ;;  %v2548_v60 = vunpack.c.h.s8.bf16 %v1188_v52 }
 0x3cb   :  { %4775 = vmatpush1.bf16.msra.mxu1 %v2492_v62  ;;  %4120 = vmatprep.subr.bf16.mxu0 %v2499_v63  ;;  %v2555_v62 = vunpack.c.l.s8.bf16 %v1195_v57  ;;  %v1194_v63 = vld [vmem:[#allocation7 + $0xa80] sm:$0xff] }
 0x3cc   :  { %4776 = vmatprep.subr.bf16.mxu1 %v2501_v0  ;;  %v2557_v0 = vunpack.c.l.s8.bf16 %v1197_v58  ;;  %v2554_v35 = vunpack.c.l.s8.bf16 %v1194_v63  ;;  %v2562_v20 = vunpack.c.h.s8.bf16 %v1194_v63 }
 0x3ce   :  { %4121 = vmatpush1.bf16.msra.mxu0 %v2498_v2  ;;  %v2556_v2 = vunpack.c.l.s8.bf16 %v1196_v1 }
 0x3cf   :  { %4777 = vmatpush1.bf16.msra.mxu1 %v2500_v13  ;;  %4122 = vmatprep.subr.bf16.mxu0 %v2507_v15  ;;  %v2563_v13 = vunpack.c.h.s8.bf16 %v1195_v57  ;;  %v2565_v15 = vunpack.c.h.s8.bf16 %v1197_v58 }
 0x3d0   :  { %4778 = vmatprep.subr.bf16.mxu1 %v2509_v16  ;;  %v1205_v16 = vld [vmem:[#allocation7 + $0xad8] sm:$0xff] }
 0x3d2   :  { %4123 = vmatpush1.bf16.msra.mxu0 %v2506_v61  ;;  %v2571_v61 = vunpack.c.l.s8.bf16 %v1203_v14 }
 0x3d3   :  { %4779 = vmatpush1.bf16.msra.mxu1 %v2508_v22  ;;  %4124 = vmatprep.subr.bf16.mxu0 %v2515_v25  ;;  %v1202_v22 = vld [vmem:[#allocation7 + $0xac0] sm:$0xff]  ;;  %v2573_v25 = vunpack.c.l.s8.bf16 %v1205_v16 }
 0x3d4   :  { %4780 = vmatprep.subr.bf16.mxu1 %v2517_v6  ;;  %v1204_v6 = vld [vmem:[#allocation7 + $0xad0] sm:$0xff]  ;;  %v2570_v26 = vunpack.c.l.s8.bf16 %v1202_v22 }
 0x3d5   :  { %v2572_v27 = vunpack.c.l.s8.bf16 %v1204_v6  ;;  %v2580_v41 = vunpack.c.h.s8.bf16 %v1204_v6 }
 0x3d6   :  { %4125 = vmatpush1.bf16.msra.mxu0 %v2514_v36  ;;  %v2579_v36 = vunpack.c.h.s8.bf16 %v1203_v14 }
 0x3d7   :  { %4781 = vmatpush1.bf16.msra.mxu1 %v2516_v39  ;;  %4135 = vmatprep.subr.bf16.mxu0 %v2523_v29  ;;  %v2581_v39 = vunpack.c.h.s8.bf16 %v1205_v16  ;;  %v1211_v29 = vld [vmem:[#allocation7 + $0xb08] sm:$0xff] }
 0x3d8   :  { %4791 = vmatprep.subr.bf16.mxu1 %v2525_v40  ;;  %v2578_v40 = vunpack.c.h.s8.bf16 %v1202_v22  ;;  %v2587_v42 = vunpack.c.l.s8.bf16 %v1211_v29  ;;  %v2595_v48 = vunpack.c.h.s8.bf16 %v1211_v29 }
 0x3d9   :  { %4127 = vmatmul.mubr.bf16.vlgmr.msra.gmra.mrb[0].mxu0 %v8379_v19 }
 0x3da   :  { %4783 = vmatmul.mubr.bf16.vlgmr.msra.gmra.mrb[0].mxu1 %v8379_v19  ;;  %4136 = vmatpush1.bf16.msra.mxu0 %v2522_v43  ;;  %v1210_v43 = vld [vmem:[#allocation7 + $0xb00] sm:$0xff] }
 0x3db   :  { %4167 = vmatprep.mubr.bf16.mxu0 %v8382_v47  ;;  %4792 = vmatpush1.bf16.msra.mxu1 %v2524_v44  ;;  %v2589_v44 = vunpack.c.l.s8.bf16 %v1213_v11  ;;  %v2586_v46 = vunpack.c.l.s8.bf16 %v1210_v43  ;;  %v2594_v50 = vunpack.c.h.s8.bf16 %v1210_v43  ;;  %v1245_v43 = vld [vmem:[#allocation7 + $0xc18] sm:$0xff] }
 0x3dc   :  { %4823 = vmatprep.mubr.bf16.mxu1 %v8382_v47  ;;  %4137 = vmatprep.subr.bf16.mxu0 %v2531_v45  ;;  %v1212_v45 = vld [vmem:[#allocation7 + $0xb10] sm:$0xff] }
 0x3dd   :  { %4793 = vmatprep.subr.bf16.mxu1 %v2533_v10  ;;  %v2588_v10 = vunpack.c.l.s8.bf16 %v1212_v45 }
 0x3de   :  { %4138 = vmatpush1.bf16.msra.mxu0 %v2530_v5  ;;  %v2597_v5 = vunpack.c.h.s8.bf16 %v1213_v11 }
 0x3df   :  { %4794 = vmatpush1.bf16.msra.mxu1 %v2532_v18  ;;  %4139 = vmatprep.subr.bf16.mxu0 %v2539_v49  ;;  %v1219_v18 = vld [vmem:[#allocation7 + $0xb48] sm:$0xff]  ;;  %v1221_v49 = vld [vmem:[#allocation7 + $0xb58] sm:$0xff] }
 0x3e0   :  { %4795 = vmatprep.subr.bf16.mxu1 %v2541_v51  ;;  %v2596_v51 = vunpack.c.h.s8.bf16 %v1212_v45  ;;  %v2603_v52 = vunpack.c.l.s8.bf16 %v1219_v18  ;;  %v2611_v58 = vunpack.c.h.s8.bf16 %v1219_v18 }
 0x3e2   :  { %4140 = vmatpush1.bf16.msra.mxu0 %v2538_v53  ;;  %v1218_v53 = vld [vmem:[#allocation7 + $0xb40] sm:$0xff] }
 0x3e3   :  { %4796 = vmatpush1.bf16.msra.mxu1 %v2540_v54  ;;  %4141 = vmatprep.subr.bf16.mxu0 %v2547_v55  ;;  %v2605_v54 = vunpack.c.l.s8.bf16 %v1221_v49  ;;  %v1220_v55 = vld [vmem:[#allocation7 + $0xb50] sm:$0xff]  ;;  %v2610_v63 = vunpack.c.h.s8.bf16 %v1218_v53 }
 0x3e4   :  { %4797 = vmatprep.subr.bf16.mxu1 %v2549_v56  ;;  %v2602_v56 = vunpack.c.l.s8.bf16 %v1218_v53  ;;  %v2604_v57 = vunpack.c.l.s8.bf16 %v1220_v55  ;;  %v1251_v53 = vld [vmem:[#allocation7 + $0xc48] sm:$0xff] }
 0x3e6   :  { %4142 = vmatpush1.bf16.msra.mxu0 %v2546_v59  ;;  %v2613_v59 = vunpack.c.h.s8.bf16 %v1221_v49 }
 0x3e7   :  { %4798 = vmatpush1.bf16.msra.mxu1 %v2548_v60  ;;  %4143 = vmatprep.subr.bf16.mxu0 %v2555_v62  ;;  %v1227_v60 = vld [vmem:[#allocation7 + $0xb88] sm:$0xff]  ;;  %v1229_v62 = vld [vmem:[#allocation7 + $0xb98] sm:$0xff] }
 0x3e8   :  { %4799 = vmatprep.subr.bf16.mxu1 %v2557_v0  ;;  %v2612_v0 = vunpack.c.h.s8.bf16 %v1220_v55  ;;  %v2619_v1 = vunpack.c.l.s8.bf16 %v1227_v60  ;;  %v2627_v16 = vunpack.c.h.s8.bf16 %v1227_v60  ;;  %v2661_v55 = vunpack.c.h.s8.bf16 %v1245_v43 }
 0x3ea   :  { %4144 = vmatpush1.bf16.msra.mxu0 %v2554_v35  ;;  %v1226_v35 = vld [vmem:[#allocation7 + $0xb80] sm:$0xff] }
 0x3eb   :  { %4800 = vmatpush1.bf16.msra.mxu1 %v2556_v2  ;;  %4145 = vmatprep.subr.bf16.mxu0 %v2563_v13  ;;  %v2621_v2 = vunpack.c.l.s8.bf16 %v1229_v62  ;;  %v1228_v13 = vld [vmem:[#allocation7 + $0xb90] sm:$0xff]  ;;  %v2626_v22 = vunpack.c.h.s8.bf16 %v1226_v35 }
 0x3ec   :  { %4801 = vmatprep.subr.bf16.mxu1 %v2565_v15  ;;  %v2618_v15 = vunpack.c.l.s8.bf16 %v1226_v35  ;;  %v2620_v14 = vunpack.c.l.s8.bf16 %v1228_v13 }
 0x3ee   :  { %4146 = vmatpush1.bf16.msra.mxu0 %v2562_v20  ;;  %v2629_v20 = vunpack.c.h.s8.bf16 %v1229_v62  ;;  %v1252_v62 = vld [vmem:[#allocation7 + $0xc50] sm:$0xff] }
 0x3ef   :  { %4802 = vmatpush1.bf16.msra.mxu1 %v2564_v21  ;;  %4147 = vmatprep.subr.bf16.mxu0 %v2571_v61  ;;  %v1235_v21 = vld [vmem:[#allocation7 + $0xbc8] sm:$0xff]  ;;  %v1237_v61 = vld [vmem:[#allocation7 + $0xbd8] sm:$0xff] }
 0x3f0   :  { %4803 = vmatprep.subr.bf16.mxu1 %v2573_v25  ;;  %v2628_v25 = vunpack.c.h.s8.bf16 %v1228_v13  ;;  %v2635_v6 = vunpack.c.l.s8.bf16 %v1235_v21  ;;  %v1261_v13 = vld [vmem:[#allocation7 + $0xc98] sm:$0xff] }
 0x3f2   :  { %4148 = vmatpush1.bf16.msra.mxu0 %v2570_v26  ;;  %v1234_v26 = vld [vmem:[#allocation7 + $0xbc0] sm:$0xff] }
 0x3f3   :  { %4804 = vmatpush1.bf16.msra.mxu1 %v2572_v27  ;;  %4149 = vmatprep.subr.bf16.mxu0 %v2579_v36  ;;  %v2637_v27 = vunpack.c.l.s8.bf16 %v1237_v61  ;;  %v1236_v36 = vld [vmem:[#allocation7 + $0xbd0] sm:$0xff]  ;;  %v2634_v29 = vunpack.c.l.s8.bf16 %v1234_v26  ;;  %v2642_v45 = vunpack.c.h.s8.bf16 %v1234_v26  ;;  %v2693_v26 = vunpack.c.h.s8.bf16 %v1261_v13 }
 0x3f4   :  { %4805 = vmatprep.subr.bf16.mxu1 %v2581_v39  ;;  %v8388_v39 = vmax.f32 %v8279_v23, 0.0  ;;  %v2636_v11 = vunpack.c.l.s8.bf16 %v1236_v36  ;;  %v2644_v23 = vunpack.c.h.s8.bf16 %v1236_v36  ;;  %v1269_v36 = vld [vmem:[#allocation7 + $0xcd8] sm:$0xff] }
 0x3f6   :  { %4150 = vmatpush1.bf16.msra.mxu0 %v2578_v40  ;;  %v2643_v40 = vunpack.c.h.s8.bf16 %v1235_v21  ;;  %v2685_v21 = vunpack.c.l.s8.bf16 %v1261_v13 }
 0x3f7   :  { %4806 = vmatpush1.bf16.msra.mxu1 %v2580_v41  ;;  %4151 = vmatprep.subr.bf16.mxu0 %v2587_v42  ;;  %v2645_v41 = vunpack.c.h.s8.bf16 %v1237_v61  ;;  %v1243_v42 = vld [vmem:[#allocation7 + $0xc08] sm:$0xff]  ;;  %v1260_v61 = vld [vmem:[#allocation7 + $0xc90] sm:$0xff] }
 0x3f8   :  { %4807 = vmatprep.subr.bf16.mxu1 %v2589_v44  ;;  %v8392_v44 = vrot.slane %v8388_v39, %v8095_v8 }
 0x3fa   :  { %4152 = vmatpush1.bf16.msra.mxu0 %v2586_v46  ;;  %v2651_v46 = vunpack.c.l.s8.bf16 %v1243_v42  ;;  %v724_v18 = vcombine.high %v8392_v44, %v8392_v44 }
 0x3fb   :  { %4808 = vmatpush1.bf16.msra.mxu1 %v2588_v10  ;;  %4153 = vmatprep.subr.bf16.mxu0 %v2595_v48  ;;  %v1242_v10 = vld [vmem:[#allocation7 + $0xc00] sm:$0xff]  ;;  %v2653_v48 = vunpack.c.l.s8.bf16 %v1245_v43  ;;  %v1268_v43 = vld [vmem:[#allocation7 + $0xcd0] sm:$0xff] }
 0x3fc   :  { %4809 = vmatprep.subr.bf16.mxu1 %v2597_v5  ;;  %v1244_v5 = vld [vmem:[#allocation7 + $0xc10] sm:$0xff]  ;;  %v2650_v49 = vunpack.c.l.s8.bf16 %v1242_v10 }
 0x3fe   :  { %4154 = vmatpush1.bf16.msra.mxu0 %v2594_v50  ;;  %v8398_v50 = vpack.c.bf16 %v8373_v9, %v8373_v9  ;;  %v2660_v9 = vunpack.c.h.s8.bf16 %v1244_v5 }
 0x3ff   :  { %4810 = vmatpush1.bf16.msra.mxu1 %v2596_v51  ;;  %4155 = vmatprep.subr.bf16.mxu0 %v2603_v52  ;;  %v2652_v51 = vunpack.c.l.s8.bf16 %v1244_v5  ;;  %v2659_v52 = vunpack.c.h.s8.bf16 %v1243_v42  ;;  %v2701_v42 = vunpack.c.l.s8.bf16 %v1269_v36  ;;  %v1277_v5 = vld [vmem:[#allocation7 + $0xd18] sm:$0xff] }
 0x400   :  { %4811 = vmatprep.subr.bf16.mxu1 %v2605_v54  ;;  %v8401_v54 = vpack.c.bf16 %v724_v18, %v724_v18 }
 0x402   :  { %4156 = vmatpush1.bf16.msra.mxu0 %v2602_v56  ;;  %v1253_v56 = vld [vmem:[#allocation7 + $0xc58] sm:$0xff] }
 0x403   :  { %4812 = vmatpush1.bf16.msra.mxu1 %v2604_v57  ;;  %4157 = vmatprep.subr.bf16.mxu0 %v2611_v58  ;;  %v2658_v57 = vunpack.c.h.s8.bf16 %v1242_v10  ;;  %v2667_v58 = vunpack.c.l.s8.bf16 %v1251_v53  ;;  %v2669_v60 = vunpack.c.l.s8.bf16 %v1253_v56  ;;  %v2677_v35 = vunpack.c.h.s8.bf16 %v1253_v56 }
 0x404   :  { %4813 = vmatprep.subr.bf16.mxu1 %v2613_v59  ;;  %v1250_v59 = vld [vmem:[#allocation7 + $0xc40] sm:$0xff]  ;;  %v2709_v10 = vunpack.c.h.s8.bf16 %v1269_v36 }
 0x406   :  { %4158 = vmatpush1.bf16.msra.mxu0 %v2610_v63  ;;  %v2666_v63 = vunpack.c.l.s8.bf16 %v1250_v59 }
 0x407   :  { %4814 = vmatpush1.bf16.msra.mxu1 %v2612_v0  ;;  %4159 = vmatprep.subr.bf16.mxu0 %v2619_v1  ;;  %v2668_v0 = vunpack.c.l.s8.bf16 %v1252_v62  ;;  %v2675_v1 = vunpack.c.h.s8.bf16 %v1251_v53  ;;  %v2717_v53 = vunpack.c.l.s8.bf16 %v1277_v5 }
 0x408   :  { %4815 = vmatprep.subr.bf16.mxu1 %v2621_v2  ;;  %v1259_v2 = vld [vmem:[#allocation7 + $0xc88] sm:$0xff] }
 0x40a   :  { %4160 = vmatpush1.bf16.msra.mxu0 %v2618_v15  ;;  %v2674_v15 = vunpack.c.h.s8.bf16 %v1250_v59  ;;  %v1283_v59 = vld [vmem:[#allocation7 + $0xd48] sm:$0xff] }
 0x40b   :  { %4816 = vmatpush1.bf16.msra.mxu1 %v2620_v14  ;;  %4161 = vmatprep.subr.bf16.mxu0 %v2627_v16  ;;  %v2676_v14 = vunpack.c.h.s8.bf16 %v1252_v62  ;;  %v2683_v16 = vunpack.c.l.s8.bf16 %v1259_v2 }
 0x40c   :  { %4817 = vmatprep.subr.bf16.mxu1 %v2629_v20  ;;  %v1258_v20 = vld [vmem:[#allocation7 + $0xc80] sm:$0xff] }
 0x40e   :  { %4162 = vmatpush1.bf16.msra.mxu0 %v2626_v22  ;;  %v2682_v22 = vunpack.c.l.s8.bf16 %v1258_v20 }
 0x40f   :  { %4818 = vmatpush1.bf16.msra.mxu1 %v2628_v25  ;;  %4163 = vmatprep.subr.bf16.mxu0 %v2635_v6  ;;  %v2684_v25 = vunpack.c.l.s8.bf16 %v1260_v61  ;;  %v2691_v6 = vunpack.c.h.s8.bf16 %v1259_v2  ;;  %v1284_v2 = vld [vmem:[#allocation7 + $0xd50] sm:$0xff] }
 0x410   :  { %4819 = vmatprep.subr.bf16.mxu1 %v2637_v27  ;;  %v1267_v27 = vld [vmem:[#allocation7 + $0xcc8] sm:$0xff] }
 0x412   :  { %4164 = vmatpush1.bf16.msra.mxu0 %v2634_v29  ;;  %v2690_v29 = vunpack.c.h.s8.bf16 %v1258_v20  ;;  %v1291_v20 = vld [vmem:[#allocation7 + $0xd88] sm:$0xff] }
 0x413   :  { %4820 = vmatpush1.bf16.msra.mxu1 %v2636_v11  ;;  %4165 = vmatprep.subr.bf16.mxu0 %v2643_v40  ;;  %v2692_v11 = vunpack.c.h.s8.bf16 %v1260_v61  ;;  %v2699_v40 = vunpack.c.l.s8.bf16 %v1267_v27 }
 0x414   :  { %4821 = vmatprep.subr.bf16.mxu1 %v2645_v41  ;;  %v1266_v41 = vld [vmem:[#allocation7 + $0xcc0] sm:$0xff] }
 0x415   :  { %v2706_v18 = vunpack.c.h.s8.bf16 %v1266_v41 }
 0x416   :  { %4166 = vmatpush1.bf16.msra.mxu0 %v2642_v45  ;;  %v2698_v45 = vunpack.c.l.s8.bf16 %v1266_v41  ;;  %v1299_v41 = vld [vmem:[#allocation7 + $0xdc8] sm:$0xff] }
 0x417   :  { %4822 = vmatpush1.bf16.msra.mxu1 %v2644_v23  ;;  %4176 = vmatprep.subr.bf16.mxu0 %v2651_v46  ;;  %v2700_v23 = vunpack.c.l.s8.bf16 %v1268_v43  ;;  %v2707_v46 = vunpack.c.h.s8.bf16 %v1267_v27  ;;  %v1292_v27 = vld [vmem:[#allocation7 + $0xd90] sm:$0xff] }
 0x418   :  { %4832 = vmatprep.subr.bf16.mxu1 %v2653_v48  ;;  %v1275_v48 = vld [vmem:[#allocation7 + $0xd08] sm:$0xff] }
 0x419   :  { %4168 = vmatmul.mubr.bf16.vlgmr.msra.gmra.mrb[0].mxu0 %v8398_v50 }
 0x41a   :  { %4824 = vmatmul.mubr.bf16.vlgmr.msra.gmra.mrb[0].mxu1 %v8398_v50  ;;  %4177 = vmatpush1.bf16.msra.mxu0 %v2650_v49  ;;  %v2708_v49 = vunpack.c.h.s8.bf16 %v1268_v43 }
 0x41b   :  { %4208 = vmatprep.mubr.bf16.mxu0 %v8401_v54  ;;  %4833 = vmatpush1.bf16.msra.mxu1 %v2652_v51  ;;  %v2715_v51 = vunpack.c.l.s8.bf16 %v1275_v48 }
 0x41c   :  { %4864 = vmatprep.mubr.bf16.mxu1 %v8401_v54  ;;  %4178 = vmatprep.subr.bf16.mxu0 %v2659_v52  ;;  %v1274_v52 = vld [vmem:[#allocation7 + $0xd00] sm:$0xff] }
 0x41d   :  { %4834 = vmatprep.subr.bf16.mxu1 %v2661_v55  ;;  %v1276_v55 = vld [vmem:[#allocation7 + $0xd10] sm:$0xff]  ;;  %v2714_v56 = vunpack.c.l.s8.bf16 %v1274_v52  ;;  %v2722_v62 = vunpack.c.h.s8.bf16 %v1274_v52 }
 0x41e   :  { %4179 = vmatpush1.bf16.msra.mxu0 %v2658_v57  ;;  %v2716_v57 = vunpack.c.l.s8.bf16 %v1276_v55 }
 0x41f   :  { %4835 = vmatpush1.bf16.msra.mxu1 %v2660_v9  ;;  %4180 = vmatprep.subr.bf16.mxu0 %v2667_v58  ;;  %v2723_v9 = vunpack.c.h.s8.bf16 %v1275_v48  ;;  %v2725_v58 = vunpack.c.h.s8.bf16 %v1277_v5  ;;  %v1300_v48 = vld [vmem:[#allocation7 + $0xdd0] sm:$0xff]  ;;  %v709_v5 = vcombine.high %v8388_v39, %v8388_v39  ;;  %v1306_v39 = vld [vmem:[#allocation7 + $0xe00] sm:$0xff] }
 0x420   :  { %4836 = vmatprep.subr.bf16.mxu1 %v2669_v60  ;;  %v1285_v60 = vld [vmem:[#allocation7 + $0xd58] sm:$0xff] }
 0x422   :  { %4181 = vmatpush1.bf16.msra.mxu0 %v2666_v63  ;;  %v2724_v63 = vunpack.c.h.s8.bf16 %v1276_v55  ;;  %v1309_v55 = vld [vmem:[#allocation7 + $0xe18] sm:$0xff] }
 0x423   :  { %4837 = vmatpush1.bf16.msra.mxu1 %v2668_v0  ;;  %4182 = vmatprep.subr.bf16.mxu0 %v2675_v1  ;;  %v2731_v0 = vunpack.c.l.s8.bf16 %v1283_v59  ;;  %v1282_v1 = vld [vmem:[#allocation7 + $0xd40] sm:$0xff] }
 0x424   :  { %4838 = vmatprep.subr.bf16.mxu1 %v2677_v35  ;;  %v2733_v35 = vunpack.c.l.s8.bf16 %v1285_v60  ;;  %v2730_v13 = vunpack.c.l.s8.bf16 %v1282_v1  ;;  %v2738_v61 = vunpack.c.h.s8.bf16 %v1282_v1 }
 0x426   :  { %4183 = vmatpush1.bf16.msra.mxu0 %v2674_v15  ;;  %v2732_v15 = vunpack.c.l.s8.bf16 %v1284_v2 }
 0x427   :  { %4839 = vmatpush1.bf16.msra.mxu1 %v2676_v14  ;;  %4184 = vmatprep.subr.bf16.mxu0 %v2683_v16  ;;  %v2739_v14 = vunpack.c.h.s8.bf16 %v1283_v59  ;;  %v2741_v16 = vunpack.c.h.s8.bf16 %v1285_v60  ;;  %v2781_v59 = vunpack.c.l.s8.bf16 %v1309_v55  ;;  %v1308_v60 = vld [vmem:[#allocation7 + $0xe10] sm:$0xff] }
 0x428   :  { %4840 = vmatprep.subr.bf16.mxu1 %v2685_v21  ;;  %v1293_v21 = vld [vmem:[#allocation7 + $0xd98] sm:$0xff]  ;;  %v2780_v1 = vunpack.c.l.s8.bf16 %v1308_v60 }
 0x42a   :  { %4185 = vmatpush1.bf16.msra.mxu0 %v2682_v22  ;;  %v2740_v22 = vunpack.c.h.s8.bf16 %v1284_v2  ;;  %v1315_v2 = vld [vmem:[#allocation7 + $0xe48] sm:$0xff] }
 0x42b   :  { %4841 = vmatpush1.bf16.msra.mxu1 %v2684_v25  ;;  %4186 = vmatprep.subr.bf16.mxu0 %v2691_v6  ;;  %v2747_v25 = vunpack.c.l.s8.bf16 %v1291_v20  ;;  %v1290_v6 = vld [vmem:[#allocation7 + $0xd80] sm:$0xff] }
 0x42c   :  { %4842 = vmatprep.subr.bf16.mxu1 %v2693_v26  ;;  %v2749_v26 = vunpack.c.l.s8.bf16 %v1293_v21  ;;  %v2746_v36 = vunpack.c.l.s8.bf16 %v1290_v6  ;;  %v2754_v43 = vunpack.c.h.s8.bf16 %v1290_v6 }
 0x42e   :  { %4187 = vmatpush1.bf16.msra.mxu0 %v2690_v29  ;;  %v2748_v29 = vunpack.c.l.s8.bf16 %v1292_v27 }
 0x42f   :  { %4843 = vmatpush1.bf16.msra.mxu1 %v2692_v11  ;;  %4188 = vmatprep.subr.bf16.mxu0 %v2699_v40  ;;  %v2755_v11 = vunpack.c.h.s8.bf16 %v1291_v20  ;;  %v2757_v40 = vunpack.c.h.s8.bf16 %v1293_v21  ;;  %v2795_v20 = vunpack.c.l.s8.bf16 %v1315_v2  ;;  %v1314_v21 = vld [vmem:[#allocation7 + $0xe40] sm:$0xff] }
 0x430   :  { %4844 = vmatprep.subr.bf16.mxu1 %v2701_v42  ;;  %v1301_v42 = vld [vmem:[#allocation7 + $0xdd8] sm:$0xff] }
 0x431   :  { %v2773_v52 = vunpack.c.h.s8.bf16 %v1301_v42 }
 0x432   :  { %4189 = vmatpush1.bf16.msra.mxu0 %v2698_v45  ;;  %v2756_v45 = vunpack.c.h.s8.bf16 %v1292_v27 }
 0x433   :  { %4845 = vmatpush1.bf16.msra.mxu1 %v2700_v23  ;;  %4190 = vmatprep.subr.bf16.mxu0 %v2707_v46  ;;  %v2763_v23 = vunpack.c.l.s8.bf16 %v1299_v41  ;;  %v1298_v46 = vld [vmem:[#allocation7 + $0xdc0] sm:$0xff] }
 0x434   :  { %4846 = vmatprep.subr.bf16.mxu1 %v2709_v10  ;;  %v2765_v10 = vunpack.c.l.s8.bf16 %v1301_v42  ;;  %v1322_v42 = vld [vmem:[#allocation7 + $0xe80] sm:$0xff] }
 0x436   :  { %4191 = vmatpush1.bf16.msra.mxu0 %v2706_v18  ;;  %v2762_v18 = vunpack.c.l.s8.bf16 %v1298_v46 }
 0x437   :  { %4847 = vmatpush1.bf16.msra.mxu1 %v2708_v49  ;;  %4192 = vmatprep.subr.bf16.mxu0 %v2715_v51  ;;  %v2764_v49 = vunpack.c.l.s8.bf16 %v1300_v48  ;;  %v2771_v51 = vunpack.c.h.s8.bf16 %v1299_v41 }
 0x438   :  { %4848 = vmatprep.subr.bf16.mxu1 %v2717_v53  ;;  %v1307_v53 = vld [vmem:[#allocation7 + $0xe08] sm:$0xff] }
 0x43a   :  { %4193 = vmatpush1.bf16.msra.mxu0 %v2714_v56  ;;  %v8409_v56 = vrot.slane %v709_v5, %v8095_v8  ;;  %v1331_v5 = vld [vmem:[#allocation7 + $0xec8] sm:$0xff] }
 0x43b   :  { %4849 = vmatpush1.bf16.msra.mxu1 %v2716_v57  ;;  %4194 = vmatprep.subr.bf16.mxu0 %v2723_v9  ;;  %v2770_v57 = vunpack.c.h.s8.bf16 %v1298_v46  ;;  %v2772_v9 = vunpack.c.h.s8.bf16 %v1300_v48 }
 0x43c   :  { %4850 = vmatprep.subr.bf16.mxu1 %v2725_v58  ;;  %v2779_v58 = vunpack.c.l.s8.bf16 %v1307_v53 }
 0x43e   :  { %4195 = vmatpush1.bf16.msra.mxu0 %v2722_v62  ;;  %v725_v62 = vcombine.high %v8409_v56, %v8409_v56 }
 0x43f   :  { %4851 = vmatpush1.bf16.msra.mxu1 %v2724_v63  ;;  %4196 = vmatprep.subr.bf16.mxu0 %v2731_v0  ;;  %v2778_v63 = vunpack.c.l.s8.bf16 %v1306_v39  ;;  %v8415_v0 = vpack.c.bf16 %v8392_v44, %v8392_v44  ;;  %v2788_v44 = vunpack.c.h.s8.bf16 %v1308_v60  ;;  %v1339_v60 = vld [vmem:[#allocation7 + $0xf08] sm:$0xff] }
 0x440   :  { %4852 = vmatprep.subr.bf16.mxu1 %v2733_v35  ;;  %v2787_v35 = vunpack.c.h.s8.bf16 %v1307_v53  ;;  %v1330_v53 = vld [vmem:[#allocation7 + $0xec0] sm:$0xff] }
 0x442   :  { %4197 = vmatpush1.bf16.msra.mxu0 %v2730_v13  ;;  %v8418_v13 = vpack.c.bf16 %v725_v62, %v725_v62  ;;  %v1341_v62 = vld [vmem:[#allocation7 + $0xf18] sm:$0xff] }
 0x443   :  { %4853 = vmatpush1.bf16.msra.mxu1 %v2732_v15  ;;  %4198 = vmatprep.subr.bf16.mxu0 %v2739_v14  ;;  %v2789_v15 = vunpack.c.h.s8.bf16 %v1309_v55  ;;  %v1317_v14 = vld [vmem:[#allocation7 + $0xe58] sm:$0xff] }
 0x444   :  { %4854 = vmatprep.subr.bf16.mxu1 %v2741_v16  ;;  %v2786_v16 = vunpack.c.h.s8.bf16 %v1306_v39  ;;  %v2805_v27 = vunpack.c.h.s8.bf16 %v1317_v14  ;;  %v2835_v39 = vunpack.c.h.s8.bf16 %v1331_v5 }
 0x446   :  { %4199 = vmatpush1.bf16.msra.mxu0 %v2738_v61  ;;  %v2797_v61 = vunpack.c.l.s8.bf16 %v1317_v14  ;;  %v1340_v14 = vld [vmem:[#allocation7 + $0xf10] sm:$0xff] }
 0x447   :  { %4855 = vmatpush1.bf16.msra.mxu1 %v2740_v22  ;;  %4200 = vmatprep.subr.bf16.mxu0 %v2747_v25  ;;  %v1316_v22 = vld [vmem:[#allocation7 + $0xe50] sm:$0xff]  ;;  %v2794_v25 = vunpack.c.l.s8.bf16 %v1314_v21 }
 0x448   :  { %4856 = vmatprep.subr.bf16.mxu1 %v2749_v26  ;;  %v2796_v6 = vunpack.c.l.s8.bf16 %v1316_v22  ;;  %v2803_v26 = vunpack.c.h.s8.bf16 %v1315_v2  ;;  %v1338_v2 = vld [vmem:[#allocation7 + $0xf00] sm:$0xff] }
 0x44a   :  { %4201 = vmatpush1.bf16.msra.mxu0 %v2746_v36  ;;  %v1323_v36 = vld [vmem:[#allocation7 + $0xe88] sm:$0xff] }
 0x44b   :  { %4857 = vmatpush1.bf16.msra.mxu1 %v2748_v29  ;;  %4202 = vmatprep.subr.bf16.mxu0 %v2755_v11  ;;  %v1325_v29 = vld [vmem:[#allocation7 + $0xe98] sm:$0xff]  ;;  %v2802_v11 = vunpack.c.h.s8.bf16 %v1314_v21  ;;  %v2811_v41 = vunpack.c.l.s8.bf16 %v1323_v36  ;;  %v2853_v21 = vunpack.c.h.s8.bf16 %v1341_v62 }
 0x44c   :  { %4858 = vmatprep.subr.bf16.mxu1 %v2757_v40  ;;  %v2804_v40 = vunpack.c.h.s8.bf16 %v1316_v22  ;;  %v2821_v48 = vunpack.c.h.s8.bf16 %v1325_v29  ;;  %v1349_v22 = vld [vmem:[#allocation7 + $0xf58] sm:$0xff] }
 0x44e   :  { %4203 = vmatpush1.bf16.msra.mxu0 %v2754_v43  ;;  %v2813_v43 = vunpack.c.l.s8.bf16 %v1325_v29  ;;  %v1348_v29 = vld [vmem:[#allocation7 + $0xf50] sm:$0xff] }
 0x44f   :  { %4859 = vmatpush1.bf16.msra.mxu1 %v2756_v45  ;;  %4204 = vmatprep.subr.bf16.mxu0 %v2763_v23  ;;  %v1324_v45 = vld [vmem:[#allocation7 + $0xe90] sm:$0xff]  ;;  %v2810_v23 = vunpack.c.l.s8.bf16 %v1322_v42 }
 0x450   :  { %4860 = vmatprep.subr.bf16.mxu1 %v2765_v10  ;;  %v2812_v46 = vunpack.c.l.s8.bf16 %v1324_v45  ;;  %v2819_v10 = vunpack.c.h.s8.bf16 %v1323_v36  ;;  %v2861_v36 = vunpack.c.l.s8.bf16 %v1349_v22 }
 0x452   :  { %4205 = vmatpush1.bf16.msra.mxu0 %v2762_v18  ;;  %v1333_v18 = vld [vmem:[#allocation7 + $0xed8] sm:$0xff] }
 0x453   :  { %4861 = vmatpush1.bf16.msra.mxu1 %v2764_v49  ;;  %4206 = vmatprep.subr.bf16.mxu0 %v2771_v51  ;;  %v2818_v49 = vunpack.c.h.s8.bf16 %v1322_v42  ;;  %v2820_v51 = vunpack.c.h.s8.bf16 %v1324_v45  ;;  %v2829_v55 = vunpack.c.l.s8.bf16 %v1333_v18  ;;  %v2869_v42 = vunpack.c.h.s8.bf16 %v1349_v22  ;;  %v1357_v45 = vld [vmem:[#allocation7 + $0xf98] sm:$0xff] }
 0x454   :  { %4862 = vmatprep.subr.bf16.mxu1 %v2773_v52  ;;  %v2827_v52 = vunpack.c.l.s8.bf16 %v1331_v5  ;;  %v2877_v5 = vunpack.c.l.s8.bf16 %v1357_v45 }
 0x456   :  { %4207 = vmatpush1.bf16.msra.mxu0 %v2770_v57  ;;  %v1332_v57 = vld [vmem:[#allocation7 + $0xed0] sm:$0xff] }
 0x457   :  { %4863 = vmatpush1.bf16.msra.mxu1 %v2772_v9  ;;  %4217 = vmatprep.subr.bf16.mxu0 %v2779_v58  ;;  %v2826_v9 = vunpack.c.l.s8.bf16 %v1330_v53  ;;  %v2828_v58 = vunpack.c.l.s8.bf16 %v1332_v57 }
 0x458   :  { %4873 = vmatprep.subr.bf16.mxu1 %v2781_v59  ;;  %v2837_v59 = vunpack.c.h.s8.bf16 %v1333_v18  ;;  %v1356_v18 = vld [vmem:[#allocation7 + $0xf90] sm:$0xff] }
 0x459   :  { %4209 = vmatmul.mubr.bf16.vlgmr.msra.gmra.mrb[0].mxu0 %v8415_v0 }
 0x45a   :  { %4865 = vmatmul.mubr.bf16.vlgmr.msra.gmra.mrb[0].mxu1 %v8415_v0  ;;  %4218 = vmatpush1.bf16.msra.mxu0 %v2778_v63  ;;  %v2834_v63 = vunpack.c.h.s8.bf16 %v1330_v53  ;;  %v2885_v53 = vunpack.c.h.s8.bf16 %v1357_v45 }
 0x45b   :  { %4249 = vmatprep.mubr.bf16.mxu0 %v8418_v13  ;;  %4874 = vmatpush1.bf16.msra.mxu1 %v2780_v1  ;;  %v2836_v1 = vunpack.c.h.s8.bf16 %v1332_v57  ;;  %v1365_v57 = vld [vmem:[#allocation7 + $0xfd8] sm:$0xff] }
 0x45c   :  { %4905 = vmatprep.mubr.bf16.mxu1 %v8418_v13  ;;  %4219 = vmatprep.subr.bf16.mxu0 %v2787_v35  ;;  %v2843_v35 = vunpack.c.l.s8.bf16 %v1339_v60 }
 0x45d   :  { %4875 = vmatprep.subr.bf16.mxu1 %v2789_v15  ;;  %v2845_v15 = vunpack.c.l.s8.bf16 %v1341_v62  ;;  %v1364_v62 = vld [vmem:[#allocation7 + $0xfd0] sm:$0xff] }
 0x45e   :  { %4220 = vmatpush1.bf16.msra.mxu0 %v2786_v16  ;;  %v2842_v16 = vunpack.c.l.s8.bf16 %v1338_v2 }
 0x45f   :  { %4876 = vmatpush1.bf16.msra.mxu1 %v2788_v44  ;;  %4221 = vmatprep.subr.bf16.mxu0 %v2795_v20  ;;  %v2844_v44 = vunpack.c.l.s8.bf16 %v1340_v14  ;;  %v2851_v20 = vunpack.c.h.s8.bf16 %v1339_v60  ;;  %v2893_v60 = vunpack.c.l.s8.bf16 %v1365_v57 }
 0x460   :  { %4877 = vmatprep.subr.bf16.mxu1 %v2797_v61  ;;  %v1347_v61 = vld [vmem:[#allocation7 + $0xf48] sm:$0xff] }
 0x462   :  { %4222 = vmatpush1.bf16.msra.mxu0 %v2794_v25  ;;  %v2850_v25 = vunpack.c.h.s8.bf16 %v1338_v2 }
 0x463   :  { %4878 = vmatpush1.bf16.msra.mxu1 %v2796_v6  ;;  %4223 = vmatprep.subr.bf16.mxu0 %v2803_v26  ;;  %v2852_v6 = vunpack.c.h.s8.bf16 %v1340_v14  ;;  %v2859_v26 = vunpack.c.l.s8.bf16 %v1347_v61  ;;  %v1371_v14 = vld [vmem:[#allocation7 + $0x1008] sm:$0xff] }
 0x464   :  { %4879 = vmatprep.subr.bf16.mxu1 %v2805_v27  ;;  %v1346_v27 = vld [vmem:[#allocation7 + $0xf40] sm:$0xff] }
 0x466   :  { %4224 = vmatpush1.bf16.msra.mxu0 %v2802_v11  ;;  %v2858_v11 = vunpack.c.l.s8.bf16 %v1346_v27 }
 0x467   :  { %4880 = vmatpush1.bf16.msra.mxu1 %v2804_v40  ;;  %4225 = vmatprep.subr.bf16.mxu0 %v2811_v41  ;;  %v2860_v40 = vunpack.c.l.s8.bf16 %v1348_v29  ;;  %v2867_v41 = vunpack.c.h.s8.bf16 %v1347_v61  ;;  %v1370_v61 = vld [vmem:[#allocation7 + $0x1000] sm:$0xff] }
 0x468   :  { %4881 = vmatprep.subr.bf16.mxu1 %v2813_v43  ;;  %v1355_v43 = vld [vmem:[#allocation7 + $0xf88] sm:$0xff] }
 0x46a   :  { %4226 = vmatpush1.bf16.msra.mxu0 %v2810_v23  ;;  %v2866_v23 = vunpack.c.h.s8.bf16 %v1346_v27  ;;  %v8434_v27 = vpack.c.bf16 %v8409_v56, %v8409_v56 }
 0x46b   :  { %4882 = vmatpush1.bf16.msra.mxu1 %v2812_v46  ;;  %4227 = vmatprep.subr.bf16.mxu0 %v2819_v10  ;;  %v2868_v46 = vunpack.c.h.s8.bf16 %v1348_v29  ;;  %v2875_v10 = vunpack.c.l.s8.bf16 %v1355_v43  ;;  %v2915_v29 = vunpack.c.h.s8.bf16 %v1371_v14 }
 0x46c   :  { %4883 = vmatprep.subr.bf16.mxu1 %v2821_v48  ;;  %v1354_v48 = vld [vmem:[#allocation7 + $0xf80] sm:$0xff] }
 0x46e   :  { %4228 = vmatpush1.bf16.msra.mxu0 %v2818_v49  ;;  %v2874_v49 = vunpack.c.l.s8.bf16 %v1354_v48 }
 0x46f   :  { %4884 = vmatpush1.bf16.msra.mxu1 %v2820_v51  ;;  %4229 = vmatprep.subr.bf16.mxu0 %v2827_v52  ;;  %v2876_v51 = vunpack.c.l.s8.bf16 %v1356_v18  ;;  %v2883_v52 = vunpack.c.h.s8.bf16 %v1355_v43  ;;  %v2914_v43 = vunpack.c.h.s8.bf16 %v1370_v61 }
 0x470   :  { %4885 = vmatprep.subr.bf16.mxu1 %v2829_v55  ;;  %v1363_v55 = vld [vmem:[#allocation7 + $0xfc8] sm:$0xff] }
 0x471   :  { %v2899_v2 = vunpack.c.h.s8.bf16 %v1363_v55 }
 0x472   :  { %4230 = vmatpush1.bf16.msra.mxu0 %v2826_v9  ;;  %v2882_v9 = vunpack.c.h.s8.bf16 %v1354_v48 }
 0x473   :  { %4886 = vmatpush1.bf16.msra.mxu1 %v2828_v58  ;;  %4231 = vmatprep.subr.bf16.mxu0 %v2835_v39  ;;  %v2884_v58 = vunpack.c.h.s8.bf16 %v1356_v18  ;;  %v2891_v39 = vunpack.c.l.s8.bf16 %v1363_v55 }
 0x474   :  { %4887 = vmatprep.subr.bf16.mxu1 %v2837_v59  ;;  %v1362_v59 = vld [vmem:[#allocation7 + $0xfc0] sm:$0xff] }
 0x476   :  { %4232 = vmatpush1.bf16.msra.mxu0 %v2834_v63  ;;  %v8424_v63 = vmax.f32 %v8282_v24, 0.0  ;;  %v2900_v24 = vunpack.c.h.s8.bf16 %v1364_v62 }
 0x477   :  { %4888 = vmatpush1.bf16.msra.mxu1 %v2836_v1  ;;  %4233 = vmatprep.subr.bf16.mxu0 %v2843_v35  ;;  %v2890_v1 = vunpack.c.l.s8.bf16 %v1362_v59  ;;  %v2892_v35 = vunpack.c.l.s8.bf16 %v1364_v62 }
 0x478   :  { %4889 = vmatprep.subr.bf16.mxu1 %v2845_v15  ;;  %v2901_v15 = vunpack.c.h.s8.bf16 %v1365_v57 }
 0x47a   :  { %4234 = vmatpush1.bf16.msra.mxu0 %v2842_v16  ;;  %v1373_v16 = vld [vmem:[#allocation7 + $0x1018] sm:$0xff] }
 0x47b   :  { %4890 = vmatpush1.bf16.msra.mxu1 %v2844_v44  ;;  %4235 = vmatprep.subr.bf16.mxu0 %v2851_v20  ;;  %v8428_v44 = vrot.slane %v8424_v63, %v8095_v8  ;;  %v2898_v20 = vunpack.c.h.s8.bf16 %v1362_v59  ;;  %v2909_v22 = vunpack.c.l.s8.bf16 %v1373_v16 }
 0x47c   :  { %4891 = vmatprep.subr.bf16.mxu1 %v2853_v21  ;;  %v2907_v21 = vunpack.c.l.s8.bf16 %v1371_v14 }
 0x47e   :  { %4236 = vmatpush1.bf16.msra.mxu0 %v2850_v25  ;;  %v1372_v25 = vld [vmem:[#allocation7 + $0x1010] sm:$0xff] }
 0x47f   :  { %4892 = vmatpush1.bf16.msra.mxu1 %v2852_v6  ;;  %4237 = vmatprep.subr.bf16.mxu0 %v2859_v26  ;;  %v741_v6 = vcombine.high %v8428_v44, %v8428_v44  ;;  %v2906_v26 = vunpack.c.l.s8.bf16 %v1370_v61  ;;  %v2916_v56 = vunpack.c.h.s8.bf16 %v1372_v25 }
 0x480   :  { %4893 = vmatprep.subr.bf16.mxu1 %v2861_v36  ;;  %v2908_v36 = vunpack.c.l.s8.bf16 %v1372_v25 }
 0x482   :  { %4238 = vmatpush1.bf16.msra.mxu0 %v2858_v11  ;;  %v1379_v11 = vld [vmem:[#allocation7 + $0x1048] sm:$0xff] }
 0x483   :  { %4894 = vmatpush1.bf16.msra.mxu1 %v2860_v40  ;;  %4239 = vmatprep.subr.bf16.mxu0 %v2867_v41  ;;  %v8437_v40 = vpack.c.bf16 %v741_v6, %v741_v6  ;;  %v2917_v41 = vunpack.c.h.s8.bf16 %v1373_v16  ;;  %v2923_v45 = vunpack.c.l.s8.bf16 %v1379_v11  ;;  %v2931_v18 = vunpack.c.h.s8.bf16 %v1379_v11 }
 0x484   :  { %4895 = vmatprep.subr.bf16.mxu1 %v2869_v42  ;;  %v1381_v42 = vld [vmem:[#allocation7 + $0x1058] sm:$0xff] }
 0x486   :  { %4240 = vmatpush1.bf16.msra.mxu0 %v2866_v23  ;;  %v1378_v23 = vld [vmem:[#allocation7 + $0x1040] sm:$0xff] }
 0x487   :  { %4896 = vmatpush1.bf16.msra.mxu1 %v2868_v46  ;;  %4241 = vmatprep.subr.bf16.mxu0 %v2875_v10  ;;  %v2925_v46 = vunpack.c.l.s8.bf16 %v1381_v42  ;;  %v1380_v10 = vld [vmem:[#allocation7 + $0x1050] sm:$0xff]  ;;  %v2922_v48 = vunpack.c.l.s8.bf16 %v1378_v23 }
 0x488   :  { %4897 = vmatprep.subr.bf16.mxu1 %v2877_v5  ;;  %v2924_v5 = vunpack.c.l.s8.bf16 %v1380_v10  ;;  %v2932_v55 = vunpack.c.h.s8.bf16 %v1380_v10 }
 0x48a   :  { %4242 = vmatpush1.bf16.msra.mxu0 %v2874_v49  ;;  %v2933_v49 = vunpack.c.h.s8.bf16 %v1381_v42  ;;  %v1402_v42 = vld [vmem:[#allocation7 + $0x1100] sm:$0xff] }
 0x48b   :  { %4898 = vmatpush1.bf16.msra.mxu1 %v2876_v51  ;;  %4243 = vmatprep.subr.bf16.mxu0 %v2883_v52  ;;  %v1387_v51 = vld [vmem:[#allocation7 + $0x1088] sm:$0xff]  ;;  %v1389_v52 = vld [vmem:[#allocation7 + $0x1098] sm:$0xff] }
 0x48c   :  { %4899 = vmatprep.subr.bf16.mxu1 %v2885_v53  ;;  %v2930_v53 = vunpack.c.h.s8.bf16 %v1378_v23  ;;  %v2939_v57 = vunpack.c.l.s8.bf16 %v1387_v51  ;;  %v2947_v62 = vunpack.c.h.s8.bf16 %v1387_v51 }
 0x48e   :  { %4244 = vmatpush1.bf16.msra.mxu0 %v2882_v9  ;;  %v1386_v9 = vld [vmem:[#allocation7 + $0x1080] sm:$0xff] }
 0x48f   :  { %4900 = vmatpush1.bf16.msra.mxu1 %v2884_v58  ;;  %4245 = vmatprep.subr.bf16.mxu0 %v2891_v39  ;;  %v2941_v58 = vunpack.c.l.s8.bf16 %v1389_v52  ;;  %v1388_v39 = vld [vmem:[#allocation7 + $0x1090] sm:$0xff]  ;;  %v2938_v59 = vunpack.c.l.s8.bf16 %v1386_v9 }
 0x490   :  { %4901 = vmatprep.subr.bf16.mxu1 %v2893_v60  ;;  %v2940_v60 = vunpack.c.l.s8.bf16 %v1388_v39  ;;  %v2948_v14 = vunpack.c.h.s8.bf16 %v1388_v39 }
 0x492   :  { %4246 = vmatpush1.bf16.msra.mxu0 %v2890_v1  ;;  %v2949_v1 = vunpack.c.h.s8.bf16 %v1389_v52  ;;  %v1410_v52 = vld [vmem:[#allocation7 + $0x1140] sm:$0xff] }
 0x493   :  { %4902 = vmatpush1.bf16.msra.mxu1 %v2892_v35  ;;  %4247 = vmatprep.subr.bf16.mxu0 %v2899_v2  ;;  %v1395_v35 = vld [vmem:[#allocation7 + $0x10c8] sm:$0xff]  ;;  %v1397_v2 = vld [vmem:[#allocation7 + $0x10d8] sm:$0xff] }
 0x494   :  { %4903 = vmatprep.subr.bf16.mxu1 %v2901_v15  ;;  %v2946_v15 = vunpack.c.h.s8.bf16 %v1386_v9  ;;  %v2955_v16 = vunpack.c.l.s8.bf16 %v1395_v35  ;;  %v2963_v25 = vunpack.c.h.s8.bf16 %v1395_v35  ;;  %v2965_v6 = vunpack.c.h.s8.bf16 %v1397_v2 }
 0x496   :  { %4248 = vmatpush1.bf16.msra.mxu0 %v2898_v20  ;;  %v1394_v20 = vld [vmem:[#allocation7 + $0x10c0] sm:$0xff] }
 0x497   :  { %4904 = vmatpush1.bf16.msra.mxu1 %v2900_v24  ;;  %4258 = vmatprep.subr.bf16.mxu0 %v2907_v21  ;;  %v2957_v24 = vunpack.c.l.s8.bf16 %v1397_v2  ;;  %v1396_v21 = vld [vmem:[#allocation7 + $0x10d0] sm:$0xff]  ;;  %v2954_v61 = vunpack.c.l.s8.bf16 %v1394_v20  ;;  %v1418_v2 = vld [vmem:[#allocation7 + $0x1180] sm:$0xff] }
 0x498   :  { %4914 = vmatprep.subr.bf16.mxu1 %v2909_v22  ;;  %v2956_v22 = vunpack.c.l.s8.bf16 %v1396_v21  ;;  %v2964_v11 = vunpack.c.h.s8.bf16 %v1396_v21 }
 0x499   :  { %4250 = vmatmul.mubr.bf16.vlgmr.msra.gmra.mrb[0].mxu0 %v8434_v27 }
 0x49a   :  { %4906 = vmatmul.mubr.bf16.vlgmr.msra.gmra.mrb[0].mxu1 %v8434_v27  ;;  %4259 = vmatpush1.bf16.msra.mxu0 %v2906_v26  ;;  %v1403_v26 = vld [vmem:[#allocation7 + $0x1108] sm:$0xff] }
 0x49b   :  { %4290 = vmatprep.mubr.bf16.mxu0 %v8437_v40  ;;  %4915 = vmatpush1.bf16.msra.mxu1 %v2908_v36  ;;  %v1405_v36 = vld [vmem:[#allocation7 + $0x1118] sm:$0xff] }
 0x49c   :  { %4946 = vmatprep.mubr.bf16.mxu1 %v8437_v40  ;;  %4260 = vmatprep.subr.bf16.mxu0 %v2915_v29  ;;  %v2962_v29 = vunpack.c.h.s8.bf16 %v1394_v20  ;;  %v2981_v10 = vunpack.c.h.s8.bf16 %v1405_v36 }
 0x49d   :  { %4916 = vmatprep.subr.bf16.mxu1 %v2917_v41  ;;  %v2971_v41 = vunpack.c.l.s8.bf16 %v1403_v26 }
 0x49e   :  { %4261 = vmatpush1.bf16.msra.mxu0 %v2914_v43  ;;  %v2973_v43 = vunpack.c.l.s8.bf16 %v1405_v36  ;;  %v1426_v36 = vld [vmem:[#allocation7 + $0x11c0] sm:$0xff] }
 0x49f   :  { %4917 = vmatpush1.bf16.msra.mxu1 %v2916_v56  ;;  %4262 = vmatprep.subr.bf16.mxu0 %v2923_v45  ;;  %v1404_v56 = vld [vmem:[#allocation7 + $0x1110] sm:$0xff]  ;;  %v2970_v45 = vunpack.c.l.s8.bf16 %v1402_v42 }
 0x4a0   :  { %4918 = vmatprep.subr.bf16.mxu1 %v2925_v46  ;;  %v2972_v23 = vunpack.c.l.s8.bf16 %v1404_v56  ;;  %v2979_v46 = vunpack.c.h.s8.bf16 %v1403_v26 }
 0x4a2   :  { %4263 = vmatpush1.bf16.msra.mxu0 %v2922_v48  ;;  %v1411_v48 = vld [vmem:[#allocation7 + $0x1148] sm:$0xff] }
 0x4a3   :  { %4919 = vmatpush1.bf16.msra.mxu1 %v2924_v5  ;;  %4264 = vmatprep.subr.bf16.mxu0 %v2931_v18  ;;  %v1413_v5 = vld [vmem:[#allocation7 + $0x1158] sm:$0xff]  ;;  %v2978_v18 = vunpack.c.h.s8.bf16 %v1402_v42  ;;  %v2987_v51 = vunpack.c.l.s8.bf16 %v1411_v48  ;;  %v3018_v42 = vunpack.c.l.s8.bf16 %v1426_v36 }
 0x4a4   :  { %4920 = vmatprep.subr.bf16.mxu1 %v2933_v49  ;;  %v2980_v49 = vunpack.c.h.s8.bf16 %v1404_v56  ;;  %v2997_v39 = vunpack.c.h.s8.bf16 %v1413_v5 }
 0x4a6   :  { %4265 = vmatpush1.bf16.msra.mxu0 %v2930_v53  ;;  %v2989_v53 = vunpack.c.l.s8.bf16 %v1413_v5 }
 0x4a7   :  { %4921 = vmatpush1.bf16.msra.mxu1 %v2932_v55  ;;  %4266 = vmatprep.subr.bf16.mxu0 %v2939_v57  ;;  %v1412_v55 = vld [vmem:[#allocation7 + $0x1150] sm:$0xff]  ;;  %v2986_v57 = vunpack.c.l.s8.bf16 %v1410_v52 }
 0x4a8   :  { %4922 = vmatprep.subr.bf16.mxu1 %v2941_v58  ;;  %v2988_v9 = vunpack.c.l.s8.bf16 %v1412_v55  ;;  %v2995_v58 = vunpack.c.h.s8.bf16 %v1411_v48  ;;  %v3026_v48 = vunpack.c.h.s8.bf16 %v1426_v36 }
 0x4aa   :  { %4267 = vmatpush1.bf16.msra.mxu0 %v2938_v59  ;;  %v1419_v59 = vld [vmem:[#allocation7 + $0x1188] sm:$0xff] }
 0x4ab   :  { %4923 = vmatpush1.bf16.msra.mxu1 %v2940_v60  ;;  %4268 = vmatprep.subr.bf16.mxu0 %v2947_v62  ;;  %v1421_v60 = vld [vmem:[#allocation7 + $0x1198] sm:$0xff]  ;;  %v2994_v62 = vunpack.c.h.s8.bf16 %v1410_v52  ;;  %v3003_v35 = vunpack.c.l.s8.bf16 %v1419_v59 }
 0x4ac   :  { %4924 = vmatprep.subr.bf16.mxu1 %v2949_v1  ;;  %v2996_v1 = vunpack.c.h.s8.bf16 %v1412_v55  ;;  %v3013_v21 = vunpack.c.h.s8.bf16 %v1421_v60  ;;  %v8451_v55 = vpack.c.bf16 %v8428_v44, %v8428_v44 }
 0x4ae   :  { %4269 = vmatpush1.bf16.msra.mxu0 %v2946_v15  ;;  %v3005_v15 = vunpack.c.l.s8.bf16 %v1421_v60  ;;  %v1445_v60 = vld [vmem:[#allocation7 + $0x1258] sm:$0xff] }
 0x4af   :  { %4925 = vmatpush1.bf16.msra.mxu1 %v2948_v14  ;;  %4270 = vmatprep.subr.bf16.mxu0 %v2955_v16  ;;  %v1420_v14 = vld [vmem:[#allocation7 + $0x1190] sm:$0xff]  ;;  %v3002_v16 = vunpack.c.l.s8.bf16 %v1418_v2 }
 0x4b0   :  { %4926 = vmatprep.subr.bf16.mxu1 %v2957_v24  ;;  %v3004_v20 = vunpack.c.l.s8.bf16 %v1420_v14  ;;  %v3011_v24 = vunpack.c.h.s8.bf16 %v1419_v59 }
 0x4b2   :  { %4271 = vmatpush1.bf16.msra.mxu0 %v2954_v61  ;;  %v1427_v61 = vld [vmem:[#allocation7 + $0x11c8] sm:$0xff] }
 0x4b3   :  { %4927 = vmatpush1.bf16.msra.mxu1 %v2956_v22  ;;  %4272 = vmatprep.subr.bf16.mxu0 %v2963_v25  ;;  %v1429_v22 = vld [vmem:[#allocation7 + $0x11d8] sm:$0xff]  ;;  %v3010_v25 = vunpack.c.h.s8.bf16 %v1418_v2  ;;  %v3019_v26 = vunpack.c.l.s8.bf16 %v1427_v61  ;;  %v3027_v56 = vunpack.c.h.s8.bf16 %v1427_v61  ;;  %v3053_v2 = vunpack.c.l.s8.bf16 %v1445_v60 }
 0x4b4   :  { %4928 = vmatprep.subr.bf16.mxu1 %v2965_v6  ;;  %v3012_v6 = vunpack.c.h.s8.bf16 %v1420_v14  ;;  %v1453_v61 = vld [vmem:[#allocation7 + $0x1298] sm:$0xff] }
 0x4b5   :  { %v3069_v36 = vunpack.c.l.s8.bf16 %v1453_v61 }
 0x4b6   :  { %4273 = vmatpush1.bf16.msra.mxu0 %v2962_v29  ;;  %v3021_v29 = vunpack.c.l.s8.bf16 %v1429_v22 }
 0x4b7   :  { %4929 = vmatpush1.bf16.msra.mxu1 %v2964_v11  ;;  %4274 = vmatprep.subr.bf16.mxu0 %v2971_v41  ;;  %v1428_v11 = vld [vmem:[#allocation7 + $0x11d0] sm:$0xff]  ;;  %v726_v41 = vcombine.high %v8424_v63, %v8424_v63  ;;  %v1434_v63 = vld [vmem:[#allocation7 + $0x1200] sm:$0xff] }
 0x4b8   :  { %4930 = vmatprep.subr.bf16.mxu1 %v2973_v43  ;;  %v3020_v43 = vunpack.c.l.s8.bf16 %v1428_v11  ;;  %v3028_v5 = vunpack.c.h.s8.bf16 %v1428_v11 }
 0x4ba   :  { %4275 = vmatpush1.bf16.msra.mxu0 %v2970_v45  ;;  %v3029_v45 = vunpack.c.h.s8.bf16 %v1429_v22 }
 0x4bb   :  { %4931 = vmatpush1.bf16.msra.mxu1 %v2972_v23  ;;  %4276 = vmatprep.subr.bf16.mxu0 %v2979_v46  ;;  %v1435_v23 = vld [vmem:[#allocation7 + $0x1208] sm:$0xff]  ;;  %v1437_v46 = vld [vmem:[#allocation7 + $0x1218] sm:$0xff] }
 0x4bc   :  { %4932 = vmatprep.subr.bf16.mxu1 %v2981_v10  ;;  %v8445_v10 = vrot.slane %v726_v41, %v8095_v8  ;;  %v3045_v59 = vunpack.c.h.s8.bf16 %v1437_v46 }
 0x4be   :  { %4277 = vmatpush1.bf16.msra.mxu0 %v2978_v18  ;;  %v3035_v18 = vunpack.c.l.s8.bf16 %v1435_v23  ;;  %v742_v52 = vcombine.high %v8445_v10, %v8445_v10 }
 0x4bf   :  { %4933 = vmatpush1.bf16.msra.mxu1 %v2980_v49  ;;  %4278 = vmatprep.subr.bf16.mxu0 %v2987_v51  ;;  %v3037_v49 = vunpack.c.l.s8.bf16 %v1437_v46  ;;  %v1436_v51 = vld [vmem:[#allocation7 + $0x1210] sm:$0xff] }
 0x4c0   :  { %4934 = vmatprep.subr.bf16.mxu1 %v2989_v53  ;;  %v3034_v53 = vunpack.c.l.s8.bf16 %v1434_v63  ;;  %v3044_v44 = vunpack.c.h.s8.bf16 %v1436_v51 }
 0x4c2   :  { %4279 = vmatpush1.bf16.msra.mxu0 %v2986_v57  ;;  %v3036_v57 = vunpack.c.l.s8.bf16 %v1436_v51 }
 0x4c3   :  { %4935 = vmatpush1.bf16.msra.mxu1 %v2988_v9  ;;  %4280 = vmatprep.subr.bf16.mxu0 %v2995_v58  ;;  %v3043_v9 = vunpack.c.h.s8.bf16 %v1435_v23  ;;  %v1443_v58 = vld [vmem:[#allocation7 + $0x1248] sm:$0xff] }
 0x4c4   :  { %4936 = vmatprep.subr.bf16.mxu1 %v2997_v39  ;;  %v8454_v39 = vpack.c.bf16 %v742_v52, %v742_v52 }
 0x4c6   :  { %4281 = vmatpush1.bf16.msra.mxu0 %v2994_v62  ;;  %v3042_v62 = vunpack.c.h.s8.bf16 %v1434_v63  ;;  %v1460_v63 = vld [vmem:[#allocation7 + $0x12d0] sm:$0xff] }
 0x4c7   :  { %4937 = vmatpush1.bf16.msra.mxu1 %v2996_v1  ;;  %4282 = vmatprep.subr.bf16.mxu0 %v3003_v35  ;;  %v3051_v1 = vunpack.c.l.s8.bf16 %v1443_v58  ;;  %v1442_v35 = vld [vmem:[#allocation7 + $0x1240] sm:$0xff]  ;;  %v3084_v51 = vunpack.c.l.s8.bf16 %v1460_v63 }
 0x4c8   :  { %4938 = vmatprep.subr.bf16.mxu1 %v3005_v15  ;;  %v1444_v15 = vld [vmem:[#allocation7 + $0x1250] sm:$0xff]  ;;  %v3050_v14 = vunpack.c.l.s8.bf16 %v1442_v35  ;;  %v3058_v22 = vunpack.c.h.s8.bf16 %v1442_v35 }
 0x4ca   :  { %4283 = vmatpush1.bf16.msra.mxu0 %v3002_v16  ;;  %v3052_v16 = vunpack.c.l.s8.bf16 %v1444_v15 }
 0x4cb   :  { %4939 = vmatpush1.bf16.msra.mxu1 %v3004_v20  ;;  %4284 = vmatprep.subr.bf16.mxu0 %v3011_v24  ;;  %v3059_v20 = vunpack.c.h.s8.bf16 %v1443_v58  ;;  %v3061_v24 = vunpack.c.h.s8.bf16 %v1445_v60 }
 0x4cc   :  { %4940 = vmatprep.subr.bf16.mxu1 %v3013_v21  ;;  %v1451_v21 = vld [vmem:[#allocation7 + $0x1288] sm:$0xff] }
 0x4ce   :  { %4285 = vmatpush1.bf16.msra.mxu0 %v3010_v25  ;;  %v3060_v25 = vunpack.c.h.s8.bf16 %v1444_v15 }
 0x4cf   :  { %4941 = vmatpush1.bf16.msra.mxu1 %v3012_v6  ;;  %4286 = vmatprep.subr.bf16.mxu0 %v3019_v26  ;;  %v3067_v6 = vunpack.c.l.s8.bf16 %v1451_v21  ;;  %v1450_v26 = vld [vmem:[#allocation7 + $0x1280] sm:$0xff] }
 0x4d0   :  { %4942 = vmatprep.subr.bf16.mxu1 %v3021_v29  ;;  %v1452_v29 = vld [vmem:[#allocation7 + $0x1290] sm:$0xff]  ;;  %v3066_v11 = vunpack.c.l.s8.bf16 %v1450_v26  ;;  %v3074_v23 = vunpack.c.h.s8.bf16 %v1450_v26 }
 0x4d1   :  { %v3068_v41 = vunpack.c.l.s8.bf16 %v1452_v29  ;;  %v3076_v46 = vunpack.c.h.s8.bf16 %v1452_v29 }
 0x4d2   :  { %4287 = vmatpush1.bf16.msra.mxu0 %v3018_v42  ;;  %v3075_v42 = vunpack.c.h.s8.bf16 %v1451_v21 }
 0x4d3   :  { %4943 = vmatpush1.bf16.msra.mxu1 %v3020_v43  ;;  %4288 = vmatprep.subr.bf16.mxu0 %v3027_v56  ;;  %v3077_v43 = vunpack.c.h.s8.bf16 %v1453_v61  ;;  %v1459_v56 = vld [vmem:[#allocation7 + $0x12c8] sm:$0xff] }
 0x4d4   :  { %4944 = vmatprep.subr.bf16.mxu1 %v3029_v45  ;;  %v1461_v45 = vld [vmem:[#allocation7 + $0x12d8] sm:$0xff]  ;;  %v3091_v52 = vunpack.c.h.s8.bf16 %v1459_v56 }
 0x4d6   :  { %4289 = vmatpush1.bf16.msra.mxu0 %v3026_v48  ;;  %v3083_v48 = vunpack.c.l.s8.bf16 %v1459_v56 }
 0x4d7   :  { %4945 = vmatpush1.bf16.msra.mxu1 %v3028_v5  ;;  %4299 = vmatprep.subr.bf16.mxu0 %v3035_v18  ;;  %v1458_v5 = vld [vmem:[#allocation7 + $0x12c0] sm:$0xff]  ;;  %v3085_v18 = vunpack.c.l.s8.bf16 %v1461_v45 }
 0x4d8   :  { %4955 = vmatprep.subr.bf16.mxu1 %v3037_v49  ;;  %v3082_v49 = vunpack.c.l.s8.bf16 %v1458_v5  ;;  %v3090_v58 = vunpack.c.h.s8.bf16 %v1458_v5 }
 0x4d9   :  { %4291 = vmatmul.mubr.bf16.vlgmr.msra.gmra.mrb[0].mxu0 %v8451_v55 }
 0x4da   :  { %4947 = vmatmul.mubr.bf16.vlgmr.msra.gmra.mrb[0].mxu1 %v8451_v55  ;;  %4300 = vmatpush1.bf16.msra.mxu0 %v3034_v53  ;;  %v3093_v53 = vunpack.c.h.s8.bf16 %v1461_v45 }
 0x4db   :  { %4331 = vmatprep.mubr.bf16.mxu0 %v8454_v39  ;;  %4956 = vmatpush1.bf16.msra.mxu1 %v3036_v57  ;;  %v1467_v57 = vld [vmem:[#allocation7 + $0x1308] sm:$0xff] }
 0x4dc   :  { %4987 = vmatprep.mubr.bf16.mxu1 %v8454_v39  ;;  %4301 = vmatprep.subr.bf16.mxu0 %v3043_v9  ;;  %v1469_v9 = vld [vmem:[#allocation7 + $0x1318] sm:$0xff]  ;;  %v3099_v60 = vunpack.c.l.s8.bf16 %v1467_v57  ;;  %v3107_v15 = vunpack.c.h.s8.bf16 %v1467_v57 }
 0x4dd   :  { %4957 = vmatprep.subr.bf16.mxu1 %v3045_v59  ;;  %v3092_v59 = vunpack.c.h.s8.bf16 %v1460_v63 }
 0x4de   :  { %4302 = vmatpush1.bf16.msra.mxu0 %v3042_v62  ;;  %v1466_v62 = vld [vmem:[#allocation7 + $0x1300] sm:$0xff] }
 0x4df   :  { %4958 = vmatpush1.bf16.msra.mxu1 %v3044_v44  ;;  %4303 = vmatprep.subr.bf16.mxu0 %v3051_v1  ;;  %v3101_v44 = vunpack.c.l.s8.bf16 %v1469_v9  ;;  %v1468_v1 = vld [vmem:[#allocation7 + $0x1310] sm:$0xff]  ;;  %v3098_v35 = vunpack.c.l.s8.bf16 %v1466_v62 }
 0x4e0   :  { %4959 = vmatprep.subr.bf16.mxu1 %v3053_v2  ;;  %v3100_v2 = vunpack.c.l.s8.bf16 %v1468_v1  ;;  %v3108_v21 = vunpack.c.h.s8.bf16 %v1468_v1 }
 0x4e2   :  { %4304 = vmatpush1.bf16.msra.mxu0 %v3050_v14  ;;  %v3109_v14 = vunpack.c.h.s8.bf16 %v1469_v9 }
 0x4e3   :  { %4960 = vmatpush1.bf16.msra.mxu1 %v3052_v16  ;;  %4305 = vmatprep.subr.bf16.mxu0 %v3059_v20  ;;  %v1475_v16 = vld [vmem:[#allocation7 + $0x1348] sm:$0xff]  ;;  %v1477_v20 = vld [vmem:[#allocation7 + $0x1358] sm:$0xff] }
 0x4e4   :  { %4961 = vmatprep.subr.bf16.mxu1 %v3061_v24  ;;  %v3106_v24 = vunpack.c.h.s8.bf16 %v1466_v62  ;;  %v3115_v61 = vunpack.c.l.s8.bf16 %v1475_v16  ;;  %v3123_v29 = vunpack.c.h.s8.bf16 %v1475_v16  ;;  %v8460_v62 = vmax.f32 %v8285_v3, 0.0 }
 0x4e6   :  { %4306 = vmatpush1.bf16.msra.mxu0 %v3058_v22  ;;  %v1474_v22 = vld [vmem:[#allocation7 + $0x1340] sm:$0xff]  ;;  %v8464_v16 = vrot.slane %v8460_v62, %v8095_v8 }
 0x4e7   :  { %4962 = vmatpush1.bf16.msra.mxu1 %v3060_v25  ;;  %4307 = vmatprep.subr.bf16.mxu0 %v3067_v6  ;;  %v3117_v25 = vunpack.c.l.s8.bf16 %v1477_v20  ;;  %v1476_v6 = vld [vmem:[#allocation7 + $0x1350] sm:$0xff]  ;;  %v3114_v26 = vunpack.c.l.s8.bf16 %v1474_v22 }
 0x4e8   :  { %4963 = vmatprep.subr.bf16.mxu1 %v3069_v36  ;;  %v3116_v36 = vunpack.c.l.s8.bf16 %v1476_v6  ;;  %v3124_v56 = vunpack.c.h.s8.bf16 %v1476_v6 }
 0x4ea   :  { %4308 = vmatpush1.bf16.msra.mxu0 %v3066_v11  ;;  %v3125_v11 = vunpack.c.h.s8.bf16 %v1477_v20 }
 0x4eb   :  { %4964 = vmatpush1.bf16.msra.mxu1 %v3068_v41  ;;  %4309 = vmatprep.subr.bf16.mxu0 %v3075_v42  ;;  %v1483_v41 = vld [vmem:[#allocation7 + $0x1388] sm:$0xff]  ;;  %v1485_v42 = vld [vmem:[#allocation7 + $0x1398] sm:$0xff] }
 0x4ec   :  { %4965 = vmatprep.subr.bf16.mxu1 %v3077_v43  ;;  %v3122_v43 = vunpack.c.h.s8.bf16 %v1474_v22  ;;  %v3131_v45 = vunpack.c.l.s8.bf16 %v1483_v41  ;;  %v3139_v63 = vunpack.c.h.s8.bf16 %v1483_v41  ;;  %v1500_v22 = vld [vmem:[#allocation7 + $0x1410] sm:$0xff] }
 0x4ee   :  { %4310 = vmatpush1.bf16.msra.mxu0 %v3074_v23  ;;  %v1482_v23 = vld [vmem:[#allocation7 + $0x1380] sm:$0xff] }
 0x4ef   :  { %4966 = vmatpush1.bf16.msra.mxu1 %v3076_v46  ;;  %4311 = vmatprep.subr.bf16.mxu0 %v3083_v48  ;;  %v3133_v46 = vunpack.c.l.s8.bf16 %v1485_v42  ;;  %v1484_v48 = vld [vmem:[#allocation7 + $0x1390] sm:$0xff]  ;;  %v3130_v5 = vunpack.c.l.s8.bf16 %v1482_v23 }
 0x4f0   :  { %4967 = vmatprep.subr.bf16.mxu1 %v3085_v18  ;;  %v3132_v18 = vunpack.c.l.s8.bf16 %v1484_v48  ;;  %v3140_v57 = vunpack.c.h.s8.bf16 %v1484_v48  ;;  %v1508_v48 = vld [vmem:[#allocation7 + $0x1450] sm:$0xff] }
 0x4f2   :  { %4312 = vmatpush1.bf16.msra.mxu0 %v3082_v49  ;;  %v3141_v49 = vunpack.c.h.s8.bf16 %v1485_v42 }
 0x4f3   :  { %4968 = vmatpush1.bf16.msra.mxu1 %v3084_v51  ;;  %4313 = vmatprep.subr.bf16.mxu0 %v3091_v52  ;;  %v1491_v51 = vld [vmem:[#allocation7 + $0x13c8] sm:$0xff]  ;;  %v1493_v52 = vld [vmem:[#allocation7 + $0x13d8] sm:$0xff] }
 0x4f4   :  { %4969 = vmatprep.subr.bf16.mxu1 %v3093_v53  ;;  %v3138_v53 = vunpack.c.h.s8.bf16 %v1482_v23  ;;  %v3147_v9 = vunpack.c.l.s8.bf16 %v1491_v51  ;;  %v1506_v23 = vld [vmem:[#allocation7 + $0x1440] sm:$0xff] }
 0x4f6   :  { %4314 = vmatpush1.bf16.msra.mxu0 %v3090_v58  ;;  %v1490_v58 = vld [vmem:[#allocation7 + $0x13c0] sm:$0xff] }
 0x4f7   :  { %4970 = vmatpush1.bf16.msra.mxu1 %v3092_v59  ;;  %4315 = vmatprep.subr.bf16.mxu0 %v3099_v60  ;;  %v3149_v59 = vunpack.c.l.s8.bf16 %v1493_v52  ;;  %v1492_v60 = vld [vmem:[#allocation7 + $0x13d0] sm:$0xff]  ;;  %v3154_v20 = vunpack.c.h.s8.bf16 %v1490_v58 }
 0x4f8   :  { %4971 = vmatprep.subr.bf16.mxu1 %v3101_v44  ;;  %v3146_v44 = vunpack.c.l.s8.bf16 %v1490_v58  ;;  %v3148_v1 = vunpack.c.l.s8.bf16 %v1492_v60  ;;  %v3156_v3 = vunpack.c.h.s8.bf16 %v1492_v60  ;;  %v1514_v58 = vld [vmem:[#allocation7 + $0x1480] sm:$0xff]  ;;  %v1516_v60 = vld [vmem:[#allocation7 + $0x1490] sm:$0xff] }
 0x4fa   :  { %4316 = vmatpush1.bf16.msra.mxu0 %v3098_v35  ;;  %v3155_v35 = vunpack.c.h.s8.bf16 %v1491_v51  ;;  %v1515_v51 = vld [vmem:[#allocation7 + $0x1488] sm:$0xff] }
 0x4fb   :  { %4972 = vmatpush1.bf16.msra.mxu1 %v3100_v2  ;;  %4317 = vmatprep.subr.bf16.mxu0 %v3107_v15  ;;  %v3157_v2 = vunpack.c.h.s8.bf16 %v1493_v52  ;;  %v1499_v15 = vld [vmem:[#allocation7 + $0x1408] sm:$0xff]  ;;  %v1517_v52 = vld [vmem:[#allocation7 + $0x1498] sm:$0xff] }
 0x4fc   :  { %4973 = vmatprep.subr.bf16.mxu1 %v3109_v14  ;;  %v1501_v14 = vld [vmem:[#allocation7 + $0x1418] sm:$0xff] }
 0x4fd   :  { %v3173_v42 = vunpack.c.h.s8.bf16 %v1501_v14 }
 0x4fe   :  { %4318 = vmatpush1.bf16.msra.mxu0 %v3106_v24  ;;  %v3163_v24 = vunpack.c.l.s8.bf16 %v1499_v15 }
 0x4ff   :  { %4974 = vmatpush1.bf16.msra.mxu1 %v3108_v21  ;;  %4319 = vmatprep.subr.bf16.mxu0 %v3115_v61  ;;  %v1498_v21 = vld [vmem:[#allocation7 + $0x1400] sm:$0xff]  ;;  %v3165_v61 = vunpack.c.l.s8.bf16 %v1501_v14  ;;  %v1525_v14 = vld [vmem:[#allocation7 + $0x14d8] sm:$0xff] }
 0x500   :  { %4975 = vmatprep.subr.bf16.mxu1 %v3117_v25  ;;  %v758_v25 = vcombine.high %v8464_v16, %v8464_v16  ;;  %v3162_v6 = vunpack.c.l.s8.bf16 %v1498_v21 }
 0x502   :  { %4320 = vmatpush1.bf16.msra.mxu0 %v3114_v26  ;;  %v8470_v26 = vpack.c.bf16 %v8445_v10, %v8445_v10  ;;  %v8473_v41 = vpack.c.bf16 %v758_v25, %v758_v25  ;;  %v3172_v10 = vunpack.c.h.s8.bf16 %v1500_v22 }
 0x503   :  { %4976 = vmatpush1.bf16.msra.mxu1 %v3116_v36  ;;  %4321 = vmatprep.subr.bf16.mxu0 %v3123_v29  ;;  %v3164_v36 = vunpack.c.l.s8.bf16 %v1500_v22  ;;  %v3171_v29 = vunpack.c.h.s8.bf16 %v1499_v15  ;;  %v1523_v15 = vld [vmem:[#allocation7 + $0x14c8] sm:$0xff]  ;;  %v1524_v22 = vld [vmem:[#allocation7 + $0x14d0] sm:$0xff] }
 0x504   :  { %4977 = vmatprep.subr.bf16.mxu1 %v3125_v11  ;;  %v1507_v11 = vld [vmem:[#allocation7 + $0x1448] sm:$0xff] }
 0x506   :  { %4322 = vmatpush1.bf16.msra.mxu0 %v3122_v43  ;;  %v1509_v43 = vld [vmem:[#allocation7 + $0x1458] sm:$0xff] }
 0x507   :  { %4978 = vmatpush1.bf16.msra.mxu1 %v3124_v56  ;;  %4323 = vmatprep.subr.bf16.mxu0 %v3131_v45  ;;  %v3170_v56 = vunpack.c.h.s8.bf16 %v1498_v21  ;;  %v3179_v45 = vunpack.c.l.s8.bf16 %v1507_v11  ;;  %v1522_v21 = vld [vmem:[#allocation7 + $0x14c0] sm:$0xff] }
 0x508   :  { %4979 = vmatprep.subr.bf16.mxu1 %v3133_v46  ;;  %v3181_v46 = vunpack.c.l.s8.bf16 %v1509_v43  ;;  %v3210_v25 = vunpack.c.l.s8.bf16 %v1522_v21 }
 0x50a   :  { %4324 = vmatpush1.bf16.msra.mxu0 %v3130_v5  ;;  %v3178_v5 = vunpack.c.l.s8.bf16 %v1506_v23 }
 0x50b   :  { %4980 = vmatpush1.bf16.msra.mxu1 %v3132_v18  ;;  %4325 = vmatprep.subr.bf16.mxu0 %v3139_v63  ;;  %v3180_v18 = vunpack.c.l.s8.bf16 %v1508_v48  ;;  %v3187_v63 = vunpack.c.h.s8.bf16 %v1507_v11  ;;  %v1531_v11 = vld [vmem:[#allocation7 + $0x1508] sm:$0xff] }
 0x50c   :  { %4981 = vmatprep.subr.bf16.mxu1 %v3141_v49  ;;  %v3189_v49 = vunpack.c.h.s8.bf16 %v1509_v43  ;;  %v3218_v43 = vunpack.c.h.s8.bf16 %v1522_v21 }
 0x50e   :  { %4326 = vmatpush1.bf16.msra.mxu0 %v3138_v53  ;;  %v3186_v53 = vunpack.c.h.s8.bf16 %v1506_v23 }
 0x50f   :  { %4982 = vmatpush1.bf16.msra.mxu1 %v3140_v57  ;;  %4327 = vmatprep.subr.bf16.mxu0 %v3147_v9  ;;  %v3188_v57 = vunpack.c.h.s8.bf16 %v1508_v48  ;;  %v3195_v9 = vunpack.c.l.s8.bf16 %v1515_v51 }
 0x510   :  { %4983 = vmatprep.subr.bf16.mxu1 %v3149_v59  ;;  %v3197_v59 = vunpack.c.l.s8.bf16 %v1517_v52 }
 0x512   :  { %4328 = vmatpush1.bf16.msra.mxu0 %v3146_v44  ;;  %v3194_v44 = vunpack.c.l.s8.bf16 %v1514_v58 }
 0x513   :  { %4984 = vmatpush1.bf16.msra.mxu1 %v3148_v1  ;;  %4329 = vmatprep.subr.bf16.mxu0 %v3155_v35  ;;  %v3196_v1 = vunpack.c.l.s8.bf16 %v1516_v60  ;;  %v3203_v35 = vunpack.c.h.s8.bf16 %v1515_v51  ;;  %v1541_v51 = vld [vmem:[#allocation7 + $0x1558] sm:$0xff] }
 0x514   :  { %4985 = vmatprep.subr.bf16.mxu1 %v3157_v2  ;;  %v3205_v2 = vunpack.c.h.s8.bf16 %v1517_v52 }
 0x516   :  { %4330 = vmatpush1.bf16.msra.mxu0 %v3154_v20  ;;  %v3202_v20 = vunpack.c.h.s8.bf16 %v1514_v58  ;;  %v3245_v58 = vunpack.c.l.s8.bf16 %v1541_v51 }
 0x517   :  { %4986 = vmatpush1.bf16.msra.mxu1 %v3156_v3  ;;  %4340 = vmatprep.subr.bf16.mxu0 %v3163_v24  ;;  %v3204_v3 = vunpack.c.h.s8.bf16 %v1516_v60  ;;  %v3211_v24 = vunpack.c.l.s8.bf16 %v1523_v15 }
 0x518   :  { %4996 = vmatprep.subr.bf16.mxu1 %v3165_v61  ;;  %v3213_v61 = vunpack.c.l.s8.bf16 %v1525_v14 }
 0x519   :  { %4332 = vmatmul.mubr.bf16.vlgmr.msra.gmra.mrb[0].mxu0 %v8470_v26 }
 0x51a   :  { %4988 = vmatmul.mubr.bf16.vlgmr.msra.gmra.mrb[0].mxu1 %v8470_v26  ;;  %4341 = vmatpush1.bf16.msra.mxu0 %v3162_v6  ;;  %v3212_v6 = vunpack.c.l.s8.bf16 %v1524_v22 }
 0x51b   :  { %4372 = vmatprep.mubr.bf16.mxu0 %v8473_v41  ;;  %4997 = vmatpush1.bf16.msra.mxu1 %v3164_v36  ;;  %v3219_v36 = vunpack.c.h.s8.bf16 %v1523_v15  ;;  %v1549_v15 = vld [vmem:[#allocation7 + $0x1598] sm:$0xff] }
 0x51c   :  { %5028 = vmatprep.mubr.bf16.mxu1 %v8473_v41  ;;  %4342 = vmatprep.subr.bf16.mxu0 %v3171_v29  ;;  %v3221_v29 = vunpack.c.h.s8.bf16 %v1525_v14  ;;  %v3261_v21 = vunpack.c.l.s8.bf16 %v1549_v15 }
 0x51d   :  { %4998 = vmatprep.subr.bf16.mxu1 %v3173_v42  ;;  %v1533_v42 = vld [vmem:[#allocation7 + $0x1518] sm:$0xff] }
 0x51e   :  { %4343 = vmatpush1.bf16.msra.mxu0 %v3170_v56  ;;  %v3220_v56 = vunpack.c.h.s8.bf16 %v1524_v22  ;;  %v3229_v23 = vunpack.c.l.s8.bf16 %v1533_v42 }
 0x51f   :  { %4999 = vmatpush1.bf16.msra.mxu1 %v3172_v10  ;;  %4344 = vmatprep.subr.bf16.mxu0 %v3179_v45  ;;  %v3227_v10 = vunpack.c.l.s8.bf16 %v1531_v11  ;;  %v1530_v45 = vld [vmem:[#allocation7 + $0x1500] sm:$0xff] }
 0x520   :  { %5000 = vmatprep.subr.bf16.mxu1 %v3181_v46  ;;  %v1532_v46 = vld [vmem:[#allocation7 + $0x1510] sm:$0xff]  ;;  %v3226_v48 = vunpack.c.l.s8.bf16 %v1530_v45  ;;  %v3234_v52 = vunpack.c.h.s8.bf16 %v1530_v45 }
 0x522   :  { %4345 = vmatpush1.bf16.msra.mxu0 %v3178_v5  ;;  %v3228_v5 = vunpack.c.l.s8.bf16 %v1532_v46 }
 0x523   :  { %5001 = vmatpush1.bf16.msra.mxu1 %v3180_v18  ;;  %4346 = vmatprep.subr.bf16.mxu0 %v3187_v63  ;;  %v3235_v18 = vunpack.c.h.s8.bf16 %v1531_v11  ;;  %v3237_v63 = vunpack.c.h.s8.bf16 %v1533_v42  ;;  %v1557_v11 = vld [vmem:[#allocation7 + $0x15d8] sm:$0xff] }
 0x524   :  { %5002 = vmatprep.subr.bf16.mxu1 %v3189_v49  ;;  %v1539_v49 = vld [vmem:[#allocation7 + $0x1548] sm:$0xff]  ;;  %v3277_v45 = vunpack.c.l.s8.bf16 %v1557_v11 }
 0x526   :  { %4347 = vmatpush1.bf16.msra.mxu0 %v3186_v53  ;;  %v3236_v53 = vunpack.c.h.s8.bf16 %v1532_v46  ;;  %v743_v46 = vcombine.high %v8460_v62, %v8460_v62  ;;  %v1562_v62 = vld [vmem:[#allocation7 + $0x1600] sm:$0xff] }
 0x527   :  { %5003 = vmatpush1.bf16.msra.mxu1 %v3188_v57  ;;  %4348 = vmatprep.subr.bf16.mxu0 %v3195_v9  ;;  %v3243_v57 = vunpack.c.l.s8.bf16 %v1539_v49  ;;  %v1538_v9 = vld [vmem:[#allocation7 + $0x1540] sm:$0xff] }
 0x528   :  { %5004 = vmatprep.subr.bf16.mxu1 %v3197_v59  ;;  %v1540_v59 = vld [vmem:[#allocation7 + $0x1550] sm:$0xff]  ;;  %v3242_v60 = vunpack.c.l.s8.bf16 %v1538_v9  ;;  %v3250_v14 = vunpack.c.h.s8.bf16 %v1538_v9 }
 0x52a   :  { %4349 = vmatpush1.bf16.msra.mxu0 %v3194_v44  ;;  %v3244_v44 = vunpack.c.l.s8.bf16 %v1540_v59 }
 0x52b   :  { %5005 = vmatpush1.bf16.msra.mxu1 %v3196_v1  ;;  %4350 = vmatprep.subr.bf16.mxu0 %v3203_v35  ;;  %v3251_v1 = vunpack.c.h.s8.bf16 %v1539_v49  ;;  %v3253_v35 = vunpack.c.h.s8.bf16 %v1541_v51  ;;  %v1563_v49 = vld [vmem:[#allocation7 + $0x1608] sm:$0xff]  ;;  %v1565_v51 = vld [vmem:[#allocation7 + $0x1618] sm:$0xff] }
 0x52c   :  { %5006 = vmatprep.subr.bf16.mxu1 %v3205_v2  ;;  %v1547_v2 = vld [vmem:[#allocation7 + $0x1588] sm:$0xff]  ;;  %v3291_v9 = vunpack.c.l.s8.bf16 %v1563_v49 }
 0x52e   :  { %4351 = vmatpush1.bf16.msra.mxu0 %v3202_v20  ;;  %v3252_v20 = vunpack.c.h.s8.bf16 %v1540_v59  ;;  %v1564_v59 = vld [vmem:[#allocation7 + $0x1610] sm:$0xff] }
 0x52f   :  { %5007 = vmatpush1.bf16.msra.mxu1 %v3204_v3  ;;  %4352 = vmatprep.subr.bf16.mxu0 %v3211_v24  ;;  %v3259_v3 = vunpack.c.l.s8.bf16 %v1547_v2  ;;  %v1546_v24 = vld [vmem:[#allocation7 + $0x1580] sm:$0xff] }
 0x530   :  { %5008 = vmatprep.subr.bf16.mxu1 %v3213_v61  ;;  %v1548_v61 = vld [vmem:[#allocation7 + $0x1590] sm:$0xff]  ;;  %v3258_v22 = vunpack.c.l.s8.bf16 %v1546_v24  ;;  %v3266_v42 = vunpack.c.h.s8.bf16 %v1546_v24  ;;  %v3298_v24 = vunpack.c.h.s8.bf16 %v1562_v62 }
 0x532   :  { %4353 = vmatpush1.bf16.msra.mxu0 %v3210_v25  ;;  %v3260_v25 = vunpack.c.l.s8.bf16 %v1548_v61 }
 0x533   :  { %5009 = vmatpush1.bf16.msra.mxu1 %v3212_v6  ;;  %4354 = vmatprep.subr.bf16.mxu0 %v3219_v36  ;;  %v3267_v6 = vunpack.c.h.s8.bf16 %v1547_v2  ;;  %v3269_v36 = vunpack.c.h.s8.bf16 %v1549_v15  ;;  %v3299_v2 = vunpack.c.h.s8.bf16 %v1563_v49  ;;  %v1571_v15 = vld [vmem:[#allocation7 + $0x1648] sm:$0xff] }
 0x534   :  { %5010 = vmatprep.subr.bf16.mxu1 %v3221_v29  ;;  %v1555_v29 = vld [vmem:[#allocation7 + $0x15c8] sm:$0xff] }
 0x536   :  { %4355 = vmatpush1.bf16.msra.mxu0 %v3218_v43  ;;  %v3268_v43 = vunpack.c.h.s8.bf16 %v1548_v61  ;;  %v1570_v61 = vld [vmem:[#allocation7 + $0x1640] sm:$0xff] }
 0x537   :  { %5011 = vmatpush1.bf16.msra.mxu1 %v3220_v56  ;;  %4356 = vmatprep.subr.bf16.mxu0 %v3227_v10  ;;  %v3275_v56 = vunpack.c.l.s8.bf16 %v1555_v29  ;;  %v1554_v10 = vld [vmem:[#allocation7 + $0x15c0] sm:$0xff] }
 0x538   :  { %5012 = vmatprep.subr.bf16.mxu1 %v3229_v23  ;;  %v1556_v23 = vld [vmem:[#allocation7 + $0x15d0] sm:$0xff] }
 0x53a   :  { %4357 = vmatpush1.bf16.msra.mxu0 %v3226_v48  ;;  %v3274_v48 = vunpack.c.l.s8.bf16 %v1554_v10 }
 0x53b   :  { %5013 = vmatpush1.bf16.msra.mxu1 %v3228_v5  ;;  %4358 = vmatprep.subr.bf16.mxu0 %v3235_v18  ;;  %v3276_v5 = vunpack.c.l.s8.bf16 %v1556_v23  ;;  %v3283_v18 = vunpack.c.h.s8.bf16 %v1555_v29  ;;  %v3315_v29 = vunpack.c.h.s8.bf16 %v1571_v15 }
 0x53c   :  { %5014 = vmatprep.subr.bf16.mxu1 %v3237_v63  ;;  %v3285_v63 = vunpack.c.h.s8.bf16 %v1557_v11 }
 0x53e   :  { %4359 = vmatpush1.bf16.msra.mxu0 %v3234_v52  ;;  %v8481_v52 = vrot.slane %v743_v46, %v8095_v8 }
 0x53f   :  { %5015 = vmatpush1.bf16.msra.mxu1 %v3236_v53  ;;  %4360 = vmatprep.subr.bf16.mxu0 %v3243_v57  ;;  %v3282_v53 = vunpack.c.h.s8.bf16 %v1554_v10  ;;  %v3284_v57 = vunpack.c.h.s8.bf16 %v1556_v23  ;;  %v1578_v23 = vld [vmem:[#allocation7 + $0x1680] sm:$0xff] }
 0x540   :  { %5016 = vmatprep.subr.bf16.mxu1 %v3245_v58  ;;  %v3293_v58 = vunpack.c.l.s8.bf16 %v1565_v51 }
 0x542   :  { %4361 = vmatpush1.bf16.msra.mxu0 %v3242_v60  ;;  %v759_v60 = vcombine.high %v8481_v52, %v8481_v52 }
 0x543   :  { %5017 = vmatpush1.bf16.msra.mxu1 %v3244_v44  ;;  %4362 = vmatprep.subr.bf16.mxu0 %v3251_v1  ;;  %v3290_v44 = vunpack.c.l.s8.bf16 %v1562_v62  ;;  %v8487_v1 = vpack.c.bf16 %v8464_v16, %v8464_v16  ;;  %v3300_v16 = vunpack.c.h.s8.bf16 %v1564_v59 }
 0x544   :  { %5018 = vmatprep.subr.bf16.mxu1 %v3253_v35  ;;  %v3292_v35 = vunpack.c.l.s8.bf16 %v1564_v59 }
 0x546   :  { %4363 = vmatpush1.bf16.msra.mxu0 %v3250_v14  ;;  %v8490_v14 = vpack.c.bf16 %v759_v60, %v759_v60  ;;  %v1588_v60 = vld [vmem:[#allocation7 + $0x16d0] sm:$0xff] }
 0x547   :  { %5019 = vmatpush1.bf16.msra.mxu1 %v3252_v20  ;;  %4364 = vmatprep.subr.bf16.mxu0 %v3259_v3  ;;  %v3301_v20 = vunpack.c.h.s8.bf16 %v1565_v51  ;;  %v1573_v3 = vld [vmem:[#allocation7 + $0x1658] sm:$0xff]  ;;  %v1587_v51 = vld [vmem:[#allocation7 + $0x16c8] sm:$0xff] }
 0x548   :  { %5020 = vmatprep.subr.bf16.mxu1 %v3261_v21  ;;  %v3307_v21 = vunpack.c.l.s8.bf16 %v1571_v15  ;;  %v3317_v11 = vunpack.c.h.s8.bf16 %v1573_v3  ;;  %v3339_v62 = vunpack.c.l.s8.bf16 %v1587_v51 }
 0x54a   :  { %4365 = vmatpush1.bf16.msra.mxu0 %v3258_v22  ;;  %v3309_v22 = vunpack.c.l.s8.bf16 %v1573_v3  ;;  %v1597_v3 = vld [vmem:[#allocation7 + $0x1718] sm:$0xff] }
 0x54b   :  { %5021 = vmatpush1.bf16.msra.mxu1 %v3260_v25  ;;  %4366 = vmatprep.subr.bf16.mxu0 %v3267_v6  ;;  %v1572_v25 = vld [vmem:[#allocation7 + $0x1650] sm:$0xff]  ;;  %v3306_v6 = vunpack.c.l.s8.bf16 %v1570_v61 }
 0x54c   :  { %5022 = vmatprep.subr.bf16.mxu1 %v3269_v36  ;;  %v3308_v36 = vunpack.c.l.s8.bf16 %v1572_v25  ;;  %v3316_v10 = vunpack.c.h.s8.bf16 %v1572_v25  ;;  %v1596_v25 = vld [vmem:[#allocation7 + $0x1710] sm:$0xff] }
 0x54e   :  { %4367 = vmatpush1.bf16.msra.mxu0 %v3266_v42  ;;  %v1579_v42 = vld [vmem:[#allocation7 + $0x1688] sm:$0xff] }
 0x54f   :  { %5023 = vmatpush1.bf16.msra.mxu1 %v3268_v43  ;;  %4368 = vmatprep.subr.bf16.mxu0 %v3275_v56  ;;  %v1581_v43 = vld [vmem:[#allocation7 + $0x1698] sm:$0xff]  ;;  %v3314_v56 = vunpack.c.h.s8.bf16 %v1570_v61  ;;  %v1594_v61 = vld [vmem:[#allocation7 + $0x1700] sm:$0xff] }
 0x550   :  { %5024 = vmatprep.subr.bf16.mxu1 %v3277_v45  ;;  %v3323_v45 = vunpack.c.l.s8.bf16 %v1579_v42  ;;  %v3325_v46 = vunpack.c.l.s8.bf16 %v1581_v43  ;;  %v3333_v49 = vunpack.c.h.s8.bf16 %v1581_v43  ;;  %v1605_v43 = vld [vmem:[#allocation7 + $0x1758] sm:$0xff] }
 0x552   :  { %4369 = vmatpush1.bf16.msra.mxu0 %v3274_v48  ;;  %v1580_v48 = vld [vmem:[#allocation7 + $0x1690] sm:$0xff] }
 0x553   :  { %5025 = vmatpush1.bf16.msra.mxu1 %v3276_v5  ;;  %4370 = vmatprep.subr.bf16.mxu0 %v3283_v18  ;;  %v3322_v5 = vunpack.c.l.s8.bf16 %v1578_v23  ;;  %v3324_v18 = vunpack.c.l.s8.bf16 %v1580_v48 }
 0x554   :  { %5026 = vmatprep.subr.bf16.mxu1 %v3285_v63  ;;  %v3331_v63 = vunpack.c.h.s8.bf16 %v1579_v42  ;;  %v1603_v42 = vld [vmem:[#allocation7 + $0x1748] sm:$0xff] }
 0x556   :  { %4371 = vmatpush1.bf16.msra.mxu0 %v3282_v53  ;;  %v1589_v53 = vld [vmem:[#allocation7 + $0x16d8] sm:$0xff] }
 0x557   :  { %5027 = vmatpush1.bf16.msra.mxu1 %v3284_v57  ;;  %4381 = vmatprep.subr.bf16.mxu0 %v3291_v9  ;;  %v3330_v57 = vunpack.c.h.s8.bf16 %v1578_v23  ;;  %v3332_v9 = vunpack.c.h.s8.bf16 %v1580_v48  ;;  %v3341_v59 = vunpack.c.l.s8.bf16 %v1589_v53  ;;  %v3349_v15 = vunpack.c.h.s8.bf16 %v1589_v53  ;;  %v1602_v23 = vld [vmem:[#allocation7 + $0x1740] sm:$0xff]  ;;  %v1604_v48 = vld [vmem:[#allocation7 + $0x1750] sm:$0xff]  ;;  %v1613_v53 = vld [vmem:[#allocation7 + $0x1798] sm:$0xff] }
 0x558   :  { %5037 = vmatprep.subr.bf16.mxu1 %v3293_v58  ;;  %v1586_v58 = vld [vmem:[#allocation7 + $0x16c0] sm:$0xff] }
 0x559   :  { %4373 = vmatmul.mubr.bf16.vlgmr.msra.gmra.mrb[0].mxu0 %v8487_v1 }
 0x55a   :  { %5029 = vmatmul.mubr.bf16.vlgmr.msra.gmra.mrb[0].mxu1 %v8487_v1  ;;  %4382 = vmatpush1.bf16.msra.mxu0 %v3290_v44  ;;  %v3338_v44 = vunpack.c.l.s8.bf16 %v1586_v58 }
 0x55b   :  { %4413 = vmatprep.mubr.bf16.mxu0 %v8490_v14  ;;  %5038 = vmatpush1.bf16.msra.mxu1 %v3292_v35  ;;  %v3340_v35 = vunpack.c.l.s8.bf16 %v1588_v60 }
 0x55c   :  { %5069 = vmatprep.mubr.bf16.mxu1 %v8490_v14  ;;  %4383 = vmatprep.subr.bf16.mxu0 %v3299_v2  ;;  %v3347_v2 = vunpack.c.h.s8.bf16 %v1587_v51  ;;  %v1611_v51 = vld [vmem:[#allocation7 + $0x1788] sm:$0xff] }
 0x55d   :  { %5039 = vmatprep.subr.bf16.mxu1 %v3301_v20  ;;  %v1595_v20 = vld [vmem:[#allocation7 + $0x1708] sm:$0xff] }
 0x55e   :  { %4384 = vmatpush1.bf16.msra.mxu0 %v3298_v24  ;;  %v3346_v24 = vunpack.c.h.s8.bf16 %v1586_v58  ;;  %v1610_v58 = vld [vmem:[#allocation7 + $0x1780] sm:$0xff] }
 0x55f   :  { %5040 = vmatpush1.bf16.msra.mxu1 %v3300_v16  ;;  %4385 = vmatprep.subr.bf16.mxu0 %v3307_v21  ;;  %v3348_v16 = vunpack.c.h.s8.bf16 %v1588_v60  ;;  %v3355_v21 = vunpack.c.l.s8.bf16 %v1595_v20  ;;  %v1612_v60 = vld [vmem:[#allocation7 + $0x1790] sm:$0xff] }
 0x560   :  { %5041 = vmatprep.subr.bf16.mxu1 %v3309_v22  ;;  %v3357_v22 = vunpack.c.l.s8.bf16 %v1597_v3 }
 0x562   :  { %4386 = vmatpush1.bf16.msra.mxu0 %v3306_v6  ;;  %v3354_v6 = vunpack.c.l.s8.bf16 %v1594_v61 }
 0x563   :  { %5042 = vmatpush1.bf16.msra.mxu1 %v3308_v36  ;;  %4387 = vmatprep.subr.bf16.mxu0 %v3315_v29  ;;  %v3356_v36 = vunpack.c.l.s8.bf16 %v1596_v25  ;;  %v3363_v29 = vunpack.c.h.s8.bf16 %v1595_v20  ;;  %v1619_v20 = vld [vmem:[#allocation7 + $0x17c8] sm:$0xff] }
 0x564   :  { %5043 = vmatprep.subr.bf16.mxu1 %v3317_v11  ;;  %v3365_v11 = vunpack.c.h.s8.bf16 %v1597_v3  ;;  %v1621_v3 = vld [vmem:[#allocation7 + $0x17d8] sm:$0xff] }
 0x566   :  { %4388 = vmatpush1.bf16.msra.mxu0 %v3314_v56  ;;  %v3362_v56 = vunpack.c.h.s8.bf16 %v1594_v61  ;;  %v1618_v61 = vld [vmem:[#allocation7 + $0x17c0] sm:$0xff] }
 0x567   :  { %5044 = vmatpush1.bf16.msra.mxu1 %v3316_v10  ;;  %4389 = vmatprep.subr.bf16.mxu0 %v3323_v45  ;;  %v3364_v10 = vunpack.c.h.s8.bf16 %v1596_v25  ;;  %v3371_v45 = vunpack.c.l.s8.bf16 %v1603_v42  ;;  %v1620_v25 = vld [vmem:[#allocation7 + $0x17d0] sm:$0xff] }
 0x568   :  { %5045 = vmatprep.subr.bf16.mxu1 %v3325_v46  ;;  %v3373_v46 = vunpack.c.l.s8.bf16 %v1605_v43 }
 0x56a   :  { %4390 = vmatpush1.bf16.msra.mxu0 %v3322_v5  ;;  %v3370_v5 = vunpack.c.l.s8.bf16 %v1602_v23 }
 0x56b   :  { %5046 = vmatpush1.bf16.msra.mxu1 %v3324_v18  ;;  %4391 = vmatprep.subr.bf16.mxu0 %v3331_v63  ;;  %v3372_v18 = vunpack.c.l.s8.bf16 %v1604_v48  ;;  %v3379_v63 = vunpack.c.h.s8.bf16 %v1603_v42  ;;  %v3413_v42 = vunpack.c.h.s8.bf16 %v1621_v3 }
 0x56c   :  { %5047 = vmatprep.subr.bf16.mxu1 %v3333_v49  ;;  %v3381_v49 = vunpack.c.h.s8.bf16 %v1605_v43  ;;  %v1627_v43 = vld [vmem:[#allocation7 + $0x1808] sm:$0xff] }
 0x56e   :  { %4392 = vmatpush1.bf16.msra.mxu0 %v3330_v57  ;;  %v3378_v57 = vunpack.c.h.s8.bf16 %v1602_v23  ;;  %v3419_v23 = vunpack.c.l.s8.bf16 %v1627_v43 }
 0x56f   :  { %5048 = vmatpush1.bf16.msra.mxu1 %v3332_v9  ;;  %4393 = vmatprep.subr.bf16.mxu0 %v3339_v62  ;;  %v3380_v9 = vunpack.c.h.s8.bf16 %v1604_v48  ;;  %v3387_v62 = vunpack.c.l.s8.bf16 %v1611_v51 }
 0x570   :  { %5049 = vmatprep.subr.bf16.mxu1 %v3341_v59  ;;  %v3389_v59 = vunpack.c.l.s8.bf16 %v1613_v53 }
 0x572   :  { %4394 = vmatpush1.bf16.msra.mxu0 %v3338_v44  ;;  %v3386_v44 = vunpack.c.l.s8.bf16 %v1610_v58 }
 0x573   :  { %5050 = vmatpush1.bf16.msra.mxu1 %v3340_v35  ;;  %4395 = vmatprep.subr.bf16.mxu0 %v3347_v2  ;;  %v3388_v35 = vunpack.c.l.s8.bf16 %v1612_v60  ;;  %v3395_v2 = vunpack.c.h.s8.bf16 %v1611_v51 }
 0x574   :  { %5051 = vmatprep.subr.bf16.mxu1 %v3349_v15  ;;  %v3397_v15 = vunpack.c.h.s8.bf16 %v1613_v53  ;;  %v3427_v53 = vunpack.c.h.s8.bf16 %v1627_v43 }
 0x576   :  { %4396 = vmatpush1.bf16.msra.mxu0 %v3346_v24  ;;  %v3394_v24 = vunpack.c.h.s8.bf16 %v1610_v58  ;;  %v1637_v58 = vld [vmem:[#allocation7 + $0x1858] sm:$0xff] }
 0x577   :  { %5052 = vmatpush1.bf16.msra.mxu1 %v3348_v16  ;;  %4397 = vmatprep.subr.bf16.mxu0 %v3355_v21  ;;  %v3396_v16 = vunpack.c.h.s8.bf16 %v1612_v60  ;;  %v3403_v21 = vunpack.c.l.s8.bf16 %v1619_v20 }
 0x578   :  { %5053 = vmatprep.subr.bf16.mxu1 %v3357_v22  ;;  %v3405_v22 = vunpack.c.l.s8.bf16 %v1621_v3 }
 0x57a   :  { %4398 = vmatpush1.bf16.msra.mxu0 %v3354_v6  ;;  %v8496_v6 = vmax.f32 %v8288_v7, 0.0  ;;  %v3412_v7 = vunpack.c.h.s8.bf16 %v1620_v25 }
 0x57b   :  { %5054 = vmatpush1.bf16.msra.mxu1 %v3356_v36  ;;  %4399 = vmatprep.subr.bf16.mxu0 %v3363_v29  ;;  %v3402_v36 = vunpack.c.l.s8.bf16 %v1618_v61  ;;  %v3404_v29 = vunpack.c.l.s8.bf16 %v1620_v25 }
 0x57c   :  { %5055 = vmatprep.subr.bf16.mxu1 %v3365_v11  ;;  %v3411_v11 = vunpack.c.h.s8.bf16 %v1619_v20 }
 0x57e   :  { %4400 = vmatpush1.bf16.msra.mxu0 %v3362_v56  ;;  %v1629_v56 = vld [vmem:[#allocation7 + $0x1818] sm:$0xff] }
 0x57f   :  { %5056 = vmatpush1.bf16.msra.mxu1 %v3364_v10  ;;  %4401 = vmatprep.subr.bf16.mxu0 %v3371_v45  ;;  %v8500_v10 = vrot.slane %v8496_v6, %v8095_v8  ;;  %v3410_v45 = vunpack.c.h.s8.bf16 %v1618_v61  ;;  %v3421_v48 = vunpack.c.l.s8.bf16 %v1629_v56 }
 0x580   :  { %5057 = vmatprep.subr.bf16.mxu1 %v3373_v46  ;;  %v1626_v46 = vld [vmem:[#allocation7 + $0x1800] sm:$0xff] }
 0x582   :  { %4402 = vmatpush1.bf16.msra.mxu0 %v3370_v5  ;;  %v1628_v5 = vld [vmem:[#allocation7 + $0x1810] sm:$0xff] }
 0x583   :  { %5058 = vmatpush1.bf16.msra.mxu1 %v3372_v18  ;;  %4403 = vmatprep.subr.bf16.mxu0 %v3379_v63  ;;  %v775_v18 = vcombine.high %v8500_v10, %v8500_v10  ;;  %v3418_v63 = vunpack.c.l.s8.bf16 %v1626_v46  ;;  %v3420_v51 = vunpack.c.l.s8.bf16 %v1628_v5 }
 0x584   :  { %5059 = vmatprep.subr.bf16.mxu1 %v3381_v49  ;;  %v8506_v49 = vpack.c.bf16 %v8481_v52, %v8481_v52  ;;  %v3428_v52 = vunpack.c.h.s8.bf16 %v1628_v5 }
 0x586   :  { %4404 = vmatpush1.bf16.msra.mxu0 %v3378_v57  ;;  %v1635_v57 = vld [vmem:[#allocation7 + $0x1848] sm:$0xff] }
 0x587   :  { %5060 = vmatpush1.bf16.msra.mxu1 %v3380_v9  ;;  %4405 = vmatprep.subr.bf16.mxu0 %v3387_v62  ;;  %v8509_v9 = vpack.c.bf16 %v775_v18, %v775_v18  ;;  %v3429_v62 = vunpack.c.h.s8.bf16 %v1629_v56  ;;  %v3435_v60 = vunpack.c.l.s8.bf16 %v1635_v57  ;;  %v3443_v3 = vunpack.c.h.s8.bf16 %v1635_v57  ;;  %v1650_v18 = vld [vmem:[#allocation7 + $0x18c0] sm:$0xff] }
 0x588   :  { %5061 = vmatprep.subr.bf16.mxu1 %v3389_v59  ;;  %v3426_v59 = vunpack.c.h.s8.bf16 %v1626_v46 }
 0x58a   :  { %4406 = vmatpush1.bf16.msra.mxu0 %v3386_v44  ;;  %v1634_v44 = vld [vmem:[#allocation7 + $0x1840] sm:$0xff] }
 0x58b   :  { %5062 = vmatpush1.bf16.msra.mxu1 %v3388_v35  ;;  %4407 = vmatprep.subr.bf16.mxu0 %v3395_v2  ;;  %v3437_v35 = vunpack.c.l.s8.bf16 %v1637_v58  ;;  %v1636_v2 = vld [vmem:[#allocation7 + $0x1850] sm:$0xff]  ;;  %v3442_v61 = vunpack.c.h.s8.bf16 %v1634_v44 }
 0x58c   :  { %5063 = vmatprep.subr.bf16.mxu1 %v3397_v15  ;;  %v3434_v15 = vunpack.c.l.s8.bf16 %v1634_v44  ;;  %v3436_v20 = vunpack.c.l.s8.bf16 %v1636_v2 }
 0x58e   :  { %4408 = vmatpush1.bf16.msra.mxu0 %v3394_v24  ;;  %v3445_v24 = vunpack.c.h.s8.bf16 %v1637_v58 }
 0x58f   :  { %5064 = vmatpush1.bf16.msra.mxu1 %v3396_v16  ;;  %4409 = vmatprep.subr.bf16.mxu0 %v3403_v21  ;;  %v1643_v16 = vld [vmem:[#allocation7 + $0x1888] sm:$0xff]  ;;  %v1645_v21 = vld [vmem:[#allocation7 + $0x1898] sm:$0xff] }
 0x590   :  { %5065 = vmatprep.subr.bf16.mxu1 %v3405_v22  ;;  %v3444_v22 = vunpack.c.h.s8.bf16 %v1636_v2  ;;  %v3451_v25 = vunpack.c.l.s8.bf16 %v1643_v16  ;;  %v3459_v56 = vunpack.c.h.s8.bf16 %v1643_v16  ;;  %v1658_v2 = vld [vmem:[#allocation7 + $0x1900] sm:$0xff] }
 0x592   :  { %4410 = vmatpush1.bf16.msra.mxu0 %v3402_v36  ;;  %v1642_v36 = vld [vmem:[#allocation7 + $0x1880] sm:$0xff] }
 0x593   :  { %5066 = vmatpush1.bf16.msra.mxu1 %v3404_v29  ;;  %4411 = vmatprep.subr.bf16.mxu0 %v3411_v11  ;;  %v3453_v29 = vunpack.c.l.s8.bf16 %v1645_v21  ;;  %v1644_v11 = vld [vmem:[#allocation7 + $0x1890] sm:$0xff]  ;;  %v3458_v46 = vunpack.c.h.s8.bf16 %v1642_v36 }
 0x594   :  { %5067 = vmatprep.subr.bf16.mxu1 %v3413_v42  ;;  %v3450_v42 = vunpack.c.l.s8.bf16 %v1642_v36  ;;  %v3452_v43 = vunpack.c.l.s8.bf16 %v1644_v11 }
 0x596   :  { %4412 = vmatpush1.bf16.msra.mxu0 %v3410_v45  ;;  %v3461_v45 = vunpack.c.h.s8.bf16 %v1645_v21 }
 0x597   :  { %5068 = vmatpush1.bf16.msra.mxu1 %v3412_v7  ;;  %4422 = vmatprep.subr.bf16.mxu0 %v3419_v23  ;;  %v1651_v7 = vld [vmem:[#allocation7 + $0x18c8] sm:$0xff]  ;;  %v1653_v23 = vld [vmem:[#allocation7 + $0x18d8] sm:$0xff] }
 0x598   :  { %5078 = vmatprep.subr.bf16.mxu1 %v3421_v48  ;;  %v3460_v48 = vunpack.c.h.s8.bf16 %v1644_v11  ;;  %v3467_v5 = vunpack.c.l.s8.bf16 %v1651_v7  ;;  %v3477_v58 = vunpack.c.h.s8.bf16 %v1653_v23  ;;  %v1666_v11 = vld [vmem:[#allocation7 + $0x1940] sm:$0xff] }
 0x599   :  { %4414 = vmatmul.mubr.bf16.vlgmr.msra.gmra.mrb[0].mxu0 %v8506_v49 }
 0x59a   :  { %5070 = vmatmul.mubr.bf16.vlgmr.msra.gmra.mrb[0].mxu1 %v8506_v49  ;;  %4423 = vmatpush1.bf16.msra.mxu0 %v3418_v63  ;;  %v3469_v63 = vunpack.c.l.s8.bf16 %v1653_v23 }
 0x59b   :  { %4454 = vmatprep.mubr.bf16.mxu0 %v8509_v9  ;;  %5079 = vmatpush1.bf16.msra.mxu1 %v3420_v51  ;;  %v1652_v51 = vld [vmem:[#allocation7 + $0x18d0] sm:$0xff] }
 0x59c   :  { %5110 = vmatprep.mubr.bf16.mxu1 %v8509_v9  ;;  %4424 = vmatprep.subr.bf16.mxu0 %v3427_v53  ;;  %v3466_v53 = vunpack.c.l.s8.bf16 %v1650_v18  ;;  %v3468_v57 = vunpack.c.l.s8.bf16 %v1652_v51  ;;  %v3476_v44 = vunpack.c.h.s8.bf16 %v1652_v51  ;;  %v1674_v51 = vld [vmem:[#allocation7 + $0x1980] sm:$0xff] }
 0x59d   :  { %5080 = vmatprep.subr.bf16.mxu1 %v3429_v62  ;;  %v3475_v62 = vunpack.c.h.s8.bf16 %v1651_v7 }
 0x59e   :  { %4425 = vmatpush1.bf16.msra.mxu0 %v3426_v59  ;;  %v1659_v59 = vld [vmem:[#allocation7 + $0x1908] sm:$0xff] }
 0x59f   :  { %5081 = vmatpush1.bf16.msra.mxu1 %v3428_v52  ;;  %4426 = vmatprep.subr.bf16.mxu0 %v3435_v60  ;;  %v1661_v52 = vld [vmem:[#allocation7 + $0x1918] sm:$0xff]  ;;  %v3474_v60 = vunpack.c.h.s8.bf16 %v1650_v18  ;;  %v3491_v16 = vunpack.c.h.s8.bf16 %v1659_v59 }
 0x5a0   :  { %5082 = vmatprep.subr.bf16.mxu1 %v3437_v35  ;;  %v3483_v35 = vunpack.c.l.s8.bf16 %v1659_v59  ;;  %v3493_v21 = vunpack.c.h.s8.bf16 %v1661_v52 }
 0x5a2   :  { %4427 = vmatpush1.bf16.msra.mxu0 %v3434_v15  ;;  %v3485_v15 = vunpack.c.l.s8.bf16 %v1661_v52 }
 0x5a3   :  { %5083 = vmatpush1.bf16.msra.mxu1 %v3436_v20  ;;  %4428 = vmatprep.subr.bf16.mxu0 %v3443_v3  ;;  %v1660_v20 = vld [vmem:[#allocation7 + $0x1910] sm:$0xff]  ;;  %v3482_v3 = vunpack.c.l.s8.bf16 %v1658_v2 }
 0x5a4   :  { %5084 = vmatprep.subr.bf16.mxu1 %v3445_v24  ;;  %v3484_v24 = vunpack.c.l.s8.bf16 %v1660_v20  ;;  %v3492_v36 = vunpack.c.h.s8.bf16 %v1660_v20  ;;  %v1682_v20 = vld [vmem:[#allocation7 + $0x19c0] sm:$0xff] }
 0x5a6   :  { %4429 = vmatpush1.bf16.msra.mxu0 %v3442_v61  ;;  %v1667_v61 = vld [vmem:[#allocation7 + $0x1948] sm:$0xff] }
 0x5a7   :  { %5085 = vmatpush1.bf16.msra.mxu1 %v3444_v22  ;;  %4430 = vmatprep.subr.bf16.mxu0 %v3451_v25  ;;  %v1669_v22 = vld [vmem:[#allocation7 + $0x1958] sm:$0xff]  ;;  %v3490_v25 = vunpack.c.h.s8.bf16 %v1658_v2  ;;  %v3507_v7 = vunpack.c.h.s8.bf16 %v1667_v61 }
 0x5a8   :  { %5086 = vmatprep.subr.bf16.mxu1 %v3453_v29  ;;  %v3499_v29 = vunpack.c.l.s8.bf16 %v1667_v61  ;;  %v3509_v23 = vunpack.c.h.s8.bf16 %v1669_v22 }
 0x5aa   :  { %4431 = vmatpush1.bf16.msra.mxu0 %v3450_v42  ;;  %v3501_v42 = vunpack.c.l.s8.bf16 %v1669_v22 }
 0x5ab   :  { %5087 = vmatpush1.bf16.msra.mxu1 %v3452_v43  ;;  %4432 = vmatprep.subr.bf16.mxu0 %v3459_v56  ;;  %v1668_v43 = vld [vmem:[#allocation7 + $0x1950] sm:$0xff]  ;;  %v3498_v56 = vunpack.c.l.s8.bf16 %v1666_v11 }
 0x5ac   :  { %5088 = vmatprep.subr.bf16.mxu1 %v3461_v45  ;;  %v3500_v45 = vunpack.c.l.s8.bf16 %v1668_v43  ;;  %v3508_v18 = vunpack.c.h.s8.bf16 %v1668_v43 }
 0x5ae   :  { %4433 = vmatpush1.bf16.msra.mxu0 %v3458_v46  ;;  %v1675_v46 = vld [vmem:[#allocation7 + $0x1988] sm:$0xff] }
 0x5af   :  { %5089 = vmatpush1.bf16.msra.mxu1 %v3460_v48  ;;  %4434 = vmatprep.subr.bf16.mxu0 %v3467_v5  ;;  %v1677_v48 = vld [vmem:[#allocation7 + $0x1998] sm:$0xff]  ;;  %v3506_v5 = vunpack.c.h.s8.bf16 %v1666_v11  ;;  %v3523_v59 = vunpack.c.h.s8.bf16 %v1675_v46 }
 0x5b0   :  { %5090 = vmatprep.subr.bf16.mxu1 %v3469_v63  ;;  %v3515_v63 = vunpack.c.l.s8.bf16 %v1675_v46  ;;  %v3525_v52 = vunpack.c.h.s8.bf16 %v1677_v48 }
 0x5b2   :  { %4435 = vmatpush1.bf16.msra.mxu0 %v3466_v53  ;;  %v3517_v53 = vunpack.c.l.s8.bf16 %v1677_v48  ;;  %v8523_v48 = vpack.c.bf16 %v8500_v10, %v8500_v10 }
 0x5b3   :  { %5091 = vmatpush1.bf16.msra.mxu1 %v3468_v57  ;;  %4436 = vmatprep.subr.bf16.mxu0 %v3475_v62  ;;  %v1676_v57 = vld [vmem:[#allocation7 + $0x1990] sm:$0xff]  ;;  %v3514_v62 = vunpack.c.l.s8.bf16 %v1674_v51 }
 0x5b4   :  { %5092 = vmatprep.subr.bf16.mxu1 %v3477_v58  ;;  %v3516_v58 = vunpack.c.l.s8.bf16 %v1676_v57  ;;  %v3524_v2 = vunpack.c.h.s8.bf16 %v1676_v57  ;;  %v1701_v57 = vld [vmem:[#allocation7 + $0x1a58] sm:$0xff] }
 0x5b6   :  { %4437 = vmatpush1.bf16.msra.mxu0 %v3474_v60  ;;  %v1683_v60 = vld [vmem:[#allocation7 + $0x19c8] sm:$0xff] }
 0x5b7   :  { %5093 = vmatpush1.bf16.msra.mxu1 %v3476_v44  ;;  %4438 = vmatprep.subr.bf16.mxu0 %v3483_v35  ;;  %v1685_v44 = vld [vmem:[#allocation7 + $0x19d8] sm:$0xff]  ;;  %v3522_v35 = vunpack.c.h.s8.bf16 %v1674_v51  ;;  %v3539_v22 = vunpack.c.h.s8.bf16 %v1683_v60 }
 0x5b8   :  { %5094 = vmatprep.subr.bf16.mxu1 %v3485_v15  ;;  %v3531_v15 = vunpack.c.l.s8.bf16 %v1683_v60  ;;  %v1700_v60 = vld [vmem:[#allocation7 + $0x1a50] sm:$0xff] }
 0x5ba   :  { %4439 = vmatpush1.bf16.msra.mxu0 %v3482_v3  ;;  %v3533_v3 = vunpack.c.l.s8.bf16 %v1685_v44 }
 0x5bb   :  { %5095 = vmatpush1.bf16.msra.mxu1 %v3484_v24  ;;  %4440 = vmatprep.subr.bf16.mxu0 %v3491_v16  ;;  %v1684_v24 = vld [vmem:[#allocation7 + $0x19d0] sm:$0xff]  ;;  %v760_v16 = vcombine.high %v8496_v6, %v8496_v6  ;;  %v1690_v6 = vld [vmem:[#allocation7 + $0x1a00] sm:$0xff] }
 0x5bc   :  { %5096 = vmatprep.subr.bf16.mxu1 %v3493_v21  ;;  %v3530_v21 = vunpack.c.l.s8.bf16 %v1682_v20  ;;  %v3532_v61 = vunpack.c.l.s8.bf16 %v1684_v24  ;;  %v3540_v43 = vunpack.c.h.s8.bf16 %v1684_v24  ;;  %v3546_v46 = vunpack.c.l.s8.bf16 %v1690_v6 }
 0x5bd   :  { %v8517_v11 = vrot.slane %v760_v16, %v8095_v8  ;;  %v3572_v16 = vunpack.c.h.s8.bf16 %v1700_v60 }
 0x5be   :  { %4441 = vmatpush1.bf16.msra.mxu0 %v3490_v25  ;;  %v3541_v25 = vunpack.c.h.s8.bf16 %v1685_v44 }
 0x5bf   :  { %5097 = vmatpush1.bf16.msra.mxu1 %v3492_v36  ;;  %4442 = vmatprep.subr.bf16.mxu0 %v3499_v29  ;;  %v1691_v36 = vld [vmem:[#allocation7 + $0x1a08] sm:$0xff]  ;;  %v1693_v29 = vld [vmem:[#allocation7 + $0x1a18] sm:$0xff] }
 0x5c0   :  { %5098 = vmatprep.subr.bf16.mxu1 %v3501_v42  ;;  %v3538_v42 = vunpack.c.h.s8.bf16 %v1682_v20  ;;  %v1707_v20 = vld [vmem:[#allocation7 + $0x1a88] sm:$0xff] }
 0x5c2   :  { %4443 = vmatpush1.bf16.msra.mxu0 %v3498_v56  ;;  %v3547_v56 = vunpack.c.l.s8.bf16 %v1691_v36 }
 0x5c3   :  { %5099 = vmatpush1.bf16.msra.mxu1 %v3500_v45  ;;  %4444 = vmatprep.subr.bf16.mxu0 %v3507_v7  ;;  %v3549_v45 = vunpack.c.l.s8.bf16 %v1693_v29  ;;  %v1692_v7 = vld [vmem:[#allocation7 + $0x1a10] sm:$0xff] }
 0x5c4   :  { %5100 = vmatprep.subr.bf16.mxu1 %v3509_v23  ;;  %v776_v23 = vcombine.high %v8517_v11, %v8517_v11  ;;  %v3556_v10 = vunpack.c.h.s8.bf16 %v1692_v7 }
 0x5c6   :  { %4445 = vmatpush1.bf16.msra.mxu0 %v3506_v5  ;;  %v3548_v5 = vunpack.c.l.s8.bf16 %v1692_v7  ;;  %v8526_v51 = vpack.c.bf16 %v776_v23, %v776_v23 }
 0x5c7   :  { %5101 = vmatpush1.bf16.msra.mxu1 %v3508_v18  ;;  %4446 = vmatprep.subr.bf16.mxu0 %v3515_v63  ;;  %v3555_v18 = vunpack.c.h.s8.bf16 %v1691_v36  ;;  %v1699_v63 = vld [vmem:[#allocation7 + $0x1a48] sm:$0xff] }
 0x5c8   :  { %5102 = vmatprep.subr.bf16.mxu1 %v3517_v53  ;;  %v3557_v53 = vunpack.c.h.s8.bf16 %v1693_v29 }
 0x5ca   :  { %4447 = vmatpush1.bf16.msra.mxu0 %v3514_v62  ;;  %v3554_v62 = vunpack.c.h.s8.bf16 %v1690_v6  ;;  %v1717_v6 = vld [vmem:[#allocation7 + $0x1ad8] sm:$0xff] }
 0x5cb   :  { %5103 = vmatpush1.bf16.msra.mxu1 %v3516_v58  ;;  %4448 = vmatprep.subr.bf16.mxu0 %v3523_v59  ;;  %v3563_v58 = vunpack.c.l.s8.bf16 %v1699_v63  ;;  %v1698_v59 = vld [vmem:[#allocation7 + $0x1a40] sm:$0xff] }
 0x5cc   :  { %5104 = vmatprep.subr.bf16.mxu1 %v3525_v52  ;;  %v3565_v52 = vunpack.c.l.s8.bf16 %v1701_v57  ;;  %v3562_v44 = vunpack.c.l.s8.bf16 %v1698_v59  ;;  %v3570_v24 = vunpack.c.h.s8.bf16 %v1698_v59 }
 0x5ce   :  { %4449 = vmatpush1.bf16.msra.mxu0 %v3522_v35  ;;  %v3564_v35 = vunpack.c.l.s8.bf16 %v1700_v60 }
 0x5cf   :  { %5105 = vmatpush1.bf16.msra.mxu1 %v3524_v2  ;;  %4450 = vmatprep.subr.bf16.mxu0 %v3531_v15  ;;  %v3571_v2 = vunpack.c.h.s8.bf16 %v1699_v63  ;;  %v3573_v15 = vunpack.c.h.s8.bf16 %v1701_v57 }
 0x5d0   :  { %5106 = vmatprep.subr.bf16.mxu1 %v3533_v3  ;;  %v1709_v3 = vld [vmem:[#allocation7 + $0x1a98] sm:$0xff] }
 0x5d2   :  { %4451 = vmatpush1.bf16.msra.mxu0 %v3530_v21  ;;  %v3579_v21 = vunpack.c.l.s8.bf16 %v1707_v20 }
 0x5d3   :  { %5107 = vmatpush1.bf16.msra.mxu1 %v3532_v61  ;;  %4452 = vmatprep.subr.bf16.mxu0 %v3539_v22  ;;  %v1706_v61 = vld [vmem:[#allocation7 + $0x1a80] sm:$0xff]  ;;  %v3581_v22 = vunpack.c.l.s8.bf16 %v1709_v3 }
 0x5d4   :  { %5108 = vmatprep.subr.bf16.mxu1 %v3541_v25  ;;  %v1708_v25 = vld [vmem:[#allocation7 + $0x1a90] sm:$0xff]  ;;  %v3578_v36 = vunpack.c.l.s8.bf16 %v1706_v61 }
 0x5d5   :  { %v3580_v29 = vunpack.c.l.s8.bf16 %v1708_v25  ;;  %v3588_v7 = vunpack.c.h.s8.bf16 %v1708_v25 }
 0x5d6   :  { %4453 = vmatpush1.bf16.msra.mxu0 %v3538_v42  ;;  %v3587_v42 = vunpack.c.h.s8.bf16 %v1707_v20 }
 0x5d7   :  { %5109 = vmatpush1.bf16.msra.mxu1 %v3540_v43  ;;  %4463 = vmatprep.subr.bf16.mxu0 %v3547_v56  ;;  %v3589_v43 = vunpack.c.h.s8.bf16 %v1709_v3  ;;  %v1715_v56 = vld [vmem:[#allocation7 + $0x1ac8] sm:$0xff] }
 0x5d8   :  { %5119 = vmatprep.subr.bf16.mxu1 %v3549_v45  ;;  %v3586_v45 = vunpack.c.h.s8.bf16 %v1706_v61  ;;  %v3595_v23 = vunpack.c.l.s8.bf16 %v1715_v56  ;;  %v3603_v57 = vunpack.c.h.s8.bf16 %v1715_v56 }
 0x5d9   :  { %4455 = vmatmul.mubr.bf16.vlgmr.msra.gmra.mrb[0].mxu0 %v8523_v48 }
 0x5da   :  { %5111 = vmatmul.mubr.bf16.vlgmr.msra.gmra.mrb[0].mxu1 %v8523_v48  ;;  %4464 = vmatpush1.bf16.msra.mxu0 %v3546_v46  ;;  %v1714_v46 = vld [vmem:[#allocation7 + $0x1ac0] sm:$0xff] }
 0x5db   :  { %4495 = vmatprep.mubr.bf16.mxu0 %v8526_v51  ;;  %5120 = vmatpush1.bf16.msra.mxu1 %v3548_v5  ;;  %v3597_v5 = vunpack.c.l.s8.bf16 %v1717_v6  ;;  %v3594_v63 = vunpack.c.l.s8.bf16 %v1714_v46  ;;  %v3602_v59 = vunpack.c.h.s8.bf16 %v1714_v46 }
 0x5dc   :  { %5151 = vmatprep.mubr.bf16.mxu1 %v8526_v51  ;;  %4465 = vmatprep.subr.bf16.mxu0 %v3555_v18  ;;  %v1716_v18 = vld [vmem:[#allocation7 + $0x1ad0] sm:$0xff] }
 0x5dd   :  { %5121 = vmatprep.subr.bf16.mxu1 %v3557_v53  ;;  %v3596_v53 = vunpack.c.l.s8.bf16 %v1716_v18 }
 0x5de   :  { %4466 = vmatpush1.bf16.msra.mxu0 %v3554_v62  ;;  %v3605_v62 = vunpack.c.h.s8.bf16 %v1717_v6 }
 0x5df   :  { %5122 = vmatpush1.bf16.msra.mxu1 %v3556_v10  ;;  %4467 = vmatprep.subr.bf16.mxu0 %v3563_v58  ;;  %v1723_v10 = vld [vmem:[#allocation7 + $0x1b08] sm:$0xff]  ;;  %v1725_v58 = vld [vmem:[#allocation7 + $0x1b18] sm:$0xff] }
 0x5e0   :  { %5123 = vmatprep.subr.bf16.mxu1 %v3565_v52  ;;  %v3604_v52 = vunpack.c.h.s8.bf16 %v1716_v18  ;;  %v3611_v60 = vunpack.c.l.s8.bf16 %v1723_v10  ;;  %v3619_v3 = vunpack.c.h.s8.bf16 %v1723_v10 }
 0x5e2   :  { %4468 = vmatpush1.bf16.msra.mxu0 %v3562_v44  ;;  %v1722_v44 = vld [vmem:[#allocation7 + $0x1b00] sm:$0xff] }
 0x5e3   :  { %5124 = vmatpush1.bf16.msra.mxu1 %v3564_v35  ;;  %4469 = vmatprep.subr.bf16.mxu0 %v3571_v2  ;;  %v3613_v35 = vunpack.c.l.s8.bf16 %v1725_v58  ;;  %v1724_v2 = vld [vmem:[#allocation7 + $0x1b10] sm:$0xff]  ;;  %v3618_v61 = vunpack.c.h.s8.bf16 %v1722_v44 }
 0x5e4   :  { %5125 = vmatprep.subr.bf16.mxu1 %v3573_v15  ;;  %v3610_v15 = vunpack.c.l.s8.bf16 %v1722_v44  ;;  %v3612_v20 = vunpack.c.l.s8.bf16 %v1724_v2 }
 0x5e6   :  { %4470 = vmatpush1.bf16.msra.mxu0 %v3570_v24  ;;  %v3621_v24 = vunpack.c.h.s8.bf16 %v1725_v58 }
 0x5e7   :  { %5126 = vmatpush1.bf16.msra.mxu1 %v3572_v16  ;;  %4471 = vmatprep.subr.bf16.mxu0 %v3579_v21  ;;  %v1731_v16 = vld [vmem:[#allocation7 + $0x1b48] sm:$0xff]  ;;  %v1733_v21 = vld [vmem:[#allocation7 + $0x1b58] sm:$0xff] }
 0x5e8   :  { %5127 = vmatprep.subr.bf16.mxu1 %v3581_v22  ;;  %v3620_v22 = vunpack.c.h.s8.bf16 %v1724_v2  ;;  %v3627_v25 = vunpack.c.l.s8.bf16 %v1731_v16  ;;  %v3635_v6 = vunpack.c.h.s8.bf16 %v1731_v16 }
 0x5ea   :  { %4472 = vmatpush1.bf16.msra.mxu0 %v3578_v36  ;;  %v1730_v36 = vld [vmem:[#allocation7 + $0x1b40] sm:$0xff] }
 0x5eb   :  { %5128 = vmatpush1.bf16.msra.mxu1 %v3580_v29  ;;  %4473 = vmatprep.subr.bf16.mxu0 %v3587_v42  ;;  %v3629_v29 = vunpack.c.l.s8.bf16 %v1733_v21  ;;  %v1732_v42 = vld [vmem:[#allocation7 + $0x1b50] sm:$0xff]  ;;  %v3634_v46 = vunpack.c.h.s8.bf16 %v1730_v36 }
 0x5ec   :  { %5129 = vmatprep.subr.bf16.mxu1 %v3589_v43  ;;  %v3626_v43 = vunpack.c.l.s8.bf16 %v1730_v36  ;;  %v3628_v56 = vunpack.c.l.s8.bf16 %v1732_v42  ;;  %v1757_v36 = vld [vmem:[#allocation7 + $0x1c18] sm:$0xff] }
 0x5ee   :  { %4474 = vmatpush1.bf16.msra.mxu0 %v3586_v45  ;;  %v3637_v45 = vunpack.c.h.s8.bf16 %v1733_v21 }
 0x5ef   :  { %5130 = vmatpush1.bf16.msra.mxu1 %v3588_v7  ;;  %4475 = vmatprep.subr.bf16.mxu0 %v3595_v23  ;;  %v1739_v7 = vld [vmem:[#allocation7 + $0x1b88] sm:$0xff]  ;;  %v1741_v23 = vld [vmem:[#allocation7 + $0x1b98] sm:$0xff] }
 0x5f0   :  { %5131 = vmatprep.subr.bf16.mxu1 %v3597_v5  ;;  %v3636_v5 = vunpack.c.h.s8.bf16 %v1732_v42  ;;  %v3643_v18 = vunpack.c.l.s8.bf16 %v1739_v7  ;;  %v3651_v58 = vunpack.c.h.s8.bf16 %v1739_v7 }
 0x5f2   :  { %4476 = vmatpush1.bf16.msra.mxu0 %v3594_v63  ;;  %v1738_v63 = vld [vmem:[#allocation7 + $0x1b80] sm:$0xff] }
 0x5f3   :  { %5132 = vmatpush1.bf16.msra.mxu1 %v3596_v53  ;;  %4477 = vmatprep.subr.bf16.mxu0 %v3603_v57  ;;  %v3645_v53 = vunpack.c.l.s8.bf16 %v1741_v23  ;;  %v1740_v57 = vld [vmem:[#allocation7 + $0x1b90] sm:$0xff]  ;;  %v3650_v44 = vunpack.c.h.s8.bf16 %v1738_v63 }
 0x5f4   :  { %5133 = vmatprep.subr.bf16.mxu1 %v3605_v62  ;;  %v3642_v62 = vunpack.c.l.s8.bf16 %v1738_v63  ;;  %v3644_v10 = vunpack.c.l.s8.bf16 %v1740_v57  ;;  %v1763_v63 = vld [vmem:[#allocation7 + $0x1c48] sm:$0xff] }
 0x5f6   :  { %4478 = vmatpush1.bf16.msra.mxu0 %v3602_v59  ;;  %v3653_v59 = vunpack.c.h.s8.bf16 %v1741_v23 }
 0x5f7   :  { %5134 = vmatpush1.bf16.msra.mxu1 %v3604_v52  ;;  %4479 = vmatprep.subr.bf16.mxu0 %v3611_v60  ;;  %v1747_v52 = vld [vmem:[#allocation7 + $0x1bc8] sm:$0xff]  ;;  %v1749_v60 = vld [vmem:[#allocation7 + $0x1bd8] sm:$0xff] }
 0x5f8   :  { %5135 = vmatprep.subr.bf16.mxu1 %v3613_v35  ;;  %v3652_v35 = vunpack.c.h.s8.bf16 %v1740_v57  ;;  %v3659_v2 = vunpack.c.l.s8.bf16 %v1747_v52  ;;  %v3685_v57 = vunpack.c.h.s8.bf16 %v1757_v36 }
 0x5fa   :  { %4480 = vmatpush1.bf16.msra.mxu0 %v3610_v15  ;;  %v1746_v15 = vld [vmem:[#allocation7 + $0x1bc0] sm:$0xff] }
 0x5fb   :  { %5136 = vmatpush1.bf16.msra.mxu1 %v3612_v20  ;;  %4481 = vmatprep.subr.bf16.mxu0 %v3619_v3  ;;  %v3661_v20 = vunpack.c.l.s8.bf16 %v1749_v60  ;;  %v1748_v3 = vld [vmem:[#allocation7 + $0x1bd0] sm:$0xff]  ;;  %v3658_v16 = vunpack.c.l.s8.bf16 %v1746_v15  ;;  %v3666_v42 = vunpack.c.h.s8.bf16 %v1746_v15 }
 0x5fc   :  { %5137 = vmatprep.subr.bf16.mxu1 %v3621_v24  ;;  %v8532_v24 = vmax.f32 %v8313_v12, 0.0  ;;  %v3660_v21 = vunpack.c.l.s8.bf16 %v1748_v3  ;;  %v3668_v12 = vunpack.c.h.s8.bf16 %v1748_v3  ;;  %v1773_v3 = vld [vmem:[#allocation7 + $0x1c98] sm:$0xff] }
 0x5fe   :  { %4482 = vmatpush1.bf16.msra.mxu0 %v3618_v61  ;;  %v3667_v61 = vunpack.c.h.s8.bf16 %v1747_v52 }
 0x5ff   :  { %5138 = vmatpush1.bf16.msra.mxu1 %v3620_v22  ;;  %4483 = vmatprep.subr.bf16.mxu0 %v3627_v25  ;;  %v3669_v22 = vunpack.c.h.s8.bf16 %v1749_v60  ;;  %v1755_v25 = vld [vmem:[#allocation7 + $0x1c08] sm:$0xff]  ;;  %v1764_v60 = vld [vmem:[#allocation7 + $0x1c50] sm:$0xff] }
 0x600   :  { %5139 = vmatprep.subr.bf16.mxu1 %v3629_v29  ;;  %v8536_v29 = vrot.slane %v8532_v24, %v8095_v8 }
 0x602   :  { %4484 = vmatpush1.bf16.msra.mxu0 %v3626_v43  ;;  %v3675_v43 = vunpack.c.l.s8.bf16 %v1755_v25  ;;  %v792_v7 = vcombine.high %v8536_v29, %v8536_v29 }
 0x603   :  { %5140 = vmatpush1.bf16.msra.mxu1 %v3628_v56  ;;  %4485 = vmatprep.subr.bf16.mxu0 %v3635_v6  ;;  %v1754_v56 = vld [vmem:[#allocation7 + $0x1c00] sm:$0xff]  ;;  %v3677_v6 = vunpack.c.l.s8.bf16 %v1757_v36  ;;  %v1772_v36 = vld [vmem:[#allocation7 + $0x1c90] sm:$0xff] }
 0x604   :  { %5141 = vmatprep.subr.bf16.mxu1 %v3637_v45  ;;  %v1756_v45 = vld [vmem:[#allocation7 + $0x1c10] sm:$0xff]  ;;  %v3674_v23 = vunpack.c.l.s8.bf16 %v1754_v56 }
 0x606   :  { %4486 = vmatpush1.bf16.msra.mxu0 %v3634_v46  ;;  %v8542_v46 = vpack.c.bf16 %v8517_v11, %v8517_v11  ;;  %v3684_v11 = vunpack.c.h.s8.bf16 %v1756_v45 }
 0x607   :  { %5142 = vmatpush1.bf16.msra.mxu1 %v3636_v5  ;;  %4487 = vmatprep.subr.bf16.mxu0 %v3643_v18  ;;  %v3676_v5 = vunpack.c.l.s8.bf16 %v1756_v45  ;;  %v3683_v18 = vunpack.c.h.s8.bf16 %v1755_v25  ;;  %v3709_v25 = vunpack.c.l.s8.bf16 %v1773_v3  ;;  %v1781_v45 = vld [vmem:[#allocation7 + $0x1cd8] sm:$0xff] }
 0x608   :  { %5143 = vmatprep.subr.bf16.mxu1 %v3645_v53  ;;  %v8545_v53 = vpack.c.bf16 %v792_v7, %v792_v7 }
 0x60a   :  { %4488 = vmatpush1.bf16.msra.mxu0 %v3642_v62  ;;  %v1765_v62 = vld [vmem:[#allocation7 + $0x1c58] sm:$0xff] }
 0x60b   :  { %5144 = vmatpush1.bf16.msra.mxu1 %v3644_v10  ;;  %4489 = vmatprep.subr.bf16.mxu0 %v3651_v58  ;;  %v3682_v10 = vunpack.c.h.s8.bf16 %v1754_v56  ;;  %v3691_v58 = vunpack.c.l.s8.bf16 %v1763_v63  ;;  %v3693_v52 = vunpack.c.l.s8.bf16 %v1765_v62  ;;  %v3701_v15 = vunpack.c.h.s8.bf16 %v1765_v62 }
 0x60c   :  { %5145 = vmatprep.subr.bf16.mxu1 %v3653_v59  ;;  %v1762_v59 = vld [vmem:[#allocation7 + $0x1c40] sm:$0xff]  ;;  %v3717_v56 = vunpack.c.h.s8.bf16 %v1773_v3 }
 0x60e   :  { %4490 = vmatpush1.bf16.msra.mxu0 %v3650_v44  ;;  %v3690_v44 = vunpack.c.l.s8.bf16 %v1762_v59 }
 0x60f   :  { %5146 = vmatpush1.bf16.msra.mxu1 %v3652_v35  ;;  %4491 = vmatprep.subr.bf16.mxu0 %v3659_v2  ;;  %v3692_v35 = vunpack.c.l.s8.bf16 %v1764_v60  ;;  %v3699_v2 = vunpack.c.h.s8.bf16 %v1763_v63  ;;  %v3725_v63 = vunpack.c.l.s8.bf16 %v1781_v45 }
 0x610   :  { %5147 = vmatprep.subr.bf16.mxu1 %v3661_v20  ;;  %v1771_v20 = vld [vmem:[#allocation7 + $0x1c88] sm:$0xff] }
 0x612   :  { %4492 = vmatpush1.bf16.msra.mxu0 %v3658_v16  ;;  %v3698_v16 = vunpack.c.h.s8.bf16 %v1762_v59  ;;  %v1787_v59 = vld [vmem:[#allocation7 + $0x1d08] sm:$0xff] }
 0x613   :  { %5148 = vmatpush1.bf16.msra.mxu1 %v3660_v21  ;;  %4493 = vmatprep.subr.bf16.mxu0 %v3667_v61  ;;  %v3700_v21 = vunpack.c.h.s8.bf16 %v1764_v60  ;;  %v3707_v61 = vunpack.c.l.s8.bf16 %v1771_v20 }
 0x614   :  { %5149 = vmatprep.subr.bf16.mxu1 %v3669_v22  ;;  %v1770_v22 = vld [vmem:[#allocation7 + $0x1c80] sm:$0xff] }
 0x615   :  { %v3714_v7 = vunpack.c.h.s8.bf16 %v1770_v22 }
 0x616   :  { %4494 = vmatpush1.bf16.msra.mxu0 %v3666_v42  ;;  %v3706_v42 = vunpack.c.l.s8.bf16 %v1770_v22  ;;  %v1795_v22 = vld [vmem:[#allocation7 + $0x1d48] sm:$0xff] }
 0x617   :  { %5150 = vmatpush1.bf16.msra.mxu1 %v3668_v12  ;;  %4504 = vmatprep.subr.bf16.mxu0 %v3675_v43  ;;  %v3708_v12 = vunpack.c.l.s8.bf16 %v1772_v36  ;;  %v3715_v43 = vunpack.c.h.s8.bf16 %v1771_v20  ;;  %v1788_v20 = vld [vmem:[#allocation7 + $0x1d10] sm:$0xff] }
 0x618   :  { %5160 = vmatprep.subr.bf16.mxu1 %v3677_v6  ;;  %v1779_v6 = vld [vmem:[#allocation7 + $0x1cc8] sm:$0xff] }
 0x619   :  { %4496 = vmatmul.mubr.bf16.vlgmr.msra.gmra.mrb[0].mxu0 %v8542_v46 }
 0x61a   :  { %5152 = vmatmul.mubr.bf16.vlgmr.msra.gmra.mrb[0].mxu1 %v8542_v46  ;;  %4505 = vmatpush1.bf16.msra.mxu0 %v3674_v23  ;;  %v3716_v23 = vunpack.c.h.s8.bf16 %v1772_v36 }
 0x61b   :  { %4536 = vmatprep.mubr.bf16.mxu0 %v8545_v53  ;;  %5161 = vmatpush1.bf16.msra.mxu1 %v3676_v5  ;;  %v3723_v5 = vunpack.c.l.s8.bf16 %v1779_v6 }
 0x61c   :  { %5192 = vmatprep.mubr.bf16.mxu1 %v8545_v53  ;;  %4506 = vmatprep.subr.bf16.mxu0 %v3683_v18  ;;  %v1778_v18 = vld [vmem:[#allocation7 + $0x1cc0] sm:$0xff] }
 0x61d   :  { %5162 = vmatprep.subr.bf16.mxu1 %v3685_v57  ;;  %v1780_v57 = vld [vmem:[#allocation7 + $0x1cd0] sm:$0xff]  ;;  %v3722_v62 = vunpack.c.l.s8.bf16 %v1778_v18  ;;  %v3730_v60 = vunpack.c.h.s8.bf16 %v1778_v18  ;;  %v1803_v18 = vld [vmem:[#allocation7 + $0x1d88] sm:$0xff] }
 0x61e   :  { %4507 = vmatpush1.bf16.msra.mxu0 %v3682_v10  ;;  %v3724_v10 = vunpack.c.l.s8.bf16 %v1780_v57 }
 0x61f   :  { %5163 = vmatpush1.bf16.msra.mxu1 %v3684_v11  ;;  %4508 = vmatprep.subr.bf16.mxu0 %v3691_v58  ;;  %v3731_v11 = vunpack.c.h.s8.bf16 %v1779_v6  ;;  %v3733_v58 = vunpack.c.h.s8.bf16 %v1781_v45  ;;  %v1796_v6 = vld [vmem:[#allocation7 + $0x1d50] sm:$0xff] }
 0x620   :  { %5164 = vmatprep.subr.bf16.mxu1 %v3693_v52  ;;  %v1789_v52 = vld [vmem:[#allocation7 + $0x1d18] sm:$0xff] }
 0x622   :  { %4509 = vmatpush1.bf16.msra.mxu0 %v3690_v44  ;;  %v3732_v44 = vunpack.c.h.s8.bf16 %v1780_v57 }
 0x623   :  { %5165 = vmatpush1.bf16.msra.mxu1 %v3692_v35  ;;  %4510 = vmatprep.subr.bf16.mxu0 %v3699_v2  ;;  %v3739_v35 = vunpack.c.l.s8.bf16 %v1787_v59  ;;  %v1786_v2 = vld [vmem:[#allocation7 + $0x1d00] sm:$0xff] }
 0x624   :  { %5166 = vmatprep.subr.bf16.mxu1 %v3701_v15  ;;  %v3741_v15 = vunpack.c.l.s8.bf16 %v1789_v52  ;;  %v3738_v3 = vunpack.c.l.s8.bf16 %v1786_v2  ;;  %v3746_v36 = vunpack.c.h.s8.bf16 %v1786_v2  ;;  %v1811_v2 = vld [vmem:[#allocation7 + $0x1dc8] sm:$0xff] }
 0x626   :  { %4511 = vmatpush1.bf16.msra.mxu0 %v3698_v16  ;;  %v3740_v16 = vunpack.c.l.s8.bf16 %v1788_v20 }
 0x627   :  { %5167 = vmatpush1.bf16.msra.mxu1 %v3700_v21  ;;  %4512 = vmatprep.subr.bf16.mxu0 %v3707_v61  ;;  %v3747_v21 = vunpack.c.h.s8.bf16 %v1787_v59  ;;  %v3749_v61 = vunpack.c.h.s8.bf16 %v1789_v52  ;;  %v1804_v59 = vld [vmem:[#allocation7 + $0x1d90] sm:$0xff] }
 0x628   :  { %5168 = vmatprep.subr.bf16.mxu1 %v3709_v25  ;;  %v1797_v25 = vld [vmem:[#allocation7 + $0x1d58] sm:$0xff] }
 0x62a   :  { %4513 = vmatpush1.bf16.msra.mxu0 %v3706_v42  ;;  %v3748_v42 = vunpack.c.h.s8.bf16 %v1788_v20 }
 0x62b   :  { %5169 = vmatpush1.bf16.msra.mxu1 %v3708_v12  ;;  %4514 = vmatprep.subr.bf16.mxu0 %v3715_v43  ;;  %v3755_v12 = vunpack.c.l.s8.bf16 %v1795_v22  ;;  %v1794_v43 = vld [vmem:[#allocation7 + $0x1d40] sm:$0xff] }
 0x62c   :  { %5170 = vmatprep.subr.bf16.mxu1 %v3717_v56  ;;  %v3757_v56 = vunpack.c.l.s8.bf16 %v1797_v25  ;;  %v3754_v45 = vunpack.c.l.s8.bf16 %v1794_v43  ;;  %v3762_v57 = vunpack.c.h.s8.bf16 %v1794_v43 }
 0x62e   :  { %4515 = vmatpush1.bf16.msra.mxu0 %v3714_v7  ;;  %v3756_v7 = vunpack.c.l.s8.bf16 %v1796_v6 }
 0x62f   :  { %5171 = vmatpush1.bf16.msra.mxu1 %v3716_v23  ;;  %4516 = vmatprep.subr.bf16.mxu0 %v3723_v5  ;;  %v3763_v23 = vunpack.c.h.s8.bf16 %v1795_v22  ;;  %v3765_v5 = vunpack.c.h.s8.bf16 %v1797_v25  ;;  %v1812_v22 = vld [vmem:[#allocation7 + $0x1dd0] sm:$0xff]  ;;  %v777_v25 = vcombine.high %v8532_v24, %v8532_v24  ;;  %v1818_v24 = vld [vmem:[#allocation7 + $0x1e00] sm:$0xff] }
 0x630   :  { %5172 = vmatprep.subr.bf16.mxu1 %v3725_v63  ;;  %v1805_v63 = vld [vmem:[#allocation7 + $0x1d98] sm:$0xff] }
 0x632   :  { %4517 = vmatpush1.bf16.msra.mxu0 %v3722_v62  ;;  %v3764_v62 = vunpack.c.h.s8.bf16 %v1796_v6  ;;  %v1821_v6 = vld [vmem:[#allocation7 + $0x1e18] sm:$0xff] }
 0x633   :  { %5173 = vmatpush1.bf16.msra.mxu1 %v3724_v10  ;;  %4518 = vmatprep.subr.bf16.mxu0 %v3731_v11  ;;  %v3771_v10 = vunpack.c.l.s8.bf16 %v1803_v18  ;;  %v1802_v11 = vld [vmem:[#allocation7 + $0x1d80] sm:$0xff] }
 0x634   :  { %5174 = vmatprep.subr.bf16.mxu1 %v3733_v58  ;;  %v3773_v58 = vunpack.c.l.s8.bf16 %v1805_v63  ;;  %v3770_v52 = vunpack.c.l.s8.bf16 %v1802_v11  ;;  %v3778_v20 = vunpack.c.h.s8.bf16 %v1802_v11 }
 0x636   :  { %4519 = vmatpush1.bf16.msra.mxu0 %v3730_v60  ;;  %v3772_v60 = vunpack.c.l.s8.bf16 %v1804_v59 }
 0x637   :  { %5175 = vmatpush1.bf16.msra.mxu1 %v3732_v44  ;;  %4520 = vmatprep.subr.bf16.mxu0 %v3739_v35  ;;  %v3779_v44 = vunpack.c.h.s8.bf16 %v1803_v18  ;;  %v3781_v35 = vunpack.c.h.s8.bf16 %v1805_v63  ;;  %v3805_v18 = vunpack.c.l.s8.bf16 %v1821_v6  ;;  %v1820_v63 = vld [vmem:[#allocation7 + $0x1e10] sm:$0xff] }
 0x638   :  { %5176 = vmatprep.subr.bf16.mxu1 %v3741_v15  ;;  %v1813_v15 = vld [vmem:[#allocation7 + $0x1dd8] sm:$0xff] }
 0x639   :  { %v3797_v43 = vunpack.c.h.s8.bf16 %v1813_v15 }
 0x63a   :  { %4521 = vmatpush1.bf16.msra.mxu0 %v3738_v3  ;;  %v3780_v3 = vunpack.c.h.s8.bf16 %v1804_v59 }
 0x63b   :  { %5177 = vmatpush1.bf16.msra.mxu1 %v3740_v16  ;;  %4522 = vmatprep.subr.bf16.mxu0 %v3747_v21  ;;  %v3787_v16 = vunpack.c.l.s8.bf16 %v1811_v2  ;;  %v1810_v21 = vld [vmem:[#allocation7 + $0x1dc0] sm:$0xff] }
 0x63c   :  { %5178 = vmatprep.subr.bf16.mxu1 %v3749_v61  ;;  %v3789_v61 = vunpack.c.l.s8.bf16 %v1813_v15 }
 0x63e   :  { %4523 = vmatpush1.bf16.msra.mxu0 %v3746_v36  ;;  %v3786_v36 = vunpack.c.l.s8.bf16 %v1810_v21 }
 0x63f   :  { %5179 = vmatpush1.bf16.msra.mxu1 %v3748_v42  ;;  %4524 = vmatprep.subr.bf16.mxu0 %v3755_v12  ;;  %v3788_v42 = vunpack.c.l.s8.bf16 %v1812_v22  ;;  %v3795_v12 = vunpack.c.h.s8.bf16 %v1811_v2  ;;  %v1826_v2 = vld [vmem:[#allocation7 + $0x1e40] sm:$0xff] }
 0x640   :  { %5180 = vmatprep.subr.bf16.mxu1 %v3757_v56  ;;  %v1819_v56 = vld [vmem:[#allocation7 + $0x1e08] sm:$0xff] }
 0x641   :  { %v3811_v11 = vunpack.c.h.s8.bf16 %v1819_v56 }
 0x642   :  { %4525 = vmatpush1.bf16.msra.mxu0 %v3754_v45  ;;  %v8553_v45 = vrot.slane %v777_v25, %v8095_v8  ;;  %v8559_v8 = vpack.c.bf16 %v8536_v29, %v8536_v29  ;;  %v3812_v29 = vunpack.c.h.s8.bf16 %v1820_v63  ;;  %v1837_v25 = vld [vmem:[#allocation7 + $0x1e98] sm:$0xff] }
 0x643   :  { %5181 = vmatpush1.bf16.msra.mxu1 %v3756_v7  ;;  %4526 = vmatprep.subr.bf16.mxu0 %v3763_v23  ;;  %v3794_v7 = vunpack.c.h.s8.bf16 %v1810_v21  ;;  %v3796_v23 = vunpack.c.h.s8.bf16 %v1812_v22  ;;  %v1835_v22 = vld [vmem:[#allocation7 + $0x1e88] sm:$0xff] }
 0x644   :  { %5182 = vmatprep.subr.bf16.mxu1 %v3765_v5  ;;  %v3803_v5 = vunpack.c.l.s8.bf16 %v1819_v56  ;;  %v3837_v56 = vunpack.c.l.s8.bf16 %v1837_v25 }
 0x646   :  { %4527 = vmatpush1.bf16.msra.mxu0 %v3762_v57  ;;  %v793_v57 = vcombine.high %v8553_v45, %v8553_v45 }
 0x647   :  { %5183 = vmatpush1.bf16.msra.mxu1 %v3764_v62  ;;  %4528 = vmatprep.subr.bf16.mxu0 %v3771_v10  ;;  %v3802_v62 = vunpack.c.l.s8.bf16 %v1818_v24  ;;  %v3804_v10 = vunpack.c.l.s8.bf16 %v1820_v63  ;;  %v1845_v63 = vld [vmem:[#allocation7 + $0x1ed8] sm:$0xff] }
 0x648   :  { %5184 = vmatprep.subr.bf16.mxu1 %v3773_v58  ;;  %v1827_v58 = vld [vmem:[#allocation7 + $0x1e48] sm:$0xff]  ;;  %v8562_v59 = vpack.c.bf16 %v793_v57, %v793_v57 }
 0x649   :  { %v3827_v21 = vunpack.c.h.s8.bf16 %v1827_v58 }
 0x64a   :  { %4529 = vmatpush1.bf16.msra.mxu0 %v3770_v52  ;;  %v3813_v52 = vunpack.c.h.s8.bf16 %v1821_v6  ;;  %v1836_v6 = vld [vmem:[#allocation7 + $0x1e90] sm:$0xff] }
 0x64b   :  { %5185 = vmatpush1.bf16.msra.mxu1 %v3772_v60  ;;  %4530 = vmatprep.subr.bf16.mxu0 %v3779_v44  ;;  %v1829_v60 = vld [vmem:[#allocation7 + $0x1e58] sm:$0xff]  ;;  %v3810_v44 = vunpack.c.h.s8.bf16 %v1818_v24  ;;  %v3845_v24 = vunpack.c.h.s8.bf16 %v1837_v25 }
 0x64c   :  { %5186 = vmatprep.subr.bf16.mxu1 %v3781_v35  ;;  %v3819_v35 = vunpack.c.l.s8.bf16 %v1827_v58  ;;  %v3821_v15 = vunpack.c.l.s8.bf16 %v1829_v60  ;;  %v3853_v58 = vunpack.c.l.s8.bf16 %v1845_v63 }
 0x64e   :  { %4531 = vmatpush1.bf16.msra.mxu0 %v3778_v20  ;;  %v1828_v20 = vld [vmem:[#allocation7 + $0x1e50] sm:$0xff] }
 0x64f   :  { %5187 = vmatpush1.bf16.msra.mxu1 %v3780_v3  ;;  %4532 = vmatprep.subr.bf16.mxu0 %v3787_v16  ;;  %v3818_v3 = vunpack.c.l.s8.bf16 %v1826_v2  ;;  %v3820_v16 = vunpack.c.l.s8.bf16 %v1828_v20 }
 0x650   :  { %5188 = vmatprep.subr.bf16.mxu1 %v3789_v61  ;;  %v3829_v61 = vunpack.c.h.s8.bf16 %v1829_v60 }
 0x652   :  { %4533 = vmatpush1.bf16.msra.mxu0 %v3786_v36  ;;  %v3826_v36 = vunpack.c.h.s8.bf16 %v1826_v2  ;;  %v1851_v2 = vld [vmem:[#allocation7 + $0x1f08] sm:$0xff] }
 0x653   :  { %5189 = vmatpush1.bf16.msra.mxu1 %v3788_v42  ;;  %4534 = vmatprep.subr.bf16.mxu0 %v3795_v12  ;;  %v3828_v42 = vunpack.c.h.s8.bf16 %v1828_v20  ;;  %v3835_v12 = vunpack.c.l.s8.bf16 %v1835_v22 }
 0x654   :  { %5190 = vmatprep.subr.bf16.mxu1 %v3797_v43  ;;  %v1834_v43 = vld [vmem:[#allocation7 + $0x1e80] sm:$0xff] }
 0x655   :  { %v3842_v57 = vunpack.c.h.s8.bf16 %v1834_v43 }
 0x656   :  { %4535 = vmatpush1.bf16.msra.mxu0 %v3794_v7  ;;  %v3834_v7 = vunpack.c.l.s8.bf16 %v1834_v43  ;;  %v1859_v43 = vld [vmem:[#allocation7 + $0x1f48] sm:$0xff] }
 0x657   :  { %5191 = vmatpush1.bf16.msra.mxu1 %v3796_v23  ;;  %4545 = vmatprep.subr.bf16.mxu0 %v3803_v5  ;;  %v3836_v23 = vunpack.c.l.s8.bf16 %v1836_v6  ;;  %v3843_v5 = vunpack.c.h.s8.bf16 %v1835_v22  ;;  %v1852_v22 = vld [vmem:[#allocation7 + $0x1f10] sm:$0xff] }
 0x658   :  { %5201 = vmatprep.subr.bf16.mxu1 %v3805_v18  ;;  %v1843_v18 = vld [vmem:[#allocation7 + $0x1ec8] sm:$0xff] }
 0x659   :  { %4537 = vmatmul.mubr.bf16.vlgmr.msra.gmra.mrb[0].mxu0 %v8559_v8 }
 0x65a   :  { %5193 = vmatmul.mubr.bf16.vlgmr.msra.gmra.mrb[0].mxu1 %v8559_v8  ;;  %4546 = vmatpush1.bf16.msra.mxu0 %v3802_v62  ;;  %v3844_v62 = vunpack.c.h.s8.bf16 %v1836_v6 }
 0x65b   :  { %4577 = vmatprep.mubr.bf16.mxu0 %v8562_v59  ;;  %5202 = vmatpush1.bf16.msra.mxu1 %v3804_v10  ;;  %v3851_v10 = vunpack.c.l.s8.bf16 %v1843_v18 }
 0x65c   :  { %5233 = vmatprep.mubr.bf16.mxu1 %v8562_v59  ;;  %4547 = vmatprep.subr.bf16.mxu0 %v3811_v11  ;;  %v1842_v11 = vld [vmem:[#allocation7 + $0x1ec0] sm:$0xff] }
 0x65d   :  { %5203 = vmatprep.subr.bf16.mxu1 %v3813_v52  ;;  %v1844_v52 = vld [vmem:[#allocation7 + $0x1ed0] sm:$0xff]  ;;  %v3850_v60 = vunpack.c.l.s8.bf16 %v1842_v11  ;;  %v3858_v20 = vunpack.c.h.s8.bf16 %v1842_v11  ;;  %v1867_v11 = vld [vmem:[#allocation7 + $0x1f88] sm:$0xff] }
 0x65e   :  { %4548 = vmatpush1.bf16.msra.mxu0 %v3810_v44  ;;  %v3852_v44 = vunpack.c.l.s8.bf16 %v1844_v52 }
 0x65f   :  { %5204 = vmatpush1.bf16.msra.mxu1 %v3812_v29  ;;  %4549 = vmatprep.subr.bf16.mxu0 %v3819_v35  ;;  %v3859_v29 = vunpack.c.h.s8.bf16 %v1843_v18  ;;  %v3861_v35 = vunpack.c.h.s8.bf16 %v1845_v63  ;;  %v1860_v18 = vld [vmem:[#allocation7 + $0x1f50] sm:$0xff] }
 0x660   :  { %5205 = vmatprep.subr.bf16.mxu1 %v3821_v15  ;;  %v1853_v15 = vld [vmem:[#allocation7 + $0x1f18] sm:$0xff] }
 0x662   :  { %4550 = vmatpush1.bf16.msra.mxu0 %v3818_v3  ;;  %v3860_v3 = vunpack.c.h.s8.bf16 %v1844_v52 }
 0x663   :  { %5206 = vmatpush1.bf16.msra.mxu1 %v3820_v16  ;;  %4551 = vmatprep.subr.bf16.mxu0 %v3827_v21  ;;  %v3867_v16 = vunpack.c.l.s8.bf16 %v1851_v2  ;;  %v1850_v21 = vld [vmem:[#allocation7 + $0x1f00] sm:$0xff] }
 0x664   :  { %5207 = vmatprep.subr.bf16.mxu1 %v3829_v61  ;;  %v3869_v61 = vunpack.c.l.s8.bf16 %v1853_v15  ;;  %v3866_v25 = vunpack.c.l.s8.bf16 %v1850_v21  ;;  %v3874_v6 = vunpack.c.h.s8.bf16 %v1850_v21  ;;  %v1875_v21 = vld [vmem:[#allocation7 + $0x1fc8] sm:$0xff] }
 0x666   :  { %4552 = vmatpush1.bf16.msra.mxu0 %v3826_v36  ;;  %v3868_v36 = vunpack.c.l.s8.bf16 %v1852_v22 }
 0x667   :  { %5208 = vmatpush1.bf16.msra.mxu1 %v3828_v42  ;;  %4553 = vmatprep.subr.bf16.mxu0 %v3835_v12  ;;  %v3875_v42 = vunpack.c.h.s8.bf16 %v1851_v2  ;;  %v3877_v12 = vunpack.c.h.s8.bf16 %v1853_v15  ;;  %v1868_v2 = vld [vmem:[#allocation7 + $0x1f90] sm:$0xff] }
 0x668   :  { %5209 = vmatprep.subr.bf16.mxu1 %v3837_v56  ;;  %v1861_v56 = vld [vmem:[#allocation7 + $0x1f58] sm:$0xff] }
 0x66a   :  { %4554 = vmatpush1.bf16.msra.mxu0 %v3834_v7  ;;  %v3876_v7 = vunpack.c.h.s8.bf16 %v1852_v22 }
 0x66b   :  { %5210 = vmatpush1.bf16.msra.mxu1 %v3836_v23  ;;  %4555 = vmatprep.subr.bf16.mxu0 %v3843_v5  ;;  %v3883_v23 = vunpack.c.l.s8.bf16 %v1859_v43  ;;  %v1858_v5 = vld [vmem:[#allocation7 + $0x1f40] sm:$0xff] }
 0x66c   :  { %5211 = vmatprep.subr.bf16.mxu1 %v3845_v24  ;;  %v3885_v24 = vunpack.c.l.s8.bf16 %v1861_v56  ;;  %v3882_v63 = vunpack.c.l.s8.bf16 %v1858_v5  ;;  %v3890_v52 = vunpack.c.h.s8.bf16 %v1858_v5  ;;  %v863_v5 = vld [vmem:[#allocation7 + $0x28] sm:$0xff] }
 0x66e   :  { %4556 = vmatpush1.bf16.msra.mxu0 %v3842_v57  ;;  %v3884_v57 = vunpack.c.l.s8.bf16 %v1860_v18 }
 0x66f   :  { %5212 = vmatpush1.bf16.msra.mxu1 %v3844_v62  ;;  %4557 = vmatprep.subr.bf16.mxu0 %v3851_v10  ;;  %v3891_v62 = vunpack.c.h.s8.bf16 %v1859_v43  ;;  %v3893_v10 = vunpack.c.h.s8.bf16 %v1861_v56  ;;  %v1876_v43 = vld [vmem:[#allocation7 + $0x1fd0] sm:$0xff] }
 0x670   :  { %5213 = vmatprep.subr.bf16.mxu1 %v3853_v58  ;;  %v1869_v58 = vld [vmem:[#allocation7 + $0x1f98] sm:$0xff] }
 0x672   :  { %4558 = vmatpush1.bf16.msra.mxu0 %v3850_v60  ;;  %v3892_v60 = vunpack.c.h.s8.bf16 %v1860_v18 }
 0x673   :  { %5214 = vmatpush1.bf16.msra.mxu1 %v3852_v44  ;;  %4559 = vmatprep.subr.bf16.mxu0 %v3859_v29  ;;  %v3899_v44 = vunpack.c.l.s8.bf16 %v1867_v11  ;;  %v1866_v29 = vld [vmem:[#allocation7 + $0x1f80] sm:$0xff] }
 0x674   :  { %5215 = vmatprep.subr.bf16.mxu1 %v3861_v35  ;;  %v3901_v35 = vunpack.c.l.s8.bf16 %v1869_v58  ;;  %v3898_v15 = vunpack.c.l.s8.bf16 %v1866_v29  ;;  %v3906_v22 = vunpack.c.h.s8.bf16 %v1866_v29  ;;  %v871_v29 = vld [vmem:[#allocation7 + $0x68] sm:$0xff] }
 0x676   :  { %4560 = vmatpush1.bf16.msra.mxu0 %v3858_v20  ;;  %v3900_v20 = vunpack.c.l.s8.bf16 %v1868_v2 }
 0x677   :  { %5216 = vmatpush1.bf16.msra.mxu1 %v3860_v3  ;;  %4561 = vmatprep.subr.bf16.mxu0 %v3867_v16  ;;  %v3907_v3 = vunpack.c.h.s8.bf16 %v1867_v11  ;;  %v3909_v16 = vunpack.c.h.s8.bf16 %v1869_v58  ;;  %v864_v11 = vld [vmem:[#allocation7 + $0x30] sm:$0xff] }
 0x678   :  { %5217 = vmatprep.subr.bf16.mxu1 %v3869_v61  ;;  %v1877_v61 = vld [vmem:[#allocation7 + $0x1fd8] sm:$0xff] }
 0x67a   :  { %4562 = vmatpush1.bf16.msra.mxu0 %v3866_v25  ;;  %v3908_v25 = vunpack.c.h.s8.bf16 %v1868_v2  ;;  %v873_v2 = vld [vmem:[#allocation7 + $0x78] sm:$0xff] }
 0x67b   :  { %5218 = vmatpush1.bf16.msra.mxu1 %v3868_v36  ;;  %4563 = vmatprep.subr.bf16.mxu0 %v3875_v42  ;;  %v3915_v36 = vunpack.c.l.s8.bf16 %v1875_v21  ;;  %v1874_v42 = vld [vmem:[#allocation7 + $0x1fc0] sm:$0xff] }
 0x67c   :  { %5219 = vmatprep.subr.bf16.mxu1 %v3877_v12  ;;  %v3917_v12 = vunpack.c.l.s8.bf16 %v1877_v61  ;;  %v3914_v56 = vunpack.c.l.s8.bf16 %v1874_v42  ;;  %v3922_v18 = vunpack.c.h.s8.bf16 %v1874_v42  ;;  %v879_v42 = vld [vmem:[#allocation7 + $0xa8] sm:$0xff] }
 0x67e   :  { %4564 = vmatpush1.bf16.msra.mxu0 %v3874_v6  ;;  %v3916_v6 = vunpack.c.l.s8.bf16 %v1876_v43 }
 0x67f   :  { %5220 = vmatpush1.bf16.msra.mxu1 %v3876_v7  ;;  %4565 = vmatprep.subr.bf16.mxu0 %v3883_v23  ;;  %v3923_v7 = vunpack.c.h.s8.bf16 %v1875_v21  ;;  %v3925_v23 = vunpack.c.h.s8.bf16 %v1877_v61  ;;  %v872_v21 = vld [vmem:[#allocation7 + $0x70] sm:$0xff] }
 0x680   :  { %5221 = vmatprep.subr.bf16.mxu1 %v3885_v24  ;;  %v865_v24 = vld [vmem:[#allocation7 + $0x38] sm:$0xff] }
 0x682   :  { %4566 = vmatpush1.bf16.msra.mxu0 %v3882_v63  ;;  %v3924_v63 = vunpack.c.h.s8.bf16 %v1876_v43 }
 0x683   :  { %5222 = vmatpush1.bf16.msra.mxu1 %v3884_v57  ;;  %4567 = vmatprep.subr.bf16.mxu0 %v3891_v62  ;;  %v1887_v57 = vunpack.c.l.s8.bf16 %v863_v5  ;;  %v862_v62 = vld [vmem:[#allocation7 + $0x20] sm:$0xff] }
 0x684   :  { %5223 = vmatprep.subr.bf16.mxu1 %v3893_v10  ;;  %v1889_v10 = vunpack.c.l.s8.bf16 %v865_v24  ;;  %v1886_v58 = vunpack.c.l.s8.bf16 %v862_v62 }
 0x686   :  { %4568 = vmatpush1.bf16.msra.mxu0 %v3890_v52  ;;  %v8569_v52 = vpack.c.bf16 %v8553_v45, %v8553_v45  ;;  %v870_v45 = vld [vmem:[#allocation7 + $0x60] sm:$0xff] }
 0x687   :  { %5224 = vmatpush1.bf16.msra.mxu1 %v3892_v60  ;;  %4569 = vmatprep.subr.bf16.mxu0 %v3899_v44  ;;  %v1888_v60 = vunpack.c.l.s8.bf16 %v864_v11  ;;  %v1895_v44 = vunpack.c.h.s8.bf16 %v863_v5  ;;  %v1902_v61 = vunpack.c.l.s8.bf16 %v870_v45  ;;  %v1910_v43 = vunpack.c.h.s8.bf16 %v870_v45  ;;  %v897_v45 = vld [vmem:[#allocation7 + $0x138] sm:$0xff] }
 0x688   :  { %5225 = vmatprep.subr.bf16.mxu1 %v3901_v35  ;;  %v1897_v35 = vunpack.c.h.s8.bf16 %v865_v24 }
 0x68a   :  { %4570 = vmatpush1.bf16.msra.mxu0 %v3898_v15  ;;  %v1894_v15 = vunpack.c.h.s8.bf16 %v862_v62  ;;  %v889_v62 = vld [vmem:[#allocation7 + $0xf8] sm:$0xff] }
 0x68b   :  { %5226 = vmatpush1.bf16.msra.mxu1 %v3900_v20  ;;  %4571 = vmatprep.subr.bf16.mxu0 %v3907_v3  ;;  %v1896_v20 = vunpack.c.h.s8.bf16 %v864_v11  ;;  %v1903_v3 = vunpack.c.l.s8.bf16 %v871_v29 }
 0x68c   :  { %5227 = vmatprep.subr.bf16.mxu1 %v3909_v16  ;;  %v1905_v16 = vunpack.c.l.s8.bf16 %v873_v2 }
 0x68e   :  { %4572 = vmatpush1.bf16.msra.mxu0 %v3906_v22  ;;  %v1904_v22 = vunpack.c.l.s8.bf16 %v872_v21 }
 0x68f   :  { %5228 = vmatpush1.bf16.msra.mxu1 %v3908_v25  ;;  %4573 = vmatprep.subr.bf16.mxu0 %v3915_v36  ;;  %v1911_v25 = vunpack.c.h.s8.bf16 %v871_v29  ;;  %v1913_v36 = vunpack.c.h.s8.bf16 %v873_v2  ;;  %v888_v29 = vld [vmem:[#allocation7 + $0xf0] sm:$0xff] }
 0x690   :  { %5229 = vmatprep.subr.bf16.mxu1 %v3917_v12  ;;  %v881_v12 = vld [vmem:[#allocation7 + $0xb8] sm:$0xff]  ;;  %v1936_v2 = vunpack.c.l.s8.bf16 %v888_v29 }
 0x692   :  { %4574 = vmatpush1.bf16.msra.mxu0 %v3914_v56  ;;  %v1912_v56 = vunpack.c.h.s8.bf16 %v872_v21  ;;  %v1944_v21 = vunpack.c.h.s8.bf16 %v888_v29 }
 0x693   :  { %5230 = vmatpush1.bf16.msra.mxu1 %v3916_v6  ;;  %4575 = vmatprep.subr.bf16.mxu0 %v3923_v7  ;;  %v878_v6 = vld [vmem:[#allocation7 + $0xa0] sm:$0xff]  ;;  %v1921_v7 = vunpack.c.l.s8.bf16 %v881_v12 }
 0x694   :  { %5231 = vmatprep.subr.bf16.mxu1 %v3925_v23  ;;  %v880_v23 = vld [vmem:[#allocation7 + $0xb0] sm:$0xff]  ;;  %v1918_v5 = vunpack.c.l.s8.bf16 %v878_v6 }
 0x695   :  { %v1920_v24 = vunpack.c.l.s8.bf16 %v880_v23  ;;  %v1928_v11 = vunpack.c.h.s8.bf16 %v880_v23 }
 0x696   :  { %4576 = vmatpush1.bf16.msra.mxu0 %v3922_v18  ;;  %v1927_v18 = vunpack.c.h.s8.bf16 %v879_v42 }
 0x697   :  { %5232 = vmatpush1.bf16.msra.mxu1 %v3924_v63  ;;  %5242 = vmatprep.subr.bf16.mxu0 %v1887_v57  ;;  %v1929_v63 = vunpack.c.h.s8.bf16 %v881_v12  ;;  %v887_v57 = vld [vmem:[#allocation7 + $0xe8] sm:$0xff] }
 0x698   :  { %5898 = vmatprep.subr.bf16.mxu1 %v1889_v10  ;;  %v1926_v10 = vunpack.c.h.s8.bf16 %v878_v6  ;;  %v905_v6 = vld [vmem:[#allocation7 + $0x178] sm:$0xff] }
 0x699   :  { %4578 = vmatmul.mubr.bf16.vlgmr.msra.gmra.mrb[0].mxu0 %v8569_v52 }
 0x69a   :  { %5234 = vmatmul.mubr.bf16.vlgmr.msra.gmra.mrb[0].mxu1 %v8569_v52  ;;  %5243 = vmatpush1.bf16.msra.mxu0 %v1886_v58  ;;  %v1935_v58 = vunpack.c.l.s8.bf16 %v887_v57 }
 0x69b   :  { %5274 = vmatprep.mubr.bf16.mxu0 %v8294_v30  ;;  %5899 = vmatpush1.bf16.msra.mxu1 %v1888_v60  ;;  %v886_v60 = vld [vmem:[#allocation7 + $0xe0] sm:$0xff] }
 0x69c   :  { %5930 = vmatprep.mubr.bf16.mxu1 %v8294_v30  ;;  %5244 = vmatprep.subr.bf16.mxu0 %v1895_v44  ;;  %v1919_v30 = vunpack.c.l.s8.bf16 %v879_v42  ;;  %v1937_v44 = vunpack.c.l.s8.bf16 %v889_v62 }
 0x69d   :  { %5900 = vmatprep.subr.bf16.mxu1 %v1897_v35  ;;  %v1934_v35 = vunpack.c.l.s8.bf16 %v886_v60 }
 0x69e   :  { %5245 = vmatpush1.bf16.msra.mxu0 %v1894_v15  ;;  %v1943_v15 = vunpack.c.h.s8.bf16 %v887_v57 }
 0x69f   :  { %5901 = vmatpush1.bf16.msra.mxu1 %v1896_v20  ;;  %5246 = vmatprep.subr.bf16.mxu0 %v1903_v3  ;;  %v1945_v20 = vunpack.c.h.s8.bf16 %v889_v62  ;;  %v895_v3 = vld [vmem:[#allocation7 + $0x128] sm:$0xff] }
 0x6a0   :  { %5902 = vmatprep.subr.bf16.mxu1 %v1905_v16  ;;  %v1942_v16 = vunpack.c.h.s8.bf16 %v886_v60  ;;  %v913_v60 = vld [vmem:[#allocation7 + $0x1b8] sm:$0xff] }
 0x6a2   :  { %5247 = vmatpush1.bf16.msra.mxu0 %v1902_v61  ;;  %v1951_v61 = vunpack.c.l.s8.bf16 %v895_v3 }
 0x6a3   :  { %5903 = vmatpush1.bf16.msra.mxu1 %v1904_v22  ;;  %5248 = vmatprep.subr.bf16.mxu0 %v1911_v25  ;;  %v894_v22 = vld [vmem:[#allocation7 + $0x120] sm:$0xff]  ;;  %v1953_v25 = vunpack.c.l.s8.bf16 %v897_v45 }
 0x6a4   :  { %5904 = vmatprep.subr.bf16.mxu1 %v1913_v36  ;;  %v896_v36 = vld [vmem:[#allocation7 + $0x130] sm:$0xff]  ;;  %v1950_v42 = vunpack.c.l.s8.bf16 %v894_v22 }
 0x6a5   :  { %v1952_v12 = vunpack.c.l.s8.bf16 %v896_v36  ;;  %v1960_v23 = vunpack.c.h.s8.bf16 %v896_v36 }
 0x6a6   :  { %5249 = vmatpush1.bf16.msra.mxu0 %v1910_v43  ;;  %v1959_v43 = vunpack.c.h.s8.bf16 %v895_v3 }
 0x6a7   :  { %5905 = vmatpush1.bf16.msra.mxu1 %v1912_v56  ;;  %5250 = vmatprep.subr.bf16.mxu0 %v1919_v30  ;;  %v1961_v56 = vunpack.c.h.s8.bf16 %v897_v45  ;;  %v903_v30 = vld [vmem:[#allocation7 + $0x168] sm:$0xff] }
 0x6a8   :  { %5906 = vmatprep.subr.bf16.mxu1 %v1921_v7  ;;  %v1958_v7 = vunpack.c.h.s8.bf16 %v894_v22  ;;  %v921_v22 = vld [vmem:[#allocation7 + $0x1f8] sm:$0xff] }
 0x6aa   :  { %5251 = vmatpush1.bf16.msra.mxu0 %v1918_v5  ;;  %v1967_v5 = vunpack.c.l.s8.bf16 %v903_v30 }
 0x6ab   :  { %5907 = vmatpush1.bf16.msra.mxu1 %v1920_v24  ;;  %5252 = vmatprep.subr.bf16.mxu0 %v1927_v18  ;;  %v902_v24 = vld [vmem:[#allocation7 + $0x160] sm:$0xff]  ;;  %v1969_v18 = vunpack.c.l.s8.bf16 %v905_v6 }
 0x6ac   :  { %5908 = vmatprep.subr.bf16.mxu1 %v1929_v63  ;;  %v904_v63 = vld [vmem:[#allocation7 + $0x170] sm:$0xff]  ;;  %v1966_v57 = vunpack.c.l.s8.bf16 %v902_v24 }
 0x6ad   :  { %v1968_v62 = vunpack.c.l.s8.bf16 %v904_v63  ;;  %v1976_v29 = vunpack.c.h.s8.bf16 %v904_v63 }
 0x6ae   :  { %5253 = vmatpush1.bf16.msra.mxu0 %v1926_v10  ;;  %v1975_v10 = vunpack.c.h.s8.bf16 %v903_v30 }
 0x6af   :  { %5909 = vmatpush1.bf16.msra.mxu1 %v1928_v11  ;;  %5254 = vmatprep.subr.bf16.mxu0 %v1935_v58  ;;  %v1977_v11 = vunpack.c.h.s8.bf16 %v905_v6  ;;  %v911_v58 = vld [vmem:[#allocation7 + $0x1a8] sm:$0xff] }
 0x6b0   :  { %5910 = vmatprep.subr.bf16.mxu1 %v1937_v44  ;;  %v1974_v44 = vunpack.c.h.s8.bf16 %v902_v24  ;;  %v929_v24 = vld [vmem:[#allocation7 + $0x238] sm:$0xff] }
 0x6b2   :  { %5255 = vmatpush1.bf16.msra.mxu0 %v1934_v35  ;;  %v1983_v35 = vunpack.c.l.s8.bf16 %v911_v58 }
 0x6b3   :  { %5911 = vmatpush1.bf16.msra.mxu1 %v1936_v2  ;;  %5256 = vmatprep.subr.bf16.mxu0 %v1943_v15  ;;  %v910_v2 = vld [vmem:[#allocation7 + $0x1a0] sm:$0xff]  ;;  %v1985_v15 = vunpack.c.l.s8.bf16 %v913_v60 }
 0x6b4   :  { %5912 = vmatprep.subr.bf16.mxu1 %v1945_v20  ;;  %v912_v20 = vld [vmem:[#allocation7 + $0x1b0] sm:$0xff]  ;;  %v1982_v3 = vunpack.c.l.s8.bf16 %v910_v2 }
 0x6b5   :  { %v1984_v45 = vunpack.c.l.s8.bf16 %v912_v20  ;;  %v1992_v36 = vunpack.c.h.s8.bf16 %v912_v20 }
 0x6b6   :  { %5257 = vmatpush1.bf16.msra.mxu0 %v1942_v16  ;;  %v1991_v16 = vunpack.c.h.s8.bf16 %v911_v58 }
 0x6b7   :  { %5913 = vmatpush1.bf16.msra.mxu1 %v1944_v21  ;;  %5258 = vmatprep.subr.bf16.mxu0 %v1951_v61  ;;  %v1993_v21 = vunpack.c.h.s8.bf16 %v913_v60  ;;  %v919_v61 = vld [vmem:[#allocation7 + $0x1e8] sm:$0xff] }
 0x6b8   :  { %5914 = vmatprep.subr.bf16.mxu1 %v1953_v25  ;;  %v1990_v25 = vunpack.c.h.s8.bf16 %v910_v2  ;;  %v937_v2 = vld [vmem:[#allocation7 + $0x278] sm:$0xff] }
 0x6ba   :  { %5259 = vmatpush1.bf16.msra.mxu0 %v1950_v42  ;;  %v1999_v42 = vunpack.c.l.s8.bf16 %v919_v61 }
 0x6bb   :  { %5915 = vmatpush1.bf16.msra.mxu1 %v1952_v12  ;;  %5260 = vmatprep.subr.bf16.mxu0 %v1959_v43  ;;  %v918_v12 = vld [vmem:[#allocation7 + $0x1e0] sm:$0xff]  ;;  %v2001_v43 = vunpack.c.l.s8.bf16 %v921_v22 }
 0x6bc   :  { %5916 = vmatprep.subr.bf16.mxu1 %v1961_v56  ;;  %v920_v56 = vld [vmem:[#allocation7 + $0x1f0] sm:$0xff]  ;;  %v1998_v30 = vunpack.c.l.s8.bf16 %v918_v12 }
 0x6bd   :  { %v2000_v6 = vunpack.c.l.s8.bf16 %v920_v56  ;;  %v2008_v63 = vunpack.c.h.s8.bf16 %v920_v56  ;;  %v942_v56 = vld [vmem:[#allocation7 + $0x2a0] sm:$0xff] }
 0x6be   :  { %5261 = vmatpush1.bf16.msra.mxu0 %v1958_v7  ;;  %v2007_v7 = vunpack.c.h.s8.bf16 %v919_v61 }
 0x6bf   :  { %5917 = vmatpush1.bf16.msra.mxu1 %v1960_v23  ;;  %5262 = vmatprep.subr.bf16.mxu0 %v1967_v5  ;;  %v2009_v23 = vunpack.c.h.s8.bf16 %v921_v22  ;;  %v927_v5 = vld [vmem:[#allocation7 + $0x228] sm:$0xff] }
 0x6c0   :  { %5918 = vmatprep.subr.bf16.mxu1 %v1969_v18  ;;  %v2006_v18 = vunpack.c.h.s8.bf16 %v918_v12 }
 0x6c2   :  { %5263 = vmatpush1.bf16.msra.mxu0 %v1966_v57  ;;  %v2015_v57 = vunpack.c.l.s8.bf16 %v927_v5 }
 0x6c3   :  { %5919 = vmatpush1.bf16.msra.mxu1 %v1968_v62  ;;  %5264 = vmatprep.subr.bf16.mxu0 %v1975_v10  ;;  %v926_v62 = vld [vmem:[#allocation7 + $0x220] sm:$0xff]  ;;  %v2017_v10 = vunpack.c.l.s8.bf16 %v929_v24 }
 0x6c4   :  { %5920 = vmatprep.subr.bf16.mxu1 %v1977_v11  ;;  %v928_v11 = vld [vmem:[#allocation7 + $0x230] sm:$0xff]  ;;  %v2014_v58 = vunpack.c.l.s8.bf16 %v926_v62 }
 0x6c5   :  { %v2016_v60 = vunpack.c.l.s8.bf16 %v928_v11  ;;  %v2024_v20 = vunpack.c.h.s8.bf16 %v928_v11  ;;  %v950_v11 = vld [vmem:[#allocation7 + $0x2e0] sm:$0xff] }
 0x6c6   :  { %5265 = vmatpush1.bf16.msra.mxu0 %v1974_v44  ;;  %v2023_v44 = vunpack.c.h.s8.bf16 %v927_v5 }
 0x6c7   :  { %5921 = vmatpush1.bf16.msra.mxu1 %v1976_v29  ;;  %5266 = vmatprep.subr.bf16.mxu0 %v1983_v35  ;;  %v935_v29 = vld [vmem:[#allocation7 + $0x268] sm:$0xff]  ;;  %v2025_v35 = vunpack.c.h.s8.bf16 %v929_v24 }
 0x6c8   :  { %5922 = vmatprep.subr.bf16.mxu1 %v1985_v15  ;;  %v2022_v15 = vunpack.c.h.s8.bf16 %v926_v62 }
 0x6ca   :  { %5267 = vmatpush1.bf16.msra.mxu0 %v1982_v3  ;;  %v2031_v3 = vunpack.c.l.s8.bf16 %v935_v29 }
 0x6cb   :  { %5923 = vmatpush1.bf16.msra.mxu1 %v1984_v45  ;;  %5268 = vmatprep.subr.bf16.mxu0 %v1991_v16  ;;  %v934_v45 = vld [vmem:[#allocation7 + $0x260] sm:$0xff]  ;;  %v2033_v16 = vunpack.c.l.s8.bf16 %v937_v2 }
 0x6cc   :  { %5924 = vmatprep.subr.bf16.mxu1 %v1993_v21  ;;  %v936_v21 = vld [vmem:[#allocation7 + $0x270] sm:$0xff]  ;;  %v2030_v61 = vunpack.c.l.s8.bf16 %v934_v45  ;;  %v2038_v12 = vunpack.c.h.s8.bf16 %v934_v45 }
 0x6cd   :  { %v2032_v22 = vunpack.c.l.s8.bf16 %v936_v21 }
 0x6ce   :  { %5269 = vmatpush1.bf16.msra.mxu0 %v1990_v25  ;;  %v2041_v25 = vunpack.c.h.s8.bf16 %v937_v2 }
 0x6cf   :  { %5925 = vmatpush1.bf16.msra.mxu1 %v1992_v36  ;;  %5270 = vmatprep.subr.bf16.mxu0 %v1999_v42  ;;  %v943_v36 = vld [vmem:[#allocation7 + $0x2a8] sm:$0xff]  ;;  %v945_v42 = vld [vmem:[#allocation7 + $0x2b8] sm:$0xff] }
 0x6d0   :  { %5926 = vmatprep.subr.bf16.mxu1 %v2001_v43  ;;  %v2040_v43 = vunpack.c.h.s8.bf16 %v936_v21  ;;  %v2055_v5 = vunpack.c.h.s8.bf16 %v943_v36  ;;  %v2057_v24 = vunpack.c.h.s8.bf16 %v945_v42  ;;  %v958_v21 = vld [vmem:[#allocation7 + $0x320] sm:$0xff] }
 0x6d2   :  { %5271 = vmatpush1.bf16.msra.mxu0 %v1998_v30  ;;  %v2049_v30 = vunpack.c.l.s8.bf16 %v945_v42 }
 0x6d3   :  { %5927 = vmatpush1.bf16.msra.mxu1 %v2000_v6  ;;  %5272 = vmatprep.subr.bf16.mxu0 %v2007_v7  ;;  %v944_v6 = vld [vmem:[#allocation7 + $0x2b0] sm:$0xff]  ;;  %v2046_v7 = vunpack.c.l.s8.bf16 %v942_v56 }
 0x6d4   :  { %5928 = vmatprep.subr.bf16.mxu1 %v2009_v23  ;;  %v2048_v23 = vunpack.c.l.s8.bf16 %v944_v6  ;;  %v2056_v62 = vunpack.c.h.s8.bf16 %v944_v6  ;;  %v966_v6 = vld [vmem:[#allocation7 + $0x360] sm:$0xff] }
 0x6d6   :  { %5273 = vmatpush1.bf16.msra.mxu0 %v2006_v18  ;;  %v951_v18 = vld [vmem:[#allocation7 + $0x2e8] sm:$0xff] }
 0x6d7   :  { %5929 = vmatpush1.bf16.msra.mxu1 %v2008_v63  ;;  %5283 = vmatprep.subr.bf16.mxu0 %v2015_v57  ;;  %v953_v63 = vld [vmem:[#allocation7 + $0x2f8] sm:$0xff]  ;;  %v2054_v57 = vunpack.c.h.s8.bf16 %v942_v56 }
 0x6d8   :  { %5939 = vmatprep.subr.bf16.mxu1 %v2017_v10  ;;  %v2063_v10 = vunpack.c.l.s8.bf16 %v951_v18  ;;  %v2073_v2 = vunpack.c.h.s8.bf16 %v953_v63 }
 0x6d9   :  { %5275 = vmatmul.mubr.bf16.vlgmr.msra.gmra.mrb[4].mxu0 %v8298_v33 }
 0x6da   :  { %5931 = vmatmul.mubr.bf16.vlgmr.msra.gmra.mrb[4].mxu1 %v8298_v33  ;;  %5284 = vmatpush1.bf16.msra.mxu0 %v2014_v58  ;;  %v2039_v33 = vunpack.c.h.s8.bf16 %v935_v29  ;;  %v2065_v58 = vunpack.c.l.s8.bf16 %v953_v63 }
 0x6db   :  { %5315 = vmatprep.mubr.bf16.mxu0 %v8302_v34  ;;  %5940 = vmatpush1.bf16.msra.mxu1 %v2016_v60  ;;  %v952_v60 = vld [vmem:[#allocation7 + $0x2f0] sm:$0xff] }
 0x6dc   :  { %5971 = vmatprep.mubr.bf16.mxu1 %v8302_v34  ;;  %5285 = vmatprep.subr.bf16.mxu0 %v2023_v44  ;;  %v2047_v34 = vunpack.c.l.s8.bf16 %v943_v36  ;;  %v2062_v44 = vunpack.c.l.s8.bf16 %v950_v11  ;;  %v2064_v29 = vunpack.c.l.s8.bf16 %v952_v60  ;;  %v2072_v45 = vunpack.c.h.s8.bf16 %v952_v60  ;;  %v974_v60 = vld [vmem:[#allocation7 + $0x3a0] sm:$0xff] }
 0x6dd   :  { %5941 = vmatprep.subr.bf16.mxu1 %v2025_v35  ;;  %v2071_v35 = vunpack.c.h.s8.bf16 %v951_v18 }
 0x6de   :  { %5286 = vmatpush1.bf16.msra.mxu0 %v2022_v15  ;;  %v959_v15 = vld [vmem:[#allocation7 + $0x328] sm:$0xff] }
 0x6df   :  { %5942 = vmatpush1.bf16.msra.mxu1 %v2024_v20  ;;  %5287 = vmatprep.subr.bf16.mxu0 %v2031_v3  ;;  %v961_v20 = vld [vmem:[#allocation7 + $0x338] sm:$0xff]  ;;  %v2070_v3 = vunpack.c.h.s8.bf16 %v950_v11  ;;  %v2087_v36 = vunpack.c.h.s8.bf16 %v959_v15 }
 0x6e0   :  { %5943 = vmatprep.subr.bf16.mxu1 %v2033_v16  ;;  %v2079_v16 = vunpack.c.l.s8.bf16 %v959_v15  ;;  %v2089_v42 = vunpack.c.h.s8.bf16 %v961_v20 }
 0x6e2   :  { %5288 = vmatpush1.bf16.msra.mxu0 %v2030_v61  ;;  %v2081_v61 = vunpack.c.l.s8.bf16 %v961_v20 }
 0x6e3   :  { %5944 = vmatpush1.bf16.msra.mxu1 %v2032_v22  ;;  %5289 = vmatprep.subr.bf16.mxu0 %v2039_v33  ;;  %v960_v22 = vld [vmem:[#allocation7 + $0x330] sm:$0xff]  ;;  %v2078_v33 = vunpack.c.l.s8.bf16 %v958_v21 }
 0x6e4   :  { %5945 = vmatprep.subr.bf16.mxu1 %v2041_v25  ;;  %v2080_v25 = vunpack.c.l.s8.bf16 %v960_v22  ;;  %v2088_v56 = vunpack.c.h.s8.bf16 %v960_v22  ;;  %v982_v22 = vld [vmem:[#allocation7 + $0x3e0] sm:$0xff] }
 0x6e6   :  { %5290 = vmatpush1.bf16.msra.mxu0 %v2038_v12  ;;  %v967_v12 = vld [vmem:[#allocation7 + $0x368] sm:$0xff] }
 0x6e7   :  { %5946 = vmatpush1.bf16.msra.mxu1 %v2040_v43  ;;  %5291 = vmatprep.subr.bf16.mxu0 %v2047_v34  ;;  %v969_v43 = vld [vmem:[#allocation7 + $0x378] sm:$0xff]  ;;  %v2086_v34 = vunpack.c.h.s8.bf16 %v958_v21  ;;  %v2103_v18 = vunpack.c.h.s8.bf16 %v967_v12 }
 0x6e8   :  { %5947 = vmatprep.subr.bf16.mxu1 %v2049_v30  ;;  %v2095_v30 = vunpack.c.l.s8.bf16 %v967_v12  ;;  %v2105_v63 = vunpack.c.h.s8.bf16 %v969_v43 }
 0x6ea   :  { %5292 = vmatpush1.bf16.msra.mxu0 %v2046_v7  ;;  %v2097_v7 = vunpack.c.l.s8.bf16 %v969_v43 }
 0x6eb   :  { %5948 = vmatpush1.bf16.msra.mxu1 %v2048_v23  ;;  %5293 = vmatprep.subr.bf16.mxu0 %v2055_v5  ;;  %v968_v23 = vld [vmem:[#allocation7 + $0x370] sm:$0xff]  ;;  %v2094_v5 = vunpack.c.l.s8.bf16 %v966_v6 }
 0x6ec   :  { %5949 = vmatprep.subr.bf16.mxu1 %v2057_v24  ;;  %v2096_v24 = vunpack.c.l.s8.bf16 %v968_v23  ;;  %v2104_v11 = vunpack.c.h.s8.bf16 %v968_v23  ;;  %v990_v23 = vld [vmem:[#allocation7 + $0x420] sm:$0xff] }
 0x6ee   :  { %5294 = vmatpush1.bf16.msra.mxu0 %v2054_v57  ;;  %v975_v57 = vld [vmem:[#allocation7 + $0x3a8] sm:$0xff] }
 0x6ef   :  { %5950 = vmatpush1.bf16.msra.mxu1 %v2056_v62  ;;  %5295 = vmatprep.subr.bf16.mxu0 %v2063_v10  ;;  %v977_v62 = vld [vmem:[#allocation7 + $0x3b8] sm:$0xff]  ;;  %v2102_v10 = vunpack.c.h.s8.bf16 %v966_v6  ;;  %v2119_v15 = vunpack.c.h.s8.bf16 %v975_v57 }
 0x6f0   :  { %5951 = vmatprep.subr.bf16.mxu1 %v2065_v58  ;;  %v2111_v58 = vunpack.c.l.s8.bf16 %v975_v57  ;;  %v2121_v20 = vunpack.c.h.s8.bf16 %v977_v62 }
 0x6f2   :  { %5296 = vmatpush1.bf16.msra.mxu0 %v2062_v44  ;;  %v2113_v44 = vunpack.c.l.s8.bf16 %v977_v62  ;;  %v999_v62 = vld [vmem:[#allocation7 + $0x468] sm:$0xff] }
 0x6f3   :  { %5952 = vmatpush1.bf16.msra.mxu1 %v2064_v29  ;;  %5297 = vmatprep.subr.bf16.mxu0 %v2071_v35  ;;  %v976_v29 = vld [vmem:[#allocation7 + $0x3b0] sm:$0xff]  ;;  %v2110_v35 = vunpack.c.l.s8.bf16 %v974_v60 }
 0x6f4   :  { %5953 = vmatprep.subr.bf16.mxu1 %v2073_v2  ;;  %v2112_v2 = vunpack.c.l.s8.bf16 %v976_v29  ;;  %v2120_v21 = vunpack.c.h.s8.bf16 %v976_v29  ;;  %v998_v29 = vld [vmem:[#allocation7 + $0x460] sm:$0xff] }
 0x6f6   :  { %5298 = vmatpush1.bf16.msra.mxu0 %v2070_v3  ;;  %v983_v3 = vld [vmem:[#allocation7 + $0x3e8] sm:$0xff] }
 0x6f7   :  { %5954 = vmatpush1.bf16.msra.mxu1 %v2072_v45  ;;  %5299 = vmatprep.subr.bf16.mxu0 %v2079_v16  ;;  %v985_v45 = vld [vmem:[#allocation7 + $0x3f8] sm:$0xff]  ;;  %v2118_v16 = vunpack.c.h.s8.bf16 %v974_v60  ;;  %v2135_v12 = vunpack.c.h.s8.bf16 %v983_v3 }
 0x6f8   :  { %5955 = vmatprep.subr.bf16.mxu1 %v2081_v61  ;;  %v2127_v61 = vunpack.c.l.s8.bf16 %v983_v3  ;;  %v2137_v43 = vunpack.c.h.s8.bf16 %v985_v45 }
 0x6fa   :  { %5300 = vmatpush1.bf16.msra.mxu0 %v2078_v33  ;;  %v2129_v33 = vunpack.c.l.s8.bf16 %v985_v45  ;;  %v1007_v45 = vld [vmem:[#allocation7 + $0x4a8] sm:$0xff] }
 0x6fb   :  { %5956 = vmatpush1.bf16.msra.mxu1 %v2080_v25  ;;  %5301 = vmatprep.subr.bf16.mxu0 %v2087_v36  ;;  %v984_v25 = vld [vmem:[#allocation7 + $0x3f0] sm:$0xff]  ;;  %v2126_v36 = vunpack.c.l.s8.bf16 %v982_v22 }
 0x6fc   :  { %5957 = vmatprep.subr.bf16.mxu1 %v2089_v42  ;;  %v2128_v42 = vunpack.c.l.s8.bf16 %v984_v25  ;;  %v2136_v6 = vunpack.c.h.s8.bf16 %v984_v25  ;;  %v1008_v25 = vld [vmem:[#allocation7 + $0x4b0] sm:$0xff] }
 0x6fe   :  { %5302 = vmatpush1.bf16.msra.mxu0 %v2086_v34  ;;  %v991_v34 = vld [vmem:[#allocation7 + $0x428] sm:$0xff] }
 0x6ff   :  { %5958 = vmatpush1.bf16.msra.mxu1 %v2088_v56  ;;  %5303 = vmatprep.subr.bf16.mxu0 %v2095_v30  ;;  %v993_v56 = vld [vmem:[#allocation7 + $0x438] sm:$0xff]  ;;  %v2134_v30 = vunpack.c.h.s8.bf16 %v982_v22  ;;  %v2151_v57 = vunpack.c.h.s8.bf16 %v991_v34  ;;  %v1006_v22 = vld [vmem:[#allocation7 + $0x4a0] sm:$0xff] }
 0x700   :  { %5959 = vmatprep.subr.bf16.mxu1 %v2097_v7  ;;  %v2143_v7 = vunpack.c.l.s8.bf16 %v991_v34  ;;  %v1015_v34 = vld [vmem:[#allocation7 + $0x4e8] sm:$0xff] }
 0x702   :  { %5304 = vmatpush1.bf16.msra.mxu0 %v2094_v5  ;;  %v2145_v5 = vunpack.c.l.s8.bf16 %v993_v56 }
 0x703   :  { %5960 = vmatpush1.bf16.msra.mxu1 %v2096_v24  ;;  %5305 = vmatprep.subr.bf16.mxu0 %v2103_v18  ;;  %v992_v24 = vld [vmem:[#allocation7 + $0x430] sm:$0xff]  ;;  %v2142_v18 = vunpack.c.l.s8.bf16 %v990_v23 }
 0x704   :  { %5961 = vmatprep.subr.bf16.mxu1 %v2105_v63  ;;  %v2144_v63 = vunpack.c.l.s8.bf16 %v992_v24  ;;  %v2152_v60 = vunpack.c.h.s8.bf16 %v992_v24  ;;  %v1016_v24 = vld [vmem:[#allocation7 + $0x4f0] sm:$0xff] }
 0x706   :  { %5306 = vmatpush1.bf16.msra.mxu0 %v2102_v10  ;;  %v2153_v10 = vunpack.c.h.s8.bf16 %v993_v56  ;;  %v1017_v56 = vld [vmem:[#allocation7 + $0x4f8] sm:$0xff] }
 0x707   :  { %5962 = vmatpush1.bf16.msra.mxu1 %v2104_v11  ;;  %5307 = vmatprep.subr.bf16.mxu0 %v2111_v58  ;;  %v1001_v11 = vld [vmem:[#allocation7 + $0x478] sm:$0xff]  ;;  %v2150_v58 = vunpack.c.h.s8.bf16 %v990_v23  ;;  %v1014_v23 = vld [vmem:[#allocation7 + $0x4e0] sm:$0xff] }
 0x708   :  { %5963 = vmatprep.subr.bf16.mxu1 %v2113_v44  ;;  %v2159_v44 = vunpack.c.l.s8.bf16 %v999_v62  ;;  %v2169_v3 = vunpack.c.h.s8.bf16 %v1001_v11 }
 0x70a   :  { %5308 = vmatpush1.bf16.msra.mxu0 %v2110_v35  ;;  %v2161_v35 = vunpack.c.l.s8.bf16 %v1001_v11  ;;  %v1025_v11 = vld [vmem:[#allocation7 + $0x538] sm:$0xff] }
 0x70b   :  { %5964 = vmatpush1.bf16.msra.mxu1 %v2112_v2  ;;  %5309 = vmatprep.subr.bf16.mxu0 %v2119_v15  ;;  %v1000_v2 = vld [vmem:[#allocation7 + $0x470] sm:$0xff]  ;;  %v2158_v15 = vunpack.c.l.s8.bf16 %v998_v29 }
 0x70c   :  { %5965 = vmatprep.subr.bf16.mxu1 %v2121_v20  ;;  %v2160_v20 = vunpack.c.l.s8.bf16 %v1000_v2 }
 0x70e   :  { %5310 = vmatpush1.bf16.msra.mxu0 %v2118_v16  ;;  %v1009_v16 = vld [vmem:[#allocation7 + $0x4b8] sm:$0xff] }
 0x70f   :  { %5966 = vmatpush1.bf16.msra.mxu1 %v2120_v21  ;;  %5311 = vmatprep.subr.bf16.mxu0 %v2127_v61  ;;  %v2166_v21 = vunpack.c.h.s8.bf16 %v998_v29  ;;  %v2168_v61 = vunpack.c.h.s8.bf16 %v1000_v2  ;;  %v1022_v29 = vld [vmem:[#allocation7 + $0x520] sm:$0xff]  ;;  %v1024_v2 = vld [vmem:[#allocation7 + $0x530] sm:$0xff] }
 0x710   :  { %5967 = vmatprep.subr.bf16.mxu1 %v2129_v33  ;;  %v2177_v33 = vunpack.c.l.s8.bf16 %v1009_v16 }
 0x712   :  { %5312 = vmatpush1.bf16.msra.mxu0 %v2126_v36  ;;  %v2174_v36 = vunpack.c.l.s8.bf16 %v1006_v22 }
 0x713   :  { %5968 = vmatpush1.bf16.msra.mxu1 %v2128_v42  ;;  %5313 = vmatprep.subr.bf16.mxu0 %v2135_v12  ;;  %v2176_v42 = vunpack.c.l.s8.bf16 %v1008_v25  ;;  %v2183_v12 = vunpack.c.h.s8.bf16 %v1007_v45 }
 0x714   :  { %5969 = vmatprep.subr.bf16.mxu1 %v2137_v43  ;;  %v2185_v43 = vunpack.c.h.s8.bf16 %v1009_v16  ;;  %v1033_v16 = vld [vmem:[#allocation7 + $0x578] sm:$0xff] }
 0x716   :  { %5314 = vmatpush1.bf16.msra.mxu0 %v2134_v30  ;;  %v2182_v30 = vunpack.c.h.s8.bf16 %v1006_v22  ;;  %v1030_v22 = vld [vmem:[#allocation7 + $0x560] sm:$0xff] }
 0x717   :  { %5970 = vmatpush1.bf16.msra.mxu1 %v2136_v6  ;;  %5324 = vmatprep.subr.bf16.mxu0 %v2143_v7  ;;  %v2184_v6 = vunpack.c.h.s8.bf16 %v1008_v25  ;;  %v2191_v7 = vunpack.c.l.s8.bf16 %v1015_v34  ;;  %v1032_v25 = vld [vmem:[#allocation7 + $0x570] sm:$0xff] }
 0x718   :  { %5980 = vmatprep.subr.bf16.mxu1 %v2145_v5  ;;  %v2193_v5 = vunpack.c.l.s8.bf16 %v1017_v56 }
 0x719   :  { %5316 = vmatmul.mubr.bf16.vlgmr.msra.gmra.mrb[4].mxu0 %v8326_v28 }
 0x71a   :  { %5972 = vmatmul.mubr.bf16.vlgmr.msra.gmra.mrb[4].mxu1 %v8326_v28  ;;  %5325 = vmatpush1.bf16.msra.mxu0 %v2142_v18  ;;  %v2167_v28 = vunpack.c.h.s8.bf16 %v999_v62  ;;  %v2190_v18 = vunpack.c.l.s8.bf16 %v1014_v23  ;;  %v2201_v62 = vunpack.c.h.s8.bf16 %v1017_v56  ;;  %v1041_v56 = vld [vmem:[#allocation7 + $0x5b8] sm:$0xff] }
 0x71b   :  { %5356 = vmatprep.mubr.bf16.mxu0 %v8328_v32  ;;  %5981 = vmatpush1.bf16.msra.mxu1 %v2144_v63  ;;  %v2192_v63 = vunpack.c.l.s8.bf16 %v1016_v24 }
 0x71c   :  { %6012 = vmatprep.mubr.bf16.mxu1 %v8328_v32  ;;  %5326 = vmatprep.subr.bf16.mxu0 %v2151_v57  ;;  %v2175_v32 = vunpack.c.l.s8.bf16 %v1007_v45  ;;  %v2199_v57 = vunpack.c.h.s8.bf16 %v1015_v34  ;;  %v1031_v45 = vld [vmem:[#allocation7 + $0x568] sm:$0xff] }
 0x71d   :  { %5982 = vmatprep.subr.bf16.mxu1 %v2153_v10  ;;  %v1023_v10 = vld [vmem:[#allocation7 + $0x528] sm:$0xff] }
 0x71e   :  { %5327 = vmatpush1.bf16.msra.mxu0 %v2150_v58  ;;  %v2198_v58 = vunpack.c.h.s8.bf16 %v1014_v23  ;;  %v1039_v34 = vld [vmem:[#allocation7 + $0x5a8] sm:$0xff]  ;;  %v1038_v23 = vld [vmem:[#allocation7 + $0x5a0] sm:$0xff] }
 0x71f   :  { %5983 = vmatpush1.bf16.msra.mxu1 %v2152_v60  ;;  %5328 = vmatprep.subr.bf16.mxu0 %v2159_v44  ;;  %v2200_v60 = vunpack.c.h.s8.bf16 %v1016_v24  ;;  %v2207_v44 = vunpack.c.l.s8.bf16 %v1023_v10  ;;  %v1040_v24 = vld [vmem:[#allocation7 + $0x5b0] sm:$0xff] }
 0x720   :  { %5984 = vmatprep.subr.bf16.mxu1 %v2161_v35  ;;  %v2209_v35 = vunpack.c.l.s8.bf16 %v1025_v11 }
 0x722   :  { %5329 = vmatpush1.bf16.msra.mxu0 %v2158_v15  ;;  %v2206_v15 = vunpack.c.l.s8.bf16 %v1022_v29 }
 0x723   :  { %5985 = vmatpush1.bf16.msra.mxu1 %v2160_v20  ;;  %5330 = vmatprep.subr.bf16.mxu0 %v2167_v28  ;;  %v2208_v20 = vunpack.c.l.s8.bf16 %v1024_v2  ;;  %v2215_v28 = vunpack.c.h.s8.bf16 %v1023_v10  ;;  %v1047_v10 = vld [vmem:[#allocation7 + $0x5e8] sm:$0xff] }
 0x724   :  { %5986 = vmatprep.subr.bf16.mxu1 %v2169_v3  ;;  %v2217_v3 = vunpack.c.h.s8.bf16 %v1025_v11  ;;  %v1049_v11 = vld [vmem:[#allocation7 + $0x5f8] sm:$0xff] }
 0x726   :  { %5331 = vmatpush1.bf16.msra.mxu0 %v2166_v21  ;;  %v2214_v21 = vunpack.c.h.s8.bf16 %v1022_v29  ;;  %v1046_v29 = vld [vmem:[#allocation7 + $0x5e0] sm:$0xff] }
 0x727   :  { %5987 = vmatpush1.bf16.msra.mxu1 %v2168_v61  ;;  %5332 = vmatprep.subr.bf16.mxu0 %v2175_v32  ;;  %v2216_v61 = vunpack.c.h.s8.bf16 %v1024_v2  ;;  %v2223_v32 = vunpack.c.l.s8.bf16 %v1031_v45  ;;  %v1048_v2 = vld [vmem:[#allocation7 + $0x5f0] sm:$0xff] }
 0x728   :  { %5988 = vmatprep.subr.bf16.mxu1 %v2177_v33  ;;  %v2225_v33 = vunpack.c.l.s8.bf16 %v1033_v16 }
 0x72a   :  { %5333 = vmatpush1.bf16.msra.mxu0 %v2174_v36  ;;  %v2222_v36 = vunpack.c.l.s8.bf16 %v1030_v22 }
 0x72b   :  { %5989 = vmatpush1.bf16.msra.mxu1 %v2176_v42  ;;  %5334 = vmatprep.subr.bf16.mxu0 %v2183_v12  ;;  %v2224_v42 = vunpack.c.l.s8.bf16 %v1032_v25  ;;  %v2231_v12 = vunpack.c.h.s8.bf16 %v1031_v45  ;;  %v1055_v45 = vld [vmem:[#allocation7 + $0x628] sm:$0xff] }
 0x72c   :  { %5990 = vmatprep.subr.bf16.mxu1 %v2185_v43  ;;  %v2233_v43 = vunpack.c.h.s8.bf16 %v1033_v16  ;;  %v1057_v16 = vld [vmem:[#allocation7 + $0x638] sm:$0xff] }
 0x72e   :  { %5335 = vmatpush1.bf16.msra.mxu0 %v2182_v30  ;;  %v2230_v30 = vunpack.c.h.s8.bf16 %v1030_v22  ;;  %v1054_v22 = vld [vmem:[#allocation7 + $0x620] sm:$0xff] }
 0x72f   :  { %5991 = vmatpush1.bf16.msra.mxu1 %v2184_v6  ;;  %5336 = vmatprep.subr.bf16.mxu0 %v2191_v7  ;;  %v2232_v6 = vunpack.c.h.s8.bf16 %v1032_v25  ;;  %v2239_v7 = vunpack.c.l.s8.bf16 %v1039_v34  ;;  %v1056_v25 = vld [vmem:[#allocation7 + $0x630] sm:$0xff] }
 0x730   :  { %5992 = vmatprep.subr.bf16.mxu1 %v2193_v5  ;;  %v2241_v5 = vunpack.c.l.s8.bf16 %v1041_v56 }
 0x732   :  { %5337 = vmatpush1.bf16.msra.mxu0 %v2190_v18  ;;  %v2238_v18 = vunpack.c.l.s8.bf16 %v1038_v23 }
 0x733   :  { %5993 = vmatpush1.bf16.msra.mxu1 %v2192_v63  ;;  %5338 = vmatprep.subr.bf16.mxu0 %v2199_v57  ;;  %v2240_v63 = vunpack.c.l.s8.bf16 %v1040_v24  ;;  %v2247_v57 = vunpack.c.h.s8.bf16 %v1039_v34  ;;  %v2281_v34 = vunpack.c.h.s8.bf16 %v1057_v16 }
 0x734   :  { %5994 = vmatprep.subr.bf16.mxu1 %v2201_v62  ;;  %v2249_v62 = vunpack.c.h.s8.bf16 %v1041_v56  ;;  %v1065_v56 = vld [vmem:[#allocation7 + $0x678] sm:$0xff] }
 0x736   :  { %5339 = vmatpush1.bf16.msra.mxu0 %v2198_v58  ;;  %v2246_v58 = vunpack.c.h.s8.bf16 %v1038_v23  ;;  %v1062_v23 = vld [vmem:[#allocation7 + $0x660] sm:$0xff] }
 0x737   :  { %5995 = vmatpush1.bf16.msra.mxu1 %v2200_v60  ;;  %5340 = vmatprep.subr.bf16.mxu0 %v2207_v44  ;;  %v2248_v60 = vunpack.c.h.s8.bf16 %v1040_v24  ;;  %v2255_v44 = vunpack.c.l.s8.bf16 %v1047_v10  ;;  %v1064_v24 = vld [vmem:[#allocation7 + $0x670] sm:$0xff] }
 0x738   :  { %5996 = vmatprep.subr.bf16.mxu1 %v2209_v35  ;;  %v2257_v35 = vunpack.c.l.s8.bf16 %v1049_v11 }
 0x73a   :  { %5341 = vmatpush1.bf16.msra.mxu0 %v2206_v15  ;;  %v2254_v15 = vunpack.c.l.s8.bf16 %v1046_v29 }
 0x73b   :  { %5997 = vmatpush1.bf16.msra.mxu1 %v2208_v20  ;;  %5342 = vmatprep.subr.bf16.mxu0 %v2215_v28  ;;  %v2256_v20 = vunpack.c.l.s8.bf16 %v1048_v2  ;;  %v2263_v28 = vunpack.c.h.s8.bf16 %v1047_v10  ;;  %v1073_v10 = vld [vmem:[#allocation7 + $0x6b8] sm:$0xff] }
 0x73c   :  { %5998 = vmatprep.subr.bf16.mxu1 %v2217_v3  ;;  %v2265_v3 = vunpack.c.h.s8.bf16 %v1049_v11  ;;  %v2294_v11 = vunpack.c.h.s8.bf16 %v1062_v23 }
 0x73e   :  { %5343 = vmatpush1.bf16.msra.mxu0 %v2214_v21  ;;  %v2262_v21 = vunpack.c.h.s8.bf16 %v1046_v29  ;;  %v1072_v29 = vld [vmem:[#allocation7 + $0x6b0] sm:$0xff] }
 0x73f   :  { %5999 = vmatpush1.bf16.msra.mxu1 %v2216_v61  ;;  %5344 = vmatprep.subr.bf16.mxu0 %v2223_v32  ;;  %v2264_v61 = vunpack.c.h.s8.bf16 %v1048_v2  ;;  %v2271_v32 = vunpack.c.l.s8.bf16 %v1055_v45  ;;  %v2304_v2 = vunpack.c.l.s8.bf16 %v1072_v29 }
 0x740   :  { %6000 = vmatprep.subr.bf16.mxu1 %v2225_v33  ;;  %v2273_v33 = vunpack.c.l.s8.bf16 %v1057_v16  ;;  %v2312_v16 = vunpack.c.h.s8.bf16 %v1072_v29  ;;  %v1097_v29 = vld [vmem:[#allocation7 + $0x778] sm:$0xff] }
 0x742   :  { %5345 = vmatpush1.bf16.msra.mxu0 %v2222_v36  ;;  %v2270_v36 = vunpack.c.l.s8.bf16 %v1054_v22 }
 0x743   :  { %6001 = vmatpush1.bf16.msra.mxu1 %v2224_v42  ;;  %5346 = vmatprep.subr.bf16.mxu0 %v2231_v12  ;;  %v2272_v42 = vunpack.c.l.s8.bf16 %v1056_v25  ;;  %v2279_v12 = vunpack.c.h.s8.bf16 %v1055_v45 }
 0x744   :  { %6002 = vmatprep.subr.bf16.mxu1 %v2233_v43  ;;  %v1063_v43 = vld [vmem:[#allocation7 + $0x668] sm:$0xff] }
 0x746   :  { %5347 = vmatpush1.bf16.msra.mxu0 %v2230_v30  ;;  %v2278_v30 = vunpack.c.h.s8.bf16 %v1054_v22 }
 0x747   :  { %6003 = vmatpush1.bf16.msra.mxu1 %v2232_v6  ;;  %5348 = vmatprep.subr.bf16.mxu0 %v2239_v7  ;;  %v2280_v6 = vunpack.c.h.s8.bf16 %v1056_v25  ;;  %v2287_v7 = vunpack.c.l.s8.bf16 %v1063_v43 }
 0x748   :  { %6004 = vmatprep.subr.bf16.mxu1 %v2241_v5  ;;  %v2289_v5 = vunpack.c.l.s8.bf16 %v1065_v56 }
 0x74a   :  { %5349 = vmatpush1.bf16.msra.mxu0 %v2238_v18  ;;  %v2286_v18 = vunpack.c.l.s8.bf16 %v1062_v23 }
 0x74b   :  { %6005 = vmatpush1.bf16.msra.mxu1 %v2240_v63  ;;  %5350 = vmatprep.subr.bf16.mxu0 %v2247_v57  ;;  %v2288_v63 = vunpack.c.l.s8.bf16 %v1064_v24  ;;  %v2297_v57 = vunpack.c.h.s8.bf16 %v1065_v56 }
 0x74c   :  { %6006 = vmatprep.subr.bf16.mxu1 %v2249_v62  ;;  %v1071_v62 = vld [vmem:[#allocation7 + $0x6a8] sm:$0xff] }
 0x74e   :  { %5351 = vmatpush1.bf16.msra.mxu0 %v2246_v58  ;;  %v2296_v58 = vunpack.c.h.s8.bf16 %v1064_v24  ;;  %v1089_v24 = vld [vmem:[#allocation7 + $0x738] sm:$0xff] }
 0x74f   :  { %6007 = vmatpush1.bf16.msra.mxu1 %v2248_v60  ;;  %5352 = vmatprep.subr.bf16.mxu0 %v2255_v44  ;;  %v1070_v60 = vld [vmem:[#allocation7 + $0x6a0] sm:$0xff]  ;;  %v2305_v44 = vunpack.c.l.s8.bf16 %v1073_v10 }
 0x750   :  { %6008 = vmatprep.subr.bf16.mxu1 %v2257_v35  ;;  %v2302_v35 = vunpack.c.l.s8.bf16 %v1070_v60  ;;  %v2310_v45 = vunpack.c.h.s8.bf16 %v1070_v60  ;;  %v2345_v60 = vunpack.c.h.s8.bf16 %v1089_v24 }
 0x752   :  { %5353 = vmatpush1.bf16.msra.mxu0 %v2254_v15  ;;  %v2311_v15 = vunpack.c.h.s8.bf16 %v1071_v62 }
 0x753   :  { %6009 = vmatpush1.bf16.msra.mxu1 %v2256_v20  ;;  %5354 = vmatprep.subr.bf16.mxu0 %v2263_v28  ;;  %v2313_v20 = vunpack.c.h.s8.bf16 %v1073_v10  ;;  %v1079_v28 = vld [vmem:[#allocation7 + $0x6e8] sm:$0xff]  ;;  %v1088_v10 = vld [vmem:[#allocation7 + $0x730] sm:$0xff] }
 0x754   :  { %6010 = vmatprep.subr.bf16.mxu1 %v2265_v3  ;;  %v1081_v3 = vld [vmem:[#allocation7 + $0x6f8] sm:$0xff] }
 0x755   :  { %v2321_v22 = vunpack.c.l.s8.bf16 %v1081_v3  ;;  %v2329_v23 = vunpack.c.h.s8.bf16 %v1081_v3  ;;  %v1096_v3 = vld [vmem:[#allocation7 + $0x770] sm:$0xff] }
 0x756   :  { %5355 = vmatpush1.bf16.msra.mxu0 %v2262_v21  ;;  %v2319_v21 = vunpack.c.l.s8.bf16 %v1079_v28 }
 0x757   :  { %6011 = vmatpush1.bf16.msra.mxu1 %v2264_v61  ;;  %5365 = vmatprep.subr.bf16.mxu0 %v2271_v32  ;;  %v1078_v61 = vld [vmem:[#allocation7 + $0x6e0] sm:$0xff] }
 0x758   :  { %6021 = vmatprep.subr.bf16.mxu1 %v2273_v33  ;;  %v1080_v33 = vld [vmem:[#allocation7 + $0x6f0] sm:$0xff] }
 0x759   :  { %5357 = vmatmul.mubr.bf16.vlgmr.msra.gmra.mrb[4].mxu0 %v8343_v31 }
 0x75a   :  { %6013 = vmatmul.mubr.bf16.vlgmr.msra.gmra.mrb[4].mxu1 %v8343_v31  ;;  %5366 = vmatpush1.bf16.msra.mxu0 %v2270_v36  ;;  %v2295_v31 = vunpack.c.h.s8.bf16 %v1063_v43  ;;  %v2318_v43 = vunpack.c.l.s8.bf16 %v1078_v61 }
 0x75b   :  { %5397 = vmatprep.mubr.bf16.mxu0 %v8346_v38  ;;  %6022 = vmatpush1.bf16.msra.mxu1 %v2272_v42 }
 0x75c   :  { %6053 = vmatprep.mubr.bf16.mxu1 %v8346_v38  ;;  %5367 = vmatprep.subr.bf16.mxu0 %v2279_v12  ;;  %v2303_v38 = vunpack.c.l.s8.bf16 %v1071_v62  ;;  %v2337_v62 = vunpack.c.l.s8.bf16 %v1089_v24 }
 0x75d   :  { %6023 = vmatprep.subr.bf16.mxu1 %v2281_v34 }
 0x75e   :  { %5368 = vmatpush1.bf16.msra.mxu0 %v2278_v30  ;;  %v2320_v30 = vunpack.c.l.s8.bf16 %v1080_v33 }
 0x75f   :  { %6024 = vmatpush1.bf16.msra.mxu1 %v2280_v6  ;;  %5369 = vmatprep.subr.bf16.mxu0 %v2287_v7  ;;  %v2327_v6 = vunpack.c.h.s8.bf16 %v1079_v28  ;;  %v2353_v28 = vunpack.c.l.s8.bf16 %v1097_v29 }
 0x760   :  { %6025 = vmatprep.subr.bf16.mxu1 %v2289_v5  ;;  %v1087_v5 = vld [vmem:[#allocation7 + $0x728] sm:$0xff] }
 0x762   :  { %5370 = vmatpush1.bf16.msra.mxu0 %v2286_v18  ;;  %v2326_v18 = vunpack.c.h.s8.bf16 %v1078_v61  ;;  %v2361_v61 = vunpack.c.h.s8.bf16 %v1097_v29 }
 0x763   :  { %6026 = vmatpush1.bf16.msra.mxu1 %v2288_v63  ;;  %5371 = vmatprep.subr.bf16.mxu0 %v2295_v31  ;;  %v2328_v63 = vunpack.c.h.s8.bf16 %v1080_v33  ;;  %v2335_v31 = vunpack.c.l.s8.bf16 %v1087_v5  ;;  %v1105_v33 = vld [vmem:[#allocation7 + $0x7b8] sm:$0xff] }
 0x764   :  { %6027 = vmatprep.subr.bf16.mxu1 %v2297_v57  ;;  %v1086_v57 = vld [vmem:[#allocation7 + $0x720] sm:$0xff]  ;;  %v2377_v24 = vunpack.c.h.s8.bf16 %v1105_v33 }
 0x766   :  { %5372 = vmatpush1.bf16.msra.mxu0 %v2294_v11  ;;  %v2334_v11 = vunpack.c.l.s8.bf16 %v1086_v57 }
 0x767   :  { %6028 = vmatpush1.bf16.msra.mxu1 %v2296_v58  ;;  %5373 = vmatprep.subr.bf16.mxu0 %v2303_v38  ;;  %v2336_v58 = vunpack.c.l.s8.bf16 %v1088_v10  ;;  %v2343_v38 = vunpack.c.h.s8.bf16 %v1087_v5 }
 0x768   :  { %6029 = vmatprep.subr.bf16.mxu1 %v2305_v44  ;;  %v1095_v44 = vld [vmem:[#allocation7 + $0x768] sm:$0xff] }
 0x76a   :  { %5374 = vmatpush1.bf16.msra.mxu0 %v2302_v35  ;;  %v2342_v35 = vunpack.c.h.s8.bf16 %v1086_v57 }
 0x76b   :  { %6030 = vmatpush1.bf16.msra.mxu1 %v2304_v2  ;;  %5375 = vmatprep.subr.bf16.mxu0 %v2311_v15  ;;  %v2344_v2 = vunpack.c.h.s8.bf16 %v1088_v10  ;;  %v2351_v15 = vunpack.c.l.s8.bf16 %v1095_v44  ;;  %v1110_v10 = vld [vmem:[#allocation7 + $0x7e0] sm:$0xff] }
 0x76c   :  { %v8587_v32 = vpop.f32.mrb[0].mxu0  ;;  %6031 = vmatprep.subr.bf16.mxu1 %v2313_v20  ;;  %v1094_v20 = vld [vmem:[#allocation7 + $0x760] sm:$0xff] }
 0x76d   :  { %v8589_v25 = vpop.f32.mrb[0].mxu1  ;;  %v8591_v36 = vpop.f32.mrb[1].mxu0 }
 0x76e   :  { %v8593_v42 = vpop.f32.mrb[1].mxu1  ;;  %v4583_v12 = vpop.f32.mrb[2].mxu0  ;;  %5376 = vmatpush1.bf16.msra.mxu0 %v2310_v45  ;;  %v2350_v45 = vunpack.c.l.s8.bf16 %v1094_v20 }
 0x76f   :  { %v5239_v34 = vpop.f32.mrb[2].mxu1  ;;  %6032 = vmatpush1.bf16.msra.mxu1 %v2312_v16  ;;  %v4584_v56 = vpop.f32.mrb[3].mxu0  ;;  %5377 = vmatprep.subr.bf16.mxu0 %v2319_v21  ;;  %v2352_v16 = vunpack.c.l.s8.bf16 %v1096_v3  ;;  %v2359_v21 = vunpack.c.h.s8.bf16 %v1095_v44  ;;  %v2358_v12 = vunpack.c.h.s8.bf16 %v1094_v20 }
 0x770   :  { %v5240_v7 = vpop.f32.mrb[3].mxu1  ;;  %6033 = vmatprep.subr.bf16.mxu1 %v2321_v22  ;;  %v1103_v22 = vld [vmem:[#allocation7 + $0x7a8] sm:$0xff]  ;;  %v1102_v56 = vld [vmem:[#allocation7 + $0x7a0] sm:$0xff] }
 0x771   :  { %v2367_v34 = vunpack.c.l.s8.bf16 %v1103_v22  ;;  %v2366_v7 = vunpack.c.l.s8.bf16 %v1102_v56  ;;  %v2375_v5 = vunpack.c.h.s8.bf16 %v1103_v22 }
 0x772   :  { %5378 = vmatpush1.bf16.msra.mxu0 %v2318_v43  ;;  %v2360_v43 = vunpack.c.h.s8.bf16 %v1096_v3  ;;  %v1118_v3 = vld [vmem:[#allocation7 + $0x820] sm:$0xff] }
 0x773   :  { %6034 = vmatpush1.bf16.msra.mxu1 %v2320_v30  ;;  %5379 = vmatprep.subr.bf16.mxu0 %v2327_v6  ;;  %v2369_v30 = vunpack.c.l.s8.bf16 %v1105_v33  ;;  %v1104_v6 = vld [vmem:[#allocation7 + $0x7b0] sm:$0xff]  ;;  %v1127_v33 = vld [vmem:[#allocation7 + $0x868] sm:$0xff] }
 0x774   :  { %6035 = vmatprep.subr.bf16.mxu1 %v2329_v23  ;;  %v2368_v23 = vunpack.c.l.s8.bf16 %v1104_v6  ;;  %v2376_v57 = vunpack.c.h.s8.bf16 %v1104_v6  ;;  %v1126_v6 = vld [vmem:[#allocation7 + $0x860] sm:$0xff] }
 0x776   :  { %5380 = vmatpush1.bf16.msra.mxu0 %v2326_v18  ;;  %v1111_v18 = vld [vmem:[#allocation7 + $0x7e8] sm:$0xff] }
 0x777   :  { %6036 = vmatpush1.bf16.msra.mxu1 %v2328_v63  ;;  %5381 = vmatprep.subr.bf16.mxu0 %v2335_v31  ;;  %v1113_v63 = vld [vmem:[#allocation7 + $0x7f8] sm:$0xff]  ;;  %v2374_v31 = vunpack.c.h.s8.bf16 %v1102_v56  ;;  %v2391_v44 = vunpack.c.h.s8.bf16 %v1111_v18 }
 0x778   :  { %6037 = vmatprep.subr.bf16.mxu1 %v2337_v62  ;;  %v2383_v62 = vunpack.c.l.s8.bf16 %v1111_v18  ;;  %v2393_v29 = vunpack.c.h.s8.bf16 %v1113_v63 }
 0x77a   :  { %5382 = vmatpush1.bf16.msra.mxu0 %v2334_v11  ;;  %v2385_v11 = vunpack.c.l.s8.bf16 %v1113_v63  ;;  %v1135_v63 = vld [vmem:[#allocation7 + $0x8a8] sm:$0xff] }
 0x77b   :  { %6038 = vmatpush1.bf16.msra.mxu1 %v2336_v58  ;;  %5383 = vmatprep.subr.bf16.mxu0 %v2343_v38  ;;  %v1112_v58 = vld [vmem:[#allocation7 + $0x7f0] sm:$0xff]  ;;  %v2382_v38 = vunpack.c.l.s8.bf16 %v1110_v10 }
 0x77c   :  { %6039 = vmatprep.subr.bf16.mxu1 %v2345_v60  ;;  %v2384_v60 = vunpack.c.l.s8.bf16 %v1112_v58  ;;  %v2392_v20 = vunpack.c.h.s8.bf16 %v1112_v58  ;;  %v1136_v58 = vld [vmem:[#allocation7 + $0x8b0] sm:$0xff] }
 0x77e   :  { %5384 = vmatpush1.bf16.msra.mxu0 %v2342_v35  ;;  %v1119_v35 = vld [vmem:[#allocation7 + $0x828] sm:$0xff] }
 0x77f   :  { %6040 = vmatpush1.bf16.msra.mxu1 %v2344_v2  ;;  %5385 = vmatprep.subr.bf16.mxu0 %v2351_v15  ;;  %v1121_v2 = vld [vmem:[#allocation7 + $0x838] sm:$0xff]  ;;  %v2390_v15 = vunpack.c.h.s8.bf16 %v1110_v10  ;;  %v2407_v22 = vunpack.c.h.s8.bf16 %v1119_v35  ;;  %v1134_v10 = vld [vmem:[#allocation7 + $0x8a0] sm:$0xff] }
 0x780   :  { %6041 = vmatprep.subr.bf16.mxu1 %v2353_v28  ;;  %v2399_v28 = vunpack.c.l.s8.bf16 %v1119_v35  ;;  %v1143_v35 = vld [vmem:[#allocation7 + $0x8e8] sm:$0xff] }
 0x782   :  { %5386 = vmatpush1.bf16.msra.mxu0 %v2350_v45  ;;  %v2401_v45 = vunpack.c.l.s8.bf16 %v1121_v2 }
 0x783   :  { %6042 = vmatpush1.bf16.msra.mxu1 %v2352_v16  ;;  %5387 = vmatprep.subr.bf16.mxu0 %v2359_v21  ;;  %v1120_v16 = vld [vmem:[#allocation7 + $0x830] sm:$0xff]  ;;  %v2398_v21 = vunpack.c.l.s8.bf16 %v1118_v3 }
 0x784   :  { %6043 = vmatprep.subr.bf16.mxu1 %v2361_v61  ;;  %v2400_v61 = vunpack.c.l.s8.bf16 %v1120_v16  ;;  %v2408_v56 = vunpack.c.h.s8.bf16 %v1120_v16  ;;  %v1144_v16 = vld [vmem:[#allocation7 + $0x8f0] sm:$0xff] }
 0x786   :  { %5388 = vmatpush1.bf16.msra.mxu0 %v2358_v12  ;;  %v2409_v12 = vunpack.c.h.s8.bf16 %v1121_v2  ;;  %v1145_v2 = vld [vmem:[#allocation7 + $0x8f8] sm:$0xff] }
 0x787   :  { %6044 = vmatpush1.bf16.msra.mxu1 %v2360_v43  ;;  %5389 = vmatprep.subr.bf16.mxu0 %v2367_v34  ;;  %v1129_v43 = vld [vmem:[#allocation7 + $0x878] sm:$0xff]  ;;  %v2406_v34 = vunpack.c.h.s8.bf16 %v1118_v3  ;;  %v1142_v3 = vld [vmem:[#allocation7 + $0x8e0] sm:$0xff] }
 0x788   :  { %6045 = vmatprep.subr.bf16.mxu1 %v2369_v30  ;;  %v2415_v30 = vunpack.c.l.s8.bf16 %v1127_v33  ;;  %v2425_v18 = vunpack.c.h.s8.bf16 %v1129_v43 }
 0x78a   :  { %5390 = vmatpush1.bf16.msra.mxu0 %v2366_v7  ;;  %v2417_v7 = vunpack.c.l.s8.bf16 %v1129_v43  ;;  %v1153_v43 = vld [vmem:[#allocation7 + $0x938] sm:$0xff] }
 0x78b   :  { %6046 = vmatpush1.bf16.msra.mxu1 %v2368_v23  ;;  %5391 = vmatprep.subr.bf16.mxu0 %v2375_v5  ;;  %v1128_v23 = vld [vmem:[#allocation7 + $0x870] sm:$0xff]  ;;  %v2414_v5 = vunpack.c.l.s8.bf16 %v1126_v6 }
 0x78c   :  { %6047 = vmatprep.subr.bf16.mxu1 %v2377_v24  ;;  %v2416_v24 = vunpack.c.l.s8.bf16 %v1128_v23 }
 0x78e   :  { %5392 = vmatpush1.bf16.msra.mxu0 %v2374_v31  ;;  %v1137_v31 = vld [vmem:[#allocation7 + $0x8b8] sm:$0xff] }
 0x78f   :  { %6048 = vmatpush1.bf16.msra.mxu1 %v2376_v57  ;;  %5393 = vmatprep.subr.bf16.mxu0 %v2383_v62  ;;  %v2422_v57 = vunpack.c.h.s8.bf16 %v1126_v6  ;;  %v2424_v62 = vunpack.c.h.s8.bf16 %v1128_v23  ;;  %v1150_v6 = vld [vmem:[#allocation7 + $0x920] sm:$0xff]  ;;  %v1152_v23 = vld [vmem:[#allocation7 + $0x930] sm:$0xff] }
 0x790   :  { %6049 = vmatprep.subr.bf16.mxu1 %v2385_v11  ;;  %v2433_v11 = vunpack.c.l.s8.bf16 %v1137_v31 }
 0x792   :  { %5394 = vmatpush1.bf16.msra.mxu0 %v2382_v38  ;;  %v2430_v38 = vunpack.c.l.s8.bf16 %v1134_v10 }
 0x793   :  { %6050 = vmatpush1.bf16.msra.mxu1 %v2384_v60  ;;  %5395 = vmatprep.subr.bf16.mxu0 %v2391_v44  ;;  %v2432_v60 = vunpack.c.l.s8.bf16 %v1136_v58  ;;  %v2439_v44 = vunpack.c.h.s8.bf16 %v1135_v63 }
 0x794   :  { %6051 = vmatprep.subr.bf16.mxu1 %v2393_v29  ;;  %v2441_v29 = vunpack.c.h.s8.bf16 %v1137_v31  ;;  %v1161_v31 = vld [vmem:[#allocation7 + $0x978] sm:$0xff] }
 0x796   :  { %5396 = vmatpush1.bf16.msra.mxu0 %v2390_v15  ;;  %v2438_v15 = vunpack.c.h.s8.bf16 %v1134_v10  ;;  %v1158_v10 = vld [vmem:[#allocation7 + $0x960] sm:$0xff] }
 0x797   :  { %6052 = vmatpush1.bf16.msra.mxu1 %v2392_v20  ;;  %5406 = vmatprep.subr.bf16.mxu0 %v2399_v28  ;;  %v2440_v20 = vunpack.c.h.s8.bf16 %v1136_v58  ;;  %v2447_v28 = vunpack.c.l.s8.bf16 %v1143_v35  ;;  %v1160_v58 = vld [vmem:[#allocation7 + $0x970] sm:$0xff] }
 0x798   :  { %6062 = vmatprep.subr.bf16.mxu1 %v2401_v45  ;;  %v2449_v45 = vunpack.c.l.s8.bf16 %v1145_v2 }
 0x799   :  { %5398 = vmatmul.mubr.bf16.vlgmr.msra.gmra.mrb[4].mxu0 %v8362_v37 }
 0x79a   :  { %6054 = vmatmul.mubr.bf16.vlgmr.msra.gmra.mrb[4].mxu1 %v8362_v37  ;;  %5407 = vmatpush1.bf16.msra.mxu0 %v2398_v21  ;;  %v2423_v37 = vunpack.c.h.s8.bf16 %v1127_v33  ;;  %v2446_v21 = vunpack.c.l.s8.bf16 %v1142_v3  ;;  %v2457_v33 = vunpack.c.h.s8.bf16 %v1145_v2  ;;  %v1169_v2 = vld [vmem:[#allocation7 + $0x9b8] sm:$0xff] }
 0x79b   :  { %5438 = vmatprep.mubr.bf16.mxu0 %v8365_v17  ;;  %6063 = vmatpush1.bf16.msra.mxu1 %v2400_v61  ;;  %v2448_v61 = vunpack.c.l.s8.bf16 %v1144_v16 }
 0x79c   :  { %6094 = vmatprep.mubr.bf16.mxu1 %v8365_v17  ;;  %5408 = vmatprep.subr.bf16.mxu0 %v2407_v22  ;;  %v2431_v17 = vunpack.c.l.s8.bf16 %v1135_v63  ;;  %v2455_v22 = vunpack.c.h.s8.bf16 %v1143_v35  ;;  %v1159_v63 = vld [vmem:[#allocation7 + $0x968] sm:$0xff] }
 0x79d   :  { %6064 = vmatprep.subr.bf16.mxu1 %v2409_v12  ;;  %v1151_v12 = vld [vmem:[#allocation7 + $0x928] sm:$0xff] }
 0x79e   :  { %5409 = vmatpush1.bf16.msra.mxu0 %v2406_v34  ;;  %v2454_v34 = vunpack.c.h.s8.bf16 %v1142_v3  ;;  %v1167_v35 = vld [vmem:[#allocation7 + $0x9a8] sm:$0xff]  ;;  %v1166_v3 = vld [vmem:[#allocation7 + $0x9a0] sm:$0xff] }
 0x79f   :  { %6065 = vmatpush1.bf16.msra.mxu1 %v2408_v56  ;;  %5410 = vmatprep.subr.bf16.mxu0 %v2415_v30  ;;  %v2456_v56 = vunpack.c.h.s8.bf16 %v1144_v16  ;;  %v2463_v30 = vunpack.c.l.s8.bf16 %v1151_v12  ;;  %v1168_v16 = vld [vmem:[#allocation7 + $0x9b0] sm:$0xff] }
 0x7a0   :  { %6066 = vmatprep.subr.bf16.mxu1 %v2417_v7  ;;  %v2465_v7 = vunpack.c.l.s8.bf16 %v1153_v43 }
 0x7a2   :  { %5411 = vmatpush1.bf16.msra.mxu0 %v2414_v5  ;;  %v2462_v5 = vunpack.c.l.s8.bf16 %v1150_v6 }
 0x7a3   :  { %6067 = vmatpush1.bf16.msra.mxu1 %v2416_v24  ;;  %5412 = vmatprep.subr.bf16.mxu0 %v2423_v37  ;;  %v2464_v24 = vunpack.c.l.s8.bf16 %v1152_v23  ;;  %v2471_v37 = vunpack.c.h.s8.bf16 %v1151_v12  ;;  %v1175_v12 = vld [vmem:[#allocation7 + $0x9e8] sm:$0xff] }
 0x7a4   :  { %6068 = vmatprep.subr.bf16.mxu1 %v2425_v18  ;;  %v2473_v18 = vunpack.c.h.s8.bf16 %v1153_v43  ;;  %v1177_v43 = vld [vmem:[#allocation7 + $0x9f8] sm:$0xff] }
 0x7a6   :  { %5413 = vmatpush1.bf16.msra.mxu0 %v2422_v57  ;;  %v2470_v57 = vunpack.c.h.s8.bf16 %v1150_v6  ;;  %v1174_v6 = vld [vmem:[#allocation7 + $0x9e0] sm:$0xff] }
 0x7a7   :  { %6069 = vmatpush1.bf16.msra.mxu1 %v2424_v62  ;;  %5414 = vmatprep.subr.bf16.mxu0 %v2431_v17  ;;  %v2472_v62 = vunpack.c.h.s8.bf16 %v1152_v23  ;;  %v2479_v17 = vunpack.c.l.s8.bf16 %v1159_v63  ;;  %v1176_v23 = vld [vmem:[#allocation7 + $0x9f0] sm:$0xff] }
 0x7a8   :  { %6070 = vmatprep.subr.bf16.mxu1 %v2433_v11  ;;  %v2481_v11 = vunpack.c.l.s8.bf16 %v1161_v31 }
 0x7aa   :  { %5415 = vmatpush1.bf16.msra.mxu0 %v2430_v38  ;;  %v2478_v38 = vunpack.c.l.s8.bf16 %v1158_v10 }
 0x7ab   :  { %6071 = vmatpush1.bf16.msra.mxu1 %v2432_v60  ;;  %5416 = vmatprep.subr.bf16.mxu0 %v2439_v44  ;;  %v2480_v60 = vunpack.c.l.s8.bf16 %v1160_v58  ;;  %v2487_v44 = vunpack.c.h.s8.bf16 %v1159_v63  ;;  %v1183_v63 = vld [vmem:[#allocation7 + $0xa28] sm:$0xff] }
 0x7ac   :  { %6072 = vmatprep.subr.bf16.mxu1 %v2441_v29  ;;  %v2489_v29 = vunpack.c.h.s8.bf16 %v1161_v31  ;;  %v1185_v31 = vld [vmem:[#allocation7 + $0xa38] sm:$0xff] }
 0x7ae   :  { %5417 = vmatpush1.bf16.msra.mxu0 %v2438_v15  ;;  %v2486_v15 = vunpack.c.h.s8.bf16 %v1158_v10  ;;  %v1182_v10 = vld [vmem:[#allocation7 + $0xa20] sm:$0xff] }
 0x7af   :  { %6073 = vmatpush1.bf16.msra.mxu1 %v2440_v20  ;;  %5418 = vmatprep.subr.bf16.mxu0 %v2447_v28  ;;  %v2488_v20 = vunpack.c.h.s8.bf16 %v1160_v58  ;;  %v2495_v28 = vunpack.c.l.s8.bf16 %v1167_v35  ;;  %v1184_v58 = vld [vmem:[#allocation7 + $0xa30] sm:$0xff] }
 0x7b0   :  { %6074 = vmatprep.subr.bf16.mxu1 %v2449_v45  ;;  %v2497_v45 = vunpack.c.l.s8.bf16 %v1169_v2 }
 0x7b2   :  { %5419 = vmatpush1.bf16.msra.mxu0 %v2446_v21  ;;  %v2494_v21 = vunpack.c.l.s8.bf16 %v1166_v3 }
 0x7b3   :  { %6075 = vmatpush1.bf16.msra.mxu1 %v2448_v61  ;;  %5420 = vmatprep.subr.bf16.mxu0 %v2455_v22  ;;  %v2496_v61 = vunpack.c.l.s8.bf16 %v1168_v16  ;;  %v2503_v22 = vunpack.c.h.s8.bf16 %v1167_v35  ;;  %v2537_v35 = vunpack.c.h.s8.bf16 %v1185_v31 }
 0x7b4   :  { %6076 = vmatprep.subr.bf16.mxu1 %v2457_v33  ;;  %v2505_v33 = vunpack.c.h.s8.bf16 %v1169_v2  ;;  %v1193_v2 = vld [vmem:[#allocation7 + $0xa78] sm:$0xff] }
 0x7b6   :  { %5421 = vmatpush1.bf16.msra.mxu0 %v2454_v34  ;;  %v2502_v34 = vunpack.c.h.s8.bf16 %v1166_v3  ;;  %v1190_v3 = vld [vmem:[#allocation7 + $0xa60] sm:$0xff] }
 0x7b7   :  { %6077 = vmatpush1.bf16.msra.mxu1 %v2456_v56  ;;  %5422 = vmatprep.subr.bf16.mxu0 %v2463_v30  ;;  %v2504_v56 = vunpack.c.h.s8.bf16 %v1168_v16  ;;  %v2511_v30 = vunpack.c.l.s8.bf16 %v1175_v12  ;;  %v1192_v16 = vld [vmem:[#allocation7 + $0xa70] sm:$0xff] }
 0x7b8   :  { %6078 = vmatprep.subr.bf16.mxu1 %v2465_v7  ;;  %v2513_v7 = vunpack.c.l.s8.bf16 %v1177_v43 }
 0x7ba   :  { %5423 = vmatpush1.bf16.msra.mxu0 %v2462_v5  ;;  %v2510_v5 = vunpack.c.l.s8.bf16 %v1174_v6 }
 0x7bb   :  { %6079 = vmatpush1.bf16.msra.mxu1 %v2464_v24  ;;  %5424 = vmatprep.subr.bf16.mxu0 %v2471_v37  ;;  %v2512_v24 = vunpack.c.l.s8.bf16 %v1176_v23  ;;  %v2519_v37 = vunpack.c.h.s8.bf16 %v1175_v12  ;;  %v1201_v12 = vld [vmem:[#allocation7 + $0xab8] sm:$0xff] }
 0x7bc   :  { %6080 = vmatprep.subr.bf16.mxu1 %v2473_v18  ;;  %v2521_v18 = vunpack.c.h.s8.bf16 %v1177_v43  ;;  %v2550_v43 = vunpack.c.h.s8.bf16 %v1190_v3 }
 0x7be   :  { %5425 = vmatpush1.bf16.msra.mxu0 %v2470_v57  ;;  %v2518_v57 = vunpack.c.h.s8.bf16 %v1174_v6  ;;  %v1200_v6 = vld [vmem:[#allocation7 + $0xab0] sm:$0xff] }
 0x7bf   :  { %6081 = vmatpush1.bf16.msra.mxu1 %v2472_v62  ;;  %5426 = vmatprep.subr.bf16.mxu0 %v2479_v17  ;;  %v2520_v62 = vunpack.c.h.s8.bf16 %v1176_v23  ;;  %v2527_v17 = vunpack.c.l.s8.bf16 %v1183_v63  ;;  %v2560_v23 = vunpack.c.l.s8.bf16 %v1200_v6 }
 0x7c0   :  { %6082 = vmatprep.subr.bf16.mxu1 %v2481_v11  ;;  %v2529_v11 = vunpack.c.l.s8.bf16 %v1185_v31  ;;  %v2568_v31 = vunpack.c.h.s8.bf16 %v1200_v6 }
 0x7c2   :  { %5427 = vmatpush1.bf16.msra.mxu0 %v2478_v38  ;;  %v2526_v38 = vunpack.c.l.s8.bf16 %v1182_v10 }
 0x7c3   :  { %6083 = vmatpush1.bf16.msra.mxu1 %v2480_v60  ;;  %5428 = vmatprep.subr.bf16.mxu0 %v2487_v44  ;;  %v2528_v60 = vunpack.c.l.s8.bf16 %v1184_v58  ;;  %v2535_v44 = vunpack.c.h.s8.bf16 %v1183_v63 }
 0x7c4   :  { %6084 = vmatprep.subr.bf16.mxu1 %v2489_v29  ;;  %v1191_v29 = vld [vmem:[#allocation7 + $0xa68] sm:$0xff] }
 0x7c6   :  { %5429 = vmatpush1.bf16.msra.mxu0 %v2486_v15  ;;  %v2534_v15 = vunpack.c.h.s8.bf16 %v1182_v10  ;;  %v1208_v10 = vld [vmem:[#allocation7 + $0xaf0] sm:$0xff] }
 0x7c7   :  { %6085 = vmatpush1.bf16.msra.mxu1 %v2488_v20  ;;  %5430 = vmatprep.subr.bf16.mxu0 %v2495_v28  ;;  %v2536_v20 = vunpack.c.h.s8.bf16 %v1184_v58  ;;  %v2543_v28 = vunpack.c.l.s8.bf16 %v1191_v29  ;;  %v2576_v58 = vunpack.c.l.s8.bf16 %v1208_v10 }
 0x7c8   :  { %6086 = vmatprep.subr.bf16.mxu1 %v2497_v45  ;;  %v2545_v45 = vunpack.c.l.s8.bf16 %v1193_v2 }
 0x7ca   :  { %5431 = vmatpush1.bf16.msra.mxu0 %v2494_v21  ;;  %v2542_v21 = vunpack.c.l.s8.bf16 %v1190_v3  ;;  %v1216_v3 = vld [vmem:[#allocation7 + $0xb30] sm:$0xff] }
 0x7cb   :  { %6087 = vmatpush1.bf16.msra.mxu1 %v2496_v61  ;;  %5432 = vmatprep.subr.bf16.mxu0 %v2503_v22  ;;  %v2544_v61 = vunpack.c.l.s8.bf16 %v1192_v16  ;;  %v2553_v22 = vunpack.c.h.s8.bf16 %v1193_v2  ;;  %v2584_v2 = vunpack.c.h.s8.bf16 %v1208_v10 }
 0x7cc   :  { %6088 = vmatprep.subr.bf16.mxu1 %v2505_v33  ;;  %v1199_v33 = vld [vmem:[#allocation7 + $0xaa8] sm:$0xff] }
 0x7ce   :  { %5433 = vmatpush1.bf16.msra.mxu0 %v2502_v34  ;;  %v2552_v34 = vunpack.c.h.s8.bf16 %v1192_v16  ;;  %v2592_v16 = vunpack.c.l.s8.bf16 %v1216_v3 }
 0x7cf   :  { %6089 = vmatpush1.bf16.msra.mxu1 %v2504_v56  ;;  %5434 = vmatprep.subr.bf16.mxu0 %v2511_v30  ;;  %v1198_v56 = vld [vmem:[#allocation7 + $0xaa0] sm:$0xff]  ;;  %v2561_v30 = vunpack.c.l.s8.bf16 %v1201_v12 }
 0x7d0   :  { %6090 = vmatprep.subr.bf16.mxu1 %v2513_v7  ;;  %v2558_v7 = vunpack.c.l.s8.bf16 %v1198_v56  ;;  %v2566_v63 = vunpack.c.h.s8.bf16 %v1198_v56  ;;  %v1224_v56 = vld [vmem:[#allocation7 + $0xb70] sm:$0xff] }
 0x7d1   :  { %v2608_v6 = vunpack.c.l.s8.bf16 %v1224_v56 }
 0x7d2   :  { %5435 = vmatpush1.bf16.msra.mxu0 %v2510_v5  ;;  %v2567_v5 = vunpack.c.h.s8.bf16 %v1199_v33 }
 0x7d3   :  { %6091 = vmatpush1.bf16.msra.mxu1 %v2512_v24  ;;  %5436 = vmatprep.subr.bf16.mxu0 %v2519_v37  ;;  %v2569_v24 = vunpack.c.h.s8.bf16 %v1201_v12  ;;  %v1207_v37 = vld [vmem:[#allocation7 + $0xae8] sm:$0xff]  ;;  %v2600_v12 = vunpack.c.h.s8.bf16 %v1216_v3 }
 0x7d4   :  { %6092 = vmatprep.subr.bf16.mxu1 %v2521_v18  ;;  %v1209_v18 = vld [vmem:[#allocation7 + $0xaf8] sm:$0xff] }
 0x7d6   :  { %5437 = vmatpush1.bf16.msra.mxu0 %v2518_v57  ;;  %v2575_v57 = vunpack.c.l.s8.bf16 %v1207_v37 }
 0x7d7   :  { %6093 = vmatpush1.bf16.msra.mxu1 %v2520_v62  ;;  %5447 = vmatprep.subr.bf16.mxu0 %v2527_v17  ;;  %v1206_v62 = vld [vmem:[#allocation7 + $0xae0] sm:$0xff]  ;;  %v2577_v17 = vunpack.c.l.s8.bf16 %v1209_v18 }
 0x7d8   :  { %6103 = vmatprep.subr.bf16.mxu1 %v2529_v11  ;;  %v2574_v11 = vunpack.c.l.s8.bf16 %v1206_v62 }
 0x7d9   :  { %5439 = vmatmul.mubr.bf16.vlgmr.msra.gmra.mrb[4].mxu0 %v8379_v19 }
 0x7da   :  { %6095 = vmatmul.mubr.bf16.vlgmr.msra.gmra.mrb[4].mxu1 %v8379_v19  ;;  %5448 = vmatpush1.bf16.msra.mxu0 %v2526_v38  ;;  %v2551_v19 = vunpack.c.h.s8.bf16 %v1191_v29  ;;  %v2583_v38 = vunpack.c.h.s8.bf16 %v1207_v37  ;;  %v1217_v29 = vld [vmem:[#allocation7 + $0xb38] sm:$0xff] }
 0x7db   :  { %5479 = vmatprep.mubr.bf16.mxu0 %v8382_v47  ;;  %6104 = vmatpush1.bf16.msra.mxu1 %v2528_v60  ;;  %v2585_v60 = vunpack.c.h.s8.bf16 %v1209_v18  ;;  %v2616_v18 = vunpack.c.h.s8.bf16 %v1224_v56 }
 0x7dc   :  { %6135 = vmatprep.mubr.bf16.mxu1 %v8382_v47  ;;  %5449 = vmatprep.subr.bf16.mxu0 %v2535_v44  ;;  %v2559_v47 = vunpack.c.l.s8.bf16 %v1199_v33  ;;  %v1215_v44 = vld [vmem:[#allocation7 + $0xb28] sm:$0xff] }
 0x7dd   :  { %6105 = vmatprep.subr.bf16.mxu1 %v2537_v35  ;;  %v2582_v35 = vunpack.c.h.s8.bf16 %v1206_v62  ;;  %v1232_v62 = vld [vmem:[#allocation7 + $0xbb0] sm:$0xff] }
 0x7de   :  { %5450 = vmatpush1.bf16.msra.mxu0 %v2534_v15  ;;  %v2591_v15 = vunpack.c.l.s8.bf16 %v1215_v44  ;;  %v2624_v10 = vunpack.c.l.s8.bf16 %v1232_v62 }
 0x7df   :  { %6106 = vmatpush1.bf16.msra.mxu1 %v2536_v20  ;;  %5451 = vmatprep.subr.bf16.mxu0 %v2543_v28  ;;  %v1214_v20 = vld [vmem:[#allocation7 + $0xb20] sm:$0xff]  ;;  %v2593_v28 = vunpack.c.l.s8.bf16 %v1217_v29 }
 0x7e0   :  { %6107 = vmatprep.subr.bf16.mxu1 %v2545_v45  ;;  %v2590_v45 = vunpack.c.l.s8.bf16 %v1214_v20  ;;  %v2598_v33 = vunpack.c.h.s8.bf16 %v1214_v20  ;;  %v1240_v20 = vld [vmem:[#allocation7 + $0xbf0] sm:$0xff] }
 0x7e1   :  { %v2640_v3 = vunpack.c.l.s8.bf16 %v1240_v20 }
 0x7e2   :  { %5452 = vmatpush1.bf16.msra.mxu0 %v2542_v21  ;;  %v2599_v21 = vunpack.c.h.s8.bf16 %v1215_v44 }
 0x7e3   :  { %6108 = vmatpush1.bf16.msra.mxu1 %v2544_v61  ;;  %5453 = vmatprep.subr.bf16.mxu0 %v2551_v19  ;;  %v2601_v61 = vunpack.c.h.s8.bf16 %v1217_v29  ;;  %v1223_v19 = vld [vmem:[#allocation7 + $0xb68] sm:$0xff]  ;;  %v2632_v29 = vunpack.c.h.s8.bf16 %v1232_v62 }
 0x7e4   :  { %6109 = vmatprep.subr.bf16.mxu1 %v2553_v22  ;;  %v1225_v22 = vld [vmem:[#allocation7 + $0xb78] sm:$0xff] }
 0x7e6   :  { %5454 = vmatpush1.bf16.msra.mxu0 %v2550_v43  ;;  %v2607_v43 = vunpack.c.l.s8.bf16 %v1223_v19 }
 0x7e7   :  { %6110 = vmatpush1.bf16.msra.mxu1 %v2552_v34  ;;  %5455 = vmatprep.subr.bf16.mxu0 %v2559_v47  ;;  %v1222_v34 = vld [vmem:[#allocation7 + $0xb60] sm:$0xff]  ;;  %v2609_v47 = vunpack.c.l.s8.bf16 %v1225_v22 }
 0x7e8   :  { %6111 = vmatprep.subr.bf16.mxu1 %v2561_v30  ;;  %v2606_v30 = vunpack.c.l.s8.bf16 %v1222_v34  ;;  %v2614_v37 = vunpack.c.h.s8.bf16 %v1222_v34  ;;  %v1248_v34 = vld [vmem:[#allocation7 + $0xc30] sm:$0xff] }
 0x7e9   :  { %v2656_v56 = vunpack.c.l.s8.bf16 %v1248_v34 }
 0x7ea   :  { %5456 = vmatpush1.bf16.msra.mxu0 %v2558_v7  ;;  %v2615_v7 = vunpack.c.h.s8.bf16 %v1223_v19 }
 0x7eb   :  { %6112 = vmatpush1.bf16.msra.mxu1 %v2560_v23  ;;  %5457 = vmatprep.subr.bf16.mxu0 %v2567_v5  ;;  %v2617_v23 = vunpack.c.h.s8.bf16 %v1225_v22  ;;  %v1231_v5 = vld [vmem:[#allocation7 + $0xba8] sm:$0xff]  ;;  %v2648_v22 = vunpack.c.h.s8.bf16 %v1240_v20 }
 0x7ec   :  { %6113 = vmatprep.subr.bf16.mxu1 %v2569_v24  ;;  %v1233_v24 = vld [vmem:[#allocation7 + $0xbb8] sm:$0xff] }
 0x7ee   :  { %5458 = vmatpush1.bf16.msra.mxu0 %v2566_v63  ;;  %v2623_v63 = vunpack.c.l.s8.bf16 %v1231_v5 }
 0x7ef   :  { %6114 = vmatpush1.bf16.msra.mxu1 %v2568_v31  ;;  %5459 = vmatprep.subr.bf16.mxu0 %v2575_v57  ;;  %v1230_v31 = vld [vmem:[#allocation7 + $0xba0] sm:$0xff]  ;;  %v2625_v57 = vunpack.c.l.s8.bf16 %v1233_v24 }
 0x7f0   :  { %6115 = vmatprep.subr.bf16.mxu1 %v2577_v17  ;;  %v2622_v17 = vunpack.c.l.s8.bf16 %v1230_v31  ;;  %v2630_v44 = vunpack.c.h.s8.bf16 %v1230_v31  ;;  %v1256_v31 = vld [vmem:[#allocation7 + $0xc70] sm:$0xff] }
 0x7f1   :  { %v2672_v62 = vunpack.c.l.s8.bf16 %v1256_v31 }
 0x7f2   :  { %5460 = vmatpush1.bf16.msra.mxu0 %v2574_v11  ;;  %v2631_v11 = vunpack.c.h.s8.bf16 %v1231_v5 }
 0x7f3   :  { %6116 = vmatpush1.bf16.msra.mxu1 %v2576_v58  ;;  %5461 = vmatprep.subr.bf16.mxu0 %v2583_v38  ;;  %v2633_v58 = vunpack.c.h.s8.bf16 %v1233_v24  ;;  %v1239_v38 = vld [vmem:[#allocation7 + $0xbe8] sm:$0xff]  ;;  %v2664_v24 = vunpack.c.h.s8.bf16 %v1248_v34 }
 0x7f4   :  { %6117 = vmatprep.subr.bf16.mxu1 %v2585_v60  ;;  %v1241_v60 = vld [vmem:[#allocation7 + $0xbf8] sm:$0xff] }
 0x7f6   :  { %5462 = vmatpush1.bf16.msra.mxu0 %v2582_v35  ;;  %v2639_v35 = vunpack.c.l.s8.bf16 %v1239_v38 }
 0x7f7   :  { %6118 = vmatpush1.bf16.msra.mxu1 %v2584_v2  ;;  %5463 = vmatprep.subr.bf16.mxu0 %v2591_v15  ;;  %v1238_v2 = vld [vmem:[#allocation7 + $0xbe0] sm:$0xff]  ;;  %v2641_v15 = vunpack.c.l.s8.bf16 %v1241_v60 }
 0x7f8   :  { %6119 = vmatprep.subr.bf16.mxu1 %v2593_v28  ;;  %v2638_v28 = vunpack.c.l.s8.bf16 %v1238_v2  ;;  %v2646_v19 = vunpack.c.h.s8.bf16 %v1238_v2 }
 0x7fa   :  { %5464 = vmatpush1.bf16.msra.mxu0 %v2590_v45  ;;  %v2647_v45 = vunpack.c.h.s8.bf16 %v1239_v38  ;;  %v2680_v38 = vunpack.c.h.s8.bf16 %v1256_v31 }
 0x7fb   :  { %6120 = vmatpush1.bf16.msra.mxu1 %v2592_v16  ;;  %5465 = vmatprep.subr.bf16.mxu0 %v2599_v21  ;;  %v2649_v16 = vunpack.c.h.s8.bf16 %v1241_v60  ;;  %v1247_v21 = vld [vmem:[#allocation7 + $0xc28] sm:$0xff]  ;;  %v1262_v60 = vld [vmem:[#allocation7 + $0xca0] sm:$0xff] }
 0x7fc   :  { %6121 = vmatprep.subr.bf16.mxu1 %v2601_v61  ;;  %v1249_v61 = vld [vmem:[#allocation7 + $0xc38] sm:$0xff] }
 0x7fe   :  { %5466 = vmatpush1.bf16.msra.mxu0 %v2598_v33  ;;  %v2655_v33 = vunpack.c.l.s8.bf16 %v1247_v21 }
 0x7ff   :  { %6122 = vmatpush1.bf16.msra.mxu1 %v2600_v12  ;;  %5467 = vmatprep.subr.bf16.mxu0 %v2607_v43  ;;  %v1246_v12 = vld [vmem:[#allocation7 + $0xc20] sm:$0xff]  ;;  %v2657_v43 = vunpack.c.l.s8.bf16 %v1249_v61 }
 0x800   :  { %6123 = vmatprep.subr.bf16.mxu1 %v2609_v47  ;;  %v2654_v47 = vunpack.c.l.s8.bf16 %v1246_v12  ;;  %v2662_v5 = vunpack.c.h.s8.bf16 %v1246_v12 }
 0x802   :  { %5468 = vmatpush1.bf16.msra.mxu0 %v2606_v30  ;;  %v2663_v30 = vunpack.c.h.s8.bf16 %v1247_v21 }
 0x803   :  { %6124 = vmatpush1.bf16.msra.mxu1 %v2608_v6  ;;  %5469 = vmatprep.subr.bf16.mxu0 %v2615_v7  ;;  %v1255_v6 = vld [vmem:[#allocation7 + $0xc68] sm:$0xff]  ;;  %v2665_v7 = vunpack.c.h.s8.bf16 %v1249_v61  ;;  %v1270_v61 = vld [vmem:[#allocation7 + $0xce0] sm:$0xff] }
 0x804   :  { %6125 = vmatprep.subr.bf16.mxu1 %v2617_v23  ;;  %v1257_v23 = vld [vmem:[#allocation7 + $0xc78] sm:$0xff] }
 0x806   :  { %5470 = vmatpush1.bf16.msra.mxu0 %v2614_v37  ;;  %v2671_v37 = vunpack.c.l.s8.bf16 %v1255_v6 }
 0x807   :  { %6126 = vmatpush1.bf16.msra.mxu1 %v2616_v18  ;;  %5471 = vmatprep.subr.bf16.mxu0 %v2623_v63  ;;  %v1254_v18 = vld [vmem:[#allocation7 + $0xc60] sm:$0xff]  ;;  %v2673_v63 = vunpack.c.l.s8.bf16 %v1257_v23 }
 0x808   :  { %6127 = vmatprep.subr.bf16.mxu1 %v2625_v57  ;;  %v2670_v57 = vunpack.c.l.s8.bf16 %v1254_v18 }
 0x80a   :  { %5472 = vmatpush1.bf16.msra.mxu0 %v2622_v17  ;;  %v2681_v17 = vunpack.c.h.s8.bf16 %v1257_v23  ;;  %v1278_v23 = vld [vmem:[#allocation7 + $0xd20] sm:$0xff] }
 0x80b   :  { %6128 = vmatpush1.bf16.msra.mxu1 %v2624_v10  ;;  %5473 = vmatprep.subr.bf16.mxu0 %v2631_v11  ;;  %v1263_v10 = vld [vmem:[#allocation7 + $0xca8] sm:$0xff]  ;;  %v1265_v11 = vld [vmem:[#allocation7 + $0xcb8] sm:$0xff] }
 0x80c   :  { %6129 = vmatprep.subr.bf16.mxu1 %v2633_v58  ;;  %v2678_v58 = vunpack.c.h.s8.bf16 %v1254_v18  ;;  %v2697_v20 = vunpack.c.h.s8.bf16 %v1265_v11 }
 0x80e   :  { %5474 = vmatpush1.bf16.msra.mxu0 %v2630_v44  ;;  %v2689_v44 = vunpack.c.l.s8.bf16 %v1265_v11  ;;  %v1286_v11 = vld [vmem:[#allocation7 + $0xd60] sm:$0xff] }
 0x80f   :  { %6130 = vmatpush1.bf16.msra.mxu1 %v2632_v29  ;;  %5475 = vmatprep.subr.bf16.mxu0 %v2639_v35  ;;  %v1264_v29 = vld [vmem:[#allocation7 + $0xcb0] sm:$0xff]  ;;  %v2686_v35 = vunpack.c.l.s8.bf16 %v1262_v60 }
 0x810   :  { %6131 = vmatprep.subr.bf16.mxu1 %v2641_v15  ;;  %v2688_v2 = vunpack.c.l.s8.bf16 %v1264_v29  ;;  %v2695_v15 = vunpack.c.h.s8.bf16 %v1263_v10 }
 0x812   :  { %5476 = vmatpush1.bf16.msra.mxu0 %v2638_v28  ;;  %v1271_v28 = vld [vmem:[#allocation7 + $0xce8] sm:$0xff] }
 0x813   :  { %6132 = vmatpush1.bf16.msra.mxu1 %v2640_v3  ;;  %5477 = vmatprep.subr.bf16.mxu0 %v2647_v45  ;;  %v1273_v3 = vld [vmem:[#allocation7 + $0xcf8] sm:$0xff]  ;;  %v2694_v45 = vunpack.c.h.s8.bf16 %v1262_v60  ;;  %v2703_v21 = vunpack.c.l.s8.bf16 %v1271_v28 }
 0x814   :  { %6133 = vmatprep.subr.bf16.mxu1 %v2649_v16  ;;  %v2696_v16 = vunpack.c.h.s8.bf16 %v1264_v29  ;;  %v2713_v34 = vunpack.c.h.s8.bf16 %v1273_v3 }
 0x816   :  { %5478 = vmatpush1.bf16.msra.mxu0 %v2646_v19  ;;  %v2705_v19 = vunpack.c.l.s8.bf16 %v1273_v3  ;;  %v1294_v3 = vld [vmem:[#allocation7 + $0xda0] sm:$0xff] }
 0x817   :  { %6134 = vmatpush1.bf16.msra.mxu1 %v2648_v22  ;;  %5488 = vmatprep.subr.bf16.mxu0 %v2655_v33  ;;  %v1272_v22 = vld [vmem:[#allocation7 + $0xcf0] sm:$0xff]  ;;  %v2702_v33 = vunpack.c.l.s8.bf16 %v1270_v61 }
 0x818   :  { %6144 = vmatprep.subr.bf16.mxu1 %v2657_v43  ;;  %v2704_v12 = vunpack.c.l.s8.bf16 %v1272_v22  ;;  %v2711_v43 = vunpack.c.h.s8.bf16 %v1271_v28 }
 0x819   :  { %5480 = vmatmul.mubr.bf16.vlgmr.msra.gmra.mrb[4].mxu0 %v8398_v50 }
 0x81a   :  { %6136 = vmatmul.mubr.bf16.vlgmr.msra.gmra.mrb[4].mxu1 %v8398_v50  ;;  %5489 = vmatpush1.bf16.msra.mxu0 %v2654_v47  ;;  %v2679_v50 = vunpack.c.h.s8.bf16 %v1255_v6  ;;  %v1279_v47 = vld [vmem:[#allocation7 + $0xd28] sm:$0xff]  ;;  %v2712_v6 = vunpack.c.h.s8.bf16 %v1272_v22 }
 0x81b   :  { %5520 = vmatprep.mubr.bf16.mxu0 %v8401_v54  ;;  %6145 = vmatpush1.bf16.msra.mxu1 %v2656_v56  ;;  %v1281_v56 = vld [vmem:[#allocation7 + $0xd38] sm:$0xff] }
 0x81c   :  { %6176 = vmatprep.mubr.bf16.mxu1 %v8401_v54  ;;  %5490 = vmatprep.subr.bf16.mxu0 %v2663_v30  ;;  %v2687_v54 = vunpack.c.l.s8.bf16 %v1263_v10  ;;  %v2710_v30 = vunpack.c.h.s8.bf16 %v1270_v61  ;;  %v2729_v31 = vunpack.c.h.s8.bf16 %v1281_v56 }
 0x81d   :  { %6146 = vmatprep.subr.bf16.mxu1 %v2665_v7  ;;  %v2719_v7 = vunpack.c.l.s8.bf16 %v1279_v47 }
 0x81e   :  { %5491 = vmatpush1.bf16.msra.mxu0 %v2662_v5  ;;  %v2721_v5 = vunpack.c.l.s8.bf16 %v1281_v56  ;;  %v1302_v56 = vld [vmem:[#allocation7 + $0xde0] sm:$0xff] }
 0x81f   :  { %6147 = vmatpush1.bf16.msra.mxu1 %v2664_v24  ;;  %5492 = vmatprep.subr.bf16.mxu0 %v2671_v37  ;;  %v1280_v24 = vld [vmem:[#allocation7 + $0xd30] sm:$0xff]  ;;  %v2718_v37 = vunpack.c.l.s8.bf16 %v1278_v23 }
 0x820   :  { %6148 = vmatprep.subr.bf16.mxu1 %v2673_v63  ;;  %v2720_v18 = vunpack.c.l.s8.bf16 %v1280_v24  ;;  %v2727_v63 = vunpack.c.h.s8.bf16 %v1279_v47 }
 0x822   :  { %5493 = vmatpush1.bf16.msra.mxu0 %v2670_v57  ;;  %v1287_v57 = vld [vmem:[#allocation7 + $0xd68] sm:$0xff] }
 0x823   :  { %6149 = vmatpush1.bf16.msra.mxu1 %v2672_v62  ;;  %5494 = vmatprep.subr.bf16.mxu0 %v2679_v50  ;;  %v1289_v62 = vld [vmem:[#allocation7 + $0xd78] sm:$0xff]  ;;  %v2726_v50 = vunpack.c.h.s8.bf16 %v1278_v23  ;;  %v2735_v10 = vunpack.c.l.s8.bf16 %v1287_v57 }
 0x824   :  { %6150 = vmatprep.subr.bf16.mxu1 %v2681_v17  ;;  %v2728_v17 = vunpack.c.h.s8.bf16 %v1280_v24  ;;  %v2745_v29 = vunpack.c.h.s8.bf16 %v1289_v62 }
 0x826   :  { %5495 = vmatpush1.bf16.msra.mxu0 %v2678_v58  ;;  %v2737_v58 = vunpack.c.l.s8.bf16 %v1289_v62  ;;  %v1310_v62 = vld [vmem:[#allocation7 + $0xe20] sm:$0xff] }
 0x827   :  { %6151 = vmatpush1.bf16.msra.mxu1 %v2680_v38  ;;  %5496 = vmatprep.subr.bf16.mxu0 %v2687_v54  ;;  %v1288_v38 = vld [vmem:[#allocation7 + $0xd70] sm:$0xff]  ;;  %v2734_v54 = vunpack.c.l.s8.bf16 %v1286_v11 }
 0x828   :  { %6152 = vmatprep.subr.bf16.mxu1 %v2689_v44  ;;  %v2736_v60 = vunpack.c.l.s8.bf16 %v1288_v38  ;;  %v2743_v44 = vunpack.c.h.s8.bf16 %v1287_v57 }
 0x82a   :  { %5497 = vmatpush1.bf16.msra.mxu0 %v2686_v35  ;;  %v1295_v35 = vld [vmem:[#allocation7 + $0xda8] sm:$0xff] }
 0x82b   :  { %6153 = vmatpush1.bf16.msra.mxu1 %v2688_v2  ;;  %5498 = vmatprep.subr.bf16.mxu0 %v2695_v15  ;;  %v1297_v2 = vld [vmem:[#allocation7 + $0xdb8] sm:$0xff]  ;;  %v2742_v15 = vunpack.c.h.s8.bf16 %v1286_v11  ;;  %v2751_v28 = vunpack.c.l.s8.bf16 %v1295_v35 }
 0x82c   :  { %6154 = vmatprep.subr.bf16.mxu1 %v2697_v20  ;;  %v2744_v20 = vunpack.c.h.s8.bf16 %v1288_v38  ;;  %v2761_v22 = vunpack.c.h.s8.bf16 %v1297_v2  ;;  %v1319_v38 = vld [vmem:[#allocation7 + $0xe68] sm:$0xff] }
 0x82e   :  { %5499 = vmatpush1.bf16.msra.mxu0 %v2694_v45  ;;  %v2753_v45 = vunpack.c.l.s8.bf16 %v1297_v2  ;;  %v1318_v2 = vld [vmem:[#allocation7 + $0xe60] sm:$0xff] }
 0x82f   :  { %6155 = vmatpush1.bf16.msra.mxu1 %v2696_v16  ;;  %5500 = vmatprep.subr.bf16.mxu0 %v2703_v21  ;;  %v1296_v16 = vld [vmem:[#allocation7 + $0xdb0] sm:$0xff]  ;;  %v2750_v21 = vunpack.c.l.s8.bf16 %v1294_v3 }
 0x830   :  { %6156 = vmatprep.subr.bf16.mxu1 %v2705_v19  ;;  %v2752_v61 = vunpack.c.l.s8.bf16 %v1296_v16  ;;  %v2759_v19 = vunpack.c.h.s8.bf16 %v1295_v35  ;;  %v2799_v35 = vunpack.c.l.s8.bf16 %v1319_v38 }
 0x832   :  { %5501 = vmatpush1.bf16.msra.mxu0 %v2702_v33  ;;  %v1303_v33 = vld [vmem:[#allocation7 + $0xde8] sm:$0xff] }
 0x833   :  { %6157 = vmatpush1.bf16.msra.mxu1 %v2704_v12  ;;  %5502 = vmatprep.subr.bf16.mxu0 %v2711_v43  ;;  %v1305_v12 = vld [vmem:[#allocation7 + $0xdf8] sm:$0xff]  ;;  %v2758_v43 = vunpack.c.h.s8.bf16 %v1294_v3  ;;  %v2767_v47 = vunpack.c.l.s8.bf16 %v1303_v33 }
 0x834   :  { %6158 = vmatprep.subr.bf16.mxu1 %v2713_v34  ;;  %v2760_v34 = vunpack.c.h.s8.bf16 %v1296_v16  ;;  %v2777_v24 = vunpack.c.h.s8.bf16 %v1305_v12  ;;  %v1327_v16 = vld [vmem:[#allocation7 + $0xea8] sm:$0xff] }
 0x836   :  { %5503 = vmatpush1.bf16.msra.mxu0 %v2710_v30  ;;  %v2769_v30 = vunpack.c.l.s8.bf16 %v1305_v12  ;;  %v1328_v12 = vld [vmem:[#allocation7 + $0xeb0] sm:$0xff] }
 0x837   :  { %6159 = vmatpush1.bf16.msra.mxu1 %v2712_v6  ;;  %5504 = vmatprep.subr.bf16.mxu0 %v2719_v7  ;;  %v1304_v6 = vld [vmem:[#allocation7 + $0xdf0] sm:$0xff]  ;;  %v2766_v7 = vunpack.c.l.s8.bf16 %v1302_v56 }
 0x838   :  { %6160 = vmatprep.subr.bf16.mxu1 %v2721_v5  ;;  %v2768_v23 = vunpack.c.l.s8.bf16 %v1304_v6  ;;  %v2775_v5 = vunpack.c.h.s8.bf16 %v1303_v33 }
 0x83a   :  { %5505 = vmatpush1.bf16.msra.mxu0 %v2718_v37  ;;  %v1311_v37 = vld [vmem:[#allocation7 + $0xe28] sm:$0xff] }
 0x83b   :  { %6161 = vmatpush1.bf16.msra.mxu1 %v2720_v18  ;;  %5506 = vmatprep.subr.bf16.mxu0 %v2727_v63  ;;  %v1313_v18 = vld [vmem:[#allocation7 + $0xe38] sm:$0xff]  ;;  %v2774_v63 = vunpack.c.h.s8.bf16 %v1302_v56  ;;  %v2783_v57 = vunpack.c.l.s8.bf16 %v1311_v37 }
 0x83c   :  { %6162 = vmatprep.subr.bf16.mxu1 %v2729_v31  ;;  %v2776_v31 = vunpack.c.h.s8.bf16 %v1304_v6  ;;  %v1337_v6 = vld [vmem:[#allocation7 + $0xef8] sm:$0xff] }
 0x83e   :  { %5507 = vmatpush1.bf16.msra.mxu0 %v2726_v50  ;;  %v2785_v50 = vunpack.c.l.s8.bf16 %v1313_v18 }
 0x83f   :  { %6163 = vmatpush1.bf16.msra.mxu1 %v2728_v17  ;;  %5508 = vmatprep.subr.bf16.mxu0 %v2735_v10  ;;  %v1312_v17 = vld [vmem:[#allocation7 + $0xe30] sm:$0xff]  ;;  %v2782_v10 = vunpack.c.l.s8.bf16 %v1310_v62 }
 0x840   :  { %6164 = vmatprep.subr.bf16.mxu1 %v2737_v58  ;;  %v2784_v11 = vunpack.c.l.s8.bf16 %v1312_v17  ;;  %v2791_v58 = vunpack.c.h.s8.bf16 %v1311_v37  ;;  %v2833_v37 = vunpack.c.l.s8.bf16 %v1337_v6 }
 0x842   :  { %5509 = vmatpush1.bf16.msra.mxu0 %v2734_v54  ;;  %v2793_v54 = vunpack.c.h.s8.bf16 %v1313_v18  ;;  %v1336_v18 = vld [vmem:[#allocation7 + $0xef0] sm:$0xff] }
 0x843   :  { %6165 = vmatpush1.bf16.msra.mxu1 %v2736_v60  ;;  %5510 = vmatprep.subr.bf16.mxu0 %v2743_v44  ;;  %v1321_v60 = vld [vmem:[#allocation7 + $0xe78] sm:$0xff]  ;;  %v2790_v44 = vunpack.c.h.s8.bf16 %v1310_v62  ;;  %v2841_v62 = vunpack.c.h.s8.bf16 %v1337_v6  ;;  %v1360_v6 = vld [vmem:[#allocation7 + $0xfb0] sm:$0xff] }
 0x844   :  { %6166 = vmatprep.subr.bf16.mxu1 %v2745_v29  ;;  %v2792_v29 = vunpack.c.h.s8.bf16 %v1312_v17  ;;  %v1345_v17 = vld [vmem:[#allocation7 + $0xf38] sm:$0xff] }
 0x846   :  { %5511 = vmatpush1.bf16.msra.mxu0 %v2742_v15  ;;  %v2801_v15 = vunpack.c.l.s8.bf16 %v1321_v60 }
 0x847   :  { %6167 = vmatpush1.bf16.msra.mxu1 %v2744_v20  ;;  %5512 = vmatprep.subr.bf16.mxu0 %v2751_v28  ;;  %v1320_v20 = vld [vmem:[#allocation7 + $0xe70] sm:$0xff]  ;;  %v2798_v28 = vunpack.c.l.s8.bf16 %v1318_v2 }
 0x848   :  { %6168 = vmatprep.subr.bf16.mxu1 %v2753_v45  ;;  %v2800_v3 = vunpack.c.l.s8.bf16 %v1320_v20  ;;  %v2809_v45 = vunpack.c.h.s8.bf16 %v1321_v60  ;;  %v1344_v60 = vld [vmem:[#allocation7 + $0xf30] sm:$0xff] }
 0x84a   :  { %5513 = vmatpush1.bf16.msra.mxu0 %v2750_v21  ;;  %v1329_v21 = vld [vmem:[#allocation7 + $0xeb8] sm:$0xff] }
 0x84b   :  { %6169 = vmatpush1.bf16.msra.mxu1 %v2752_v61  ;;  %5514 = vmatprep.subr.bf16.mxu0 %v2759_v19  ;;  %v2806_v61 = vunpack.c.h.s8.bf16 %v1318_v2  ;;  %v2808_v19 = vunpack.c.h.s8.bf16 %v1320_v20  ;;  %v2817_v33 = vunpack.c.l.s8.bf16 %v1329_v21  ;;  %v2825_v56 = vunpack.c.h.s8.bf16 %v1329_v21  ;;  %v1353_v20 = vld [vmem:[#allocation7 + $0xf78] sm:$0xff]  ;;  %v1352_v21 = vld [vmem:[#allocation7 + $0xf70] sm:$0xff] }
 0x84c   :  { %6170 = vmatprep.subr.bf16.mxu1 %v2761_v22  ;;  %v1326_v22 = vld [vmem:[#allocation7 + $0xea0] sm:$0xff]  ;;  %v2857_v2 = vunpack.c.h.s8.bf16 %v1345_v17 }
 0x84e   :  { %5515 = vmatpush1.bf16.msra.mxu0 %v2758_v43  ;;  %v2814_v43 = vunpack.c.l.s8.bf16 %v1326_v22 }
 0x84f   :  { %6171 = vmatpush1.bf16.msra.mxu1 %v2760_v34  ;;  %5516 = vmatprep.subr.bf16.mxu0 %v2767_v47  ;;  %v2816_v34 = vunpack.c.l.s8.bf16 %v1328_v12  ;;  %v2823_v47 = vunpack.c.h.s8.bf16 %v1327_v16 }
 0x850   :  { %6172 = vmatprep.subr.bf16.mxu1 %v2769_v30  ;;  %v1335_v30 = vld [vmem:[#allocation7 + $0xee8] sm:$0xff] }
 0x852   :  { %5517 = vmatpush1.bf16.msra.mxu0 %v2766_v7  ;;  %v2822_v7 = vunpack.c.h.s8.bf16 %v1326_v22  ;;  %v2873_v22 = vunpack.c.h.s8.bf16 %v1353_v20 }
 0x853   :  { %6173 = vmatpush1.bf16.msra.mxu1 %v2768_v23  ;;  %5518 = vmatprep.subr.bf16.mxu0 %v2775_v5  ;;  %v2824_v23 = vunpack.c.h.s8.bf16 %v1328_v12  ;;  %v2831_v5 = vunpack.c.l.s8.bf16 %v1335_v30  ;;  %v1361_v12 = vld [vmem:[#allocation7 + $0xfb8] sm:$0xff] }
 0x854   :  { %6174 = vmatprep.subr.bf16.mxu1 %v2777_v24  ;;  %v1334_v24 = vld [vmem:[#allocation7 + $0xee0] sm:$0xff] }
 0x856   :  { %5519 = vmatpush1.bf16.msra.mxu0 %v2774_v63  ;;  %v2830_v63 = vunpack.c.l.s8.bf16 %v1334_v24 }
 0x857   :  { %6175 = vmatpush1.bf16.msra.mxu1 %v2776_v31  ;;  %5529 = vmatprep.subr.bf16.mxu0 %v2783_v57  ;;  %v2832_v31 = vunpack.c.l.s8.bf16 %v1336_v18  ;;  %v2839_v57 = vunpack.c.h.s8.bf16 %v1335_v30  ;;  %v2881_v30 = vunpack.c.l.s8.bf16 %v1361_v12 }
 0x858   :  { %6185 = vmatprep.subr.bf16.mxu1 %v2785_v50  ;;  %v1343_v50 = vld [vmem:[#allocation7 + $0xf28] sm:$0xff] }
 0x859   :  { %5521 = vmatmul.mubr.bf16.vlgmr.msra.gmra.mrb[4].mxu0 %v8415_v0 }
 0x85a   :  { %6177 = vmatmul.mubr.bf16.vlgmr.msra.gmra.mrb[4].mxu1 %v8415_v0  ;;  %5530 = vmatpush1.bf16.msra.mxu0 %v2782_v10  ;;  %v2807_v0 = vunpack.c.h.s8.bf16 %v1319_v38  ;;  %v2838_v10 = vunpack.c.h.s8.bf16 %v1334_v24  ;;  %v1342_v38 = vld [vmem:[#allocation7 + $0xf20] sm:$0xff]  ;;  %v2889_v24 = vunpack.c.h.s8.bf16 %v1361_v12  ;;  %v1384_v12 = vld [vmem:[#allocation7 + $0x1070] sm:$0xff] }
 0x85b   :  { %5561 = vmatprep.mubr.bf16.mxu0 %v8418_v13  ;;  %6186 = vmatpush1.bf16.msra.mxu1 %v2784_v11  ;;  %v2840_v11 = vunpack.c.h.s8.bf16 %v1336_v18  ;;  %v1369_v18 = vld [vmem:[#allocation7 + $0xff8] sm:$0xff] }
 0x85c   :  { %6217 = vmatprep.mubr.bf16.mxu1 %v8418_v13  ;;  %5531 = vmatprep.subr.bf16.mxu0 %v2791_v58  ;;  %v2815_v13 = vunpack.c.l.s8.bf16 %v1327_v16  ;;  %v2847_v58 = vunpack.c.l.s8.bf16 %v1343_v50  ;;  %v2865_v16 = vunpack.c.l.s8.bf16 %v1353_v20  ;;  %v1376_v20 = vld [vmem:[#allocation7 + $0x1030] sm:$0xff] }
 0x85d   :  { %6187 = vmatprep.subr.bf16.mxu1 %v2793_v54  ;;  %v2849_v54 = vunpack.c.l.s8.bf16 %v1345_v17  ;;  %v1368_v17 = vld [vmem:[#allocation7 + $0xff0] sm:$0xff] }
 0x85e   :  { %5532 = vmatpush1.bf16.msra.mxu0 %v2790_v44  ;;  %v2846_v44 = vunpack.c.l.s8.bf16 %v1342_v38 }
 0x85f   :  { %6188 = vmatpush1.bf16.msra.mxu1 %v2792_v29  ;;  %5533 = vmatprep.subr.bf16.mxu0 %v2799_v35  ;;  %v2848_v29 = vunpack.c.l.s8.bf16 %v1344_v60  ;;  %v2855_v35 = vunpack.c.h.s8.bf16 %v1343_v50  ;;  %v2897_v50 = vunpack.c.l.s8.bf16 %v1369_v18 }
 0x860   :  { %6189 = vmatprep.subr.bf16.mxu1 %v2801_v15  ;;  %v1351_v15 = vld [vmem:[#allocation7 + $0xf68] sm:$0xff] }
 0x862   :  { %5534 = vmatpush1.bf16.msra.mxu0 %v2798_v28  ;;  %v2854_v28 = vunpack.c.h.s8.bf16 %v1342_v38  ;;  %v2905_v38 = vunpack.c.h.s8.bf16 %v1369_v18 }
 0x863   :  { %6190 = vmatpush1.bf16.msra.mxu1 %v2800_v3  ;;  %5535 = vmatprep.subr.bf16.mxu0 %v2807_v0  ;;  %v2856_v3 = vunpack.c.h.s8.bf16 %v1344_v60  ;;  %v2863_v0 = vunpack.c.l.s8.bf16 %v1351_v15  ;;  %v1377_v60 = vld [vmem:[#allocation7 + $0x1038] sm:$0xff] }
 0x864   :  { %6191 = vmatprep.subr.bf16.mxu1 %v2809_v45  ;;  %v1350_v45 = vld [vmem:[#allocation7 + $0xf60] sm:$0xff] }
 0x866   :  { %5536 = vmatpush1.bf16.msra.mxu0 %v2806_v61  ;;  %v2862_v61 = vunpack.c.l.s8.bf16 %v1350_v45 }
 0x867   :  { %6192 = vmatpush1.bf16.msra.mxu1 %v2808_v19  ;;  %5537 = vmatprep.subr.bf16.mxu0 %v2815_v13  ;;  %v2864_v19 = vunpack.c.l.s8.bf16 %v1352_v21  ;;  %v2871_v13 = vunpack.c.h.s8.bf16 %v1351_v15  ;;  %v2913_v15 = vunpack.c.l.s8.bf16 %v1377_v60 }
 0x868   :  { %6193 = vmatprep.subr.bf16.mxu1 %v2817_v33  ;;  %v1359_v33 = vld [vmem:[#allocation7 + $0xfa8] sm:$0xff] }
 0x86a   :  { %5538 = vmatpush1.bf16.msra.mxu0 %v2814_v43  ;;  %v2870_v43 = vunpack.c.h.s8.bf16 %v1350_v45  ;;  %v1383_v45 = vld [vmem:[#allocation7 + $0x1068] sm:$0xff] }
 0x86b   :  { %6194 = vmatpush1.bf16.msra.mxu1 %v2816_v34  ;;  %5539 = vmatprep.subr.bf16.mxu0 %v2823_v47  ;;  %v2872_v34 = vunpack.c.h.s8.bf16 %v1352_v21  ;;  %v2879_v47 = vunpack.c.l.s8.bf16 %v1359_v33  ;;  %v1385_v21 = vld [vmem:[#allocation7 + $0x1078] sm:$0xff] }
 0x86c   :  { %6195 = vmatprep.subr.bf16.mxu1 %v2825_v56  ;;  %v1358_v56 = vld [vmem:[#allocation7 + $0xfa0] sm:$0xff] }
 0x86e   :  { %5540 = vmatpush1.bf16.msra.mxu0 %v2822_v7  ;;  %v2878_v7 = vunpack.c.l.s8.bf16 %v1358_v56 }
 0x86f   :  { %6196 = vmatpush1.bf16.msra.mxu1 %v2824_v23  ;;  %5541 = vmatprep.subr.bf16.mxu0 %v2831_v5  ;;  %v2880_v23 = vunpack.c.l.s8.bf16 %v1360_v6  ;;  %v2887_v5 = vunpack.c.h.s8.bf16 %v1359_v33  ;;  %v2929_v33 = vunpack.c.l.s8.bf16 %v1385_v21 }
 0x870   :  { %6197 = vmatprep.subr.bf16.mxu1 %v2833_v37  ;;  %v1367_v37 = vld [vmem:[#allocation7 + $0xfe8] sm:$0xff] }
 0x872   :  { %5542 = vmatpush1.bf16.msra.mxu0 %v2830_v63  ;;  %v2886_v63 = vunpack.c.h.s8.bf16 %v1358_v56  ;;  %v1391_v56 = vld [vmem:[#allocation7 + $0x10a8] sm:$0xff] }
 0x873   :  { %6198 = vmatpush1.bf16.msra.mxu1 %v2832_v31  ;;  %5543 = vmatprep.subr.bf16.mxu0 %v2839_v57  ;;  %v2888_v31 = vunpack.c.h.s8.bf16 %v1360_v6  ;;  %v2895_v57 = vunpack.c.l.s8.bf16 %v1367_v37 }
 0x874   :  { %6199 = vmatprep.subr.bf16.mxu1 %v2841_v62  ;;  %v1366_v62 = vld [vmem:[#allocation7 + $0xfe0] sm:$0xff] }
 0x876   :  { %5544 = vmatpush1.bf16.msra.mxu0 %v2838_v10  ;;  %v2894_v10 = vunpack.c.l.s8.bf16 %v1366_v62 }
 0x877   :  { %6200 = vmatpush1.bf16.msra.mxu1 %v2840_v11  ;;  %5545 = vmatprep.subr.bf16.mxu0 %v2847_v58  ;;  %v2896_v11 = vunpack.c.l.s8.bf16 %v1368_v17  ;;  %v2903_v58 = vunpack.c.h.s8.bf16 %v1367_v37 }
 0x878   :  { %6201 = vmatprep.subr.bf16.mxu1 %v2849_v54  ;;  %v1375_v54 = vld [vmem:[#allocation7 + $0x1028] sm:$0xff] }
 0x87a   :  { %5546 = vmatpush1.bf16.msra.mxu0 %v2846_v44  ;;  %v2902_v44 = vunpack.c.h.s8.bf16 %v1366_v62  ;;  %v1401_v62 = vld [vmem:[#allocation7 + $0x10f8] sm:$0xff] }
 0x87b   :  { %6202 = vmatpush1.bf16.msra.mxu1 %v2848_v29  ;;  %5547 = vmatprep.subr.bf16.mxu0 %v2855_v35  ;;  %v2904_v29 = vunpack.c.h.s8.bf16 %v1368_v17  ;;  %v2911_v35 = vunpack.c.l.s8.bf16 %v1375_v54 }
 0x87c   :  { %6203 = vmatprep.subr.bf16.mxu1 %v2857_v2  ;;  %v1374_v2 = vld [vmem:[#allocation7 + $0x1020] sm:$0xff] }
 0x87e   :  { %5548 = vmatpush1.bf16.msra.mxu0 %v2854_v28  ;;  %v2910_v28 = vunpack.c.l.s8.bf16 %v1374_v2 }
 0x87f   :  { %6204 = vmatpush1.bf16.msra.mxu1 %v2856_v3  ;;  %5549 = vmatprep.subr.bf16.mxu0 %v2863_v0  ;;  %v2912_v3 = vunpack.c.l.s8.bf16 %v1376_v20  ;;  %v2919_v0 = vunpack.c.h.s8.bf16 %v1375_v54 }
 0x880   :  { %6205 = vmatprep.subr.bf16.mxu1 %v2865_v16  ;;  %v2921_v16 = vunpack.c.h.s8.bf16 %v1377_v60 }
 0x882   :  { %5550 = vmatpush1.bf16.msra.mxu0 %v2862_v61  ;;  %v2918_v61 = vunpack.c.h.s8.bf16 %v1374_v2  ;;  %v1409_v2 = vld [vmem:[#allocation7 + $0x1138] sm:$0xff] }
 0x883   :  { %6206 = vmatpush1.bf16.msra.mxu1 %v2864_v19  ;;  %5551 = vmatprep.subr.bf16.mxu0 %v2871_v13  ;;  %v2920_v19 = vunpack.c.h.s8.bf16 %v1376_v20  ;;  %v2927_v13 = vunpack.c.l.s8.bf16 %v1383_v45 }
 0x884   :  { %6207 = vmatprep.subr.bf16.mxu1 %v2873_v22  ;;  %v1382_v22 = vld [vmem:[#allocation7 + $0x1060] sm:$0xff] }
 0x885   :  { %v2934_v6 = vunpack.c.h.s8.bf16 %v1382_v22 }
 0x886   :  { %5552 = vmatpush1.bf16.msra.mxu0 %v2870_v43  ;;  %v2926_v43 = vunpack.c.l.s8.bf16 %v1382_v22  ;;  %v1417_v22 = vld [vmem:[#allocation7 + $0x1178] sm:$0xff] }
 0x887   :  { %6208 = vmatpush1.bf16.msra.mxu1 %v2872_v34  ;;  %5553 = vmatprep.subr.bf16.mxu0 %v2879_v47  ;;  %v2928_v34 = vunpack.c.l.s8.bf16 %v1384_v12  ;;  %v2937_v47 = vunpack.c.h.s8.bf16 %v1385_v21 }
 0x888   :  { %6209 = vmatprep.subr.bf16.mxu1 %v2881_v30  ;;  %v1393_v30 = vld [vmem:[#allocation7 + $0x10b8] sm:$0xff] }
 0x88a   :  { %5554 = vmatpush1.bf16.msra.mxu0 %v2878_v7  ;;  %v2936_v7 = vunpack.c.h.s8.bf16 %v1384_v12 }
 0x88b   :  { %6210 = vmatpush1.bf16.msra.mxu1 %v2880_v23  ;;  %5555 = vmatprep.subr.bf16.mxu0 %v2887_v5  ;;  %v1390_v23 = vld [vmem:[#allocation7 + $0x10a0] sm:$0xff]  ;;  %v2945_v5 = vunpack.c.l.s8.bf16 %v1393_v30 }
 0x88c   :  { %6211 = vmatprep.subr.bf16.mxu1 %v2889_v24  ;;  %v1392_v24 = vld [vmem:[#allocation7 + $0x10b0] sm:$0xff]  ;;  %v2942_v37 = vunpack.c.l.s8.bf16 %v1390_v23 }
 0x88d   :  { %v2944_v18 = vunpack.c.l.s8.bf16 %v1392_v24  ;;  %v2952_v17 = vunpack.c.h.s8.bf16 %v1392_v24 }
 0x88e   :  { %5556 = vmatpush1.bf16.msra.mxu0 %v2886_v63  ;;  %v2951_v63 = vunpack.c.h.s8.bf16 %v1391_v56 }
 0x88f   :  { %6212 = vmatpush1.bf16.msra.mxu1 %v2888_v31  ;;  %5557 = vmatprep.subr.bf16.mxu0 %v2895_v57  ;;  %v2953_v31 = vunpack.c.h.s8.bf16 %v1393_v30  ;;  %v1399_v57 = vld [vmem:[#allocation7 + $0x10e8] sm:$0xff] }
 0x890   :  { %6213 = vmatprep.subr.bf16.mxu1 %v2897_v50  ;;  %v2950_v50 = vunpack.c.h.s8.bf16 %v1390_v23  ;;  %v1425_v23 = vld [vmem:[#allocation7 + $0x11b8] sm:$0xff] }
 0x892   :  { %5558 = vmatpush1.bf16.msra.mxu0 %v2894_v10  ;;  %v2959_v10 = vunpack.c.l.s8.bf16 %v1399_v57 }
 0x893   :  { %6214 = vmatpush1.bf16.msra.mxu1 %v2896_v11  ;;  %5559 = vmatprep.subr.bf16.mxu0 %v2903_v58  ;;  %v1398_v11 = vld [vmem:[#allocation7 + $0x10e0] sm:$0xff]  ;;  %v2961_v58 = vunpack.c.l.s8.bf16 %v1401_v62 }
 0x894   :  { %6215 = vmatprep.subr.bf16.mxu1 %v2905_v38  ;;  %v1400_v38 = vld [vmem:[#allocation7 + $0x10f0] sm:$0xff]  ;;  %v2958_v54 = vunpack.c.l.s8.bf16 %v1398_v11 }
 0x895   :  { %v2960_v60 = vunpack.c.l.s8.bf16 %v1400_v38  ;;  %v2968_v20 = vunpack.c.h.s8.bf16 %v1400_v38 }
 0x896   :  { %5560 = vmatpush1.bf16.msra.mxu0 %v2902_v44  ;;  %v2967_v44 = vunpack.c.h.s8.bf16 %v1399_v57 }
 0x897   :  { %6216 = vmatpush1.bf16.msra.mxu1 %v2904_v29  ;;  %5570 = vmatprep.subr.bf16.mxu0 %v2911_v35  ;;  %v2969_v29 = vunpack.c.h.s8.bf16 %v1401_v62  ;;  %v1407_v35 = vld [vmem:[#allocation7 + $0x1128] sm:$0xff] }
 0x898   :  { %6226 = vmatprep.subr.bf16.mxu1 %v2913_v15  ;;  %v2966_v15 = vunpack.c.h.s8.bf16 %v1398_v11  ;;  %v1433_v11 = vld [vmem:[#allocation7 + $0x11f8] sm:$0xff] }
 0x899   :  { %5562 = vmatmul.mubr.bf16.vlgmr.msra.gmra.mrb[4].mxu0 %v8434_v27 }
 0x89a   :  { %6218 = vmatmul.mubr.bf16.vlgmr.msra.gmra.mrb[4].mxu1 %v8434_v27  ;;  %5571 = vmatpush1.bf16.msra.mxu0 %v2910_v28  ;;  %v2935_v27 = vunpack.c.h.s8.bf16 %v1383_v45  ;;  %v2975_v28 = vunpack.c.l.s8.bf16 %v1407_v35  ;;  %v1408_v45 = vld [vmem:[#allocation7 + $0x1130] sm:$0xff] }
 0x89b   :  { %5602 = vmatprep.mubr.bf16.mxu0 %v8437_v40  ;;  %6227 = vmatpush1.bf16.msra.mxu1 %v2912_v3  ;;  %v1406_v3 = vld [vmem:[#allocation7 + $0x1120] sm:$0xff]  ;;  %v2976_v21 = vunpack.c.l.s8.bf16 %v1408_v45  ;;  %v2984_v12 = vunpack.c.h.s8.bf16 %v1408_v45 }
 0x89c   :  { %6258 = vmatprep.mubr.bf16.mxu1 %v8437_v40  ;;  %5572 = vmatprep.subr.bf16.mxu0 %v2919_v0  ;;  %v2943_v40 = vunpack.c.l.s8.bf16 %v1391_v56  ;;  %v2977_v0 = vunpack.c.l.s8.bf16 %v1409_v2 }
 0x89d   :  { %6228 = vmatprep.subr.bf16.mxu1 %v2921_v16  ;;  %v2974_v16 = vunpack.c.l.s8.bf16 %v1406_v3 }
 0x89e   :  { %5573 = vmatpush1.bf16.msra.mxu0 %v2918_v61  ;;  %v2983_v61 = vunpack.c.h.s8.bf16 %v1407_v35 }
 0x89f   :  { %6229 = vmatpush1.bf16.msra.mxu1 %v2920_v19  ;;  %5574 = vmatprep.subr.bf16.mxu0 %v2927_v13  ;;  %v2985_v19 = vunpack.c.h.s8.bf16 %v1409_v2  ;;  %v1415_v13 = vld [vmem:[#allocation7 + $0x1168] sm:$0xff] }
 0x8a0   :  { %6230 = vmatprep.subr.bf16.mxu1 %v2929_v33  ;;  %v2982_v33 = vunpack.c.h.s8.bf16 %v1406_v3  ;;  %v1441_v3 = vld [vmem:[#allocation7 + $0x1238] sm:$0xff] }
 0x8a2   :  { %5575 = vmatpush1.bf16.msra.mxu0 %v2926_v43  ;;  %v2991_v43 = vunpack.c.l.s8.bf16 %v1415_v13 }
 0x8a3   :  { %6231 = vmatpush1.bf16.msra.mxu1 %v2928_v34  ;;  %5576 = vmatprep.subr.bf16.mxu0 %v2935_v27  ;;  %v1414_v34 = vld [vmem:[#allocation7 + $0x1160] sm:$0xff]  ;;  %v2993_v27 = vunpack.c.l.s8.bf16 %v1417_v22 }
 0x8a4   :  { %6232 = vmatprep.subr.bf16.mxu1 %v2937_v47  ;;  %v1416_v47 = vld [vmem:[#allocation7 + $0x1170] sm:$0xff]  ;;  %v2990_v56 = vunpack.c.l.s8.bf16 %v1414_v34 }
 0x8a5   :  { %v2992_v30 = vunpack.c.l.s8.bf16 %v1416_v47  ;;  %v3000_v24 = vunpack.c.h.s8.bf16 %v1416_v47 }
 0x8a6   :  { %5577 = vmatpush1.bf16.msra.mxu0 %v2934_v6  ;;  %v2999_v6 = vunpack.c.h.s8.bf16 %v1415_v13 }
 0x8a7   :  { %6233 = vmatpush1.bf16.msra.mxu1 %v2936_v7  ;;  %5578 = vmatprep.subr.bf16.mxu0 %v2943_v40  ;;  %v3001_v7 = vunpack.c.h.s8.bf16 %v1417_v22  ;;  %v1423_v40 = vld [vmem:[#allocation7 + $0x11a8] sm:$0xff] }
 0x8a8   :  { %6234 = vmatprep.subr.bf16.mxu1 %v2945_v5  ;;  %v2998_v5 = vunpack.c.h.s8.bf16 %v1414_v34  ;;  %v1449_v34 = vld [vmem:[#allocation7 + $0x1278] sm:$0xff] }
 0x8aa   :  { %5579 = vmatpush1.bf16.msra.mxu0 %v2942_v37  ;;  %v3007_v37 = vunpack.c.l.s8.bf16 %v1423_v40 }
 0x8ab   :  { %6235 = vmatpush1.bf16.msra.mxu1 %v2944_v18  ;;  %5580 = vmatprep.subr.bf16.mxu0 %v2951_v63  ;;  %v1422_v18 = vld [vmem:[#allocation7 + $0x11a0] sm:$0xff]  ;;  %v3009_v63 = vunpack.c.l.s8.bf16 %v1425_v23 }
 0x8ac   :  { %6236 = vmatprep.subr.bf16.mxu1 %v2953_v31  ;;  %v1424_v31 = vld [vmem:[#allocation7 + $0x11b0] sm:$0xff]  ;;  %v3006_v57 = vunpack.c.l.s8.bf16 %v1422_v18 }
 0x8ad   :  { %v3008_v62 = vunpack.c.l.s8.bf16 %v1424_v31  ;;  %v3016_v38 = vunpack.c.h.s8.bf16 %v1424_v31  ;;  %v1454_v31 = vld [vmem:[#allocation7 + $0x12a0] sm:$0xff] }
 0x8ae   :  { %5581 = vmatpush1.bf16.msra.mxu0 %v2950_v50  ;;  %v3015_v50 = vunpack.c.h.s8.bf16 %v1423_v40 }
 0x8af   :  { %6237 = vmatpush1.bf16.msra.mxu1 %v2952_v17  ;;  %5582 = vmatprep.subr.bf16.mxu0 %v2959_v10  ;;  %v3017_v17 = vunpack.c.h.s8.bf16 %v1425_v23  ;;  %v1431_v10 = vld [vmem:[#allocation7 + $0x11e8] sm:$0xff] }
 0x8b0   :  { %6238 = vmatprep.subr.bf16.mxu1 %v2961_v58  ;;  %v3014_v58 = vunpack.c.h.s8.bf16 %v1422_v18 }
 0x8b2   :  { %5583 = vmatpush1.bf16.msra.mxu0 %v2958_v54  ;;  %v3023_v54 = vunpack.c.l.s8.bf16 %v1431_v10 }
 0x8b3   :  { %6239 = vmatpush1.bf16.msra.mxu1 %v2960_v60  ;;  %5584 = vmatprep.subr.bf16.mxu0 %v2967_v44  ;;  %v1430_v60 = vld [vmem:[#allocation7 + $0x11e0] sm:$0xff]  ;;  %v3025_v44 = vunpack.c.l.s8.bf16 %v1433_v11 }
 0x8b4   :  { %6240 = vmatprep.subr.bf16.mxu1 %v2969_v29  ;;  %v1432_v29 = vld [vmem:[#allocation7 + $0x11f0] sm:$0xff]  ;;  %v3022_v35 = vunpack.c.l.s8.bf16 %v1430_v60 }
 0x8b5   :  { %v3024_v2 = vunpack.c.l.s8.bf16 %v1432_v29  ;;  %v3032_v45 = vunpack.c.h.s8.bf16 %v1432_v29  ;;  %v1462_v29 = vld [vmem:[#allocation7 + $0x12e0] sm:$0xff] }
 0x8b6   :  { %5585 = vmatpush1.bf16.msra.mxu0 %v2966_v15  ;;  %v3031_v15 = vunpack.c.h.s8.bf16 %v1431_v10 }
 0x8b7   :  { %6241 = vmatpush1.bf16.msra.mxu1 %v2968_v20  ;;  %5586 = vmatprep.subr.bf16.mxu0 %v2975_v28  ;;  %v3033_v20 = vunpack.c.h.s8.bf16 %v1433_v11  ;;  %v1439_v28 = vld [vmem:[#allocation7 + $0x1228] sm:$0xff] }
 0x8b8   :  { %6242 = vmatprep.subr.bf16.mxu1 %v2977_v0  ;;  %v3030_v0 = vunpack.c.h.s8.bf16 %v1430_v60 }
 0x8ba   :  { %5587 = vmatpush1.bf16.msra.mxu0 %v2974_v16  ;;  %v3039_v16 = vunpack.c.l.s8.bf16 %v1439_v28 }
 0x8bb   :  { %6243 = vmatpush1.bf16.msra.mxu1 %v2976_v21  ;;  %5588 = vmatprep.subr.bf16.mxu0 %v2983_v61  ;;  %v1438_v21 = vld [vmem:[#allocation7 + $0x1220] sm:$0xff]  ;;  %v3041_v61 = vunpack.c.l.s8.bf16 %v1441_v3 }
 0x8bc   :  { %6244 = vmatprep.subr.bf16.mxu1 %v2985_v19  ;;  %v1440_v19 = vld [vmem:[#allocation7 + $0x1230] sm:$0xff]  ;;  %v3038_v13 = vunpack.c.l.s8.bf16 %v1438_v21 }
 0x8bd   :  { %v3040_v22 = vunpack.c.l.s8.bf16 %v1440_v19  ;;  %v3048_v47 = vunpack.c.h.s8.bf16 %v1440_v19  ;;  %v1470_v19 = vld [vmem:[#allocation7 + $0x1320] sm:$0xff] }
 0x8be   :  { %5589 = vmatpush1.bf16.msra.mxu0 %v2982_v33  ;;  %v3047_v33 = vunpack.c.h.s8.bf16 %v1439_v28 }
 0x8bf   :  { %6245 = vmatpush1.bf16.msra.mxu1 %v2984_v12  ;;  %5590 = vmatprep.subr.bf16.mxu0 %v2991_v43  ;;  %v1447_v12 = vld [vmem:[#allocation7 + $0x1268] sm:$0xff]  ;;  %v3049_v43 = vunpack.c.h.s8.bf16 %v1441_v3 }
 0x8c0   :  { %6246 = vmatprep.subr.bf16.mxu1 %v2993_v27  ;;  %v3046_v27 = vunpack.c.h.s8.bf16 %v1438_v21 }
 0x8c2   :  { %5591 = vmatpush1.bf16.msra.mxu0 %v2990_v56  ;;  %v3055_v56 = vunpack.c.l.s8.bf16 %v1447_v12 }
 0x8c3   :  { %6247 = vmatpush1.bf16.msra.mxu1 %v2992_v30  ;;  %5592 = vmatprep.subr.bf16.mxu0 %v2999_v6  ;;  %v1446_v30 = vld [vmem:[#allocation7 + $0x1260] sm:$0xff]  ;;  %v3057_v6 = vunpack.c.l.s8.bf16 %v1449_v34 }
 0x8c4   :  { %6248 = vmatprep.subr.bf16.mxu1 %v3001_v7  ;;  %v1448_v7 = vld [vmem:[#allocation7 + $0x1270] sm:$0xff]  ;;  %v3054_v40 = vunpack.c.l.s8.bf16 %v1446_v30  ;;  %v3062_v18 = vunpack.c.h.s8.bf16 %v1446_v30 }
 0x8c5   :  { %v3056_v23 = vunpack.c.l.s8.bf16 %v1448_v7 }
 0x8c6   :  { %5593 = vmatpush1.bf16.msra.mxu0 %v2998_v5  ;;  %v3065_v5 = vunpack.c.h.s8.bf16 %v1449_v34 }
 0x8c7   :  { %6249 = vmatpush1.bf16.msra.mxu1 %v3000_v24  ;;  %5594 = vmatprep.subr.bf16.mxu0 %v3007_v37  ;;  %v1455_v24 = vld [vmem:[#allocation7 + $0x12a8] sm:$0xff]  ;;  %v1457_v37 = vld [vmem:[#allocation7 + $0x12b8] sm:$0xff] }
 0x8c8   :  { %6250 = vmatprep.subr.bf16.mxu1 %v3009_v63  ;;  %v3064_v63 = vunpack.c.h.s8.bf16 %v1448_v7  ;;  %v3079_v10 = vunpack.c.h.s8.bf16 %v1455_v24  ;;  %v3081_v11 = vunpack.c.h.s8.bf16 %v1457_v37  ;;  %v1478_v7 = vld [vmem:[#allocation7 + $0x1360] sm:$0xff] }
 0x8ca   :  { %5595 = vmatpush1.bf16.msra.mxu0 %v3006_v57  ;;  %v3073_v57 = vunpack.c.l.s8.bf16 %v1457_v37 }
 0x8cb   :  { %6251 = vmatpush1.bf16.msra.mxu1 %v3008_v62  ;;  %5596 = vmatprep.subr.bf16.mxu0 %v3015_v50  ;;  %v1456_v62 = vld [vmem:[#allocation7 + $0x12b0] sm:$0xff]  ;;  %v3070_v50 = vunpack.c.l.s8.bf16 %v1454_v31 }
 0x8cc   :  { %6252 = vmatprep.subr.bf16.mxu1 %v3017_v17  ;;  %v3072_v17 = vunpack.c.l.s8.bf16 %v1456_v62  ;;  %v3080_v60 = vunpack.c.h.s8.bf16 %v1456_v62  ;;  %v1486_v62 = vld [vmem:[#allocation7 + $0x13a0] sm:$0xff] }
 0x8ce   :  { %5597 = vmatpush1.bf16.msra.mxu0 %v3014_v58  ;;  %v1463_v58 = vld [vmem:[#allocation7 + $0x12e8] sm:$0xff] }
 0x8cf   :  { %6253 = vmatpush1.bf16.msra.mxu1 %v3016_v38  ;;  %5598 = vmatprep.subr.bf16.mxu0 %v3023_v54  ;;  %v1465_v38 = vld [vmem:[#allocation7 + $0x12f8] sm:$0xff]  ;;  %v3078_v54 = vunpack.c.h.s8.bf16 %v1454_v31  ;;  %v3095_v28 = vunpack.c.h.s8.bf16 %v1463_v58 }
 0x8d0   :  { %6254 = vmatprep.subr.bf16.mxu1 %v3025_v44  ;;  %v3087_v44 = vunpack.c.l.s8.bf16 %v1463_v58  ;;  %v3097_v3 = vunpack.c.h.s8.bf16 %v1465_v38 }
 0x8d2   :  { %5599 = vmatpush1.bf16.msra.mxu0 %v3022_v35  ;;  %v3089_v35 = vunpack.c.l.s8.bf16 %v1465_v38 }
 0x8d3   :  { %6255 = vmatpush1.bf16.msra.mxu1 %v3024_v2  ;;  %5600 = vmatprep.subr.bf16.mxu0 %v3031_v15  ;;  %v1464_v2 = vld [vmem:[#allocation7 + $0x12f0] sm:$0xff]  ;;  %v3086_v15 = vunpack.c.l.s8.bf16 %v1462_v29 }
 0x8d4   :  { %6256 = vmatprep.subr.bf16.mxu1 %v3033_v20  ;;  %v3088_v20 = vunpack.c.l.s8.bf16 %v1464_v2  ;;  %v3096_v21 = vunpack.c.h.s8.bf16 %v1464_v2  ;;  %v1494_v2 = vld [vmem:[#allocation7 + $0x13e0] sm:$0xff] }
 0x8d6   :  { %5601 = vmatpush1.bf16.msra.mxu0 %v3030_v0  ;;  %v1471_v0 = vld [vmem:[#allocation7 + $0x1328] sm:$0xff] }
 0x8d7   :  { %6257 = vmatpush1.bf16.msra.mxu1 %v3032_v45  ;;  %5611 = vmatprep.subr.bf16.mxu0 %v3039_v16  ;;  %v1473_v45 = vld [vmem:[#allocation7 + $0x1338] sm:$0xff]  ;;  %v3094_v16 = vunpack.c.h.s8.bf16 %v1462_v29 }
 0x8d8   :  { %6267 = vmatprep.subr.bf16.mxu1 %v3041_v61  ;;  %v3103_v61 = vunpack.c.l.s8.bf16 %v1471_v0  ;;  %v3113_v34 = vunpack.c.h.s8.bf16 %v1473_v45 }
 0x8d9   :  { %5603 = vmatmul.mubr.bf16.vlgmr.msra.gmra.mrb[4].mxu0 %v8451_v55 }
 0x8da   :  { %6259 = vmatmul.mubr.bf16.vlgmr.msra.gmra.mrb[4].mxu1 %v8451_v55  ;;  %5612 = vmatpush1.bf16.msra.mxu0 %v3038_v13  ;;  %v3063_v55 = vunpack.c.h.s8.bf16 %v1447_v12  ;;  %v3105_v13 = vunpack.c.l.s8.bf16 %v1473_v45 }
 0x8db   :  { %5643 = vmatprep.mubr.bf16.mxu0 %v8454_v39  ;;  %6268 = vmatpush1.bf16.msra.mxu1 %v3040_v22  ;;  %v1472_v22 = vld [vmem:[#allocation7 + $0x1330] sm:$0xff] }
 0x8dc   :  { %6299 = vmatprep.mubr.bf16.mxu1 %v8454_v39  ;;  %5613 = vmatprep.subr.bf16.mxu0 %v3047_v33  ;;  %v3071_v39 = vunpack.c.l.s8.bf16 %v1455_v24  ;;  %v3102_v33 = vunpack.c.l.s8.bf16 %v1470_v19  ;;  %v3104_v12 = vunpack.c.l.s8.bf16 %v1472_v22  ;;  %v3112_v30 = vunpack.c.h.s8.bf16 %v1472_v22  ;;  %v1502_v22 = vld [vmem:[#allocation7 + $0x1420] sm:$0xff] }
 0x8dd   :  { %6269 = vmatprep.subr.bf16.mxu1 %v3049_v43  ;;  %v3111_v43 = vunpack.c.h.s8.bf16 %v1471_v0 }
 0x8de   :  { %5614 = vmatpush1.bf16.msra.mxu0 %v3046_v27  ;;  %v1479_v27 = vld [vmem:[#allocation7 + $0x1368] sm:$0xff] }
 0x8df   :  { %6270 = vmatpush1.bf16.msra.mxu1 %v3048_v47  ;;  %5615 = vmatprep.subr.bf16.mxu0 %v3055_v56  ;;  %v1481_v47 = vld [vmem:[#allocation7 + $0x1378] sm:$0xff]  ;;  %v3110_v56 = vunpack.c.h.s8.bf16 %v1470_v19  ;;  %v3127_v24 = vunpack.c.h.s8.bf16 %v1479_v27 }
 0x8e0   :  { %6271 = vmatprep.subr.bf16.mxu1 %v3057_v6  ;;  %v3119_v6 = vunpack.c.l.s8.bf16 %v1479_v27  ;;  %v3129_v37 = vunpack.c.h.s8.bf16 %v1481_v47 }
 0x8e2   :  { %5616 = vmatpush1.bf16.msra.mxu0 %v3054_v40  ;;  %v3121_v40 = vunpack.c.l.s8.bf16 %v1481_v47  ;;  %v1511_v47 = vld [vmem:[#allocation7 + $0x1468] sm:$0xff] }
 0x8e3   :  { %6272 = vmatpush1.bf16.msra.mxu1 %v3056_v23  ;;  %5617 = vmatprep.subr.bf16.mxu0 %v3063_v55  ;;  %v1480_v23 = vld [vmem:[#allocation7 + $0x1370] sm:$0xff]  ;;  %v3118_v55 = vunpack.c.l.s8.bf16 %v1478_v7 }
 0x8e4   :  { %6273 = vmatprep.subr.bf16.mxu1 %v3065_v5  ;;  %v3120_v5 = vunpack.c.l.s8.bf16 %v1480_v23  ;;  %v3128_v31 = vunpack.c.h.s8.bf16 %v1480_v23  ;;  %v1510_v23 = vld [vmem:[#allocation7 + $0x1460] sm:$0xff] }
 0x8e6   :  { %5618 = vmatpush1.bf16.msra.mxu0 %v3062_v18  ;;  %v1487_v18 = vld [vmem:[#allocation7 + $0x13a8] sm:$0xff] }
 0x8e7   :  { %6274 = vmatpush1.bf16.msra.mxu1 %v3064_v63  ;;  %5619 = vmatprep.subr.bf16.mxu0 %v3071_v39  ;;  %v1489_v63 = vld [vmem:[#allocation7 + $0x13b8] sm:$0xff]  ;;  %v3126_v39 = vunpack.c.h.s8.bf16 %v1478_v7  ;;  %v3143_v58 = vunpack.c.h.s8.bf16 %v1487_v18 }
 0x8e8   :  { %6275 = vmatprep.subr.bf16.mxu1 %v3073_v57  ;;  %v3135_v57 = vunpack.c.l.s8.bf16 %v1487_v18  ;;  %v3145_v38 = vunpack.c.h.s8.bf16 %v1489_v63 }
 0x8ea   :  { %5620 = vmatpush1.bf16.msra.mxu0 %v3070_v50  ;;  %v3137_v50 = vunpack.c.l.s8.bf16 %v1489_v63  ;;  %v1519_v63 = vld [vmem:[#allocation7 + $0x14a8] sm:$0xff] }
 0x8eb   :  { %6276 = vmatpush1.bf16.msra.mxu1 %v3072_v17  ;;  %5621 = vmatprep.subr.bf16.mxu0 %v3079_v10  ;;  %v1488_v17 = vld [vmem:[#allocation7 + $0x13b0] sm:$0xff]  ;;  %v3134_v10 = vunpack.c.l.s8.bf16 %v1486_v62 }
 0x8ec   :  { %6277 = vmatprep.subr.bf16.mxu1 %v3081_v11  ;;  %v3136_v11 = vunpack.c.l.s8.bf16 %v1488_v17  ;;  %v3144_v29 = vunpack.c.h.s8.bf16 %v1488_v17  ;;  %v1520_v17 = vld [vmem:[#allocation7 + $0x14b0] sm:$0xff] }
 0x8ee   :  { %5622 = vmatpush1.bf16.msra.mxu0 %v3078_v54  ;;  %v1495_v54 = vld [vmem:[#allocation7 + $0x13e8] sm:$0xff] }
 0x8ef   :  { %6278 = vmatpush1.bf16.msra.mxu1 %v3080_v60  ;;  %5623 = vmatprep.subr.bf16.mxu0 %v3087_v44  ;;  %v1497_v60 = vld [vmem:[#allocation7 + $0x13f8] sm:$0xff]  ;;  %v3142_v44 = vunpack.c.h.s8.bf16 %v1486_v62  ;;  %v3159_v0 = vunpack.c.h.s8.bf16 %v1495_v54  ;;  %v1518_v62 = vld [vmem:[#allocation7 + $0x14a0] sm:$0xff] }
 0x8f0   :  { %6279 = vmatprep.subr.bf16.mxu1 %v3089_v35  ;;  %v3151_v35 = vunpack.c.l.s8.bf16 %v1495_v54  ;;  %v3161_v45 = vunpack.c.h.s8.bf16 %v1497_v60  ;;  %v1527_v54 = vld [vmem:[#allocation7 + $0x14e8] sm:$0xff] }
 0x8f2   :  { %5624 = vmatpush1.bf16.msra.mxu0 %v3086_v15  ;;  %v3153_v15 = vunpack.c.l.s8.bf16 %v1497_v60  ;;  %v1529_v60 = vld [vmem:[#allocation7 + $0x14f8] sm:$0xff] }
 0x8f3   :  { %6280 = vmatpush1.bf16.msra.mxu1 %v3088_v20  ;;  %5625 = vmatprep.subr.bf16.mxu0 %v3095_v28  ;;  %v1496_v20 = vld [vmem:[#allocation7 + $0x13f0] sm:$0xff]  ;;  %v3150_v28 = vunpack.c.l.s8.bf16 %v1494_v2 }
 0x8f4   :  { %6281 = vmatprep.subr.bf16.mxu1 %v3097_v3  ;;  %v3152_v3 = vunpack.c.l.s8.bf16 %v1496_v20  ;;  %v3160_v19 = vunpack.c.h.s8.bf16 %v1496_v20  ;;  %v1528_v20 = vld [vmem:[#allocation7 + $0x14f0] sm:$0xff] }
 0x8f6   :  { %5626 = vmatpush1.bf16.msra.mxu0 %v3094_v16  ;;  %v1503_v16 = vld [vmem:[#allocation7 + $0x1428] sm:$0xff] }
 0x8f7   :  { %6282 = vmatpush1.bf16.msra.mxu1 %v3096_v21  ;;  %5627 = vmatprep.subr.bf16.mxu0 %v3103_v61  ;;  %v1505_v21 = vld [vmem:[#allocation7 + $0x1438] sm:$0xff]  ;;  %v3158_v61 = vunpack.c.h.s8.bf16 %v1494_v2  ;;  %v3175_v27 = vunpack.c.h.s8.bf16 %v1503_v16  ;;  %v1526_v2 = vld [vmem:[#allocation7 + $0x14e0] sm:$0xff] }
 0x8f8   :  { %6283 = vmatprep.subr.bf16.mxu1 %v3105_v13  ;;  %v3167_v13 = vunpack.c.l.s8.bf16 %v1503_v16  ;;  %v1535_v16 = vld [vmem:[#allocation7 + $0x1528] sm:$0xff] }
 0x8fa   :  { %5628 = vmatpush1.bf16.msra.mxu0 %v3102_v33  ;;  %v3169_v33 = vunpack.c.l.s8.bf16 %v1505_v21 }
 0x8fb   :  { %6284 = vmatpush1.bf16.msra.mxu1 %v3104_v12  ;;  %5629 = vmatprep.subr.bf16.mxu0 %v3111_v43  ;;  %v1504_v12 = vld [vmem:[#allocation7 + $0x1430] sm:$0xff]  ;;  %v3166_v43 = vunpack.c.l.s8.bf16 %v1502_v22 }
 0x8fc   :  { %6285 = vmatprep.subr.bf16.mxu1 %v3113_v34  ;;  %v3168_v34 = vunpack.c.l.s8.bf16 %v1504_v12  ;;  %v3176_v7 = vunpack.c.h.s8.bf16 %v1504_v12  ;;  %v1536_v12 = vld [vmem:[#allocation7 + $0x1530] sm:$0xff] }
 0x8fe   :  { %5630 = vmatpush1.bf16.msra.mxu0 %v3110_v56  ;;  %v3177_v56 = vunpack.c.h.s8.bf16 %v1505_v21  ;;  %v1537_v21 = vld [vmem:[#allocation7 + $0x1538] sm:$0xff] }
 0x8ff   :  { %6286 = vmatpush1.bf16.msra.mxu1 %v3112_v30  ;;  %5631 = vmatprep.subr.bf16.mxu0 %v3119_v6  ;;  %v1513_v30 = vld [vmem:[#allocation7 + $0x1478] sm:$0xff]  ;;  %v3174_v6 = vunpack.c.h.s8.bf16 %v1502_v22  ;;  %v1534_v22 = vld [vmem:[#allocation7 + $0x1520] sm:$0xff] }
 0x900   :  { %6287 = vmatprep.subr.bf16.mxu1 %v3121_v40  ;;  %v3183_v40 = vunpack.c.l.s8.bf16 %v1511_v47  ;;  %v3193_v18 = vunpack.c.h.s8.bf16 %v1513_v30 }
 0x902   :  { %5632 = vmatpush1.bf16.msra.mxu0 %v3118_v55  ;;  %v3185_v55 = vunpack.c.l.s8.bf16 %v1513_v30  ;;  %v1545_v30 = vld [vmem:[#allocation7 + $0x1578] sm:$0xff] }
 0x903   :  { %6288 = vmatpush1.bf16.msra.mxu1 %v3120_v5  ;;  %5633 = vmatprep.subr.bf16.mxu0 %v3127_v24  ;;  %v1512_v5 = vld [vmem:[#allocation7 + $0x1470] sm:$0xff]  ;;  %v3182_v24 = vunpack.c.l.s8.bf16 %v1510_v23 }
 0x904   :  { %6289 = vmatprep.subr.bf16.mxu1 %v3129_v37  ;;  %v3184_v37 = vunpack.c.l.s8.bf16 %v1512_v5 }
 0x906   :  { %5634 = vmatpush1.bf16.msra.mxu0 %v3126_v39  ;;  %v1521_v39 = vld [vmem:[#allocation7 + $0x14b8] sm:$0xff] }
 0x907   :  { %6290 = vmatpush1.bf16.msra.mxu1 %v3128_v31  ;;  %5635 = vmatprep.subr.bf16.mxu0 %v3135_v57  ;;  %v3190_v31 = vunpack.c.h.s8.bf16 %v1510_v23  ;;  %v3192_v57 = vunpack.c.h.s8.bf16 %v1512_v5  ;;  %v1542_v23 = vld [vmem:[#allocation7 + $0x1560] sm:$0xff]  ;;  %v1544_v5 = vld [vmem:[#allocation7 + $0x1570] sm:$0xff] }
 0x908   :  { %6291 = vmatprep.subr.bf16.mxu1 %v3137_v50  ;;  %v3201_v50 = vunpack.c.l.s8.bf16 %v1521_v39 }
 0x90a   :  { %5636 = vmatpush1.bf16.msra.mxu0 %v3134_v10  ;;  %v3198_v10 = vunpack.c.l.s8.bf16 %v1518_v62 }
 0x90b   :  { %6292 = vmatpush1.bf16.msra.mxu1 %v3136_v11  ;;  %5637 = vmatprep.subr.bf16.mxu0 %v3143_v58  ;;  %v3200_v11 = vunpack.c.l.s8.bf16 %v1520_v17  ;;  %v3207_v58 = vunpack.c.h.s8.bf16 %v1519_v63 }
 0x90c   :  { %6293 = vmatprep.subr.bf16.mxu1 %v3145_v38  ;;  %v3209_v38 = vunpack.c.h.s8.bf16 %v1521_v39  ;;  %v1553_v39 = vld [vmem:[#allocation7 + $0x15b8] sm:$0xff] }
 0x90e   :  { %5638 = vmatpush1.bf16.msra.mxu0 %v3142_v44  ;;  %v3206_v44 = vunpack.c.h.s8.bf16 %v1518_v62  ;;  %v1550_v62 = vld [vmem:[#allocation7 + $0x15a0] sm:$0xff] }
 0x90f   :  { %6294 = vmatpush1.bf16.msra.mxu1 %v3144_v29  ;;  %5639 = vmatprep.subr.bf16.mxu0 %v3151_v35  ;;  %v3208_v29 = vunpack.c.h.s8.bf16 %v1520_v17  ;;  %v3215_v35 = vunpack.c.l.s8.bf16 %v1527_v54  ;;  %v1552_v17 = vld [vmem:[#allocation7 + $0x15b0] sm:$0xff] }
 0x910   :  { %6295 = vmatprep.subr.bf16.mxu1 %v3153_v15  ;;  %v3217_v15 = vunpack.c.l.s8.bf16 %v1529_v60 }
 0x912   :  { %5640 = vmatpush1.bf16.msra.mxu0 %v3150_v28  ;;  %v3214_v28 = vunpack.c.l.s8.bf16 %v1526_v2 }
 0x913   :  { %6296 = vmatpush1.bf16.msra.mxu1 %v3152_v3  ;;  %5641 = vmatprep.subr.bf16.mxu0 %v3159_v0  ;;  %v3216_v3 = vunpack.c.l.s8.bf16 %v1528_v20  ;;  %v3223_v0 = vunpack.c.h.s8.bf16 %v1527_v54  ;;  %v1559_v54 = vld [vmem:[#allocation7 + $0x15e8] sm:$0xff] }
 0x914   :  { %6297 = vmatprep.subr.bf16.mxu1 %v3161_v45  ;;  %v3225_v45 = vunpack.c.h.s8.bf16 %v1529_v60  ;;  %v1561_v60 = vld [vmem:[#allocation7 + $0x15f8] sm:$0xff] }
 0x916   :  { %5642 = vmatpush1.bf16.msra.mxu0 %v3158_v61  ;;  %v3222_v61 = vunpack.c.h.s8.bf16 %v1526_v2  ;;  %v1558_v2 = vld [vmem:[#allocation7 + $0x15e0] sm:$0xff] }
 0x917   :  { %6298 = vmatpush1.bf16.msra.mxu1 %v3160_v19  ;;  %5652 = vmatprep.subr.bf16.mxu0 %v3167_v13  ;;  %v3224_v19 = vunpack.c.h.s8.bf16 %v1528_v20  ;;  %v3231_v13 = vunpack.c.l.s8.bf16 %v1535_v16  ;;  %v1560_v20 = vld [vmem:[#allocation7 + $0x15f0] sm:$0xff] }
 0x918   :  { %6308 = vmatprep.subr.bf16.mxu1 %v3169_v33  ;;  %v3233_v33 = vunpack.c.l.s8.bf16 %v1537_v21 }
 0x919   :  { %5644 = vmatmul.mubr.bf16.vlgmr.msra.gmra.mrb[4].mxu0 %v8470_v26 }
 0x91a   :  { %6300 = vmatmul.mubr.bf16.vlgmr.msra.gmra.mrb[4].mxu1 %v8470_v26  ;;  %5653 = vmatpush1.bf16.msra.mxu0 %v3166_v43  ;;  %v3191_v26 = vunpack.c.h.s8.bf16 %v1511_v47  ;;  %v3230_v43 = vunpack.c.l.s8.bf16 %v1534_v22  ;;  %v3241_v47 = vunpack.c.h.s8.bf16 %v1537_v21  ;;  %v1569_v21 = vld [vmem:[#allocation7 + $0x1638] sm:$0xff] }
 0x91b   :  { %5684 = vmatprep.mubr.bf16.mxu0 %v8473_v41  ;;  %6309 = vmatpush1.bf16.msra.mxu1 %v3168_v34  ;;  %v3232_v34 = vunpack.c.l.s8.bf16 %v1536_v12 }
 0x91c   :  { %6340 = vmatprep.mubr.bf16.mxu1 %v8473_v41  ;;  %5654 = vmatprep.subr.bf16.mxu0 %v3175_v27  ;;  %v3199_v41 = vunpack.c.l.s8.bf16 %v1519_v63  ;;  %v3239_v27 = vunpack.c.h.s8.bf16 %v1535_v16  ;;  %v1551_v63 = vld [vmem:[#allocation7 + $0x15a8] sm:$0xff] }
 0x91d   :  { %6310 = vmatprep.subr.bf16.mxu1 %v3177_v56  ;;  %v1543_v56 = vld [vmem:[#allocation7 + $0x1568] sm:$0xff] }
 0x91e   :  { %5655 = vmatpush1.bf16.msra.mxu0 %v3174_v6  ;;  %v3238_v6 = vunpack.c.h.s8.bf16 %v1534_v22  ;;  %v1567_v16 = vld [vmem:[#allocation7 + $0x1628] sm:$0xff]  ;;  %v1566_v22 = vld [vmem:[#allocation7 + $0x1620] sm:$0xff] }
 0x91f   :  { %6311 = vmatpush1.bf16.msra.mxu1 %v3176_v7  ;;  %5656 = vmatprep.subr.bf16.mxu0 %v3183_v40  ;;  %v3240_v7 = vunpack.c.h.s8.bf16 %v1536_v12  ;;  %v3247_v40 = vunpack.c.l.s8.bf16 %v1543_v56  ;;  %v1568_v12 = vld [vmem:[#allocation7 + $0x1630] sm:$0xff] }
 0x920   :  { %6312 = vmatprep.subr.bf16.mxu1 %v3185_v55  ;;  %v3249_v55 = vunpack.c.l.s8.bf16 %v1545_v30 }
 0x922   :  { %5657 = vmatpush1.bf16.msra.mxu0 %v3182_v24  ;;  %v3246_v24 = vunpack.c.l.s8.bf16 %v1542_v23 }
 0x923   :  { %6313 = vmatpush1.bf16.msra.mxu1 %v3184_v37  ;;  %5658 = vmatprep.subr.bf16.mxu0 %v3191_v26  ;;  %v3248_v37 = vunpack.c.l.s8.bf16 %v1544_v5  ;;  %v3255_v26 = vunpack.c.h.s8.bf16 %v1543_v56  ;;  %v3305_v56 = vunpack.c.h.s8.bf16 %v1569_v21 }
 0x924   :  { %6314 = vmatprep.subr.bf16.mxu1 %v3193_v18  ;;  %v3257_v18 = vunpack.c.h.s8.bf16 %v1545_v30  ;;  %v1577_v30 = vld [vmem:[#allocation7 + $0x1678] sm:$0xff] }
 0x926   :  { %5659 = vmatpush1.bf16.msra.mxu0 %v3190_v31  ;;  %v3254_v31 = vunpack.c.h.s8.bf16 %v1542_v23  ;;  %v1574_v23 = vld [vmem:[#allocation7 + $0x1660] sm:$0xff] }
 0x927   :  { %6315 = vmatpush1.bf16.msra.mxu1 %v3192_v57  ;;  %5660 = vmatprep.subr.bf16.mxu0 %v3199_v41  ;;  %v3256_v57 = vunpack.c.h.s8.bf16 %v1544_v5  ;;  %v3263_v41 = vunpack.c.l.s8.bf16 %v1551_v63  ;;  %v1576_v5 = vld [vmem:[#allocation7 + $0x1670] sm:$0xff] }
 0x928   :  { %6316 = vmatprep.subr.bf16.mxu1 %v3201_v50  ;;  %v3265_v50 = vunpack.c.l.s8.bf16 %v1553_v39 }
 0x92a   :  { %5661 = vmatpush1.bf16.msra.mxu0 %v3198_v10  ;;  %v3262_v10 = vunpack.c.l.s8.bf16 %v1550_v62 }
 0x92b   :  { %6317 = vmatpush1.bf16.msra.mxu1 %v3200_v11  ;;  %5662 = vmatprep.subr.bf16.mxu0 %v3207_v58  ;;  %v3264_v11 = vunpack.c.l.s8.bf16 %v1552_v17  ;;  %v3271_v58 = vunpack.c.h.s8.bf16 %v1551_v63  ;;  %v1585_v63 = vld [vmem:[#allocation7 + $0x16b8] sm:$0xff] }
 0x92c   :  { %6318 = vmatprep.subr.bf16.mxu1 %v3209_v38  ;;  %v3273_v38 = vunpack.c.h.s8.bf16 %v1553_v39  ;;  %v3318_v39 = vunpack.c.h.s8.bf16 %v1574_v23 }
 0x92e   :  { %5663 = vmatpush1.bf16.msra.mxu0 %v3206_v44  ;;  %v3270_v44 = vunpack.c.h.s8.bf16 %v1550_v62  ;;  %v1584_v62 = vld [vmem:[#allocation7 + $0x16b0] sm:$0xff] }
 0x92f   :  { %6319 = vmatpush1.bf16.msra.mxu1 %v3208_v29  ;;  %5664 = vmatprep.subr.bf16.mxu0 %v3215_v35  ;;  %v3272_v29 = vunpack.c.h.s8.bf16 %v1552_v17  ;;  %v3279_v35 = vunpack.c.l.s8.bf16 %v1559_v54  ;;  %v3328_v17 = vunpack.c.l.s8.bf16 %v1584_v62 }
 0x930   :  { %6320 = vmatprep.subr.bf16.mxu1 %v3217_v15  ;;  %v3281_v15 = vunpack.c.l.s8.bf16 %v1561_v60 }
 0x932   :  { %5665 = vmatpush1.bf16.msra.mxu0 %v3214_v28  ;;  %v3278_v28 = vunpack.c.l.s8.bf16 %v1558_v2 }
 0x933   :  { %6321 = vmatpush1.bf16.msra.mxu1 %v3216_v3  ;;  %5666 = vmatprep.subr.bf16.mxu0 %v3223_v0  ;;  %v3280_v3 = vunpack.c.l.s8.bf16 %v1560_v20  ;;  %v3287_v0 = vunpack.c.h.s8.bf16 %v1559_v54 }
 0x934   :  { %6322 = vmatprep.subr.bf16.mxu1 %v3225_v45  ;;  %v3289_v45 = vunpack.c.h.s8.bf16 %v1561_v60  ;;  %v3336_v60 = vunpack.c.h.s8.bf16 %v1584_v62 }
 0x936   :  { %5667 = vmatpush1.bf16.msra.mxu0 %v3222_v61  ;;  %v3286_v61 = vunpack.c.h.s8.bf16 %v1558_v2  ;;  %v1592_v2 = vld [vmem:[#allocation7 + $0x16f0] sm:$0xff] }
 0x937   :  { %6323 = vmatpush1.bf16.msra.mxu1 %v3224_v19  ;;  %5668 = vmatprep.subr.bf16.mxu0 %v3231_v13  ;;  %v3288_v19 = vunpack.c.h.s8.bf16 %v1560_v20  ;;  %v3295_v13 = vunpack.c.l.s8.bf16 %v1567_v16  ;;  %v3344_v20 = vunpack.c.l.s8.bf16 %v1592_v2 }
 0x938   :  { %6324 = vmatprep.subr.bf16.mxu1 %v3233_v33  ;;  %v3297_v33 = vunpack.c.l.s8.bf16 %v1569_v21  ;;  %v3352_v21 = vunpack.c.h.s8.bf16 %v1592_v2 }
 0x93a   :  { %5669 = vmatpush1.bf16.msra.mxu0 %v3230_v43  ;;  %v3294_v43 = vunpack.c.l.s8.bf16 %v1566_v22 }
 0x93b   :  { %6325 = vmatpush1.bf16.msra.mxu1 %v3232_v34  ;;  %5670 = vmatprep.subr.bf16.mxu0 %v3239_v27  ;;  %v3296_v34 = vunpack.c.l.s8.bf16 %v1568_v12  ;;  %v3303_v27 = vunpack.c.h.s8.bf16 %v1567_v16 }
 0x93c   :  { %6326 = vmatprep.subr.bf16.mxu1 %v3241_v47  ;;  %v1575_v47 = vld [vmem:[#allocation7 + $0x1668] sm:$0xff] }
 0x93e   :  { %5671 = vmatpush1.bf16.msra.mxu0 %v3238_v6  ;;  %v3302_v6 = vunpack.c.h.s8.bf16 %v1566_v22  ;;  %v1600_v22 = vld [vmem:[#allocation7 + $0x1730] sm:$0xff] }
 0x93f   :  { %6327 = vmatpush1.bf16.msra.mxu1 %v3240_v7  ;;  %5672 = vmatprep.subr.bf16.mxu0 %v3247_v40  ;;  %v3304_v7 = vunpack.c.h.s8.bf16 %v1568_v12  ;;  %v3311_v40 = vunpack.c.l.s8.bf16 %v1575_v47  ;;  %v3360_v12 = vunpack.c.l.s8.bf16 %v1600_v22 }
 0x940   :  { %6328 = vmatprep.subr.bf16.mxu1 %v3249_v55  ;;  %v3313_v55 = vunpack.c.l.s8.bf16 %v1577_v30 }
 0x942   :  { %5673 = vmatpush1.bf16.msra.mxu0 %v3246_v24  ;;  %v3310_v24 = vunpack.c.l.s8.bf16 %v1574_v23  ;;  %v1608_v23 = vld [vmem:[#allocation7 + $0x1770] sm:$0xff] }
 0x943   :  { %6329 = vmatpush1.bf16.msra.mxu1 %v3248_v37  ;;  %5674 = vmatprep.subr.bf16.mxu0 %v3255_v26  ;;  %v3312_v37 = vunpack.c.l.s8.bf16 %v1576_v5  ;;  %v3321_v26 = vunpack.c.h.s8.bf16 %v1577_v30  ;;  %v3368_v30 = vunpack.c.h.s8.bf16 %v1600_v22 }
 0x944   :  { %6330 = vmatprep.subr.bf16.mxu1 %v3257_v18  ;;  %v1583_v18 = vld [vmem:[#allocation7 + $0x16a8] sm:$0xff] }
 0x946   :  { %5675 = vmatpush1.bf16.msra.mxu0 %v3254_v31  ;;  %v3320_v31 = vunpack.c.h.s8.bf16 %v1576_v5  ;;  %v3376_v5 = vunpack.c.l.s8.bf16 %v1608_v23 }
 0x947   :  { %6331 = vmatpush1.bf16.msra.mxu1 %v3256_v57  ;;  %5676 = vmatprep.subr.bf16.mxu0 %v3263_v41  ;;  %v1582_v57 = vld [vmem:[#allocation7 + $0x16a0] sm:$0xff]  ;;  %v3329_v41 = vunpack.c.l.s8.bf16 %v1585_v63 }
 0x948   :  { %6332 = vmatprep.subr.bf16.mxu1 %v3265_v50  ;;  %v3326_v50 = vunpack.c.l.s8.bf16 %v1582_v57  ;;  %v3334_v54 = vunpack.c.h.s8.bf16 %v1582_v57  ;;  %v1616_v57 = vld [vmem:[#allocation7 + $0x17b0] sm:$0xff] }
 0x949   :  { %v3392_v62 = vunpack.c.l.s8.bf16 %v1616_v57 }
 0x94a   :  { %5677 = vmatpush1.bf16.msra.mxu0 %v3262_v10  ;;  %v3335_v10 = vunpack.c.h.s8.bf16 %v1583_v18 }
 0x94b   :  { %6333 = vmatpush1.bf16.msra.mxu1 %v3264_v11  ;;  %5678 = vmatprep.subr.bf16.mxu0 %v3271_v58  ;;  %v3337_v11 = vunpack.c.h.s8.bf16 %v1585_v63  ;;  %v1591_v58 = vld [vmem:[#allocation7 + $0x16e8] sm:$0xff]  ;;  %v3384_v63 = vunpack.c.h.s8.bf16 %v1608_v23 }
 0x94c   :  { %6334 = vmatprep.subr.bf16.mxu1 %v3273_v38  ;;  %v1593_v38 = vld [vmem:[#allocation7 + $0x16f8] sm:$0xff] }
 0x94e   :  { %5679 = vmatpush1.bf16.msra.mxu0 %v3270_v44  ;;  %v3343_v44 = vunpack.c.l.s8.bf16 %v1591_v58 }
 0x94f   :  { %6335 = vmatpush1.bf16.msra.mxu1 %v3272_v29  ;;  %5680 = vmatprep.subr.bf16.mxu0 %v3279_v35  ;;  %v1590_v29 = vld [vmem:[#allocation7 + $0x16e0] sm:$0xff]  ;;  %v3345_v35 = vunpack.c.l.s8.bf16 %v1593_v38 }
 0x950   :  { %6336 = vmatprep.subr.bf16.mxu1 %v3281_v15  ;;  %v3342_v15 = vunpack.c.l.s8.bf16 %v1590_v29  ;;  %v3350_v16 = vunpack.c.h.s8.bf16 %v1590_v29  ;;  %v1624_v29 = vld [vmem:[#allocation7 + $0x17f0] sm:$0xff] }
 0x951   :  { %v3408_v2 = vunpack.c.l.s8.bf16 %v1624_v29 }
 0x952   :  { %5681 = vmatpush1.bf16.msra.mxu0 %v3278_v28  ;;  %v3351_v28 = vunpack.c.h.s8.bf16 %v1591_v58 }
 0x953   :  { %6337 = vmatpush1.bf16.msra.mxu1 %v3280_v3  ;;  %5682 = vmatprep.subr.bf16.mxu0 %v3287_v0  ;;  %v3353_v3 = vunpack.c.h.s8.bf16 %v1593_v38  ;;  %v1599_v0 = vld [vmem:[#allocation7 + $0x1728] sm:$0xff]  ;;  %v3400_v38 = vunpack.c.h.s8.bf16 %v1616_v57 }
 0x954   :  { %6338 = vmatprep.subr.bf16.mxu1 %v3289_v45  ;;  %v1601_v45 = vld [vmem:[#allocation7 + $0x1738] sm:$0xff] }
 0x956   :  { %5683 = vmatpush1.bf16.msra.mxu0 %v3286_v61  ;;  %v3359_v61 = vunpack.c.l.s8.bf16 %v1599_v0 }
 0x957   :  { %6339 = vmatpush1.bf16.msra.mxu1 %v3288_v19  ;;  %5693 = vmatprep.subr.bf16.mxu0 %v3295_v13  ;;  %v1598_v19 = vld [vmem:[#allocation7 + $0x1720] sm:$0xff]  ;;  %v3361_v13 = vunpack.c.l.s8.bf16 %v1601_v45 }
 0x958   :  { %6349 = vmatprep.subr.bf16.mxu1 %v3297_v33  ;;  %v3358_v33 = vunpack.c.l.s8.bf16 %v1598_v19 }
 0x959   :  { %5685 = vmatmul.mubr.bf16.vlgmr.msra.gmra.mrb[4].mxu0 %v8487_v1 }
 0x95a   :  { %6341 = vmatmul.mubr.bf16.vlgmr.msra.gmra.mrb[4].mxu1 %v8487_v1  ;;  %5694 = vmatpush1.bf16.msra.mxu0 %v3294_v43  ;;  %v3319_v1 = vunpack.c.h.s8.bf16 %v1575_v47  ;;  %v3367_v43 = vunpack.c.h.s8.bf16 %v1599_v0  ;;  %v1609_v47 = vld [vmem:[#allocation7 + $0x1778] sm:$0xff] }
 0x95b   :  { %5725 = vmatprep.mubr.bf16.mxu0 %v8490_v14  ;;  %6350 = vmatpush1.bf16.msra.mxu1 %v3296_v34  ;;  %v3369_v34 = vunpack.c.h.s8.bf16 %v1601_v45  ;;  %v3416_v45 = vunpack.c.h.s8.bf16 %v1624_v29 }
 0x95c   :  { %6381 = vmatprep.mubr.bf16.mxu1 %v8490_v14  ;;  %5695 = vmatprep.subr.bf16.mxu0 %v3303_v27  ;;  %v3327_v14 = vunpack.c.l.s8.bf16 %v1583_v18  ;;  %v1607_v27 = vld [vmem:[#allocation7 + $0x1768] sm:$0xff] }
 0x95d   :  { %6351 = vmatprep.subr.bf16.mxu1 %v3305_v56  ;;  %v3366_v56 = vunpack.c.h.s8.bf16 %v1598_v19  ;;  %v1632_v19 = vld [vmem:[#allocation7 + $0x1830] sm:$0xff] }
 0x95e   :  { %5696 = vmatpush1.bf16.msra.mxu0 %v3302_v6  ;;  %v3375_v6 = vunpack.c.l.s8.bf16 %v1607_v27  ;;  %v3424_v22 = vunpack.c.l.s8.bf16 %v1632_v19 }
 0x95f   :  { %6352 = vmatpush1.bf16.msra.mxu1 %v3304_v7  ;;  %5697 = vmatprep.subr.bf16.mxu0 %v3311_v40  ;;  %v1606_v7 = vld [vmem:[#allocation7 + $0x1760] sm:$0xff]  ;;  %v3377_v40 = vunpack.c.l.s8.bf16 %v1609_v47 }
 0x960   :  { %6353 = vmatprep.subr.bf16.mxu1 %v3313_v55  ;;  %v3374_v55 = vunpack.c.l.s8.bf16 %v1606_v7  ;;  %v3382_v18 = vunpack.c.h.s8.bf16 %v1606_v7  ;;  %v1640_v7 = vld [vmem:[#allocation7 + $0x1870] sm:$0xff] }
 0x961   :  { %v3440_v23 = vunpack.c.l.s8.bf16 %v1640_v7 }
 0x962   :  { %5698 = vmatpush1.bf16.msra.mxu0 %v3310_v24  ;;  %v3383_v24 = vunpack.c.h.s8.bf16 %v1607_v27 }
 0x963   :  { %6354 = vmatpush1.bf16.msra.mxu1 %v3312_v37  ;;  %5699 = vmatprep.subr.bf16.mxu0 %v3319_v1  ;;  %v3385_v37 = vunpack.c.h.s8.bf16 %v1609_v47  ;;  %v1615_v1 = vld [vmem:[#allocation7 + $0x17a8] sm:$0xff]  ;;  %v3432_v47 = vunpack.c.h.s8.bf16 %v1632_v19 }
 0x964   :  { %6355 = vmatprep.subr.bf16.mxu1 %v3321_v26  ;;  %v1617_v26 = vld [vmem:[#allocation7 + $0x17b8] sm:$0xff] }
 0x966   :  { %5700 = vmatpush1.bf16.msra.mxu0 %v3318_v39  ;;  %v3391_v39 = vunpack.c.l.s8.bf16 %v1615_v1 }
 0x967   :  { %6356 = vmatpush1.bf16.msra.mxu1 %v3320_v31  ;;  %5701 = vmatprep.subr.bf16.mxu0 %v3327_v14  ;;  %v1614_v31 = vld [vmem:[#allocation7 + $0x17a0] sm:$0xff]  ;;  %v3393_v14 = vunpack.c.l.s8.bf16 %v1617_v26 }
 0x968   :  { %6357 = vmatprep.subr.bf16.mxu1 %v3329_v41  ;;  %v3390_v41 = vunpack.c.l.s8.bf16 %v1614_v31  ;;  %v3398_v58 = vunpack.c.h.s8.bf16 %v1614_v31 }
 0x96a   :  { %5702 = vmatpush1.bf16.msra.mxu0 %v3326_v50  ;;  %v3399_v50 = vunpack.c.h.s8.bf16 %v1615_v1  ;;  %v3448_v1 = vunpack.c.h.s8.bf16 %v1640_v7 }
 0x96b   :  { %6358 = vmatpush1.bf16.msra.mxu1 %v3328_v17  ;;  %5703 = vmatprep.subr.bf16.mxu0 %v3335_v10  ;;  %v3401_v17 = vunpack.c.h.s8.bf16 %v1617_v26  ;;  %v1623_v10 = vld [vmem:[#allocation7 + $0x17e8] sm:$0xff]  ;;  %v1646_v26 = vld [vmem:[#allocation7 + $0x18a0] sm:$0xff] }
 0x96c   :  { %6359 = vmatprep.subr.bf16.mxu1 %v3337_v11  ;;  %v1625_v11 = vld [vmem:[#allocation7 + $0x17f8] sm:$0xff] }
 0x96e   :  { %5704 = vmatpush1.bf16.msra.mxu0 %v3334_v54  ;;  %v3407_v54 = vunpack.c.l.s8.bf16 %v1623_v10 }
 0x96f   :  { %6360 = vmatpush1.bf16.msra.mxu1 %v3336_v60  ;;  %5705 = vmatprep.subr.bf16.mxu0 %v3343_v44  ;;  %v1622_v60 = vld [vmem:[#allocation7 + $0x17e0] sm:$0xff]  ;;  %v3409_v44 = vunpack.c.l.s8.bf16 %v1625_v11 }
 0x970   :  { %6361 = vmatprep.subr.bf16.mxu1 %v3345_v35  ;;  %v3406_v35 = vunpack.c.l.s8.bf16 %v1622_v60  ;;  %v3414_v0 = vunpack.c.h.s8.bf16 %v1622_v60 }
 0x972   :  { %5706 = vmatpush1.bf16.msra.mxu0 %v3342_v15  ;;  %v3415_v15 = vunpack.c.h.s8.bf16 %v1623_v10 }
 0x973   :  { %6362 = vmatpush1.bf16.msra.mxu1 %v3344_v20  ;;  %5707 = vmatprep.subr.bf16.mxu0 %v3351_v28  ;;  %v3417_v20 = vunpack.c.h.s8.bf16 %v1625_v11  ;;  %v1631_v28 = vld [vmem:[#allocation7 + $0x1828] sm:$0xff]  ;;  %v1654_v11 = vld [vmem:[#allocation7 + $0x18e0] sm:$0xff] }
 0x974   :  { %6363 = vmatprep.subr.bf16.mxu1 %v3353_v3  ;;  %v1633_v3 = vld [vmem:[#allocation7 + $0x1838] sm:$0xff] }
 0x976   :  { %5708 = vmatpush1.bf16.msra.mxu0 %v3350_v16  ;;  %v3423_v16 = vunpack.c.l.s8.bf16 %v1631_v28 }
 0x977   :  { %6364 = vmatpush1.bf16.msra.mxu1 %v3352_v21  ;;  %5709 = vmatprep.subr.bf16.mxu0 %v3359_v61  ;;  %v1630_v21 = vld [vmem:[#allocation7 + $0x1820] sm:$0xff]  ;;  %v3425_v61 = vunpack.c.l.s8.bf16 %v1633_v3 }
 0x978   :  { %6365 = vmatprep.subr.bf16.mxu1 %v3361_v13  ;;  %v3422_v13 = vunpack.c.l.s8.bf16 %v1630_v21  ;;  %v3430_v27 = vunpack.c.h.s8.bf16 %v1630_v21 }
 0x97a   :  { %5710 = vmatpush1.bf16.msra.mxu0 %v3358_v33  ;;  %v3431_v33 = vunpack.c.h.s8.bf16 %v1631_v28 }
 0x97b   :  { %6366 = vmatpush1.bf16.msra.mxu1 %v3360_v12  ;;  %5711 = vmatprep.subr.bf16.mxu0 %v3367_v43  ;;  %v1639_v12 = vld [vmem:[#allocation7 + $0x1868] sm:$0xff]  ;;  %v3433_v43 = vunpack.c.h.s8.bf16 %v1633_v3  ;;  %v1662_v3 = vld [vmem:[#allocation7 + $0x1920] sm:$0xff] }
 0x97c   :  { %6367 = vmatprep.subr.bf16.mxu1 %v3369_v34  ;;  %v1641_v34 = vld [vmem:[#allocation7 + $0x1878] sm:$0xff] }
 0x97e   :  { %5712 = vmatpush1.bf16.msra.mxu0 %v3366_v56  ;;  %v3439_v56 = vunpack.c.l.s8.bf16 %v1639_v12 }
 0x97f   :  { %6368 = vmatpush1.bf16.msra.mxu1 %v3368_v30  ;;  %5713 = vmatprep.subr.bf16.mxu0 %v3375_v6  ;;  %v1638_v30 = vld [vmem:[#allocation7 + $0x1860] sm:$0xff]  ;;  %v3441_v6 = vunpack.c.l.s8.bf16 %v1641_v34 }
 0x980   :  { %6369 = vmatprep.subr.bf16.mxu1 %v3377_v40  ;;  %v3438_v40 = vunpack.c.l.s8.bf16 %v1638_v30 }
 0x982   :  { %5714 = vmatpush1.bf16.msra.mxu0 %v3374_v55  ;;  %v3449_v55 = vunpack.c.h.s8.bf16 %v1641_v34  ;;  %v1670_v34 = vld [vmem:[#allocation7 + $0x1960] sm:$0xff] }
 0x983   :  { %6370 = vmatpush1.bf16.msra.mxu1 %v3376_v5  ;;  %5715 = vmatprep.subr.bf16.mxu0 %v3383_v24  ;;  %v1647_v5 = vld [vmem:[#allocation7 + $0x18a8] sm:$0xff]  ;;  %v1649_v24 = vld [vmem:[#allocation7 + $0x18b8] sm:$0xff] }
 0x984   :  { %6371 = vmatprep.subr.bf16.mxu1 %v3385_v37  ;;  %v3446_v37 = vunpack.c.h.s8.bf16 %v1638_v30  ;;  %v3465_v57 = vunpack.c.h.s8.bf16 %v1649_v24 }
 0x986   :  { %5716 = vmatpush1.bf16.msra.mxu0 %v3382_v18  ;;  %v3457_v18 = vunpack.c.l.s8.bf16 %v1649_v24  ;;  %v1678_v24 = vld [vmem:[#allocation7 + $0x19a0] sm:$0xff] }
 0x987   :  { %6372 = vmatpush1.bf16.msra.mxu1 %v3384_v63  ;;  %5717 = vmatprep.subr.bf16.mxu0 %v3391_v39  ;;  %v1648_v63 = vld [vmem:[#allocation7 + $0x18b0] sm:$0xff]  ;;  %v3454_v39 = vunpack.c.l.s8.bf16 %v1646_v26 }
 0x988   :  { %6373 = vmatprep.subr.bf16.mxu1 %v3393_v14  ;;  %v3456_v31 = vunpack.c.l.s8.bf16 %v1648_v63  ;;  %v3463_v14 = vunpack.c.h.s8.bf16 %v1647_v5 }
 0x98a   :  { %5718 = vmatpush1.bf16.msra.mxu0 %v3390_v41  ;;  %v1655_v41 = vld [vmem:[#allocation7 + $0x18e8] sm:$0xff] }
 0x98b   :  { %6374 = vmatpush1.bf16.msra.mxu1 %v3392_v62  ;;  %5719 = vmatprep.subr.bf16.mxu0 %v3399_v50  ;;  %v1657_v62 = vld [vmem:[#allocation7 + $0x18f8] sm:$0xff]  ;;  %v3462_v50 = vunpack.c.h.s8.bf16 %v1646_v26  ;;  %v3471_v10 = vunpack.c.l.s8.bf16 %v1655_v41 }
 0x98c   :  { %6375 = vmatprep.subr.bf16.mxu1 %v3401_v17  ;;  %v3464_v17 = vunpack.c.h.s8.bf16 %v1648_v63  ;;  %v3481_v29 = vunpack.c.h.s8.bf16 %v1657_v62 }
 0x98e   :  { %5720 = vmatpush1.bf16.msra.mxu0 %v3398_v58  ;;  %v3473_v58 = vunpack.c.l.s8.bf16 %v1657_v62  ;;  %v1686_v62 = vld [vmem:[#allocation7 + $0x19e0] sm:$0xff] }
 0x98f   :  { %6376 = vmatpush1.bf16.msra.mxu1 %v3400_v38  ;;  %5721 = vmatprep.subr.bf16.mxu0 %v3407_v54  ;;  %v1656_v38 = vld [vmem:[#allocation7 + $0x18f0] sm:$0xff]  ;;  %v3470_v54 = vunpack.c.l.s8.bf16 %v1654_v11 }
 0x990   :  { %6377 = vmatprep.subr.bf16.mxu1 %v3409_v44  ;;  %v3472_v60 = vunpack.c.l.s8.bf16 %v1656_v38  ;;  %v3479_v44 = vunpack.c.h.s8.bf16 %v1655_v41 }
 0x992   :  { %5722 = vmatpush1.bf16.msra.mxu0 %v3406_v35  ;;  %v1663_v35 = vld [vmem:[#allocation7 + $0x1928] sm:$0xff] }
 0x993   :  { %6378 = vmatpush1.bf16.msra.mxu1 %v3408_v2  ;;  %5723 = vmatprep.subr.bf16.mxu0 %v3415_v15  ;;  %v1665_v2 = vld [vmem:[#allocation7 + $0x1938] sm:$0xff]  ;;  %v3478_v15 = vunpack.c.h.s8.bf16 %v1654_v11  ;;  %v3487_v28 = vunpack.c.l.s8.bf16 %v1663_v35 }
 0x994   :  { %6379 = vmatprep.subr.bf16.mxu1 %v3417_v20  ;;  %v3480_v20 = vunpack.c.h.s8.bf16 %v1656_v38  ;;  %v3497_v19 = vunpack.c.h.s8.bf16 %v1665_v2 }
 0x996   :  { %5724 = vmatpush1.bf16.msra.mxu0 %v3414_v0  ;;  %v3489_v0 = vunpack.c.l.s8.bf16 %v1665_v2  ;;  %v1694_v2 = vld [vmem:[#allocation7 + $0x1a20] sm:$0xff] }
 0x997   :  { %6380 = vmatpush1.bf16.msra.mxu1 %v3416_v45  ;;  %5734 = vmatprep.subr.bf16.mxu0 %v3423_v16  ;;  %v1664_v45 = vld [vmem:[#allocation7 + $0x1930] sm:$0xff]  ;;  %v3486_v16 = vunpack.c.l.s8.bf16 %v1662_v3 }
 0x998   :  { %6390 = vmatprep.subr.bf16.mxu1 %v3425_v61  ;;  %v3488_v21 = vunpack.c.l.s8.bf16 %v1664_v45  ;;  %v3495_v61 = vunpack.c.h.s8.bf16 %v1663_v35 }
 0x999   :  { %5726 = vmatmul.mubr.bf16.vlgmr.msra.gmra.mrb[4].mxu0 %v8506_v49 }
 0x99a   :  { %6382 = vmatmul.mubr.bf16.vlgmr.msra.gmra.mrb[4].mxu1 %v8506_v49  ;;  %5735 = vmatpush1.bf16.msra.mxu0 %v3422_v13  ;;  %v3447_v49 = vunpack.c.h.s8.bf16 %v1639_v12  ;;  %v1671_v13 = vld [vmem:[#allocation7 + $0x1968] sm:$0xff]  ;;  %v3496_v12 = vunpack.c.h.s8.bf16 %v1664_v45 }
 0x99b   :  { %5766 = vmatprep.mubr.bf16.mxu0 %v8509_v9  ;;  %6391 = vmatpush1.bf16.msra.mxu1 %v3424_v22  ;;  %v1673_v22 = vld [vmem:[#allocation7 + $0x1978] sm:$0xff]  ;;  %v1703_v45 = vld [vmem:[#allocation7 + $0x1a68] sm:$0xff] }
 0x99c   :  { %6422 = vmatprep.mubr.bf16.mxu1 %v8509_v9  ;;  %5736 = vmatprep.subr.bf16.mxu0 %v3431_v33  ;;  %v3455_v9 = vunpack.c.l.s8.bf16 %v1647_v5  ;;  %v3494_v33 = vunpack.c.h.s8.bf16 %v1662_v3  ;;  %v3513_v7 = vunpack.c.h.s8.bf16 %v1673_v22 }
 0x99d   :  { %6392 = vmatprep.subr.bf16.mxu1 %v3433_v43  ;;  %v3503_v43 = vunpack.c.l.s8.bf16 %v1671_v13 }
 0x99e   :  { %5737 = vmatpush1.bf16.msra.mxu0 %v3430_v27  ;;  %v3505_v27 = vunpack.c.l.s8.bf16 %v1673_v22  ;;  %v1702_v22 = vld [vmem:[#allocation7 + $0x1a60] sm:$0xff] }
 0x99f   :  { %6393 = vmatpush1.bf16.msra.mxu1 %v3432_v47  ;;  %5738 = vmatprep.subr.bf16.mxu0 %v3439_v56  ;;  %v1672_v47 = vld [vmem:[#allocation7 + $0x1970] sm:$0xff]  ;;  %v3502_v56 = vunpack.c.l.s8.bf16 %v1670_v34 }
 0x9a0   :  { %6394 = vmatprep.subr.bf16.mxu1 %v3441_v6  ;;  %v3504_v30 = vunpack.c.l.s8.bf16 %v1672_v47  ;;  %v3511_v6 = vunpack.c.h.s8.bf16 %v1671_v13  ;;  %v3567_v13 = vunpack.c.l.s8.bf16 %v1703_v45 }
 0x9a2   :  { %5739 = vmatpush1.bf16.msra.mxu0 %v3438_v40  ;;  %v1679_v40 = vld [vmem:[#allocation7 + $0x19a8] sm:$0xff] }
 0x9a3   :  { %6395 = vmatpush1.bf16.msra.mxu1 %v3440_v23  ;;  %5740 = vmatprep.subr.bf16.mxu0 %v3447_v49  ;;  %v1681_v23 = vld [vmem:[#allocation7 + $0x19b8] sm:$0xff]  ;;  %v3510_v49 = vunpack.c.h.s8.bf16 %v1670_v34  ;;  %v3519_v5 = vunpack.c.l.s8.bf16 %v1679_v40 }
 0x9a4   :  { %6396 = vmatprep.subr.bf16.mxu1 %v3449_v55  ;;  %v3512_v55 = vunpack.c.h.s8.bf16 %v1672_v47  ;;  %v3529_v63 = vunpack.c.h.s8.bf16 %v1681_v23  ;;  %v1711_v47 = vld [vmem:[#allocation7 + $0x1aa8] sm:$0xff] }
 0x9a6   :  { %5741 = vmatpush1.bf16.msra.mxu0 %v3446_v37  ;;  %v3521_v37 = vunpack.c.l.s8.bf16 %v1681_v23  ;;  %v1712_v23 = vld [vmem:[#allocation7 + $0x1ab0] sm:$0xff] }
 0x9a7   :  { %6397 = vmatpush1.bf16.msra.mxu1 %v3448_v1  ;;  %5742 = vmatprep.subr.bf16.mxu0 %v3455_v9  ;;  %v1680_v1 = vld [vmem:[#allocation7 + $0x19b0] sm:$0xff]  ;;  %v3518_v9 = vunpack.c.l.s8.bf16 %v1678_v24 }
 0x9a8   :  { %6398 = vmatprep.subr.bf16.mxu1 %v3457_v18  ;;  %v3520_v26 = vunpack.c.l.s8.bf16 %v1680_v1  ;;  %v3527_v18 = vunpack.c.h.s8.bf16 %v1679_v40 }
 0x9aa   :  { %5743 = vmatpush1.bf16.msra.mxu0 %v3454_v39  ;;  %v1687_v39 = vld [vmem:[#allocation7 + $0x19e8] sm:$0xff] }
 0x9ab   :  { %6399 = vmatpush1.bf16.msra.mxu1 %v3456_v31  ;;  %5744 = vmatprep.subr.bf16.mxu0 %v3463_v14  ;;  %v1689_v31 = vld [vmem:[#allocation7 + $0x19f8] sm:$0xff]  ;;  %v3526_v14 = vunpack.c.h.s8.bf16 %v1678_v24  ;;  %v3535_v41 = vunpack.c.l.s8.bf16 %v1687_v39 }
 0x9ac   :  { %6400 = vmatprep.subr.bf16.mxu1 %v3465_v57  ;;  %v3528_v57 = vunpack.c.h.s8.bf16 %v1680_v1  ;;  %v3545_v38 = vunpack.c.h.s8.bf16 %v1689_v31  ;;  %v1721_v1 = vld [vmem:[#allocation7 + $0x1af8] sm:$0xff] }
 0x9ae   :  { %5745 = vmatpush1.bf16.msra.mxu0 %v3462_v50  ;;  %v3537_v50 = vunpack.c.l.s8.bf16 %v1689_v31  ;;  %v1720_v31 = vld [vmem:[#allocation7 + $0x1af0] sm:$0xff] }
 0x9af   :  { %6401 = vmatpush1.bf16.msra.mxu1 %v3464_v17  ;;  %5746 = vmatprep.subr.bf16.mxu0 %v3471_v10  ;;  %v1688_v17 = vld [vmem:[#allocation7 + $0x19f0] sm:$0xff]  ;;  %v3534_v10 = vunpack.c.l.s8.bf16 %v1686_v62 }
 0x9b0   :  { %6402 = vmatprep.subr.bf16.mxu1 %v3473_v58  ;;  %v3536_v11 = vunpack.c.l.s8.bf16 %v1688_v17  ;;  %v3543_v58 = vunpack.c.h.s8.bf16 %v1687_v39  ;;  %v3601_v39 = vunpack.c.l.s8.bf16 %v1721_v1 }
 0x9b2   :  { %5747 = vmatpush1.bf16.msra.mxu0 %v3470_v54  ;;  %v1695_v54 = vld [vmem:[#allocation7 + $0x1a28] sm:$0xff] }
 0x9b3   :  { %6403 = vmatpush1.bf16.msra.mxu1 %v3472_v60  ;;  %5748 = vmatprep.subr.bf16.mxu0 %v3479_v44  ;;  %v1697_v60 = vld [vmem:[#allocation7 + $0x1a38] sm:$0xff]  ;;  %v3542_v44 = vunpack.c.h.s8.bf16 %v1686_v62  ;;  %v3551_v35 = vunpack.c.l.s8.bf16 %v1695_v54  ;;  %v3609_v62 = vunpack.c.h.s8.bf16 %v1721_v1  ;;  %v1752_v1 = vld [vmem:[#allocation7 + $0x1bf0] sm:$0xff] }
 0x9b4   :  { %6404 = vmatprep.subr.bf16.mxu1 %v3481_v29  ;;  %v3544_v29 = vunpack.c.h.s8.bf16 %v1688_v17  ;;  %v1729_v17 = vld [vmem:[#allocation7 + $0x1b38] sm:$0xff] }
 0x9b6   :  { %5749 = vmatpush1.bf16.msra.mxu0 %v3478_v15  ;;  %v3553_v15 = vunpack.c.l.s8.bf16 %v1697_v60 }
 0x9b7   :  { %6405 = vmatpush1.bf16.msra.mxu1 %v3480_v20  ;;  %5750 = vmatprep.subr.bf16.mxu0 %v3487_v28  ;;  %v1696_v20 = vld [vmem:[#allocation7 + $0x1a30] sm:$0xff]  ;;  %v3550_v28 = vunpack.c.l.s8.bf16 %v1694_v2 }
 0x9b8   :  { %6406 = vmatprep.subr.bf16.mxu1 %v3489_v0  ;;  %v3552_v3 = vunpack.c.l.s8.bf16 %v1696_v20  ;;  %v3559_v0 = vunpack.c.h.s8.bf16 %v1695_v54  ;;  %v3617_v54 = vunpack.c.l.s8.bf16 %v1729_v17 }
 0x9ba   :  { %5751 = vmatpush1.bf16.msra.mxu0 %v3486_v16  ;;  %v3561_v16 = vunpack.c.h.s8.bf16 %v1697_v60  ;;  %v1728_v60 = vld [vmem:[#allocation7 + $0x1b30] sm:$0xff] }
 0x9bb   :  { %6407 = vmatpush1.bf16.msra.mxu1 %v3488_v21  ;;  %5752 = vmatprep.subr.bf16.mxu0 %v3495_v61  ;;  %v1705_v21 = vld [vmem:[#allocation7 + $0x1a78] sm:$0xff]  ;;  %v3558_v61 = vunpack.c.h.s8.bf16 %v1694_v2  ;;  %v3625_v2 = vunpack.c.h.s8.bf16 %v1729_v17  ;;  %v1760_v17 = vld [vmem:[#allocation7 + $0x1c30] sm:$0xff] }
 0x9bc   :  { %6408 = vmatprep.subr.bf16.mxu1 %v3497_v19  ;;  %v3560_v19 = vunpack.c.h.s8.bf16 %v1696_v20  ;;  %v1737_v20 = vld [vmem:[#allocation7 + $0x1b78] sm:$0xff] }
 0x9be   :  { %5753 = vmatpush1.bf16.msra.mxu0 %v3494_v33  ;;  %v3569_v33 = vunpack.c.l.s8.bf16 %v1705_v21 }
 0x9bf   :  { %6409 = vmatpush1.bf16.msra.mxu1 %v3496_v12  ;;  %5754 = vmatprep.subr.bf16.mxu0 %v3503_v43  ;;  %v1704_v12 = vld [vmem:[#allocation7 + $0x1a70] sm:$0xff]  ;;  %v3566_v43 = vunpack.c.l.s8.bf16 %v1702_v22 }
 0x9c0   :  { %6410 = vmatprep.subr.bf16.mxu1 %v3505_v27  ;;  %v3568_v34 = vunpack.c.l.s8.bf16 %v1704_v12  ;;  %v3577_v27 = vunpack.c.h.s8.bf16 %v1705_v21  ;;  %v1736_v21 = vld [vmem:[#allocation7 + $0x1b70] sm:$0xff] }
 0x9c2   :  { %5755 = vmatpush1.bf16.msra.mxu0 %v3502_v56  ;;  %v1713_v56 = vld [vmem:[#allocation7 + $0x1ab8] sm:$0xff] }
 0x9c3   :  { %6411 = vmatpush1.bf16.msra.mxu1 %v3504_v30  ;;  %5756 = vmatprep.subr.bf16.mxu0 %v3511_v6  ;;  %v3574_v30 = vunpack.c.h.s8.bf16 %v1702_v22  ;;  %v3576_v6 = vunpack.c.h.s8.bf16 %v1704_v12  ;;  %v3585_v40 = vunpack.c.l.s8.bf16 %v1713_v56  ;;  %v3593_v24 = vunpack.c.h.s8.bf16 %v1713_v56  ;;  %v1745_v12 = vld [vmem:[#allocation7 + $0x1bb8] sm:$0xff]  ;;  %v1744_v56 = vld [vmem:[#allocation7 + $0x1bb0] sm:$0xff] }
 0x9c4   :  { %6412 = vmatprep.subr.bf16.mxu1 %v3513_v7  ;;  %v1710_v7 = vld [vmem:[#allocation7 + $0x1aa0] sm:$0xff]  ;;  %v3641_v22 = vunpack.c.h.s8.bf16 %v1737_v20 }
 0x9c6   :  { %5757 = vmatpush1.bf16.msra.mxu0 %v3510_v49  ;;  %v3582_v49 = vunpack.c.l.s8.bf16 %v1710_v7 }
 0x9c7   :  { %6413 = vmatpush1.bf16.msra.mxu1 %v3512_v55  ;;  %5758 = vmatprep.subr.bf16.mxu0 %v3519_v5  ;;  %v3584_v55 = vunpack.c.l.s8.bf16 %v1712_v23  ;;  %v3591_v5 = vunpack.c.h.s8.bf16 %v1711_v47 }
 0x9c8   :  { %6414 = vmatprep.subr.bf16.mxu1 %v3521_v37  ;;  %v1719_v37 = vld [vmem:[#allocation7 + $0x1ae8] sm:$0xff] }
 0x9ca   :  { %5759 = vmatpush1.bf16.msra.mxu0 %v3518_v9  ;;  %v3590_v9 = vunpack.c.h.s8.bf16 %v1710_v7  ;;  %v3657_v7 = vunpack.c.h.s8.bf16 %v1745_v12 }
 0x9cb   :  { %6415 = vmatpush1.bf16.msra.mxu1 %v3520_v26  ;;  %5760 = vmatprep.subr.bf16.mxu0 %v3527_v18  ;;  %v3592_v26 = vunpack.c.h.s8.bf16 %v1712_v23  ;;  %v3599_v18 = vunpack.c.l.s8.bf16 %v1719_v37  ;;  %v1753_v23 = vld [vmem:[#allocation7 + $0x1bf8] sm:$0xff] }
 0x9cc   :  { %6416 = vmatprep.subr.bf16.mxu1 %v3529_v63  ;;  %v1718_v63 = vld [vmem:[#allocation7 + $0x1ae0] sm:$0xff] }
 0x9ce   :  { %5761 = vmatpush1.bf16.msra.mxu0 %v3526_v14  ;;  %v3598_v14 = vunpack.c.l.s8.bf16 %v1718_v63 }
 0x9cf   :  { %6417 = vmatpush1.bf16.msra.mxu1 %v3528_v57  ;;  %5762 = vmatprep.subr.bf16.mxu0 %v3535_v41  ;;  %v3600_v57 = vunpack.c.l.s8.bf16 %v1720_v31  ;;  %v3607_v41 = vunpack.c.h.s8.bf16 %v1719_v37  ;;  %v3665_v37 = vunpack.c.l.s8.bf16 %v1753_v23 }
 0x9d0   :  { %6418 = vmatprep.subr.bf16.mxu1 %v3537_v50  ;;  %v1727_v50 = vld [vmem:[#allocation7 + $0x1b28] sm:$0xff] }
 0x9d2   :  { %5763 = vmatpush1.bf16.msra.mxu0 %v3534_v10  ;;  %v3606_v10 = vunpack.c.h.s8.bf16 %v1718_v63  ;;  %v3673_v63 = vunpack.c.h.s8.bf16 %v1753_v23 }
 0x9d3   :  { %6419 = vmatpush1.bf16.msra.mxu1 %v3536_v11  ;;  %5764 = vmatprep.subr.bf16.mxu0 %v3543_v58  ;;  %v3608_v11 = vunpack.c.h.s8.bf16 %v1720_v31  ;;  %v3615_v58 = vunpack.c.l.s8.bf16 %v1727_v50  ;;  %v1761_v31 = vld [vmem:[#allocation7 + $0x1c38] sm:$0xff] }
 0x9d4   :  { %6420 = vmatprep.subr.bf16.mxu1 %v3545_v38  ;;  %v1726_v38 = vld [vmem:[#allocation7 + $0x1b20] sm:$0xff] }
 0x9d6   :  { %5765 = vmatpush1.bf16.msra.mxu0 %v3542_v44  ;;  %v3614_v44 = vunpack.c.l.s8.bf16 %v1726_v38 }
 0x9d7   :  { %6421 = vmatpush1.bf16.msra.mxu1 %v3544_v29  ;;  %5775 = vmatprep.subr.bf16.mxu0 %v3551_v35  ;;  %v3616_v29 = vunpack.c.l.s8.bf16 %v1728_v60  ;;  %v3623_v35 = vunpack.c.h.s8.bf16 %v1727_v50  ;;  %v3681_v50 = vunpack.c.l.s8.bf16 %v1761_v31 }
 0x9d8   :  { %6431 = vmatprep.subr.bf16.mxu1 %v3553_v15  ;;  %v1735_v15 = vld [vmem:[#allocation7 + $0x1b68] sm:$0xff] }
 0x9d9   :  { %5767 = vmatmul.mubr.bf16.vlgmr.msra.gmra.mrb[4].mxu0 %v8523_v48 }
 0x9da   :  { %6423 = vmatmul.mubr.bf16.vlgmr.msra.gmra.mrb[4].mxu1 %v8523_v48  ;;  %5776 = vmatpush1.bf16.msra.mxu0 %v3550_v28  ;;  %v3575_v48 = vunpack.c.h.s8.bf16 %v1703_v45  ;;  %v3622_v28 = vunpack.c.h.s8.bf16 %v1726_v38  ;;  %v1734_v45 = vld [vmem:[#allocation7 + $0x1b60] sm:$0xff]  ;;  %v1767_v38 = vld [vmem:[#allocation7 + $0x1c68] sm:$0xff] }
 0x9db   :  { %5807 = vmatprep.mubr.bf16.mxu0 %v8526_v51  ;;  %6432 = vmatpush1.bf16.msra.mxu1 %v3552_v3  ;;  %v3624_v3 = vunpack.c.h.s8.bf16 %v1728_v60  ;;  %v1769_v60 = vld [vmem:[#allocation7 + $0x1c78] sm:$0xff] }
 0x9dc   :  { %6463 = vmatprep.mubr.bf16.mxu1 %v8526_v51  ;;  %5777 = vmatprep.subr.bf16.mxu0 %v3559_v0  ;;  %v3583_v51 = vunpack.c.l.s8.bf16 %v1711_v47  ;;  %v3631_v0 = vunpack.c.l.s8.bf16 %v1735_v15  ;;  %v3649_v47 = vunpack.c.l.s8.bf16 %v1745_v12 }
 0x9dd   :  { %6433 = vmatprep.subr.bf16.mxu1 %v3561_v16  ;;  %v3633_v16 = vunpack.c.l.s8.bf16 %v1737_v20  ;;  %v1768_v20 = vld [vmem:[#allocation7 + $0x1c70] sm:$0xff] }
 0x9de   :  { %5778 = vmatpush1.bf16.msra.mxu0 %v3558_v61  ;;  %v3630_v61 = vunpack.c.l.s8.bf16 %v1734_v45 }
 0x9df   :  { %6434 = vmatpush1.bf16.msra.mxu1 %v3560_v19  ;;  %5779 = vmatprep.subr.bf16.mxu0 %v3567_v13  ;;  %v3632_v19 = vunpack.c.l.s8.bf16 %v1736_v21  ;;  %v3639_v13 = vunpack.c.h.s8.bf16 %v1735_v15  ;;  %v3697_v15 = vunpack.c.l.s8.bf16 %v1769_v60 }
 0x9e0   :  { %6435 = vmatprep.subr.bf16.mxu1 %v3569_v33  ;;  %v1743_v33 = vld [vmem:[#allocation7 + $0x1ba8] sm:$0xff] }
 0x9e2   :  { %5780 = vmatpush1.bf16.msra.mxu0 %v3566_v43  ;;  %v3638_v43 = vunpack.c.h.s8.bf16 %v1734_v45  ;;  %v1775_v45 = vld [vmem:[#allocation7 + $0x1ca8] sm:$0xff] }
 0x9e3   :  { %6436 = vmatpush1.bf16.msra.mxu1 %v3568_v34  ;;  %5781 = vmatprep.subr.bf16.mxu0 %v3575_v48  ;;  %v3640_v34 = vunpack.c.h.s8.bf16 %v1736_v21  ;;  %v3647_v48 = vunpack.c.l.s8.bf16 %v1743_v33 }
 0x9e4   :  { %6437 = vmatprep.subr.bf16.mxu1 %v3577_v27  ;;  %v1742_v27 = vld [vmem:[#allocation7 + $0x1ba0] sm:$0xff] }
 0x9e6   :  { %5782 = vmatpush1.bf16.msra.mxu0 %v3574_v30  ;;  %v3646_v30 = vunpack.c.l.s8.bf16 %v1742_v27 }
 0x9e7   :  { %6438 = vmatpush1.bf16.msra.mxu1 %v3576_v6  ;;  %5783 = vmatprep.subr.bf16.mxu0 %v3583_v51  ;;  %v3648_v6 = vunpack.c.l.s8.bf16 %v1744_v56  ;;  %v3655_v51 = vunpack.c.h.s8.bf16 %v1743_v33 }
 0x9e8   :  { %6439 = vmatprep.subr.bf16.mxu1 %v3585_v40  ;;  %v1751_v40 = vld [vmem:[#allocation7 + $0x1be8] sm:$0xff] }
 0x9ea   :  { %5784 = vmatpush1.bf16.msra.mxu0 %v3582_v49  ;;  %v3654_v49 = vunpack.c.h.s8.bf16 %v1742_v27  ;;  %v1785_v27 = vld [vmem:[#allocation7 + $0x1cf8] sm:$0xff] }
 0x9eb   :  { %6440 = vmatpush1.bf16.msra.mxu1 %v3584_v55  ;;  %5785 = vmatprep.subr.bf16.mxu0 %v3591_v5  ;;  %v3656_v55 = vunpack.c.h.s8.bf16 %v1744_v56  ;;  %v3663_v5 = vunpack.c.l.s8.bf16 %v1751_v40 }
 0x9ec   :  { %6441 = vmatprep.subr.bf16.mxu1 %v3593_v24  ;;  %v1750_v24 = vld [vmem:[#allocation7 + $0x1be0] sm:$0xff] }
 0x9ee   :  { %5786 = vmatpush1.bf16.msra.mxu0 %v3590_v9  ;;  %v3662_v9 = vunpack.c.l.s8.bf16 %v1750_v24 }
 0x9ef   :  { %6442 = vmatpush1.bf16.msra.mxu1 %v3592_v26  ;;  %5787 = vmatprep.subr.bf16.mxu0 %v3599_v18  ;;  %v3664_v26 = vunpack.c.l.s8.bf16 %v1752_v1  ;;  %v3671_v18 = vunpack.c.h.s8.bf16 %v1751_v40 }
 0x9f0   :  { %6443 = vmatprep.subr.bf16.mxu1 %v3601_v39  ;;  %v1759_v39 = vld [vmem:[#allocation7 + $0x1c28] sm:$0xff] }
 0x9f2   :  { %5788 = vmatpush1.bf16.msra.mxu0 %v3598_v14  ;;  %v3670_v14 = vunpack.c.h.s8.bf16 %v1750_v24  ;;  %v1793_v24 = vld [vmem:[#allocation7 + $0x1d38] sm:$0xff] }
 0x9f3   :  { %6444 = vmatpush1.bf16.msra.mxu1 %v3600_v57  ;;  %5789 = vmatprep.subr.bf16.mxu0 %v3607_v41  ;;  %v3672_v57 = vunpack.c.h.s8.bf16 %v1752_v1  ;;  %v3679_v41 = vunpack.c.l.s8.bf16 %v1759_v39 }
 0x9f4   :  { %6445 = vmatprep.subr.bf16.mxu1 %v3609_v62  ;;  %v1758_v62 = vld [vmem:[#allocation7 + $0x1c20] sm:$0xff] }
 0x9f6   :  { %5790 = vmatpush1.bf16.msra.mxu0 %v3606_v10  ;;  %v3678_v10 = vunpack.c.l.s8.bf16 %v1758_v62 }
 0x9f7   :  { %6446 = vmatpush1.bf16.msra.mxu1 %v3608_v11  ;;  %5791 = vmatprep.subr.bf16.mxu0 %v3615_v58  ;;  %v3680_v11 = vunpack.c.l.s8.bf16 %v1760_v17  ;;  %v3687_v58 = vunpack.c.h.s8.bf16 %v1759_v39 }
 0x9f8   :  { %6447 = vmatprep.subr.bf16.mxu1 %v3617_v54  ;;  %v3689_v54 = vunpack.c.h.s8.bf16 %v1761_v31 }
 0x9fa   :  { %5792 = vmatpush1.bf16.msra.mxu0 %v3614_v44  ;;  %v3686_v44 = vunpack.c.h.s8.bf16 %v1758_v62  ;;  %v1801_v62 = vld [vmem:[#allocation7 + $0x1d78] sm:$0xff] }
 0x9fb   :  { %6448 = vmatpush1.bf16.msra.mxu1 %v3616_v29  ;;  %5793 = vmatprep.subr.bf16.mxu0 %v3623_v35  ;;  %v3688_v29 = vunpack.c.h.s8.bf16 %v1760_v17  ;;  %v3695_v35 = vunpack.c.l.s8.bf16 %v1767_v38 }
 0x9fc   :  { %6449 = vmatprep.subr.bf16.mxu1 %v3625_v2  ;;  %v1766_v2 = vld [vmem:[#allocation7 + $0x1c60] sm:$0xff] }
 0x9fd   :  { %v3702_v21 = vunpack.c.h.s8.bf16 %v1766_v2 }
 0x9fe   :  { %5794 = vmatpush1.bf16.msra.mxu0 %v3622_v28  ;;  %v3694_v28 = vunpack.c.l.s8.bf16 %v1766_v2  ;;  %v1809_v2 = vld [vmem:[#allocation7 + $0x1db8] sm:$0xff] }
 0x9ff   :  { %6450 = vmatpush1.bf16.msra.mxu1 %v3624_v3  ;;  %5795 = vmatprep.subr.bf16.mxu0 %v3631_v0  ;;  %v3696_v3 = vunpack.c.l.s8.bf16 %v1768_v20  ;;  %v3705_v0 = vunpack.c.h.s8.bf16 %v1769_v60 }
 0xa00   :  { %6451 = vmatprep.subr.bf16.mxu1 %v3633_v16  ;;  %v1777_v16 = vld [vmem:[#allocation7 + $0x1cb8] sm:$0xff] }
 0xa02   :  { %5796 = vmatpush1.bf16.msra.mxu0 %v3630_v61  ;;  %v3704_v61 = vunpack.c.h.s8.bf16 %v1768_v20 }
 0xa03   :  { %6452 = vmatpush1.bf16.msra.mxu1 %v3632_v19  ;;  %5797 = vmatprep.subr.bf16.mxu0 %v3639_v13  ;;  %v1774_v19 = vld [vmem:[#allocation7 + $0x1ca0] sm:$0xff]  ;;  %v3713_v13 = vunpack.c.l.s8.bf16 %v1777_v16 }
 0xa04   :  { %6453 = vmatprep.subr.bf16.mxu1 %v3641_v22  ;;  %v1776_v22 = vld [vmem:[#allocation7 + $0x1cb0] sm:$0xff]  ;;  %v3710_v33 = vunpack.c.l.s8.bf16 %v1774_v19 }
 0xa05   :  { %v3712_v12 = vunpack.c.l.s8.bf16 %v1776_v22  ;;  %v3720_v56 = vunpack.c.h.s8.bf16 %v1776_v22 }
 0xa06   :  { %5798 = vmatpush1.bf16.msra.mxu0 %v3638_v43  ;;  %v3719_v43 = vunpack.c.h.s8.bf16 %v1775_v45 }
 0xa07   :  { %6454 = vmatpush1.bf16.msra.mxu1 %v3640_v34  ;;  %5799 = vmatprep.subr.bf16.mxu0 %v3647_v48  ;;  %v3721_v34 = vunpack.c.h.s8.bf16 %v1777_v16  ;;  %v1783_v48 = vld [vmem:[#allocation7 + $0x1ce8] sm:$0xff] }
 0xa08   :  { %6455 = vmatprep.subr.bf16.mxu1 %v3649_v47  ;;  %v3718_v47 = vunpack.c.h.s8.bf16 %v1774_v19  ;;  %v1817_v19 = vld [vmem:[#allocation7 + $0x1df8] sm:$0xff] }
 0xa0a   :  { %5800 = vmatpush1.bf16.msra.mxu0 %v3646_v30  ;;  %v3727_v30 = vunpack.c.l.s8.bf16 %v1783_v48 }
 0xa0b   :  { %6456 = vmatpush1.bf16.msra.mxu1 %v3648_v6  ;;  %5801 = vmatprep.subr.bf16.mxu0 %v3655_v51  ;;  %v1782_v6 = vld [vmem:[#allocation7 + $0x1ce0] sm:$0xff]  ;;  %v3729_v51 = vunpack.c.l.s8.bf16 %v1785_v27 }
 0xa0c   :  { %6457 = vmatprep.subr.bf16.mxu1 %v3657_v7  ;;  %v1784_v7 = vld [vmem:[#allocation7 + $0x1cf0] sm:$0xff]  ;;  %v3726_v40 = vunpack.c.l.s8.bf16 %v1782_v6 }
 0xa0d   :  { %v3728_v23 = vunpack.c.l.s8.bf16 %v1784_v7  ;;  %v3736_v1 = vunpack.c.h.s8.bf16 %v1784_v7 }
 0xa0e   :  { %5802 = vmatpush1.bf16.msra.mxu0 %v3654_v49  ;;  %v3735_v49 = vunpack.c.h.s8.bf16 %v1783_v48 }
 0xa0f   :  { %6458 = vmatpush1.bf16.msra.mxu1 %v3656_v55  ;;  %5803 = vmatprep.subr.bf16.mxu0 %v3663_v5  ;;  %v3737_v55 = vunpack.c.h.s8.bf16 %v1785_v27  ;;  %v1791_v5 = vld [vmem:[#allocation7 + $0x1d28] sm:$0xff] }
 0xa10   :  { %6459 = vmatprep.subr.bf16.mxu1 %v3665_v37  ;;  %v3734_v37 = vunpack.c.h.s8.bf16 %v1782_v6  ;;  %v1825_v6 = vld [vmem:[#allocation7 + $0x1e38] sm:$0xff] }
 0xa12   :  { %5804 = vmatpush1.bf16.msra.mxu0 %v3662_v9  ;;  %v3743_v9 = vunpack.c.l.s8.bf16 %v1791_v5 }
 0xa13   :  { %6460 = vmatpush1.bf16.msra.mxu1 %v3664_v26  ;;  %5805 = vmatprep.subr.bf16.mxu0 %v3671_v18  ;;  %v1790_v26 = vld [vmem:[#allocation7 + $0x1d20] sm:$0xff]  ;;  %v3745_v18 = vunpack.c.l.s8.bf16 %v1793_v24 }
 0xa14   :  { %6461 = vmatprep.subr.bf16.mxu1 %v3673_v63  ;;  %v1792_v63 = vld [vmem:[#allocation7 + $0x1d30] sm:$0xff]  ;;  %v3742_v39 = vunpack.c.l.s8.bf16 %v1790_v26 }
 0xa15   :  { %v3744_v31 = vunpack.c.l.s8.bf16 %v1792_v63  ;;  %v3752_v17 = vunpack.c.h.s8.bf16 %v1792_v63 }
 0xa16   :  { %5806 = vmatpush1.bf16.msra.mxu0 %v3670_v14  ;;  %v3751_v14 = vunpack.c.h.s8.bf16 %v1791_v5 }
 0xa17   :  { %6462 = vmatpush1.bf16.msra.mxu1 %v3672_v57  ;;  %5816 = vmatprep.subr.bf16.mxu0 %v3679_v41  ;;  %v3753_v57 = vunpack.c.h.s8.bf16 %v1793_v24  ;;  %v1799_v41 = vld [vmem:[#allocation7 + $0x1d68] sm:$0xff] }
 0xa18   :  { %6472 = vmatprep.subr.bf16.mxu1 %v3681_v50  ;;  %v3750_v50 = vunpack.c.h.s8.bf16 %v1790_v26  ;;  %v1833_v26 = vld [vmem:[#allocation7 + $0x1e78] sm:$0xff] }
 0xa19   :  { %5808 = vmatmul.mubr.bf16.vlgmr.msra.gmra.mrb[4].mxu0 %v8542_v46 }
 0xa1a   :  { %6464 = vmatmul.mubr.bf16.vlgmr.msra.gmra.mrb[4].mxu1 %v8542_v46  ;;  %5817 = vmatpush1.bf16.msra.mxu0 %v3678_v10  ;;  %v3703_v46 = vunpack.c.h.s8.bf16 %v1767_v38  ;;  %v3759_v10 = vunpack.c.l.s8.bf16 %v1799_v41  ;;  %v1800_v38 = vld [vmem:[#allocation7 + $0x1d70] sm:$0xff] }
 0xa1b   :  { %5848 = vmatprep.mubr.bf16.mxu0 %v8545_v53  ;;  %6473 = vmatpush1.bf16.msra.mxu1 %v3680_v11  ;;  %v1798_v11 = vld [vmem:[#allocation7 + $0x1d60] sm:$0xff]  ;;  %v3760_v60 = vunpack.c.l.s8.bf16 %v1800_v38  ;;  %v3768_v20 = vunpack.c.h.s8.bf16 %v1800_v38 }
 0xa1c   :  { %6504 = vmatprep.mubr.bf16.mxu1 %v8545_v53  ;;  %5818 = vmatprep.subr.bf16.mxu0 %v3687_v58  ;;  %v3711_v53 = vunpack.c.l.s8.bf16 %v1775_v45  ;;  %v3761_v58 = vunpack.c.l.s8.bf16 %v1801_v62  ;;  %v1838_v38 = vld [vmem:[#allocation7 + $0x1ea0] sm:$0xff] }
 0xa1d   :  { %6474 = vmatprep.subr.bf16.mxu1 %v3689_v54  ;;  %v3758_v54 = vunpack.c.l.s8.bf16 %v1798_v11 }
 0xa1e   :  { %5819 = vmatpush1.bf16.msra.mxu0 %v3686_v44  ;;  %v3767_v44 = vunpack.c.h.s8.bf16 %v1799_v41 }
 0xa1f   :  { %6475 = vmatpush1.bf16.msra.mxu1 %v3688_v29  ;;  %5820 = vmatprep.subr.bf16.mxu0 %v3695_v35  ;;  %v3769_v29 = vunpack.c.h.s8.bf16 %v1801_v62  ;;  %v1807_v35 = vld [vmem:[#allocation7 + $0x1da8] sm:$0xff] }
 0xa20   :  { %6476 = vmatprep.subr.bf16.mxu1 %v3697_v15  ;;  %v3766_v15 = vunpack.c.h.s8.bf16 %v1798_v11 }
 0xa22   :  { %5821 = vmatpush1.bf16.msra.mxu0 %v3694_v28  ;;  %v3775_v28 = vunpack.c.l.s8.bf16 %v1807_v35 }
 0xa23   :  { %6477 = vmatpush1.bf16.msra.mxu1 %v3696_v3  ;;  %5822 = vmatprep.subr.bf16.mxu0 %v3703_v46  ;;  %v1806_v3 = vld [vmem:[#allocation7 + $0x1da0] sm:$0xff]  ;;  %v3777_v46 = vunpack.c.l.s8.bf16 %v1809_v2 }
 0xa24   :  { %6478 = vmatprep.subr.bf16.mxu1 %v3705_v0  ;;  %v1808_v0 = vld [vmem:[#allocation7 + $0x1db0] sm:$0xff]  ;;  %v3774_v45 = vunpack.c.l.s8.bf16 %v1806_v3 }
 0xa25   :  { %v3776_v16 = vunpack.c.l.s8.bf16 %v1808_v0  ;;  %v3784_v22 = vunpack.c.h.s8.bf16 %v1808_v0  ;;  %v1846_v0 = vld [vmem:[#allocation7 + $0x1ee0] sm:$0xff] }
 0xa26   :  { %5823 = vmatpush1.bf16.msra.mxu0 %v3702_v21  ;;  %v3783_v21 = vunpack.c.h.s8.bf16 %v1807_v35 }
 0xa27   :  { %6479 = vmatpush1.bf16.msra.mxu1 %v3704_v61  ;;  %5824 = vmatprep.subr.bf16.mxu0 %v3711_v53  ;;  %v3785_v61 = vunpack.c.h.s8.bf16 %v1809_v2  ;;  %v1815_v53 = vld [vmem:[#allocation7 + $0x1de8] sm:$0xff] }
 0xa28   :  { %6480 = vmatprep.subr.bf16.mxu1 %v3713_v13  ;;  %v3782_v13 = vunpack.c.h.s8.bf16 %v1806_v3 }
 0xa2a   :  { %5825 = vmatpush1.bf16.msra.mxu0 %v3710_v33  ;;  %v3791_v33 = vunpack.c.l.s8.bf16 %v1815_v53 }
 0xa2b   :  { %6481 = vmatpush1.bf16.msra.mxu1 %v3712_v12  ;;  %5826 = vmatprep.subr.bf16.mxu0 %v3719_v43  ;;  %v1814_v12 = vld [vmem:[#allocation7 + $0x1de0] sm:$0xff]  ;;  %v3793_v43 = vunpack.c.l.s8.bf16 %v1817_v19 }
 0xa2c   :  { %6482 = vmatprep.subr.bf16.mxu1 %v3721_v34  ;;  %v1816_v34 = vld [vmem:[#allocation7 + $0x1df0] sm:$0xff]  ;;  %v3790_v48 = vunpack.c.l.s8.bf16 %v1814_v12 }
 0xa2d   :  { %v3792_v27 = vunpack.c.l.s8.bf16 %v1816_v34  ;;  %v3800_v7 = vunpack.c.h.s8.bf16 %v1816_v34  ;;  %v1854_v34 = vld [vmem:[#allocation7 + $0x1f20] sm:$0xff] }
 0xa2e   :  { %5827 = vmatpush1.bf16.msra.mxu0 %v3718_v47  ;;  %v3799_v47 = vunpack.c.h.s8.bf16 %v1815_v53 }
 0xa2f   :  { %6483 = vmatpush1.bf16.msra.mxu1 %v3720_v56  ;;  %5828 = vmatprep.subr.bf16.mxu0 %v3727_v30  ;;  %v3801_v56 = vunpack.c.h.s8.bf16 %v1817_v19  ;;  %v1823_v30 = vld [vmem:[#allocation7 + $0x1e28] sm:$0xff] }
 0xa30   :  { %6484 = vmatprep.subr.bf16.mxu1 %v3729_v51  ;;  %v3798_v51 = vunpack.c.h.s8.bf16 %v1814_v12 }
 0xa32   :  { %5829 = vmatpush1.bf16.msra.mxu0 %v3726_v40  ;;  %v3807_v40 = vunpack.c.l.s8.bf16 %v1823_v30 }
 0xa33   :  { %6485 = vmatpush1.bf16.msra.mxu1 %v3728_v23  ;;  %5830 = vmatprep.subr.bf16.mxu0 %v3735_v49  ;;  %v1822_v23 = vld [vmem:[#allocation7 + $0x1e20] sm:$0xff]  ;;  %v3809_v49 = vunpack.c.l.s8.bf16 %v1825_v6 }
 0xa34   :  { %6486 = vmatprep.subr.bf16.mxu1 %v3737_v55  ;;  %v1824_v55 = vld [vmem:[#allocation7 + $0x1e30] sm:$0xff]  ;;  %v3806_v5 = vunpack.c.l.s8.bf16 %v1822_v23 }
 0xa35   :  { %v3808_v24 = vunpack.c.l.s8.bf16 %v1824_v55  ;;  %v3816_v63 = vunpack.c.h.s8.bf16 %v1824_v55  ;;  %v1862_v55 = vld [vmem:[#allocation7 + $0x1f60] sm:$0xff] }
 0xa36   :  { %5831 = vmatpush1.bf16.msra.mxu0 %v3734_v37  ;;  %v3815_v37 = vunpack.c.h.s8.bf16 %v1823_v30 }
 0xa37   :  { %6487 = vmatpush1.bf16.msra.mxu1 %v3736_v1  ;;  %5832 = vmatprep.subr.bf16.mxu0 %v3743_v9  ;;  %v1831_v1 = vld [vmem:[#allocation7 + $0x1e68] sm:$0xff]  ;;  %v3817_v9 = vunpack.c.h.s8.bf16 %v1825_v6 }
 0xa38   :  { %6488 = vmatprep.subr.bf16.mxu1 %v3745_v18  ;;  %v3814_v18 = vunpack.c.h.s8.bf16 %v1822_v23 }
 0xa3a   :  { %5833 = vmatpush1.bf16.msra.mxu0 %v3742_v39  ;;  %v3823_v39 = vunpack.c.l.s8.bf16 %v1831_v1 }
 0xa3b   :  { %6489 = vmatpush1.bf16.msra.mxu1 %v3744_v31  ;;  %5834 = vmatprep.subr.bf16.mxu0 %v3751_v14  ;;  %v1830_v31 = vld [vmem:[#allocation7 + $0x1e60] sm:$0xff]  ;;  %v3825_v14 = vunpack.c.l.s8.bf16 %v1833_v26 }
 0xa3c   :  { %6490 = vmatprep.subr.bf16.mxu1 %v3753_v57  ;;  %v1832_v57 = vld [vmem:[#allocation7 + $0x1e70] sm:$0xff]  ;;  %v3822_v41 = vunpack.c.l.s8.bf16 %v1830_v31  ;;  %v3830_v11 = vunpack.c.h.s8.bf16 %v1830_v31 }
 0xa3d   :  { %v3824_v62 = vunpack.c.l.s8.bf16 %v1832_v57 }
 0xa3e   :  { %5835 = vmatpush1.bf16.msra.mxu0 %v3750_v50  ;;  %v3833_v50 = vunpack.c.h.s8.bf16 %v1833_v26 }
 0xa3f   :  { %6491 = vmatpush1.bf16.msra.mxu1 %v3752_v17  ;;  %5836 = vmatprep.subr.bf16.mxu0 %v3759_v10  ;;  %v1839_v17 = vld [vmem:[#allocation7 + $0x1ea8] sm:$0xff]  ;;  %v1841_v10 = vld [vmem:[#allocation7 + $0x1eb8] sm:$0xff] }
 0xa40   :  { %6492 = vmatprep.subr.bf16.mxu1 %v3761_v58  ;;  %v3832_v58 = vunpack.c.h.s8.bf16 %v1832_v57  ;;  %v3847_v35 = vunpack.c.h.s8.bf16 %v1839_v17  ;;  %v3849_v2 = vunpack.c.h.s8.bf16 %v1841_v10  ;;  %v1870_v57 = vld [vmem:[#allocation7 + $0x1fa0] sm:$0xff] }
 0xa42   :  { %5837 = vmatpush1.bf16.msra.mxu0 %v3758_v54  ;;  %v3841_v54 = vunpack.c.l.s8.bf16 %v1841_v10  ;;  %v3902_v10 = vunpack.c.l.s8.bf16 %v1870_v57 }
 0xa43   :  { %6493 = vmatpush1.bf16.msra.mxu1 %v3760_v60  ;;  %5838 = vmatprep.subr.bf16.mxu0 %v3767_v44  ;;  %v1840_v60 = vld [vmem:[#allocation7 + $0x1eb0] sm:$0xff]  ;;  %v3838_v44 = vunpack.c.l.s8.bf16 %v1838_v38 }
 0xa44   :  { %6494 = vmatprep.subr.bf16.mxu1 %v3769_v29  ;;  %v3840_v29 = vunpack.c.l.s8.bf16 %v1840_v60  ;;  %v3848_v3 = vunpack.c.h.s8.bf16 %v1840_v60  ;;  %v1881_v60 = vld [vmem:[#allocation7 + $0x1ff8] sm:$0xff] }
 0xa46   :  { %5839 = vmatpush1.bf16.msra.mxu0 %v3766_v15  ;;  %v1847_v15 = vld [vmem:[#allocation7 + $0x1ee8] sm:$0xff] }
 0xa47   :  { %6495 = vmatpush1.bf16.msra.mxu1 %v3768_v20  ;;  %5840 = vmatprep.subr.bf16.mxu0 %v3775_v28  ;;  %v1849_v20 = vld [vmem:[#allocation7 + $0x1ef8] sm:$0xff]  ;;  %v3846_v28 = vunpack.c.h.s8.bf16 %v1838_v38  ;;  %v3863_v53 = vunpack.c.h.s8.bf16 %v1847_v15  ;;  %v1879_v38 = vld [vmem:[#allocation7 + $0x1fe8] sm:$0xff] }
 0xa48   :  { %6496 = vmatprep.subr.bf16.mxu1 %v3777_v46  ;;  %v3855_v46 = vunpack.c.l.s8.bf16 %v1847_v15  ;;  %v3865_v19 = vunpack.c.h.s8.bf16 %v1849_v20  ;;  %v3919_v15 = vunpack.c.l.s8.bf16 %v1879_v38 }
 0xa4a   :  { %5841 = vmatpush1.bf16.msra.mxu0 %v3774_v45  ;;  %v3857_v45 = vunpack.c.l.s8.bf16 %v1849_v20  ;;  %v1878_v20 = vld [vmem:[#allocation7 + $0x1fe0] sm:$0xff] }
 0xa4b   :  { %6497 = vmatpush1.bf16.msra.mxu1 %v3776_v16  ;;  %5842 = vmatprep.subr.bf16.mxu0 %v3783_v21  ;;  %v1848_v16 = vld [vmem:[#allocation7 + $0x1ef0] sm:$0xff]  ;;  %v3854_v21 = vunpack.c.l.s8.bf16 %v1846_v0 }
 0xa4c   :  { %6498 = vmatprep.subr.bf16.mxu1 %v3785_v61  ;;  %v3856_v61 = vunpack.c.l.s8.bf16 %v1848_v16  ;;  %v3864_v12 = vunpack.c.h.s8.bf16 %v1848_v16 }
 0xa4e   :  { %5843 = vmatpush1.bf16.msra.mxu0 %v3782_v13  ;;  %v1855_v13 = vld [vmem:[#allocation7 + $0x1f28] sm:$0xff] }
 0xa4f   :  { %6499 = vmatpush1.bf16.msra.mxu1 %v3784_v22  ;;  %5844 = vmatprep.subr.bf16.mxu0 %v3791_v33  ;;  %v1857_v22 = vld [vmem:[#allocation7 + $0x1f38] sm:$0xff]  ;;  %v3862_v33 = vunpack.c.h.s8.bf16 %v1846_v0  ;;  %v3879_v30 = vunpack.c.h.s8.bf16 %v1855_v13 }
 0xa50   :  { %6500 = vmatprep.subr.bf16.mxu1 %v3793_v43  ;;  %v3871_v43 = vunpack.c.l.s8.bf16 %v1855_v13  ;;  %v3881_v6 = vunpack.c.h.s8.bf16 %v1857_v22 }
 0xa52   :  { %5845 = vmatpush1.bf16.msra.mxu0 %v3790_v48  ;;  %v3873_v48 = vunpack.c.l.s8.bf16 %v1857_v22 }
 0xa53   :  { %6501 = vmatpush1.bf16.msra.mxu1 %v3792_v27  ;;  %5846 = vmatprep.subr.bf16.mxu0 %v3799_v47  ;;  %v1856_v27 = vld [vmem:[#allocation7 + $0x1f30] sm:$0xff]  ;;  %v3870_v47 = vunpack.c.l.s8.bf16 %v1854_v34 }
 0xa54   :  { %6502 = vmatprep.subr.bf16.mxu1 %v3801_v56  ;;  %v3872_v56 = vunpack.c.l.s8.bf16 %v1856_v27  ;;  %v3880_v23 = vunpack.c.h.s8.bf16 %v1856_v27  ;;  %v7783_v27 = vld [vmem:[%s8886_s5 + $0x80] sm:$0xff]  }
 0xa56   :  { %5847 = vmatpush1.bf16.msra.mxu0 %v3798_v51  ;;  %v1863_v51 = vld [vmem:[#allocation7 + $0x1f68] sm:$0xff] }
 0xa57   :  { %6503 = vmatpush1.bf16.msra.mxu1 %v3800_v7  ;;  %5857 = vmatprep.subr.bf16.mxu0 %v3807_v40  ;;  %v1865_v7 = vld [vmem:[#allocation7 + $0x1f78] sm:$0xff]  ;;  %v3878_v40 = vunpack.c.h.s8.bf16 %v1854_v34 }
 0xa58   :  { %6513 = vmatprep.subr.bf16.mxu1 %v3809_v49  ;;  %v3887_v49 = vunpack.c.l.s8.bf16 %v1863_v51  ;;  %v3897_v26 = vunpack.c.h.s8.bf16 %v1865_v7 }
 0xa59   :  { %5849 = vmatmul.mubr.bf16.vlgmr.msra.gmra.mrb[4].mxu0 %v8559_v8 }
 0xa5a   :  { %6505 = vmatmul.mubr.bf16.vlgmr.msra.gmra.mrb[4].mxu1 %v8559_v8  ;;  %5858 = vmatpush1.bf16.msra.mxu0 %v3806_v5  ;;  %v3831_v8 = vunpack.c.h.s8.bf16 %v1831_v1  ;;  %v3889_v5 = vunpack.c.l.s8.bf16 %v1865_v7  ;;  %v7787_v7 = vld [vmem:[%s8886_s5 + $0x88] sm:$0xff]  }
 0xa5b   :  { %5889 = vmatprep.mubr.bf16.mxu0 %v8562_v59  ;;  %6514 = vmatpush1.bf16.msra.mxu1 %v3808_v24  ;;  %v1864_v24 = vld [vmem:[#allocation7 + $0x1f70] sm:$0xff] }
 0xa5c   :  { %6545 = vmatprep.mubr.bf16.mxu1 %v8562_v59  ;;  %5859 = vmatprep.subr.bf16.mxu0 %v3815_v37  ;;  %v3839_v59 = vunpack.c.l.s8.bf16 %v1839_v17  ;;  %v3886_v37 = vunpack.c.l.s8.bf16 %v1862_v55  ;;  %v3888_v1 = vunpack.c.l.s8.bf16 %v1864_v24  ;;  %v3896_v31 = vunpack.c.h.s8.bf16 %v1864_v24  ;;  %v7794_v24 = vld [vmem:[%s8886_s5 + $0x18] sm:$0xff]  }
 0xa5d   :  { %6515 = vmatprep.subr.bf16.mxu1 %v3817_v9  ;;  %v3895_v9 = vunpack.c.h.s8.bf16 %v1863_v51  ;;  %v6570_v17 = vsub.s32 3, %v8088_v4  ;;  %v7786_v51 = vld [vmem:[%s8886_s5 + $0x8] sm:$0xff]  }
 0xa5e   :  { %5860 = vmatpush1.bf16.msra.mxu0 %v3814_v18  ;;  %v1871_v18 = vld [vmem:[#allocation7 + $0x1fa8] sm:$0xff] }
 0xa5f   :  { %6516 = vmatpush1.bf16.msra.mxu1 %v3816_v63  ;;  %5861 = vmatprep.subr.bf16.mxu0 %v3823_v39  ;;  %v1873_v63 = vld [vmem:[#allocation7 + $0x1fb8] sm:$0xff]  ;;  %v3894_v39 = vunpack.c.h.s8.bf16 %v1862_v55 }
 0xa60   :  { %6517 = vmatprep.subr.bf16.mxu1 %v3825_v14  ;;  %v3903_v14 = vunpack.c.l.s8.bf16 %v1871_v18  ;;  %v7792_v55 = vld [vmem:[%s8886_s5 + $0x58] sm:$0xff]  }
 0xa62   :  { %5862 = vmatpush1.bf16.msra.mxu0 %v3822_v41  ;;  %v3905_v41 = vunpack.c.l.s8.bf16 %v1873_v63 }
 0xa63   :  { %6518 = vmatpush1.bf16.msra.mxu1 %v3824_v62  ;;  %5863 = vmatprep.subr.bf16.mxu0 %v3831_v8  ;;  %v1872_v62 = vld [vmem:[#allocation7 + $0x1fb0] sm:$0xff]  ;;  %v6562_v8 = vsub.s32 1, %v8088_v4 }
 0xa64   :  { %6519 = vmatprep.subr.bf16.mxu1 %v3833_v50  ;;  %v8644_v50 = vld [vmem:[#allocation9] sm:$0xff] }
 0xa66   :  { %5864 = vmatpush1.bf16.msra.mxu0 %v3830_v11  ;;  %v3904_v11 = vunpack.c.l.s8.bf16 %v1872_v62 }
 0xa67   :  { %6520 = vmatpush1.bf16.msra.mxu1 %v3832_v58  ;;  %5865 = vmatprep.subr.bf16.mxu0 %v3839_v59  ;;  %v3911_v58 = vunpack.c.h.s8.bf16 %v1871_v18  ;;  %v3913_v59 = vunpack.c.h.s8.bf16 %v1873_v63  ;;  %v7797_v18 = vld [vmem:[%s8886_s5 + $0xe0] sm:$0xff]  }
 0xa68   :  { %6521 = vmatprep.subr.bf16.mxu1 %v3841_v54  ;;  %v6563_v54 = vrot.slane %v8644_v50, %v6562_v8  ;;  %v7798_v63 = vld [vmem:[%s8886_s5 + $0x20] sm:$0xff]  }
 0xa6a   :  { %5866 = vmatpush1.bf16.msra.mxu0 %v3838_v44  ;;  %v8648_v44 = vld [vmem:[#allocation10] sm:$0xff] }
 0xa6b   :  { %6522 = vmatpush1.bf16.msra.mxu1 %v3840_v29  ;;  %5867 = vmatprep.subr.bf16.mxu0 %v3847_v35  ;;  %v6571_v29 = vrot.slane %v8644_v50, %v6570_v17  ;;  %v3910_v35 = vunpack.c.h.s8.bf16 %v1870_v57  ;;  %v6613_v0 = vrot.slane %v8648_v44, %v6562_v8  ;;  %v6621_v16 = vrot.slane %v8648_v44, %v6570_v17 }
 0xa6c   :  { %6523 = vmatprep.subr.bf16.mxu1 %v3849_v2  ;;  %v3912_v2 = vunpack.c.h.s8.bf16 %v1872_v62  ;;  %v7802_v62 = vld [vmem:[%s8886_s5 + $0x28] sm:$0xff]  }
 0xa6e   :  { %5868 = vmatpush1.bf16.msra.mxu0 %v3846_v28  ;;  %v3921_v28 = vunpack.c.l.s8.bf16 %v1881_v60 }
 0xa6f   :  { %6524 = vmatpush1.bf16.msra.mxu1 %v3848_v3  ;;  %5869 = vmatprep.subr.bf16.mxu0 %v3855_v46  ;;  %v1880_v3 = vld [vmem:[#allocation7 + $0x1ff0] sm:$0xff]  ;;  %v6597_v46 = vmul.f32 %v6563_v54, %v8591_v36 }
 0xa70   :  { %6525 = vmatprep.subr.bf16.mxu1 %v3857_v45  ;;  %v6599_v45 = vmul.f32 %v6571_v29, %v8593_v42  ;;  %v3928_v36 = vunpack.c.h.s8.bf16 %v1880_v3  ;;  %v7780_v42 = vld [vmem:[%s8886_s5 + $0x40] sm:$0xff]  }
 0xa71   :  { %v6647_v13 = vadd.f32 %v6613_v0, %v6597_v46  ;;  %v7813_v46 = vld [vmem:[%s8886_s5 + $0x1c0] sm:$0xff]  }
 0xa72   :  { %5870 = vmatpush1.bf16.msra.mxu0 %v3854_v21  ;;  %v3918_v21 = vunpack.c.l.s8.bf16 %v1878_v20  ;;  %v6649_v22 = vadd.f32 %v6621_v16, %v6599_v45  ;;  %v7814_v0 = vld [vmem:[%s8886_s5 + $0x100] sm:$0xff]  }
 0xa73   :  { %6526 = vmatpush1.bf16.msra.mxu1 %v3856_v61  ;;  %5871 = vmatprep.subr.bf16.mxu0 %v3863_v53  ;;  %v3920_v61 = vunpack.c.l.s8.bf16 %v1880_v3  ;;  %v3927_v53 = vunpack.c.h.s8.bf16 %v1879_v38  ;;  %v7806_v38 = vld [vmem:[%s8886_s5 + $0x30] sm:$0xff]   ;;  %v7815_v16 = vld [vmem:[%s8886_s5 + $0x180] sm:$0xff]  }
 0xa74   :  { %6527 = vmatprep.subr.bf16.mxu1 %v3865_v19  ;;  %v3929_v19 = vunpack.c.h.s8.bf16 %v1881_v60  ;;  %v6657_v34 = vmax.f32 %v6649_v22, 0.0  ;;  %v7807_v60 = vld [vmem:[%s8886_s5 + $0xb0] sm:$0xff]  }
 0xa75   :  { %v7820_v22 = vld [vmem:[%s8886_s5 + $0x150] sm:$0xff]  }
 0xa76   :  { %5872 = vmatpush1.bf16.msra.mxu0 %v3862_v33  ;;  %v3926_v33 = vunpack.c.h.s8.bf16 %v1878_v20  ;;  %v7811_v20 = vld [vmem:[%s8886_s5 + $0xb8] sm:$0xff]  }
 0xa77   :  { %6528 = vmatpush1.bf16.msra.mxu1 %v3864_v12  ;;  %5873 = vmatprep.subr.bf16.mxu0 %v3871_v43  ;;  %v7781_v12 = vld [vmem:[%s8886_s5 + $0xc0] sm:$0xff]   ;;  %v6655_v43 = vmax.f32 %v6647_v13, 0.0  ;;  %v7819_v13 = vld [vmem:[%s8886_s5 + $0x188] sm:$0xff]  }
 0xa78   :  { %6529 = vmatprep.subr.bf16.mxu1 %v3873_v48  ;;  %v7782_v48 = vld [vmem:[%s8886_s5] sm:$0xff]  }
 0xa7a   :  { %5874 = vmatpush1.bf16.msra.mxu0 %v3870_v47  ;;  %v7784_v47 = vld [vmem:[%s8886_s5 + $0x48] sm:$0xff]  }
 0xa7b   :  { %6530 = vmatpush1.bf16.msra.mxu1 %v3872_v56  ;;  %5875 = vmatprep.subr.bf16.mxu0 %v3879_v30  ;;  %v6663_v56 = vpack.c.bf16 %v6655_v43, %v6655_v43  ;;  %v7785_v30 = vld [vmem:[%s8886_s5 + $0xc8] sm:$0xff]   ;;  %v7825_v43 = vld [vmem:[%s8886_s5 + $0x1d8] sm:$0xff]  }
 0xa7c   :  { %6531 = vmatprep.subr.bf16.mxu1 %v3881_v6  ;;  %v6665_v6 = vpack.c.bf16 %v6657_v34, %v6657_v34  ;;  %v7826_v34 = vld [vmem:[%s8886_s5 + $0x118] sm:$0xff]  }
 0xa7e   :  { %5876 = vmatpush1.bf16.msra.mxu0 %v3878_v40  ;;  %v7788_v40 = vld [vmem:[%s8886_s5 + $0x50] sm:$0xff]  }
 0xa7f   :  { %6532 = vmatpush1.bf16.msra.mxu1 %v3880_v23  ;;  %5877 = vmatprep.subr.bf16.mxu0 %v3887_v49  ;;  %v7790_v23 = vld [vmem:[%s8886_s5 + $0x10] sm:$0xff]  }
 0xa80   :  { %6533 = vmatprep.subr.bf16.mxu1 %v3889_v5  ;;  %v7791_v49 = vld [vmem:[%s8886_s5 + $0x90] sm:$0xff]   ;;  %v7793_v5 = vld [vmem:[%s8886_s5 + $0xd8] sm:$0xff]  }
 0xa82   :  { %5878 = vmatpush1.bf16.msra.mxu0 %v3886_v37  ;;  %v6558_v37 = vsub.s32 0, %v8088_v4 }
 0xa83   :  { %6534 = vmatpush1.bf16.msra.mxu1 %v3888_v1  ;;  %5879 = vmatprep.subr.bf16.mxu0 %v3895_v9  ;;  %v7795_v1 = vld [vmem:[%s8886_s5 + $0x98] sm:$0xff]   ;;  %v7796_v9 = vld [vmem:[%s8886_s5 + $0x60] sm:$0xff]  }
 0xa84   :  { %6535 = vmatprep.subr.bf16.mxu1 %v3897_v26  ;;  %v6566_v26 = vsub.s32 2, %v8088_v4  ;;  %v6609_v17 = vrot.slane %v8648_v44, %v6558_v37 }
 0xa86   :  { %5880 = vmatpush1.bf16.msra.mxu0 %v3894_v39  ;;  %v6559_v39 = vrot.slane %v8644_v50, %v6558_v37  ;;  %v6567_v57 = vrot.slane %v8644_v50, %v6566_v26  ;;  %v7842_v37 = vld [vmem:[%s8886_s5 + $0x138] sm:$0xff]  }
 0xa87   :  { %6536 = vmatpush1.bf16.msra.mxu1 %v3896_v31  ;;  %5881 = vmatprep.subr.bf16.mxu0 %v3903_v14  ;;  %v7799_v31 = vld [vmem:[%s8886_s5 + $0xa0] sm:$0xff]   ;;  %v7800_v14 = vld [vmem:[%s8886_s5 + $0x68] sm:$0xff]  }
 0xa88   :  { %6537 = vmatprep.subr.bf16.mxu1 %v3905_v41  ;;  %v7801_v41 = vld [vmem:[%s8886_s5 + $0xe8] sm:$0xff]   ;;  %v6596_v8 = vmul.f32 %v6559_v39, %v8587_v32  ;;  %v7805_v32 = vld [vmem:[%s8886_s5 + $0xf0] sm:$0xff]  }
 0xa8a   :  { %5882 = vmatpush1.bf16.msra.mxu0 %v3902_v10  ;;  %v7803_v10 = vld [vmem:[%s8886_s5 + $0xa8] sm:$0xff]   ;;  %v6646_v54 = vadd.f32 %v6609_v17, %v6596_v8 }
 0xa8b   :  { %6538 = vmatpush1.bf16.msra.mxu1 %v3904_v11  ;;  %5883 = vmatprep.subr.bf16.mxu0 %v3911_v58  ;;  %v7804_v11 = vld [vmem:[%s8886_s5 + $0x70] sm:$0xff]   ;;  %v6598_v58 = vmul.f32 %v6567_v57, %v8589_v25  ;;  %v7808_v25 = vld [vmem:[%s8886_s5 + $0x78] sm:$0xff]  }
 0xa8c   :  { %6539 = vmatprep.subr.bf16.mxu1 %v3913_v59  ;;  %v6617_v59 = vrot.slane %v8648_v44, %v6566_v26  ;;  %v6582_v26 = vsub.s32 6, %v8088_v4 }
 0xa8e   :  { %5884 = vmatpush1.bf16.msra.mxu0 %v3910_v35  ;;  %v6648_v29 = vadd.f32 %v6617_v59, %v6598_v58  ;;  %v7809_v35 = vld [vmem:[%s8886_s5 + $0xf8] sm:$0xff]   ;;  %v6633_v8 = vrot.slane %v8648_v44, %v6582_v26 }
 0xa8f   :  { %6540 = vmatpush1.bf16.msra.mxu1 %v3912_v2  ;;  %5885 = vmatprep.subr.bf16.mxu0 %v3919_v15  ;;  %v7810_v2 = vld [vmem:[%s8886_s5 + $0x38] sm:$0xff]   ;;  %v6654_v15 = vmax.f32 %v6646_v54, 0.0 }
 0xa90   :  { %6541 = vmatprep.subr.bf16.mxu1 %v3921_v28  ;;  %v7812_v28 = vld [vmem:[%s8886_s5 + $0x140] sm:$0xff]   ;;  %v6656_v3 = vmax.f32 %v6648_v29, 0.0 }
 0xa91   :  { %v6662_v45 = vpack.c.bf16 %v6654_v15, %v6654_v15 }
 0xa92   :  { %5886 = vmatpush1.bf16.msra.mxu0 %v3918_v21  ;;  %v7816_v21 = vld [vmem:[%s8886_s5 + $0x148] sm:$0xff]  }
 0xa93   :  { %6542 = vmatpush1.bf16.msra.mxu1 %v3920_v61  ;;  %5887 = vmatprep.subr.bf16.mxu0 %v3927_v53  ;;  %v6664_v61 = vpack.c.bf16 %v6656_v3, %v6656_v3  ;;  %v7817_v53 = vld [vmem:[%s8886_s5 + $0x1c8] sm:$0xff]  }
 0xa94   :  { %6543 = vmatprep.subr.bf16.mxu1 %v3929_v19  ;;  %v7818_v19 = vld [vmem:[%s8886_s5 + $0x108] sm:$0xff]  }
 0xa96   :  { %5888 = vmatpush1.bf16.msra.mxu0 %v3926_v33  ;;  %v7821_v33 = vld [vmem:[%s8886_s5 + $0x1d0] sm:$0xff]  }
 0xa97   :  { %6544 = vmatpush1.bf16.msra.mxu1 %v3928_v36  ;;  %7428 = vmatprep.subr.bf16.mxu0 %v7780_v42  ;;  %v7822_v36 = vld [vmem:[%s8886_s5 + $0x110] sm:$0xff]  }
 0xa98   :  { %7450 = vmatprep.subr.bf16.mxu1 %v7781_v12  ;;  %v7823_v42 = vld [vmem:[%s8886_s5 + $0x190] sm:$0xff]   ;;  %v7824_v12 = vld [vmem:[%s8886_s5 + $0x158] sm:$0xff]  }
 0xa99   :  { %5890 = vmatmul.mubr.bf16.vlgmr.msra.gmra.mrb[4].mxu0 %v8569_v52 }
 0xa9a   :  { %6546 = vmatmul.mubr.bf16.vlgmr.msra.gmra.mrb[4].mxu1 %v8569_v52  ;;  %7429 = vmatpush3.bf16.msra.mxu0 %v7782_v48  ;;  %v7789_v52 = vld [vmem:[%s8886_s5 + $0xd0] sm:$0xff]   ;;  %v7827_v48 = vld [vmem:[%s8886_s5 + $0x198] sm:$0xff]  }
 0xa9b   :  { %7214 = vmatprep.mubr.bf16.mxu0 %v6663_v56  ;;  %7451 = vmatpush3.bf16.msra.mxu1 %v7783_v27  ;;  %v7828_v27 = vld [vmem:[%s8886_s5 + $0x160] sm:$0xff]  }
 0xa9c   :  { %7254 = vmatprep.mubr.bf16.mxu1 %v6665_v6  ;;  %7430 = vmatprep.subr.bf16.mxu0 %v7784_v47  ;;  %v7829_v47 = vld [vmem:[%s8886_s5 + $0x1e0] sm:$0xff]   ;;  %v7832_v6 = vld [vmem:[%s8886_s5 + $0x168] sm:$0xff]  }
 0xa9d   :  { %7452 = vmatprep.subr.bf16.mxu1 %v7785_v30  ;;  %v7830_v56 = vld [vmem:[%s8886_s5 + $0x120] sm:$0xff]  }
 0xa9e   :  { %7431 = vmatpush3.bf16.msra.mxu0 %v7786_v51  ;;  %v7831_v30 = vld [vmem:[%s8886_s5 + $0x1a0] sm:$0xff]   ;;  %v7833_v51 = vld [vmem:[%s8886_s5 + $0x1e8] sm:$0xff]  }
 0xa9f   :  { %7453 = vmatpush3.bf16.msra.mxu1 %v7787_v7  ;;  %7432 = vmatprep.subr.bf16.mxu0 %v7788_v40  ;;  %v7834_v7 = vld [vmem:[%s8886_s5 + $0x128] sm:$0xff]  }
 0xaa0   :  { %7454 = vmatprep.subr.bf16.mxu1 %v7789_v52  ;;  %v7835_v40 = vld [vmem:[%s8886_s5 + $0x1a8] sm:$0xff]   ;;  %v7836_v52 = vld [vmem:[%s8886_s5 + $0x170] sm:$0xff]  }
 0xaa2   :  { %7433 = vmatpush3.bf16.msra.mxu0 %v7790_v23  ;;  %v7837_v23 = vld [vmem:[%s8886_s5 + $0x1f0] sm:$0xff]  }
 0xaa3   :  { %7455 = vmatpush3.bf16.msra.mxu1 %v7791_v49  ;;  %7434 = vmatprep.subr.bf16.mxu0 %v7792_v55  ;;  %v7838_v49 = vld [vmem:[%s8886_s5 + $0x130] sm:$0xff]  }
 0xaa4   :  { %7456 = vmatprep.subr.bf16.mxu1 %v7793_v5  ;;  %v7839_v55 = vld [vmem:[%s8886_s5 + $0x1b0] sm:$0xff]   ;;  %v7840_v5 = vld [vmem:[%s8886_s5 + $0x178] sm:$0xff]  }
 0xaa6   :  { %7435 = vmatpush3.bf16.msra.mxu0 %v7794_v24  ;;  %v7841_v24 = vld [vmem:[%s8886_s5 + $0x1f8] sm:$0xff]  }
 0xaa7   :  { %7457 = vmatpush3.bf16.msra.mxu1 %v7795_v1  ;;  %7436 = vmatprep.subr.bf16.mxu0 %v7796_v9  ;;  %v7843_v1 = vld [vmem:[%s8886_s5 + $0x1b8] sm:$0xff]   ;;  %v6574_v9 = vsub.s32 4, %v8088_v4  ;;  %s7990_s5 = smov [#allocation12]  }
 0xaa8   :  { %7458 = vmatprep.subr.bf16.mxu1 %v7797_v18  ;;  %v6578_v18 = vsub.s32 5, %v8088_v4  ;;  %s7350_s28 = sshll.u32 %s7990_s5, 4  ;;  %s7351_s28 = int_to_ptr.vmem [resolvable:$true] %s7350_s28 }
 0xaa9   :  { %v6575_v39 = vrot.slane %v8644_v50, %v6574_v9  ;;  %v6625_v57 = vrot.slane %v8648_v44, %v6574_v9  ;;  %s7949_s29 = scalar_lea.vmem %s7351_s28, 32  ;;  %p7954_p8 = scmp.lt.s32.totalorder %s7351_s28, %s7351_s28 }
 0xaaa   :  { %7437 = vmatpush3.bf16.msra.mxu0 %v7798_v63  ;;  %v6586_v63 = vsub.s32 7, %v8088_v4  ;;  %v6629_v17 = vrot.slane %v8648_v44, %v6578_v18  ;;  %p7950_p7 = scmp.ne.s32.totalorder %s7351_s28, %s7949_s29  ;;  %p7955_p9 = scmp.lt.s32.totalorder %s7949_s29, %s7949_s29 }
 0xaab   :  { %7459 = vmatpush3.bf16.msra.mxu1 %v7799_v31  ;;  %7438 = vmatprep.subr.bf16.mxu0 %v7800_v14  ;;  %v6583_v31 = vrot.slane %v8644_v50, %v6582_v26  ;;  %v6579_v14 = vrot.slane %v8644_v50, %v6578_v18 }
 0xaac   :  { %7460 = vmatprep.subr.bf16.mxu1 %v7801_v41  ;;  %v6587_v41 = vrot.slane %v8644_v50, %v6586_v63  ;;  %v6637_v4 = vrot.slane %v8648_v44, %v6586_v63  ;;  %p7956_p10 = por %p7955_p9, %p7954_p8 }
 0xaae   :  { %7439 = vmatpush3.bf16.msra.mxu0 %v7802_v62  ;;  %p7957_p11 = pnand %p7956_p10, %p7950_p7 }
 0xaaf   :  { %7461 = vmatpush3.bf16.msra.mxu1 %v7803_v10  ;;  %7440 = vmatprep.subr.bf16.mxu0 %v7804_v11 }
 0xab0   :  { %7462 = vmatprep.subr.bf16.mxu1 %v7805_v32 }
 0xab2   :  { %7441 = vmatpush3.bf16.msra.mxu0 %v7806_v38 }
 0xab3   :  { %7463 = vmatpush3.bf16.msra.mxu1 %v7807_v60  ;;  %7442 = vmatprep.subr.bf16.mxu0 %v7808_v25 }
 0xab4   :  { %7464 = vmatprep.subr.bf16.mxu1 %v7809_v35 }
 0xab6   :  { %7443 = vmatpush3.bf16.msra.mxu0 %v7810_v2 }
 0xab7   :  { %7465 = vmatpush3.bf16.msra.mxu1 %v7811_v20  ;;  %7472 = vmatprep.subr.bf16.mxu0 %v7812_v28 }
 0xab8   :  { %7494 = vmatprep.subr.bf16.mxu1 %v7813_v46 }
 0xab9   :  { %7215 = vmatmul.mubr.bf16.vlgmr.msra.gmra.mrb[8].mxu0 %v6662_v45 }
 0xaba   :  { %7255 = vmatmul.mubr.bf16.vlgmr.msra.gmra.mrb[8].mxu1 %v6664_v61  ;;  %7473 = vmatpush3.bf16.msra.mxu0 %v7814_v0 }
 0xabb   :  { %7495 = vmatpush3.bf16.msra.mxu1 %v7815_v16  ;;  %7474 = vmatprep.subr.bf16.mxu0 %v7816_v21 }
 0xabc   :  { %7496 = vmatprep.subr.bf16.mxu1 %v7817_v53 }
 0xabe   :  { %7475 = vmatpush3.bf16.msra.mxu0 %v7818_v19 }
 0xabf   :  { %7497 = vmatpush3.bf16.msra.mxu1 %v7819_v13  ;;  %7476 = vmatprep.subr.bf16.mxu0 %v7820_v22 }
 0xac0   :  { %7498 = vmatprep.subr.bf16.mxu1 %v7821_v33 }
 0xac2   :  { %7477 = vmatpush3.bf16.msra.mxu0 %v7822_v36 }
 0xac3   :  { %7499 = vmatpush3.bf16.msra.mxu1 %v7823_v42  ;;  %7478 = vmatprep.subr.bf16.mxu0 %v7824_v12 }
 0xac4   :  { %7500 = vmatprep.subr.bf16.mxu1 %v7825_v43 }
 0xac6   :  { %7479 = vmatpush3.bf16.msra.mxu0 %v7826_v34 }
 0xac7   :  { %7501 = vmatpush3.bf16.msra.mxu1 %v7827_v48  ;;  %7480 = vmatprep.subr.bf16.mxu0 %v7828_v27 }
 0xac8   :  { %7502 = vmatprep.subr.bf16.mxu1 %v7829_v47 }
 0xaca   :  { %7481 = vmatpush3.bf16.msra.mxu0 %v7830_v56 }
 0xacb   :  { %7503 = vmatpush3.bf16.msra.mxu1 %v7831_v30  ;;  %7482 = vmatprep.subr.bf16.mxu0 %v7832_v6 }
 0xacc   :  { %7504 = vmatprep.subr.bf16.mxu1 %v7833_v51 }
 0xace   :  { %7483 = vmatpush3.bf16.msra.mxu0 %v7834_v7 }
 0xacf   :  { %7505 = vmatpush3.bf16.msra.mxu1 %v7835_v40  ;;  %7484 = vmatprep.subr.bf16.mxu0 %v7836_v52 }
 0xad0   :  { %7506 = vmatprep.subr.bf16.mxu1 %v7837_v23 }
 0xad2   :  { %7485 = vmatpush3.bf16.msra.mxu0 %v7838_v49 }
 0xad3   :  { %7507 = vmatpush3.bf16.msra.mxu1 %v7839_v55  ;;  %7486 = vmatprep.subr.bf16.mxu0 %v7840_v5 }
 0xad4   :  { %7508 = vmatprep.subr.bf16.mxu1 %v7841_v24 }
 0xad6   :  { %7487 = vmatpush3.bf16.msra.mxu0 %v7842_v37 }
 0xad7   :  { %7509 = vmatpush3.bf16.msra.mxu1 %v7843_v1 }
 0xb6c   :  { %v5891_v62 = vpop.f32.mrb[4].mxu0 }
 0xb6d   :  { %v6600_v10 = vmul.f32 %v6575_v39, %v5891_v62  ;;  %v6547_v11 = vpop.f32.mrb[4].mxu1  ;;  %v5893_v58 = vpop.f32.mrb[5].mxu0 }
 0xb6e   :  { %v6602_v59 = vmul.f32 %v6583_v31, %v6547_v11  ;;  %v6601_v32 = vmul.f32 %v6579_v14, %v5893_v58  ;;  %v6549_v38 = vpop.f32.mrb[5].mxu1  ;;  %v5895_v54 = vpop.f32.mrb[6].mxu0 }
 0xb6f   :  { %v6650_v60 = vadd.f32 %v6625_v57, %v6600_v10  ;;  %v6603_v25 = vmul.f32 %v6587_v41, %v6549_v38  ;;  %v6551_v29 = vpop.f32.mrb[6].mxu1  ;;  %v5896_v35 = vpop.f32.mrb[7].mxu0 }
 0xb70   :  { %v6652_v2 = vadd.f32 %v6633_v8, %v6602_v59  ;;  %v6651_v50 = vadd.f32 %v6629_v17, %v6601_v32  ;;  %v6552_v15 = vpop.f32.mrb[7].mxu1 }
 0xb71   :  { %v6658_v20 = vmax.f32 %v6650_v60, 0.0  ;;  %v6653_v28 = vadd.f32 %v6637_v4, %v6603_v25 }
 0xb72   :  { %v6660_v3 = vmax.f32 %v6652_v2, 0.0  ;;  %v6659_v46 = vmax.f32 %v6651_v50, 0.0 }
 0xb73   :  { %v6661_v0 = vmax.f32 %v6653_v28, 0.0  ;;  %v6666_v16 = vpack.c.bf16 %v6658_v20, %v6658_v20 }
 0xb74   :  { %v6667_v45 = vpack.c.bf16 %v6659_v46, %v6659_v46  ;;  %v6668_v44 = vpack.c.bf16 %v6660_v3, %v6660_v3 }
 0xb75   :  { %v6669_v21 = vpack.c.bf16 %v6661_v0, %v6661_v0 }
 0xb76   :  { %7294 = vmatprep.mubr.bf16.mxu0 %v6667_v45 }
 0xb77   :  { %7334 = vmatprep.mubr.bf16.mxu1 %v6669_v21  ;;  %7295 = vmatmul.mubr.bf16.vlgmr.msra.gmra.mrb[12].mxu0 %v6666_v16 }
 0xb78   :  { %7335 = vmatmul.mubr.bf16.vlgmr.msra.gmra.mrb[12].mxu1 %v6668_v44 }
 0xb8c   :  { %v7444_v61 = vpop.f32.mrb[8].mxu0 }
 0xb8d   :  { %v7466_v53 = vpop.f32.mrb[8].mxu1  ;;  %v7445_v19 = vpop.f32.mrb[9].mxu0 }
 0xb8e   :  { %v7446_v13 = vadd.f32 %v7445_v19, %v7444_v61  ;;  %v7467_v22 = vpop.f32.mrb[9].mxu1  ;;  %v7447_v33 = vpop.f32.mrb[10].mxu0 }
 0xb8f   :  { %v7468_v36 = vadd.f32 %v7467_v22, %v7466_v53  ;;  %v7469_v42 = vpop.f32.mrb[10].mxu1  ;;  %v7448_v12 = vpop.f32.mrb[11].mxu0 }
 0xb90   :  { %v7470_v43 = vpop.f32.mrb[11].mxu1 }
 0xb91   :  { %v7257_v34 = vadd.f32 %v7468_v36, %v7446_v13 }
 0xc4a   :  { %v7488_v48 = vpop.f32.mrb[12].mxu0 }
 0xc4b   :  { %v7510_v27 = vpop.f32.mrb[12].mxu1  ;;  %v7489_v47 = vpop.f32.mrb[13].mxu0 }
 0xc4c   :  { %v7490_v56 = vadd.f32 %v7489_v47, %v7488_v48  ;;  %v7511_v30 = vpop.f32.mrb[13].mxu1  ;;  %v7491_v6 = vpop.f32.mrb[14].mxu0 }
 0xc4d   :  { %v7512_v51 = vadd.f32 %v7511_v30, %v7510_v27  ;;  %v7513_v7 = vpop.f32.mrb[14].mxu1  ;;  %v7492_v40 = vpop.f32.mrb[15].mxu0 }
 0xc4e   :  { %v7297_v52 = vadd.f32 %v7490_v56, %v7257_v34  ;;  %v7514_v23 = vpop.f32.mrb[15].mxu1 }
 0xc50   :  { %v7337_v49 = vadd.f32 %v7512_v51, %v7297_v52 }
 0xc52   :  { %7343 = vst.msk [vmem:[#allocation12] sm:$0x3] %vm7342_vm1, %v7337_v49 }
 0xc53   :  { %7960 = shalt.err (!%p7957_p11)
}
 0xc54   :  { %s7961_s7 = scalar_lea.hbm %s8887_s6, 32 }
 0xc55   :  { %p7962_p12 = scmp.ne.s32.totalorder %s8887_s6, %s7961_s7  ;;  %p7965_p13 = scmp.lt.u32.totalorder %s7961_s7, %s8887_s6 }
 0xc57   :  { %p7967_p0 = pnand %p7965_p13, %p7962_p12 }
 0xc59   :  { %7970 = shalt.err (!%p7967_p0)
}
 0xc5a   :  { %7353 = dma.vmem_to_hbm [thread:$0]  %s7351_s28, 32, %s8887_s6, [#allocation4]  }
 0xc5b   :  { %7979 = dma.done.wait [#allocation4], 32  }
 0xc5c   :  { %7980 = vsyncadd [#allocation4], 4294967264 }
 0xc5d   :  { %7357 = vsyncpa [#allocation3], 1 }
 0xc5e   :  { %7358 = vsyncpa [#allocation8], 1 }
 0xc5f   :  { %7359 = vsyncpa [#allocation11], 1 }
 0xc60   :  { %7360 = vsyncpa [#allocation4], 1 }
 0xc61   :  { %7361 = vsyncpa [#allocation5], 1 }

</bundles_post_ra>
